<compile_context>
chip_gen: v7x
topology: tpu7x:2x2x1
jax: 0.10.0
libtpu: 0.0.40
codegen_flags: <defaults>
</compile_context>

<pallas_src>
import functools

import jax
import jax.numpy as jnp
import numpy as np
from jax import lax
from jax.experimental import pallas as pl
from jax.experimental.pallas import tpu as pltpu

HIDDEN = 512
EMB = 128
SUBLANE = 8      # f32 sublane height
LANE = 128       # lane width
TCHUNK = 8       # timesteps per grid iteration on the sequence path (tunable, 8-32)
VMEM_LIMIT_STEP = 24 * 1024 * 1024
VMEM_LIMIT_SEQ = 32 * 1024 * 1024


def _round_up(x, m):
    return (x + m - 1) // m * m


def _pick_vtile(vp):
    """Lane tile for the deferred output projection (only tiles large vocabularies)."""
    if vp <= 2048:
        return vp
    for cand in (2048, 1024, 512, 256, 128):
        if vp % cand == 0:
            return cand
    return vp


# ---------------------------------------------------------------------------
# Shared math (used by the Pallas kernels and the bf16-faithful reference).
# ---------------------------------------------------------------------------
def _gru_cell(x, h, wih, whh, b_rz, b_in, b_hn):
    """torch.nn.GRUCell with pre-combined r/z biases (b_rz = b_ih[:2H] + b_hh[:2H]).
    bf16 MXU matmuls with f32 accumulation; gates / hidden state in f32."""
    gi = jnp.dot(x.astype(jnp.bfloat16), wih, preferred_element_type=jnp.float32)
    gh = jnp.dot(h.astype(jnp.bfloat16), whh, preferred_element_type=jnp.float32)
    H = HIDDEN
    rz = jax.nn.sigmoid(gi[:, :2 * H] + gh[:, :2 * H] + b_rz)
    r, z = rz[:, :H], rz[:, H:]
    n = jnp.tanh(gi[:, 2 * H:] + b_in + r * (gh[:, 2 * H:] + b_hn))
    return (1.0 - z) * n + z * h


def _gru_cell_pre(gi, h, whh, b_hh_rz, b_hn):
    """GRU cell where the input projection gi = x @ w_ih + b_ih was hoisted out of
    the recurrence (layer 1 of the sequence path)."""
    gh = jnp.dot(h.astype(jnp.bfloat16), whh, preferred_element_type=jnp.float32)
    H = HIDDEN
    rz = jax.nn.sigmoid(gi[:, :2 * H] + gh[:, :2 * H] + b_hh_rz)
    r, z = rz[:, :H], rz[:, H:]
    n = jnp.tanh(gi[:, 2 * H:] + r * (gh[:, 2 * H:] + b_hn))
    return (1.0 - z) * n + z * h


def _gru_cell_f32(x, h, wih, whh, bih, bhh):
    """Full-f32 torch-ordering reference cell (loose numerical bound)."""
    gi = jnp.dot(x, wih.astype(jnp.float32), precision=lax.Precision.HIGHEST) + bih
    gh = jnp.dot(h, whh.astype(jnp.float32), precision=lax.Precision.HIGHEST) + bhh
    H = HIDDEN
    r = jax.nn.sigmoid(gi[:, :H] + gh[:, :H])
    z = jax.nn.sigmoid(gi[:, H:2 * H] + gh[:, H:2 * H])
    n = jnp.tanh(gi[:, 2 * H:] + r * gh[:, 2 * H:])
    return (1.0 - z) * n + z * h


def _embed_onehot(idx, emb):
    """Embedding gather as a bf16 one-hot (Bp,Vp) @ (Vp,EMB) MXU matmul.
    Exact: each output row is one bf16 table row accumulated in f32."""
    bp, vp = idx.shape[0], emb.shape[0]
    iota = lax.broadcasted_iota(jnp.int32, (bp, vp), 1)
    onehot = (idx == iota).astype(jnp.bfloat16)
    return jnp.dot(onehot, emb, preferred_element_type=jnp.float32)


def _derive_biases(params):
    """Pre-combine r/z biases (saves two (Bp,1024) VPU adds per layer per step) and
    split out the n-gate biases, which torch keeps separate inside the tanh."""
    H = HIDDEN
    d = {}
    for l in (1, 2, 3):
        bih, bhh = params[f"b_ih{l}"], params[f"b_hh{l}"]
        d[f"b_rz{l}"] = bih[:, :2 * H] + bhh[:, :2 * H]
        d[f"b_in{l}"] = bih[:, 2 * H:]
        d[f"b_hn{l}"] = bhh[:, 2 * H:]
        d[f"b_hh_rz{l}"] = bhh[:, :2 * H]
    return d


def _const_spec(x):
    """Full-array BlockSpec with a constant index map (block is DMA'd once and stays
    VMEM-resident across the grid)."""
    return pl.BlockSpec(x.shape, lambda *_args, _n=x.ndim: (0,) * _n)


# ---------------------------------------------------------------------------
# Single-step kernel (matches the PyTorch forward signature: one token per seq).
# ---------------------------------------------------------------------------
def multigru_step_kernel(h_ref, idx_ref, emb_ref,
                         wih1_ref, whh1_ref, brz1_ref, bin1_ref, bhn1_ref,
                         wih2_ref, whh2_ref, brz2_ref, bin2_ref, bhn2_ref,
                         wih3_ref, whh3_ref, brz3_ref, bin3_ref, bhn3_ref,
                         wlin_ref, blin_ref,
                         logits_ref, hout_ref):
    x = _embed_onehot(idx_ref[...], emb_ref[...])                    # (Bp, EMB) f32

    h1 = _gru_cell(x, h_ref[0], wih1_ref[...], whh1_ref[...],
                   brz1_ref[...], bin1_ref[...], bhn1_ref[...])
    h2 = _gru_cell(h1, h_ref[1], wih2_ref[...], whh2_ref[...],
                   brz2_ref[...], bin2_ref[...], bhn2_ref[...])
    h3 = _gru_cell(h2, h_ref[2], wih3_ref[...], whh3_ref[...],
                   brz3_ref[...], bin3_ref[...], bhn3_ref[...])
    hout_ref[0] = h1
    hout_ref[1] = h2
    hout_ref[2] = h3

    logits_ref[...] = (jnp.dot(h3.astype(jnp.bfloat16), wlin_ref[...],
                               preferred_element_type=jnp.float32) + blin_ref[...])


@functools.partial(jax.jit, static_argnames=("voc_size",))
def multigru_forward(x_idx, h, params, voc_size):
    """Single-step forward: x_idx (B,) int32, h (3,B,512) -> (logits, h_out)."""
    B = x_idx.shape[0]
    Bp = _round_up(max(B, 1), SUBLANE)
    Vp = params["w_lin"].shape[1]
    d = _derive_biases(params)

    idx_p = jnp.zeros((Bp, 1), jnp.int32).at[:B, 0].set(x_idx.astype(jnp.int32))
    h_p = jnp.zeros((3, Bp, HIDDEN), jnp.float32).at[:, :B, :].set(h)

    args = (h_p, idx_p, params["embedding"],
            params["w_ih1"], params["w_hh1"], d["b_rz1"], d["b_in1"], d["b_hn1"],
            params["w_ih2"], params["w_hh2"], d["b_rz2"], d["b_in2"], d["b_hn2"],
            params["w_ih3"], params["w_hh3"], d["b_rz3"], d["b_in3"], d["b_hn3"],
            params["w_lin"], params["b_lin"])

    vmem = pl.BlockSpec(memory_space=pltpu.MemorySpace.VMEM)
    logits_p, hout_p = pl.pallas_call(
        multigru_step_kernel,
        out_shape=(jax.ShapeDtypeStruct((Bp, Vp), jnp.float32),
                   jax.ShapeDtypeStruct((3, Bp, HIDDEN), jnp.float32)),
        in_specs=[vmem] * len(args),
        out_specs=(vmem, vmem),
        input_output_aliases={0: 1},      # reuse the padded-h buffer for h_out
        compiler_params=pltpu.CompilerParams(vmem_limit_bytes=VMEM_LIMIT_STEP),
    )(*args)
    return logits_p[:B, :voc_size], hout_p[:, :B, :]


# ---------------------------------------------------------------------------
# Sequence path — three phases.
# ---------------------------------------------------------------------------
def _input_proj_kernel(idx_ref, emb_ref, wih1_ref, bih1_ref, gi1_ref):
    """Phase 1: gi1 = embed(X) @ w_ih1 + b_ih1 for a (Tc, Bp) block of timesteps."""
    tc, bp = idx_ref.shape
    vp = emb_ref.shape[0]
    idx = idx_ref[...]                                               # (Tc, Bp) int32
    iota = lax.broadcasted_iota(jnp.int32, (tc, bp, vp), 2)
    onehot = (idx[:, :, None] == iota).astype(jnp.bfloat16)          # (Tc, Bp, Vp)
    onehot2d = onehot.reshape(tc * bp, vp)
    xemb = jnp.dot(onehot2d, emb_ref[...],
                   preferred_element_type=jnp.float32)               # (Tc*Bp, EMB)
    gi1_ref[...] = (jnp.dot(xemb.astype(jnp.bfloat16), wih1_ref[...],
                            preferred_element_type=jnp.float32) + bih1_ref[...])


def _recurrence_kernel(gi1_ref, h0_ref,
                       whh1_ref, bhhrz1_ref, bhn1_ref,
                       wih2_ref, whh2_ref, brz2_ref, bin2_ref, bhn2_ref,
                       wih3_ref, whh3_ref, brz3_ref, bin3_ref, bhn3_ref,
                       h3seq_ref, hfin_ref,
                       hstate, *, t_valid):
    """Phase 2: sequential recurrence; TCHUNK steps per grid iteration, recurrent
    weights VMEM-resident (constant index maps), hidden state in VMEM scratch."""
    bp = hstate.shape[1]
    t_chunk = gi1_ref.shape[0] // bp
    tc_idx = pl.program_id(0)

    @pl.when(tc_idx == 0)
    def _():
        hstate[...] = h0_ref[...]

    def step(s, carry):
        h1, h2, h3 = carry
        row = s * bp
        gi1 = gi1_ref[pl.ds(row, bp), :]                             # (Bp, 3H) f32
        h1n = _gru_cell_pre(gi1, h1, whh1_ref[...], bhhrz1_ref[...], bhn1_ref[...])
        h2n = _gru_cell(h1n, h2, wih2_ref[...], whh2_ref[...],
                        brz2_ref[...], bin2_ref[...], bhn2_ref[...])
        h3n = _gru_cell(h2n, h3, wih3_ref[...], whh3_ref[...],
                        brz3_ref[...], bin3_ref[...], bhn3_ref[...])
        h3seq_ref[pl.ds(row, bp), :] = h3n.astype(jnp.bfloat16)
        if t_valid % t_chunk != 0:            # static: only traced if T was padded
            valid = (tc_idx * t_chunk + s) < t_valid
            h1n = jnp.where(valid, h1n, h1)
            h2n = jnp.where(valid, h2n, h2)
            h3n = jnp.where(valid, h3n, h3)
        return (h1n, h2n, h3n)

    h1, h2, h3 = lax.fori_loop(0, t_chunk, step,
                               (hstate[0], hstate[1], hstate[2]), unroll=True)
    hstate[0] = h1
    hstate[1] = h2
    hstate[2] = h3

    @pl.when(tc_idx == pl.num_programs(0) - 1)
    def _():
        hfin_ref[...] = hstate[...]


def _output_proj_kernel(h3_ref, wlin_ref, blin_ref, logits_ref):
    """Phase 3: deferred output projection, batched over a chunk of timesteps."""
    logits_ref[...] = (jnp.dot(h3_ref[...], wlin_ref[...],
                               preferred_element_type=jnp.float32) + blin_ref[...])


@functools.partial(jax.jit, static_argnames=("voc_size",))
def multigru_forward_seq(x_idx_seq, h0, params, voc_size):
    """Run T steps: x_idx_seq (T,B) int32, h0 (3,B,512) -> (logits (T,B,voc), h_fin)."""
    T, B = x_idx_seq.shape
    Bp = _round_up(max(B, 1), SUBLANE)
    Tc = TCHUNK
    Tp = _round_up(max(T, 1), Tc)
    Vp = params["w_lin"].shape[1]
    H = HIDDEN
    d = _derive_biases(params)
    n_tchunks = Tp // Tc

    idx_p = jnp.zeros((Tp, Bp), jnp.int32).at[:T, :B].set(x_idx_seq.astype(jnp.int32))
    h_p = jnp.zeros((3, Bp, H), jnp.float32).at[:, :B, :].set(h0)

    # ---- Phase 1: batched input projection (parallel over T-chunks) ----
    gi1 = pl.pallas_call(
        _input_proj_kernel,
        out_shape=jax.ShapeDtypeStruct((Tp * Bp, 3 * H), jnp.float32),
        grid=(n_tchunks,),
        in_specs=[pl.BlockSpec((Tc, Bp), lambda t: (t, 0)),
                  _const_spec(params["embedding"]),
                  _const_spec(params["w_ih1"]),
                  _const_spec(params["b_ih1"])],
        out_specs=pl.BlockSpec((Tc * Bp, 3 * H), lambda t: (t, 0)),
        compiler_params=pltpu.CompilerParams(
            dimension_semantics=("parallel",), vmem_limit_bytes=VMEM_LIMIT_SEQ),
    )(idx_p, params["embedding"], params["w_ih1"], params["b_ih1"])

    # ---- Phase 2: sequential recurrence (weights VMEM-resident) ----
    rec_args = (gi1, h_p,
                params["w_hh1"], d["b_hh_rz1"], d["b_hn1"],
                params["w_ih2"], params["w_hh2"], d["b_rz2"], d["b_in2"], d["b_hn2"],
                params["w_ih3"], params["w_hh3"], d["b_rz3"], d["b_in3"], d["b_hn3"])
    rec_in_specs = ([pl.BlockSpec((Tc * Bp, 3 * H), lambda t: (t, 0))]
                    + [_const_spec(a) for a in rec_args[1:]])
    h3seq, hfin = pl.pallas_call(
        functools.partial(_recurrence_kernel, t_valid=T),
        out_shape=(jax.ShapeDtypeStruct((Tp * Bp, H), jnp.bfloat16),
                   jax.ShapeDtypeStruct((3, Bp, H), jnp.float32)),
        grid=(n_tchunks,),
        in_specs=rec_in_specs,
        out_specs=(pl.BlockSpec((Tc * Bp, H), lambda t: (t, 0)),
                   pl.BlockSpec((3, Bp, H), lambda t: (0, 0, 0))),
        scratch_shapes=[pltpu.VMEM((3, Bp, H), jnp.float32)],
        compiler_params=pltpu.CompilerParams(
            dimension_semantics=("arbitrary",), vmem_limit_bytes=VMEM_LIMIT_SEQ),
    )(*rec_args)

    # ---- Phase 3: deferred output projection (parallel over T-chunks x V-tiles) ----
    Vn = _pick_vtile(Vp)
    logits_flat = pl.pallas_call(
        _output_proj_kernel,
        out_shape=jax.ShapeDtypeStruct((Tp * Bp, Vp), jnp.float32),
        grid=(n_tchunks, Vp // Vn),
        in_specs=[pl.BlockSpec((Tc * Bp, H), lambda t, v: (t, 0)),
                  pl.BlockSpec((H, Vn), lambda t, v: (0, v)),
                  pl.BlockSpec((1, Vn), lambda t, v: (0, v))],
        out_specs=pl.BlockSpec((Tc * Bp, Vn), lambda t, v: (t, v)),
        compiler_params=pltpu.CompilerParams(
            dimension_semantics=("parallel", "parallel"),
            vmem_limit_bytes=VMEM_LIMIT_SEQ),
    )(h3seq, params["w_lin"], params["b_lin"])

    logits = logits_flat.reshape(Tp, Bp, Vp)
    return logits[:T, :B, :voc_size], hfin[:, :B, :]


# ---------------------------------------------------------------------------
# Parameters & references.
# ---------------------------------------------------------------------------
def init_params(key, voc_size):
    """Deterministic synthetic parameters (deployment layout: transposed, bf16 weights
    and embedding table, lane-padded vocab)."""
    Vp = _round_up(voc_size, LANE)
    ks = jax.random.split(key, 16)
    s = 1.0 / np.sqrt(HIDDEN)

    def u(k, shape):
        return jax.random.uniform(k, shape, jnp.float32, -s, s)

    emb = jax.random.normal(ks[0], (voc_size, EMB), jnp.float32)
    emb_p = jnp.zeros((Vp, EMB), jnp.float32).at[:voc_size].set(emb).astype(jnp.bfloat16)

    w_lin = jnp.zeros((HIDDEN, Vp), jnp.float32).at[:, :voc_size].set(
        u(ks[13], (HIDDEN, voc_size))).astype(jnp.bfloat16)
    b_lin = jnp.zeros((1, Vp), jnp.float32).at[:, :voc_size].set(u(ks[14], (1, voc_size)))

    return {
        "embedding": emb_p,                                           # bf16 (Vp, 128)
        "w_ih1": u(ks[1], (EMB, 3 * HIDDEN)).astype(jnp.bfloat16),
        "w_hh1": u(ks[2], (HIDDEN, 3 * HIDDEN)).astype(jnp.bfloat16),
        "b_ih1": u(ks[3], (1, 3 * HIDDEN)),
        "b_hh1": u(ks[4], (1, 3 * HIDDEN)),
        "w_ih2": u(ks[5], (HIDDEN, 3 * HIDDEN)).astype(jnp.bfloat16),
        "w_hh2": u(ks[6], (HIDDEN, 3 * HIDDEN)).astype(jnp.bfloat16),
        "b_ih2": u(ks[7], (1, 3 * HIDDEN)),
        "b_hh2": u(ks[8], (1, 3 * HIDDEN)),
        "w_ih3": u(ks[9], (HIDDEN, 3 * HIDDEN)).astype(jnp.bfloat16),
        "w_hh3": u(ks[10], (HIDDEN, 3 * HIDDEN)).astype(jnp.bfloat16),
        "b_ih3": u(ks[11], (1, 3 * HIDDEN)),
        "b_hh3": u(ks[12], (1, 3 * HIDDEN)),
        "w_lin": w_lin,                                               # bf16 (512, Vp)
        "b_lin": b_lin,                                               # f32  (1, Vp)
    }


def multigru_reference(x_idx, h, params, voc_size, *, bf16_matmul=True):
    """Pure-JAX reference of the PyTorch forward.  bf16_matmul=True mirrors the kernel
    numerics; False computes everything in f32 (loose bound on bf16 quantization)."""
    if bf16_matmul:
        d = _derive_biases(params)
        x = params["embedding"][x_idx]                                # bf16 gather
        h1 = _gru_cell(x, h[0], params["w_ih1"], params["w_hh1"],
                       d["b_rz1"], d["b_in1"], d["b_hn1"])
        h2 = _gru_cell(h1, h[1], params["w_ih2"], params["w_hh2"],
                       d["b_rz2"], d["b_in2"], d["b_hn2"])
        h3 = _gru_cell(h2, h[2], params["w_ih3"], params["w_hh3"],
                       d["b_rz3"], d["b_in3"], d["b_hn3"])
        logits = (jnp.dot(h3.astype(jnp.bfloat16), params["w_lin"],
                          preferred_element_type=jnp.float32) + params["b_lin"])
    else:
        x = params["embedding"].astype(jnp.float32)[x_idx]
        h1 = _gru_cell_f32(x, h[0], params["w_ih1"], params["w_hh1"],
                           params["b_ih1"], params["b_hh1"])
        h2 = _gru_cell_f32(h1, h[1], params["w_ih2"], params["w_hh2"],
                           params["b_ih2"], params["b_hh2"])
        h3 = _gru_cell_f32(h2, h[2], params["w_ih3"], params["w_hh3"],
                           params["b_ih3"], params["b_hh3"])
        logits = (jnp.dot(h3, params["w_lin"].astype(jnp.float32),
                          precision=lax.Precision.HIGHEST) + params["b_lin"])
    return logits[:, :voc_size], jnp.stack([h1, h2, h3], axis=0)


if __name__ == "__main__":
    VOC, B, T = 32, 2, 8

    key = jax.random.PRNGKey(0)
    kp, kx, kh, ks = jax.random.split(key, 4)

    params = init_params(kp, VOC)
    x_idx = jax.random.randint(kx, (B,), 0, VOC, dtype=jnp.int32)
    h0 = jax.random.normal(kh, (3, B, HIDDEN), jnp.float32)

    # --- single-step kernel (PyTorch forward semantics) ---
    logits, h_out = multigru_forward(x_idx, h0, params, voc_size=VOC)
    jax.block_until_ready((logits, h_out))
    assert logits.shape == (B, VOC) and h_out.shape == (3, B, HIDDEN)

    ref_logits, ref_h = multigru_reference(x_idx, h0, params, VOC, bf16_matmul=True)
    np.testing.assert_allclose(np.asarray(logits), np.asarray(ref_logits),
                               rtol=2e-3, atol=2e-3)
    np.testing.assert_allclose(np.asarray(h_out), np.asarray(ref_h),
                               rtol=2e-3, atol=2e-3)

    f32_logits, f32_h = multigru_reference(x_idx, h0, params, VOC, bf16_matmul=False)
    np.testing.assert_allclose(np.asarray(logits), np.asarray(f32_logits),
                               rtol=1e-1, atol=1e-1)
    np.testing.assert_allclose(np.asarray(h_out), np.asarray(f32_h),
                               rtol=1e-1, atol=1e-1)

    # --- sequence path (hoisted input/output projections, resident weights) ---
    x_seq = jax.random.randint(ks, (T, B), 0, VOC, dtype=jnp.int32)
    seq_logits, h_fin = multigru_forward_seq(x_seq, h0, params, voc_size=VOC)
    jax.block_until_ready((seq_logits, h_fin))
    assert seq_logits.shape == (T, B, VOC) and h_fin.shape == (3, B, HIDDEN)

    h_ref = h0
    ref_steps = []
    for t in range(T):
        lg, h_ref = multigru_reference(x_seq[t], h_ref, params, VOC, bf16_matmul=True)
        ref_steps.append(lg)
    ref_seq = jnp.stack(ref_steps, axis=0)
    np.testing.assert_allclose(np.asarray(seq_logits), np.asarray(ref_seq),
                               rtol=3e-3, atol=3e-3)
    np.testing.assert_allclose(np.asarray(h_fin), np.asarray(h_ref),
                               rtol=3e-3, atol=3e-3)

    print("KERNEL_OK")
</pallas_src>

<mosaic_0001>
module attributes {stable_mosaic.version = 11 : i64} {
  func.func @multigru_step_kernel(%arg0: memref<3x8x512xf32, #tpu.memory_space<vmem>>, %arg1: memref<8x1xi32, #tpu.memory_space<vmem>>, %arg2: memref<128x128xbf16, #tpu.memory_space<vmem>>, %arg3: memref<128x1536xbf16, #tpu.memory_space<vmem>>, %arg4: memref<512x1536xbf16, #tpu.memory_space<vmem>>, %arg5: memref<1x1024xf32, #tpu.memory_space<vmem>>, %arg6: memref<1x512xf32, #tpu.memory_space<vmem>>, %arg7: memref<1x512xf32, #tpu.memory_space<vmem>>, %arg8: memref<512x1536xbf16, #tpu.memory_space<vmem>>, %arg9: memref<512x1536xbf16, #tpu.memory_space<vmem>>, %arg10: memref<1x1024xf32, #tpu.memory_space<vmem>>, %arg11: memref<1x512xf32, #tpu.memory_space<vmem>>, %arg12: memref<1x512xf32, #tpu.memory_space<vmem>>, %arg13: memref<512x1536xbf16, #tpu.memory_space<vmem>>, %arg14: memref<512x1536xbf16, #tpu.memory_space<vmem>>, %arg15: memref<1x1024xf32, #tpu.memory_space<vmem>>, %arg16: memref<1x512xf32, #tpu.memory_space<vmem>>, %arg17: memref<1x512xf32, #tpu.memory_space<vmem>>, %arg18: memref<512x128xbf16, #tpu.memory_space<vmem>>, %arg19: memref<1x128xf32, #tpu.memory_space<vmem>>, %arg20: memref<8x128xf32, #tpu.memory_space<vmem>>, %arg21: memref<3x8x512xf32, #tpu.memory_space<vmem>>) attributes {dimension_semantics = [], scalar_prefetch = 0 : i64, scratch_operands = 0 : i64, tpu.core_type = #tpu.core_type<tc>} {
    %c0 = arith.constant 0 : index
    %c0_0 = arith.constant 0 : index
    %0 = vector.load %arg1[%c0, %c0_0] : memref<8x1xi32, #tpu.memory_space<vmem>>, vector<8x1xi32>
    %c0_1 = arith.constant 0 : index
    %c0_2 = arith.constant 0 : index
    %1 = vector.load %arg2[%c0_1, %c0_2] : memref<128x128xbf16, #tpu.memory_space<vmem>>, vector<128x128xbf16>
    %2 = tpu.iota {dimensions = array<i32: 1>} : vector<8x128xi32>
    %3 = vector.broadcast %0 : vector<8x1xi32> to vector<8x128xi32>
    %4 = arith.cmpi eq, %3, %2 : vector<8x128xi32>
    %5 = arith.extui %4 : vector<8x128xi1> to vector<8x128xi32>
    %6 = arith.sitofp %5 : vector<8x128xi32> to vector<8x128xf32>
    %7 = arith.truncf %6 : vector<8x128xf32> to vector<8x128xbf16>
    %cst = arith.constant dense<0.000000e+00> : vector<8x128xf32>
    %8 = tpu.matmul %7, %1, %cst {dimension_numbers = #tpu.dot_dimension_numbers<[1], [0], [0], [1], [0, 0, 1, 1], [], []>} : vector<8x128xbf16>, vector<128x128xbf16>, vector<8x128xf32> -> vector<8x128xf32>
    %c0_3 = arith.constant 0 : index
    %c0_4 = arith.constant 0 : index
    %c0_5 = arith.constant 0 : index
    %9 = vector.load %arg0[%c0_3, %c0_4, %c0_5] : memref<3x8x512xf32, #tpu.memory_space<vmem>>, vector<1x8x512xf32>
    %10 = vector.shape_cast %9 : vector<1x8x512xf32> to vector<8x512xf32>
    %c0_6 = arith.constant 0 : index
    %c0_7 = arith.constant 0 : index
    %11 = vector.load %arg3[%c0_6, %c0_7] : memref<128x1536xbf16, #tpu.memory_space<vmem>>, vector<128x1536xbf16>
    %c0_8 = arith.constant 0 : index
    %c0_9 = arith.constant 0 : index
    %12 = vector.load %arg4[%c0_8, %c0_9] : memref<512x1536xbf16, #tpu.memory_space<vmem>>, vector<512x1536xbf16>
    %c0_10 = arith.constant 0 : index
    %c0_11 = arith.constant 0 : index
    %13 = vector.load %arg5[%c0_10, %c0_11] : memref<1x1024xf32, #tpu.memory_space<vmem>>, vector<1x1024xf32>
    %c0_12 = arith.constant 0 : index
    %c0_13 = arith.constant 0 : index
    %14 = vector.load %arg6[%c0_12, %c0_13] : memref<1x512xf32, #tpu.memory_space<vmem>>, vector<1x512xf32>
    %c0_14 = arith.constant 0 : index
    %c0_15 = arith.constant 0 : index
    %15 = vector.load %arg7[%c0_14, %c0_15] : memref<1x512xf32, #tpu.memory_space<vmem>>, vector<1x512xf32>
    %16 = arith.truncf %8 : vector<8x128xf32> to vector<8x128xbf16>
    %cst_16 = arith.constant dense<0.000000e+00> : vector<8x1536xf32>
    %17 = tpu.matmul %16, %11, %cst_16 {dimension_numbers = #tpu.dot_dimension_numbers<[1], [0], [0], [1], [0, 0, 1, 1], [], []>} : vector<8x128xbf16>, vector<128x1536xbf16>, vector<8x1536xf32> -> vector<8x1536xf32>
    %18 = arith.truncf %10 : vector<8x512xf32> to vector<8x512xbf16>
    %cst_17 = arith.constant dense<0.000000e+00> : vector<8x1536xf32>
    %19 = tpu.matmul %18, %12, %cst_17 {dimension_numbers = #tpu.dot_dimension_numbers<[1], [0], [0], [1], [0, 0, 1, 1], [], []>} : vector<8x512xbf16>, vector<512x1536xbf16>, vector<8x1536xf32> -> vector<8x1536xf32>
    %20 = vector.extract_strided_slice %17 {offsets = [0, 0], sizes = [8, 1024], strides = [1, 1]} : vector<8x1536xf32> to vector<8x1024xf32>
    %21 = vector.extract_strided_slice %19 {offsets = [0, 0], sizes = [8, 1024], strides = [1, 1]} : vector<8x1536xf32> to vector<8x1024xf32>
    %22 = arith.addf %20, %21 : vector<8x1024xf32>
    %23 = vector.broadcast %13 : vector<1x1024xf32> to vector<8x1024xf32>
    %24 = arith.addf %22, %23 : vector<8x1024xf32>
    %25 = arith.negf %24 : vector<8x1024xf32>
    %26 = math.exp %25 : vector<8x1024xf32>
    %cst_18 = arith.constant 1.000000e+00 : f32
    %27 = vector.broadcast %cst_18 : f32 to vector<8x1024xf32>
    %28 = arith.addf %27, %26 : vector<8x1024xf32>
    %29 = arith.divf %27, %28 : vector<8x1024xf32>
    %30 = vector.extract_strided_slice %29 {offsets = [0, 0], sizes = [8, 512], strides = [1, 1]} : vector<8x1024xf32> to vector<8x512xf32>
    %31 = vector.extract_strided_slice %29 {offsets = [0, 512], sizes = [8, 512], strides = [1, 1]} : vector<8x1024xf32> to vector<8x512xf32>
    %32 = vector.extract_strided_slice %17 {offsets = [0, 1024], sizes = [8, 512], strides = [1, 1]} : vector<8x1536xf32> to vector<8x512xf32>
    %33 = vector.broadcast %14 : vector<1x512xf32> to vector<8x512xf32>
    %34 = arith.addf %32, %33 : vector<8x512xf32>
    %35 = vector.extract_strided_slice %19 {offsets = [0, 1024], sizes = [8, 512], strides = [1, 1]} : vector<8x1536xf32> to vector<8x512xf32>
    %36 = vector.broadcast %15 : vector<1x512xf32> to vector<8x512xf32>
    %37 = arith.addf %35, %36 : vector<8x512xf32>
    %38 = arith.mulf %30, %37 : vector<8x512xf32>
    %39 = arith.addf %34, %38 : vector<8x512xf32>
    %40 = math.tanh %39 : vector<8x512xf32>
    %cst_19 = arith.constant 1.000000e+00 : f32
    %41 = vector.broadcast %cst_19 : f32 to vector<8x512xf32>
    %42 = arith.subf %41, %31 : vector<8x512xf32>
    %43 = arith.mulf %42, %40 : vector<8x512xf32>
    %44 = arith.mulf %31, %10 : vector<8x512xf32>
    %45 = arith.addf %43, %44 : vector<8x512xf32>
    %c1 = arith.constant 1 : index
    %c0_20 = arith.constant 0 : index
    %c0_21 = arith.constant 0 : index
    %46 = vector.load %arg0[%c1, %c0_20, %c0_21] : memref<3x8x512xf32, #tpu.memory_space<vmem>>, vector<1x8x512xf32>
    %47 = vector.shape_cast %46 : vector<1x8x512xf32> to vector<8x512xf32>
    %c0_22 = arith.constant 0 : index
    %c0_23 = arith.constant 0 : index
    %48 = vector.load %arg8[%c0_22, %c0_23] : memref<512x1536xbf16, #tpu.memory_space<vmem>>, vector<512x1536xbf16>
    %c0_24 = arith.constant 0 : index
    %c0_25 = arith.constant 0 : index
    %49 = vector.load %arg9[%c0_24, %c0_25] : memref<512x1536xbf16, #tpu.memory_space<vmem>>, vector<512x1536xbf16>
    %c0_26 = arith.constant 0 : index
    %c0_27 = arith.constant 0 : index
    %50 = vector.load %arg10[%c0_26, %c0_27] : memref<1x1024xf32, #tpu.memory_space<vmem>>, vector<1x1024xf32>
    %c0_28 = arith.constant 0 : index
    %c0_29 = arith.constant 0 : index
    %51 = vector.load %arg11[%c0_28, %c0_29] : memref<1x512xf32, #tpu.memory_space<vmem>>, vector<1x512xf32>
    %c0_30 = arith.constant 0 : index
    %c0_31 = arith.constant 0 : index
    %52 = vector.load %arg12[%c0_30, %c0_31] : memref<1x512xf32, #tpu.memory_space<vmem>>, vector<1x512xf32>
    %53 = arith.truncf %45 : vector<8x512xf32> to vector<8x512xbf16>
    %cst_32 = arith.constant dense<0.000000e+00> : vector<8x1536xf32>
    %54 = tpu.matmul %53, %48, %cst_32 {dimension_numbers = #tpu.dot_dimension_numbers<[1], [0], [0], [1], [0, 0, 1, 1], [], []>} : vector<8x512xbf16>, vector<512x1536xbf16>, vector<8x1536xf32> -> vector<8x1536xf32>
    %55 = arith.truncf %47 : vector<8x512xf32> to vector<8x512xbf16>
    %cst_33 = arith.constant dense<0.000000e+00> : vector<8x1536xf32>
    %56 = tpu.matmul %55, %49, %cst_33 {dimension_numbers = #tpu.dot_dimension_numbers<[1], [0], [0], [1], [0, 0, 1, 1], [], []>} : vector<8x512xbf16>, vector<512x1536xbf16>, vector<8x1536xf32> -> vector<8x1536xf32>
    %57 = vector.extract_strided_slice %54 {offsets = [0, 0], sizes = [8, 1024], strides = [1, 1]} : vector<8x1536xf32> to vector<8x1024xf32>
    %58 = vector.extract_strided_slice %56 {offsets = [0, 0], sizes = [8, 1024], strides = [1, 1]} : vector<8x1536xf32> to vector<8x1024xf32>
    %59 = arith.addf %57, %58 : vector<8x1024xf32>
    %60 = vector.broadcast %50 : vector<1x1024xf32> to vector<8x1024xf32>
    %61 = arith.addf %59, %60 : vector<8x1024xf32>
    %62 = arith.negf %61 : vector<8x1024xf32>
    %63 = math.exp %62 : vector<8x1024xf32>
    %cst_34 = arith.constant 1.000000e+00 : f32
    %64 = vector.broadcast %cst_34 : f32 to vector<8x1024xf32>
    %65 = arith.addf %64, %63 : vector<8x1024xf32>
    %66 = arith.divf %64, %65 : vector<8x1024xf32>
    %67 = vector.extract_strided_slice %66 {offsets = [0, 0], sizes = [8, 512], strides = [1, 1]} : vector<8x1024xf32> to vector<8x512xf32>
    %68 = vector.extract_strided_slice %66 {offsets = [0, 512], sizes = [8, 512], strides = [1, 1]} : vector<8x1024xf32> to vector<8x512xf32>
    %69 = vector.extract_strided_slice %54 {offsets = [0, 1024], sizes = [8, 512], strides = [1, 1]} : vector<8x1536xf32> to vector<8x512xf32>
    %70 = vector.broadcast %51 : vector<1x512xf32> to vector<8x512xf32>
    %71 = arith.addf %69, %70 : vector<8x512xf32>
    %72 = vector.extract_strided_slice %56 {offsets = [0, 1024], sizes = [8, 512], strides = [1, 1]} : vector<8x1536xf32> to vector<8x512xf32>
    %73 = vector.broadcast %52 : vector<1x512xf32> to vector<8x512xf32>
    %74 = arith.addf %72, %73 : vector<8x512xf32>
    %75 = arith.mulf %67, %74 : vector<8x512xf32>
    %76 = arith.addf %71, %75 : vector<8x512xf32>
    %77 = math.tanh %76 : vector<8x512xf32>
    %cst_35 = arith.constant 1.000000e+00 : f32
    %78 = vector.broadcast %cst_35 : f32 to vector<8x512xf32>
    %79 = arith.subf %78, %68 : vector<8x512xf32>
    %80 = arith.mulf %79, %77 : vector<8x512xf32>
    %81 = arith.mulf %68, %47 : vector<8x512xf32>
    %82 = arith.addf %80, %81 : vector<8x512xf32>
    %c2 = arith.constant 2 : index
    %c0_36 = arith.constant 0 : index
    %c0_37 = arith.constant 0 : index
    %83 = vector.load %arg0[%c2, %c0_36, %c0_37] : memref<3x8x512xf32, #tpu.memory_space<vmem>>, vector<1x8x512xf32>
    %84 = vector.shape_cast %83 : vector<1x8x512xf32> to vector<8x512xf32>
    %c0_38 = arith.constant 0 : index
    %c0_39 = arith.constant 0 : index
    %85 = vector.load %arg13[%c0_38, %c0_39] : memref<512x1536xbf16, #tpu.memory_space<vmem>>, vector<512x1536xbf16>
    %c0_40 = arith.constant 0 : index
    %c0_41 = arith.constant 0 : index
    %86 = vector.load %arg14[%c0_40, %c0_41] : memref<512x1536xbf16, #tpu.memory_space<vmem>>, vector<512x1536xbf16>
    %c0_42 = arith.constant 0 : index
    %c0_43 = arith.constant 0 : index
    %87 = vector.load %arg15[%c0_42, %c0_43] : memref<1x1024xf32, #tpu.memory_space<vmem>>, vector<1x1024xf32>
    %c0_44 = arith.constant 0 : index
    %c0_45 = arith.constant 0 : index
    %88 = vector.load %arg16[%c0_44, %c0_45] : memref<1x512xf32, #tpu.memory_space<vmem>>, vector<1x512xf32>
    %c0_46 = arith.constant 0 : index
    %c0_47 = arith.constant 0 : index
    %89 = vector.load %arg17[%c0_46, %c0_47] : memref<1x512xf32, #tpu.memory_space<vmem>>, vector<1x512xf32>
    %90 = arith.truncf %82 : vector<8x512xf32> to vector<8x512xbf16>
    %cst_48 = arith.constant dense<0.000000e+00> : vector<8x1536xf32>
    %91 = tpu.matmul %90, %85, %cst_48 {dimension_numbers = #tpu.dot_dimension_numbers<[1], [0], [0], [1], [0, 0, 1, 1], [], []>} : vector<8x512xbf16>, vector<512x1536xbf16>, vector<8x1536xf32> -> vector<8x1536xf32>
    %92 = arith.truncf %84 : vector<8x512xf32> to vector<8x512xbf16>
    %cst_49 = arith.constant dense<0.000000e+00> : vector<8x1536xf32>
    %93 = tpu.matmul %92, %86, %cst_49 {dimension_numbers = #tpu.dot_dimension_numbers<[1], [0], [0], [1], [0, 0, 1, 1], [], []>} : vector<8x512xbf16>, vector<512x1536xbf16>, vector<8x1536xf32> -> vector<8x1536xf32>
    %94 = vector.extract_strided_slice %91 {offsets = [0, 0], sizes = [8, 1024], strides = [1, 1]} : vector<8x1536xf32> to vector<8x1024xf32>
    %95 = vector.extract_strided_slice %93 {offsets = [0, 0], sizes = [8, 1024], strides = [1, 1]} : vector<8x1536xf32> to vector<8x1024xf32>
    %96 = arith.addf %94, %95 : vector<8x1024xf32>
    %97 = vector.broadcast %87 : vector<1x1024xf32> to vector<8x1024xf32>
    %98 = arith.addf %96, %97 : vector<8x1024xf32>
    %99 = arith.negf %98 : vector<8x1024xf32>
    %100 = math.exp %99 : vector<8x1024xf32>
    %cst_50 = arith.constant 1.000000e+00 : f32
    %101 = vector.broadcast %cst_50 : f32 to vector<8x1024xf32>
    %102 = arith.addf %101, %100 : vector<8x1024xf32>
    %103 = arith.divf %101, %102 : vector<8x1024xf32>
    %104 = vector.extract_strided_slice %103 {offsets = [0, 0], sizes = [8, 512], strides = [1, 1]} : vector<8x1024xf32> to vector<8x512xf32>
    %105 = vector.extract_strided_slice %103 {offsets = [0, 512], sizes = [8, 512], strides = [1, 1]} : vector<8x1024xf32> to vector<8x512xf32>
    %106 = vector.extract_strided_slice %91 {offsets = [0, 1024], sizes = [8, 512], strides = [1, 1]} : vector<8x1536xf32> to vector<8x512xf32>
    %107 = vector.broadcast %88 : vector<1x512xf32> to vector<8x512xf32>
    %108 = arith.addf %106, %107 : vector<8x512xf32>
    %109 = vector.extract_strided_slice %93 {offsets = [0, 1024], sizes = [8, 512], strides = [1, 1]} : vector<8x1536xf32> to vector<8x512xf32>
    %110 = vector.broadcast %89 : vector<1x512xf32> to vector<8x512xf32>
    %111 = arith.addf %109, %110 : vector<8x512xf32>
    %112 = arith.mulf %104, %111 : vector<8x512xf32>
    %113 = arith.addf %108, %112 : vector<8x512xf32>
    %114 = math.tanh %113 : vector<8x512xf32>
    %cst_51 = arith.constant 1.000000e+00 : f32
    %115 = vector.broadcast %cst_51 : f32 to vector<8x512xf32>
    %116 = arith.subf %115, %105 : vector<8x512xf32>
    %117 = arith.mulf %116, %114 : vector<8x512xf32>
    %118 = arith.mulf %105, %84 : vector<8x512xf32>
    %119 = arith.addf %117, %118 : vector<8x512xf32>
    %c0_52 = arith.constant 0 : index
    %c0_53 = arith.constant 0 : index
    %c0_54 = arith.constant 0 : index
    %120 = vector.load %arg21[%c0_52, %c0_53, %c0_54] : memref<3x8x512xf32, #tpu.memory_space<vmem>>, vector<1x8x512xf32>
    %121 = vector.shape_cast %120 : vector<1x8x512xf32> to vector<8x512xf32>
    %122 = vector.shape_cast %45 : vector<8x512xf32> to vector<1x8x512xf32>
    tpu.vector_store %arg21[%c0_52, %c0_53, %c0_54], %122 {strides = array<i32>} : memref<3x8x512xf32, #tpu.memory_space<vmem>>, vector<1x8x512xf32>,
    %c1_55 = arith.constant 1 : index
    %c0_56 = arith.constant 0 : index
    %c0_57 = arith.constant 0 : index
    %123 = vector.load %arg21[%c1_55, %c0_56, %c0_57] : memref<3x8x512xf32, #tpu.memory_space<vmem>>, vector<1x8x512xf32>
    %124 = vector.shape_cast %123 : vector<1x8x512xf32> to vector<8x512xf32>
    %125 = vector.shape_cast %82 : vector<8x512xf32> to vector<1x8x512xf32>
    tpu.vector_store %arg21[%c1_55, %c0_56, %c0_57], %125 {strides = array<i32>} : memref<3x8x512xf32, #tpu.memory_space<vmem>>, vector<1x8x512xf32>,
    %c2_58 = arith.constant 2 : index
    %c0_59 = arith.constant 0 : index
    %c0_60 = arith.constant 0 : index
    %126 = vector.load %arg21[%c2_58, %c0_59, %c0_60] : memref<3x8x512xf32, #tpu.memory_space<vmem>>, vector<1x8x512xf32>
    %127 = vector.shape_cast %126 : vector<1x8x512xf32> to vector<8x512xf32>
    %128 = vector.shape_cast %119 : vector<8x512xf32> to vector<1x8x512xf32>
    tpu.vector_store %arg21[%c2_58, %c0_59, %c0_60], %128 {strides = array<i32>} : memref<3x8x512xf32, #tpu.memory_space<vmem>>, vector<1x8x512xf32>,
    %129 = arith.truncf %119 : vector<8x512xf32> to vector<8x512xbf16>
    %c0_61 = arith.constant 0 : index
    %c0_62 = arith.constant 0 : index
    %130 = vector.load %arg18[%c0_61, %c0_62] : memref<512x128xbf16, #tpu.memory_space<vmem>>, vector<512x128xbf16>
    %cst_63 = arith.constant dense<0.000000e+00> : vector<8x128xf32>
    %131 = tpu.matmul %129, %130, %cst_63 {dimension_numbers = #tpu.dot_dimension_numbers<[1], [0], [0], [1], [0, 0, 1, 1], [], []>} : vector<8x512xbf16>, vector<512x128xbf16>, vector<8x128xf32> -> vector<8x128xf32>
    %c0_64 = arith.constant 0 : index
    %c0_65 = arith.constant 0 : index
    %132 = vector.load %arg19[%c0_64, %c0_65] : memref<1x128xf32, #tpu.memory_space<vmem>>, vector<1x128xf32>
    %133 = vector.broadcast %132 : vector<1x128xf32> to vector<8x128xf32>
    %134 = arith.addf %131, %133 : vector<8x128xf32>
    %c0_66 = arith.constant 0 : index
    %c0_67 = arith.constant 0 : index
    %135 = vector.load %arg20[%c0_66, %c0_67] : memref<8x128xf32, #tpu.memory_space<vmem>>, vector<8x128xf32>
    tpu.vector_store %arg20[%c0_66, %c0_67], %134 {strides = array<i32>} : memref<8x128xf32, #tpu.memory_space<vmem>>, vector<8x128xf32>,
    return
  }
}

</mosaic_0001>

<bundles_post_ra>
// kernel: multigru_forward.1
= control target key start
LH: loop header
LB: loop body
LE: loop exit
PB: predicated region body
PF: predicated region fallthrough
CT: control target
= control target key end

     0   :  { %s22688_s0 = inlined_call_operand.vmem [shape: f32[3,8,512], index: 0, kind: input, shape index: {}, may-alias: {0,21}]   ;;  %s22689_s1 = inlined_call_operand.vmem [shape: s32[8,1], index: 1, kind: input, shape index: {}]   ;;  %s22690_s2 = inlined_call_operand.hbm [shape: bf16[128,128], index: 2, kind: input, shape index: {}]   ;;  %s22691_s3 = inlined_call_operand.hbm [shape: bf16[128,1536], index: 3, kind: input, shape index: {}]   ;;  %s22692_s4 = inlined_call_operand.hbm [shape: bf16[512,1536], index: 4, kind: input, shape index: {}]   ;;  %s22693_s5 = inlined_call_operand.vmem [shape: f32[1,1024], index: 5, kind: input, shape index: {}]   ;;  %s22694_s6 = inlined_call_operand.vmem [shape: f32[1,512], index: 6, kind: input, shape index: {}]   ;;  %s22695_s7 = inlined_call_operand.vmem [shape: f32[1,512], index: 7, kind: input, shape index: {}]   ;;  %s22696_s8 = inlined_call_operand.hbm [shape: bf16[512,1536], index: 8, kind: input, shape index: {}]   ;;  %s22697_s9 = inlined_call_operand.hbm [shape: bf16[512,1536], index: 9, kind: input, shape index: {}]   ;;  %s22698_s10 = inlined_call_operand.vmem [shape: f32[1,1024], index: 10, kind: input, shape index: {}]   ;;  %s22699_s11 = inlined_call_operand.vmem [shape: f32[1,512], index: 11, kind: input, shape index: {}]   ;;  %s22700_s12 = inlined_call_operand.vmem [shape: f32[1,512], index: 12, kind: input, shape index: {}]   ;;  %s22701_s13 = inlined_call_operand.hbm [shape: bf16[512,1536], index: 13, kind: input, shape index: {}]   ;;  %s22702_s14 = inlined_call_operand.hbm [shape: bf16[512,1536], index: 14, kind: input, shape index: {}]   ;;  %s22703_s15 = inlined_call_operand.vmem [shape: f32[1,1024], index: 15, kind: input, shape index: {}]   ;;  %s22704_s16 = inlined_call_operand.vmem [shape: f32[1,512], index: 16, kind: input, shape index: {}]   ;;  %s22705_s17 = inlined_call_operand.vmem [shape: f32[1,512], index: 17, kind: input, shape index: {}]   ;;  %s22706_s18 = inlined_call_operand.hbm [shape: bf16[512,128], index: 18, kind: input, shape index: {}]   ;;  %s22707_s19 = inlined_call_operand.hbm [shape: f32[1,128], index: 19, kind: input, shape index: {}]   ;;  %s22708_s20 = inlined_call_operand.vmem [shape: f32[8,128], index: 20, kind: output, shape index: {0}]   ;;  %s22709_s21 = inlined_call_operand.vmem [shape: f32[3,8,512], index: 21, kind: output, shape index: {1}, may-alias: {0,21}]  }
   0x1   :  { %22714 = sst [smem:[#allocation21_spill]] %s22688_s0 }
   0x2   :  { %22715 = sst [smem:[#allocation22_spill]] %s22689_s1 }
   0x3   :  { %22716 = sst [smem:[#allocation23_spill]] %s22690_s2 }
   0x4   :  { %22717 = sst [smem:[#allocation24_spill]] %s22691_s3 }
   0x5   :  { %22718 = sst [smem:[#allocation25_spill]] %s22692_s4 }
   0x6   :  { %22719 = sst [smem:[#allocation26_spill]] %s22693_s5 }
   0x7   :  { %22720 = sst [smem:[#allocation27_spill]] %s22704_s16 }
   0x8   :  { %22721 = sst [smem:[#allocation28_spill]] %s22708_s20 }
   0x9   :  { %27 = vsyncpa [#allocation3], 0 }
   0xa   :  { %28 = vsyncpa [#allocation5], 0 }
   0xb   :  { %29 = vsyncpa [#allocation8], 0 }
   0xc   :  { %30 = vsyncpa [#allocation11], 0 }
   0xd   :  { %31 = vsyncpa [#allocation14], 0  ;;  %s21668_s2 = smov [#allocation4]   ;;  %s22722_s3 = sld [smem:[#allocation24_spill]] }
   0xe   :  { %s53_s25 = sshll.u32 %s21668_s2, 4  ;;  %s54_s25 = int_to_ptr.vmem [resolvable:$true] %s53_s25 }
  0x13   :  { %s21460_s28 = scalar_lea.hbm %s22722_s3, 12288 }
  0x14   :  { %p21461_p0 = scmp.ne.s32.totalorder %s22722_s3, %s21460_s28  ;;  %p21464_p1 = scmp.lt.u32.totalorder %s21460_s28, %s22722_s3 }
  0x16   :  { %p21466_p2 = pnand %p21464_p1, %p21461_p0 }
  0x18   :  { %21469 = shalt.err (!%p21466_p2)
}
  0x19   :  { %s21470_s5 = scalar_lea.vmem %s54_s25, 12288  ;;  %p21475_p4 = scmp.lt.s32.totalorder %s54_s25, %s54_s25 }
  0x1a   :  { %p21471_p3 = scmp.ne.s32.totalorder %s54_s25, %s21470_s5  ;;  %p21476_p5 = scmp.lt.s32.totalorder %s21470_s5, %s21470_s5 }
  0x1c   :  { %p21477_p6 = por %p21476_p5, %p21475_p4 }
  0x1e   :  { %p21478_p7 = pnand %p21477_p6, %p21471_p3 }
  0x20   :  { %21481 = shalt.err (!%p21478_p7)
}
  0x21   :  { %s21669_s22 = smov 768   ;;  %s21670_s23 = smov 48  }
  0x22   :  { %59 = dma.hbm_to_vmem [thread:$0]  %s22722_s3, 12288, %s54_s25, [#allocation5], %s21669_s22, %s21669_s22, %s21670_s23  }
  0x23   :  { %s21671_s2 = smov [#allocation7]   ;;  %s21672_s27 = smov [#allocation10]  }
  0x24   :  { %s83_s26 = sshll.u32 %s21671_s2, 4  ;;  %s113_s28 = sshll.u32 %s21672_s27, 4  ;;  %s84_s26 = int_to_ptr.vmem [resolvable:$true] %s83_s26  ;;  %s114_s28 = int_to_ptr.vmem [resolvable:$true] %s113_s28 }
  0x25   :  { %s21482_s4 = scalar_lea.hbm %s22696_s8, 49152 }
  0x26   :  { %p21483_p8 = scmp.ne.s32.totalorder %s22696_s8, %s21482_s4  ;;  %p21486_p9 = scmp.lt.u32.totalorder %s21482_s4, %s22696_s8 }
  0x28   :  { %p21488_p10 = pnand %p21486_p9, %p21483_p8 }
  0x2a   :  { %21491 = shalt.err (!%p21488_p10)
}
  0x2b   :  { %s21492_s25 = scalar_lea.vmem %s84_s26, 49152  ;;  %p21497_p12 = scmp.lt.s32.totalorder %s84_s26, %s84_s26 }
  0x2c   :  { %p21493_p11 = scmp.ne.s32.totalorder %s84_s26, %s21492_s25  ;;  %p21498_p13 = scmp.lt.s32.totalorder %s21492_s25, %s21492_s25 }
  0x2e   :  { %p21499_p0 = por %p21498_p13, %p21497_p12 }
  0x30   :  { %p21500_p1 = pnand %p21499_p0, %p21493_p11 }
  0x32   :  { %21503 = shalt.err (!%p21500_p1)
}
  0x33   :  { %89 = dma.hbm_to_vmem [thread:$0]  %s22696_s8, 49152, %s84_s26, [#allocation8], %s21669_s22, %s21669_s22, %s21670_s23  }
  0x34   :  { %s21504_s20 = scalar_lea.hbm %s22701_s13, 49152 }
  0x35   :  { %p21505_p2 = scmp.ne.s32.totalorder %s22701_s13, %s21504_s20  ;;  %p21508_p3 = scmp.lt.u32.totalorder %s21504_s20, %s22701_s13 }
  0x37   :  { %p21510_p4 = pnand %p21508_p3, %p21505_p2 }
  0x39   :  { %21513 = shalt.err (!%p21510_p4)
}
  0x3a   :  { %s21514_s4 = scalar_lea.vmem %s114_s28, 49152  ;;  %p21519_p6 = scmp.lt.s32.totalorder %s114_s28, %s114_s28 }
  0x3b   :  { %p21515_p5 = scmp.ne.s32.totalorder %s114_s28, %s21514_s4  ;;  %p21520_p7 = scmp.lt.s32.totalorder %s21514_s4, %s21514_s4 }
  0x3d   :  { %p21521_p8 = por %p21520_p7, %p21519_p6 }
  0x3f   :  { %p21522_p9 = pnand %p21521_p8, %p21515_p5 }
  0x41   :  { %21525 = shalt.err (!%p21522_p9)
}
  0x42   :  { %119 = dma.hbm_to_vmem [thread:$0]  %s22701_s13, 49152, %s114_s28, [#allocation11], %s21669_s22, %s21669_s22, %s21670_s23  }
  0x43   :  { %s21673_s30 = smov [#allocation13]   ;;  %s21674_s25 = smov [#allocation2]  }
  0x44   :  { %s143_s5 = sshll.u32 %s21673_s30, 4  ;;  %s41_s3 = sshll.u32 %s21674_s25, 4  ;;  %s144_s5 = int_to_ptr.vmem [resolvable:$true] %s143_s5  ;;  %s42_s3 = int_to_ptr.vmem [resolvable:$true] %s41_s3 }
  0x45   :  { %s21526_s16 = scalar_lea.hbm %s22706_s18, 4096 }
  0x46   :  { %p21527_p10 = scmp.ne.s32.totalorder %s22706_s18, %s21526_s16  ;;  %p21530_p11 = scmp.lt.u32.totalorder %s21526_s16, %s22706_s18 }
  0x48   :  { %p21532_p12 = pnand %p21530_p11, %p21527_p10 }
  0x4a   :  { %21535 = shalt.err (!%p21532_p12)
}
  0x4b   :  { %s21536_s13 = scalar_lea.vmem %s144_s5, 4096  ;;  %p21541_p0 = scmp.lt.s32.totalorder %s144_s5, %s144_s5 }
  0x4c   :  { %p21537_p13 = scmp.ne.s32.totalorder %s144_s5, %s21536_s13  ;;  %p21542_p1 = scmp.lt.s32.totalorder %s21536_s13, %s21536_s13 }
  0x4e   :  { %p21543_p2 = por %p21542_p1, %p21541_p0 }
  0x50   :  { %p21544_p3 = pnand %p21543_p2, %p21537_p13 }
  0x52   :  { %21547 = shalt.err (!%p21544_p3)
}
  0x53   :  { %s21675_s28 = smov 64   ;;  %s21676_s0 = smov 4  }
  0x54   :  { %149 = dma.hbm_to_vmem [thread:$0]  %s22706_s18, 4096, %s144_s5, [#allocation14], %s21675_s28, %s21675_s28, %s21676_s0  }
  0x55   :  { %s22723_s25 = sld [smem:[#allocation23_spill]] }
  0x5b   :  { %s21548_s1 = scalar_lea.hbm %s22723_s25, 1024 }
  0x5c   :  { %p21549_p4 = scmp.ne.s32.totalorder %s22723_s25, %s21548_s1  ;;  %p21552_p5 = scmp.lt.u32.totalorder %s21548_s1, %s22723_s25 }
  0x5e   :  { %p21554_p6 = pnand %p21552_p5, %p21549_p4 }
  0x60   :  { %21557 = shalt.err (!%p21554_p6)
}
  0x61   :  { %s21558_s27 = scalar_lea.vmem %s42_s3, 1024  ;;  %p21563_p8 = scmp.lt.s32.totalorder %s42_s3, %s42_s3 }
  0x62   :  { %p21559_p7 = scmp.ne.s32.totalorder %s42_s3, %s21558_s27  ;;  %p21564_p9 = scmp.lt.s32.totalorder %s21558_s27, %s21558_s27 }
  0x64   :  { %p21565_p10 = por %p21564_p9, %p21563_p8 }
  0x66   :  { %p21566_p11 = pnand %p21565_p10, %p21559_p7 }
  0x68   :  { %21569 = shalt.err (!%p21566_p11)
}
  0x69   :  { %47 = dma.hbm_to_vmem [thread:$0]  %s22723_s25, 1024, %s42_s3, [#allocation3], %s21675_s28, %s21675_s28, %s21676_s0  }
  0x6a   :  { %s21677_s29 = smov [#allocation6]   ;;  %s21678_s4 = smov [#allocation9]  }
  0x6b   :  { %s65_s13 = sshll.u32 %s21677_s29, 4  ;;  %s95_s8 = sshll.u32 %s21678_s4, 4  ;;  %s66_s13 = int_to_ptr.vmem [resolvable:$true] %s65_s13  ;;  %s96_s8 = int_to_ptr.vmem [resolvable:$true] %s95_s8 }
  0x6c   :  { %s22724_s1 = sld [smem:[#allocation25_spill]] }
  0x72   :  { %s21570_s24 = scalar_lea.hbm %s22724_s1, 49152 }
  0x73   :  { %p21571_p12 = scmp.ne.s32.totalorder %s22724_s1, %s21570_s24  ;;  %p21574_p13 = scmp.lt.u32.totalorder %s21570_s24, %s22724_s1 }
  0x75   :  { %p21576_p0 = pnand %p21574_p13, %p21571_p12 }
  0x77   :  { %21579 = shalt.err (!%p21576_p0)
}
  0x78   :  { %s21580_s3 = scalar_lea.vmem %s66_s13, 49152  ;;  %p21585_p2 = scmp.lt.s32.totalorder %s66_s13, %s66_s13 }
  0x79   :  { %p21581_p1 = scmp.ne.s32.totalorder %s66_s13, %s21580_s3  ;;  %p21586_p3 = scmp.lt.s32.totalorder %s21580_s3, %s21580_s3 }
  0x7b   :  { %p21587_p4 = por %p21586_p3, %p21585_p2 }
  0x7d   :  { %p21588_p5 = pnand %p21587_p4, %p21581_p1 }
  0x7f   :  { %21591 = shalt.err (!%p21588_p5)
}
  0x80   :  { %71 = dma.hbm_to_vmem [thread:$0]  %s22724_s1, 49152, %s66_s13, [#allocation5], %s21669_s22, %s21669_s22, %s21670_s23  }
  0x81   :  { %s21592_s5 = scalar_lea.hbm %s22697_s9, 49152 }
  0x82   :  { %p21593_p6 = scmp.ne.s32.totalorder %s22697_s9, %s21592_s5  ;;  %p21596_p7 = scmp.lt.u32.totalorder %s21592_s5, %s22697_s9 }
  0x84   :  { %p21598_p8 = pnand %p21596_p7, %p21593_p6 }
  0x86   :  { %21601 = shalt.err (!%p21598_p8)
}
  0x87   :  { %s21602_s24 = scalar_lea.vmem %s96_s8, 49152  ;;  %p21607_p10 = scmp.lt.s32.totalorder %s96_s8, %s96_s8 }
  0x88   :  { %p21603_p9 = scmp.ne.s32.totalorder %s96_s8, %s21602_s24  ;;  %p21608_p11 = scmp.lt.s32.totalorder %s21602_s24, %s21602_s24 }
  0x8a   :  { %p21609_p12 = por %p21608_p11, %p21607_p10 }
  0x8c   :  { %p21610_p13 = pnand %p21609_p12, %p21603_p9 }
  0x8e   :  { %21613 = shalt.err (!%p21610_p13)
}
  0x8f   :  { %101 = dma.hbm_to_vmem [thread:$0]  %s22697_s9, 49152, %s96_s8, [#allocation8], %s21669_s22, %s21669_s22, %s21670_s23  }
  0x90   :  { %s21679_s16 = smov [#allocation12]   ;;  %s21680_s2 = smov [#allocation15]  }
  0x91   :  { %s125_s20 = sshll.u32 %s21679_s16, 4  ;;  %s156_s27 = sshll.u32 %s21680_s2, 4  ;;  %s126_s20 = int_to_ptr.vmem [resolvable:$true] %s125_s20  ;;  %s157_s27 = int_to_ptr.vmem [resolvable:$true] %s156_s27 }
  0x92   :  { %s21614_s0 = scalar_lea.hbm %s22702_s14, 49152 }
  0x93   :  { %p21615_p0 = scmp.ne.s32.totalorder %s22702_s14, %s21614_s0  ;;  %p21618_p1 = scmp.lt.u32.totalorder %s21614_s0, %s22702_s14 }
  0x95   :  { %p21620_p2 = pnand %p21618_p1, %p21615_p0 }
  0x97   :  { %21623 = shalt.err (!%p21620_p2)
}
  0x98   :  { %s21624_s9 = scalar_lea.vmem %s126_s20, 49152  ;;  %p21629_p4 = scmp.lt.s32.totalorder %s126_s20, %s126_s20 }
  0x99   :  { %p21625_p3 = scmp.ne.s32.totalorder %s126_s20, %s21624_s9  ;;  %p21630_p5 = scmp.lt.s32.totalorder %s21624_s9, %s21624_s9 }
  0x9b   :  { %p21631_p6 = por %p21630_p5, %p21629_p4 }
  0x9d   :  { %p21632_p7 = pnand %p21631_p6, %p21625_p3 }
  0x9f   :  { %21635 = shalt.err (!%p21632_p7)
}
  0xa0   :  { %131 = dma.hbm_to_vmem [thread:$0]  %s22702_s14, 49152, %s126_s20, [#allocation11], %s21669_s22, %s21669_s22, %s21670_s23  }
  0xa1   :  { %s21636_s24 = scalar_lea.hbm %s22707_s19, 16 }
  0xa2   :  { %p21637_p8 = scmp.ne.s32.totalorder %s22707_s19, %s21636_s24  ;;  %p21640_p9 = scmp.lt.u32.totalorder %s21636_s24, %s22707_s19 }
  0xa4   :  { %p21642_p10 = pnand %p21640_p9, %p21637_p8 }
  0xa6   :  { %21645 = shalt.err (!%p21642_p10)
}
  0xa7   :  { %s21646_s3 = scalar_lea.vmem %s157_s27, 16  ;;  %s21650_s28 = scalar_lea.vmem %s157_s27, 32 }
  0xa8   :  { %p21647_p11 = scmp.ne.s32.totalorder %s157_s27, %s21646_s3  ;;  %p21651_p12 = scmp.lt.s32.totalorder %s157_s27, %s157_s27 }
  0xa9   :  { %p21652_p13 = scmp.lt.s32.totalorder %s21650_s28, %s21646_s3 }
  0xab   :  { %p21653_p0 = por %p21652_p13, %p21651_p12 }
  0xad   :  { %p21654_p1 = pnand %p21653_p0, %p21647_p11 }
  0xaf   :  { %21657 = shalt.err (!%p21654_p1)
}
  0xb0   :  { %159 = dma.hbm_to_vmem [thread:$0]  %s22707_s19, 16, %s157_s27, [#allocation14]  }
  0xb1   :  { %21658 = dma.done.wait [#allocation3], 1024  }
  0xb2   :  { %21659 = vsyncadd [#allocation3], 4294966272 }
  0xb3   :  { %21660 = dma.done.wait [#allocation5], 61440  }
  0xb4   :  { %21661 = vsyncadd [#allocation5], 4294905856 }
  0xb5   :  { %21662 = dma.done.wait [#allocation8], 98304  }
  0xb6   :  { %21663 = vsyncadd [#allocation8], 4294868992 }
  0xb7   :  { %21664 = dma.done.wait [#allocation11], 98304  }
  0xb8   :  { %21665 = vsyncadd [#allocation11], 4294868992 }
  0xb9   :  { %21666 = dma.done.wait [#allocation14], 4112  }
  0xba   :  { %21667 = vsyncadd [#allocation14], 4294963184  ;;  %v21681_v0 = vmov 0   ;;  %v21682_v1 = vmov 0.0   ;;  %s22725_s19 = sld [smem:[#allocation22_spill]]  ;;  %v18263_v3 = vld [vmem:[#allocation2] sm:$0xff]   ;;  %v205_v28 = vlaneseq }
  0xbb   :  { %18262 = vset.pattern.permute.xlu0 %v21681_v0  ;;  %18225 = vmatprep.subr.bf16.mxu0 %v21682_v1  ;;  %vm21683_vm0 = vmmov 0   ;;  %v18264_v4 = vld [vmem:[#allocation2 + $0x8] sm:$0xff]   ;;  %v18265_v5 = vld [vmem:[#allocation2 + $0x10] sm:$0xff]   ;;  %v18266_v7 = vld [vmem:[#allocation2 + $0x18] sm:$0xff]   ;;  %v21684_v34 = vmov 1.0|1.0  }
  0xbc   :  { %1302 = vmatprep.mubr.bf16.mxu1 %v21681_v0  ;;  %18241 = vmatprep.mubr.msk.bf16.mxu0 %vm21683_vm0, %v21682_v1  ;;  %v18271_v6 = vld [vmem:[#allocation4 + $0x4] ss:$48 sps:$4 sm:$0xff]   ;;  %v18276_v8 = vld [vmem:[#allocation4] ss:$48 sps:$4 sm:$0xff]   ;;  %v18268_v15 = vld [vmem:[#allocation2 + $0x28] sm:$0xff]   ;;  %v206_v29 = vand.u32 127, %v205_v28 }
  0xbd   :  { %18226 = vmatpush3.bf16.msra.mxu0 %v18263_v3  ;;  %1270 = vmatprep.subr.bf16.mxu1 %v18271_v6  ;;  %v18277_v9 = vld [vmem:[#allocation4 + $0x64] ss:$48 sps:$4 sm:$0xff]   ;;  %v18282_v10 = vld [vmem:[#allocation4 + $0x60] ss:$48 sps:$4 sm:$0xff]   ;;  %v18270_v21 = vld [vmem:[#allocation2 + $0x38] sm:$0xff]   ;;  %s22726_s25 = sld [smem:[#allocation21_spill]] }
  0xbe   :  { %18227 = vmatprep.subr.bf16.mxu0 %v21682_v1  ;;  %1271 = vmatpush1.bf16.msra.mxu1 %v18276_v8  ;;  %v18283_v11 = vld [vmem:[#allocation4 + $0xc4] ss:$48 sps:$4 sm:$0xff]   ;;  %v18288_v13 = vld [vmem:[#allocation4 + $0xc0] ss:$48 sps:$4 sm:$0xff]   ;;  %v18275_v22 = vld [vmem:[#allocation4 + $0xc] ss:$48 sps:$4 sm:$0xff]  }
  0xbf   :  { %1272 = vmatprep.subr.bf16.mxu1 %v18277_v9  ;;  %v18267_v12 = vld [vmem:[#allocation2 + $0x20] sm:$0xff]   ;;  %v18269_v18 = vld [vmem:[#allocation2 + $0x30] sm:$0xff]   ;;  %v18273_v30 = vld [vmem:[#allocation4 + $0x8] ss:$48 sps:$4 sm:$0xff]   ;;  %s22727_s1 = sld [smem:[#allocation26_spill]]  ;;  %s22728_s20 = sld [smem:[#allocation27_spill]] }
  0xc0   :  { %v188_v2 = vld [vmem:[%s22725_s19] sm:$0xff]  ;;  %v18281_v31 = vld [vmem:[#allocation4 + $0x6c] ss:$48 sps:$4 sm:$0xff]   ;;  %v18279_v33 = vld [vmem:[#allocation4 + $0x68] ss:$48 sps:$4 sm:$0xff]  }
  0xc1   :  { %208 = vperm.xlu0 %18262, %v188_v2   ;;  %18228 = vmatpush3.bf16.msra.mxu0 %v18264_v4  ;;  %v18289_v14 = vld [vmem:[#allocation4 + $0x124] ss:$48 sps:$4 sm:$0xff]   ;;  %v18294_v16 = vld [vmem:[#allocation4 + $0x120] ss:$48 sps:$4 sm:$0xff]   ;;  %v18287_v35 = vld [vmem:[#allocation4 + $0xcc] ss:$48 sps:$4 sm:$0xff]  }
  0xc2   :  { %18229 = vmatprep.subr.bf16.mxu0 %v21682_v1  ;;  %1273 = vmatpush1.bf16.msra.mxu1 %v18282_v10  ;;  %v18295_v17 = vld [vmem:[#allocation4 + $0x184] ss:$48 sps:$4 sm:$0xff]   ;;  %v18300_v19 = vld [vmem:[#allocation4 + $0x180] ss:$48 sps:$4 sm:$0xff]   ;;  %v18285_v36 = vld [vmem:[#allocation4 + $0xc8] ss:$48 sps:$4 sm:$0xff]  }
  0xc3   :  { %1274 = vmatprep.subr.bf16.mxu1 %v18283_v11  ;;  %v18301_v20 = vld [vmem:[#allocation4 + $0x1e4] ss:$48 sps:$4 sm:$0xff]   ;;  %v18306_v23 = vld [vmem:[#allocation4 + $0x1e0] ss:$48 sps:$4 sm:$0xff]   ;;  %v18293_v37 = vld [vmem:[#allocation4 + $0x12c] ss:$48 sps:$4 sm:$0xff]  }
  0xc4   :  { %v18307_v24 = vld [vmem:[#allocation4 + $0x244] ss:$48 sps:$4 sm:$0xff]   ;;  %v18312_v25 = vld [vmem:[#allocation4 + $0x240] ss:$48 sps:$4 sm:$0xff]   ;;  %v18291_v38 = vld [vmem:[#allocation4 + $0x128] ss:$48 sps:$4 sm:$0xff]  }
  0xc5   :  { %18230 = vmatpush3.bf16.msra.mxu0 %v18265_v5  ;;  %v18313_v26 = vld [vmem:[#allocation4 + $0x2a4] ss:$48 sps:$4 sm:$0xff]   ;;  %v18318_v27 = vld [vmem:[#allocation4 + $0x2a0] ss:$48 sps:$4 sm:$0xff]   ;;  %v18299_v39 = vld [vmem:[#allocation4 + $0x18c] ss:$48 sps:$4 sm:$0xff]  }
  0xc6   :  { %18231 = vmatprep.subr.bf16.mxu0 %v21682_v1  ;;  %1275 = vmatpush1.bf16.msra.mxu1 %v18288_v13  ;;  %v18297_v40 = vld [vmem:[#allocation4 + $0x188] ss:$48 sps:$4 sm:$0xff]   ;;  %v18305_v41 = vld [vmem:[#allocation4 + $0x1ec] ss:$48 sps:$4 sm:$0xff]   ;;  %v18321_v47 = vld [vmem:[#allocation4 + $0x14] ss:$48 sps:$4 sm:$0xff]  }
  0xc7   :  { %1276 = vmatprep.subr.bf16.mxu1 %v18289_v14  ;;  %v18303_v42 = vld [vmem:[#allocation4 + $0x1e8] ss:$48 sps:$4 sm:$0xff]   ;;  %v18311_v43 = vld [vmem:[#allocation4 + $0x24c] ss:$48 sps:$4 sm:$0xff]   ;;  %v18319_v50 = vld [vmem:[#allocation4 + $0x10] ss:$48 sps:$4 sm:$0xff]  }
  0xc8   :  { %v18309_v44 = vld [vmem:[#allocation4 + $0x248] ss:$48 sps:$4 sm:$0xff]   ;;  %v18317_v45 = vld [vmem:[#allocation4 + $0x2ac] ss:$48 sps:$4 sm:$0xff]   ;;  %v18327_v54 = vld [vmem:[#allocation4 + $0x74] ss:$48 sps:$4 sm:$0xff]  }
  0xc9   :  { %18232 = vmatpush3.bf16.msra.mxu0 %v18266_v7  ;;  %v18315_v46 = vld [vmem:[#allocation4 + $0x2a8] ss:$48 sps:$4 sm:$0xff]   ;;  %v18324_v48 = vld [vmem:[#allocation4 + $0x1c] ss:$48 sps:$4 sm:$0xff]   ;;  %v18325_v58 = vld [vmem:[#allocation4 + $0x70] ss:$48 sps:$4 sm:$0xff]  }
  0xca   :  { %18233 = vmatprep.subr.bf16.mxu0 %v21682_v1  ;;  %1277 = vmatpush1.bf16.msra.mxu1 %v18294_v16  ;;  %v18322_v51 = vld [vmem:[#allocation4 + $0x18] ss:$48 sps:$4 sm:$0xff]   ;;  %v18330_v55 = vld [vmem:[#allocation4 + $0x7c] ss:$48 sps:$4 sm:$0xff]   ;;  %v18333_v60 = vld [vmem:[#allocation4 + $0xd4] ss:$48 sps:$4 sm:$0xff]  }
  0xcb   :  { %1278 = vmatprep.subr.bf16.mxu1 %v18295_v17  ;;  %v18328_v59 = vld [vmem:[#allocation4 + $0x78] ss:$48 sps:$4 sm:$0xff]   ;;  %v18336_v61 = vld [vmem:[#allocation4 + $0xdc] ss:$48 sps:$4 sm:$0xff]   ;;  %v18331_v62 = vld [vmem:[#allocation4 + $0xd0] ss:$48 sps:$4 sm:$0xff]  }
  0xcc   :  { %v18334_v63 = vld [vmem:[#allocation4 + $0xd8] ss:$48 sps:$4 sm:$0xff]   ;;  %v18342_v2 = vld [vmem:[#allocation4 + $0x13c] ss:$48 sps:$4 sm:$0xff]   ;;  %v18337_v3 = vld [vmem:[#allocation4 + $0x130] ss:$48 sps:$4 sm:$0xff]  }
  0xcd   :  { %18234 = vmatpush3.bf16.msra.mxu0 %v18267_v12  ;;  %v18340_v4 = vld [vmem:[#allocation4 + $0x138] ss:$48 sps:$4 sm:$0xff]   ;;  %v18345_v5 = vld [vmem:[#allocation4 + $0x194] ss:$48 sps:$4 sm:$0xff]   ;;  %v18348_v6 = vld [vmem:[#allocation4 + $0x19c] ss:$48 sps:$4 sm:$0xff]  }
  0xce   :  { %18235 = vmatprep.subr.bf16.mxu0 %v21682_v1  ;;  %1279 = vmatpush1.bf16.msra.mxu1 %v18300_v19  ;;  %v18343_v7 = vld [vmem:[#allocation4 + $0x190] ss:$48 sps:$4 sm:$0xff]   ;;  %v18346_v8 = vld [vmem:[#allocation4 + $0x198] ss:$48 sps:$4 sm:$0xff]   ;;  %v18351_v9 = vld [vmem:[#allocation4 + $0x1f4] ss:$48 sps:$4 sm:$0xff]  }
  0xcf   :  { %1280 = vmatprep.subr.bf16.mxu1 %v18301_v20  ;;  %v18354_v10 = vld [vmem:[#allocation4 + $0x1fc] ss:$48 sps:$4 sm:$0xff]   ;;  %v18349_v11 = vld [vmem:[#allocation4 + $0x1f0] ss:$48 sps:$4 sm:$0xff]   ;;  %v18352_v12 = vld [vmem:[#allocation4 + $0x1f8] ss:$48 sps:$4 sm:$0xff]  }
  0xd0   :  { %v18357_v13 = vld [vmem:[#allocation4 + $0x254] ss:$48 sps:$4 sm:$0xff]   ;;  %v18360_v14 = vld [vmem:[#allocation4 + $0x25c] ss:$48 sps:$4 sm:$0xff]   ;;  %v18358_v16 = vld [vmem:[#allocation4 + $0x258] ss:$48 sps:$4 sm:$0xff]  }
  0xd1   :  { %18236 = vmatpush3.bf16.msra.mxu0 %v18268_v15  ;;  %v18355_v15 = vld [vmem:[#allocation4 + $0x250] ss:$48 sps:$4 sm:$0xff]   ;;  %v18363_v17 = vld [vmem:[#allocation4 + $0x2b4] ss:$48 sps:$4 sm:$0xff]   ;;  %v18364_v20 = vld [vmem:[#allocation4 + $0x2b8] ss:$48 sps:$4 sm:$0xff]  }
  0xd2   :  { %18237 = vmatprep.subr.bf16.mxu0 %v21682_v1  ;;  %1281 = vmatpush1.bf16.msra.mxu1 %v18306_v23  ;;  %v18361_v19 = vld [vmem:[#allocation4 + $0x2b0] ss:$48 sps:$4 sm:$0xff]  }
  0xd3   :  { %1282 = vmatprep.subr.bf16.mxu1 %v18307_v24  ;;  %v18367_v23 = vld [vmem:[#allocation4 + $0x20] ss:$48 sps:$4 sm:$0xff]   ;;  %v18370_v24 = vld [vmem:[#allocation4 + $0x28] ss:$48 sps:$4 sm:$0xff]  }
  0xd5   :  { %18238 = vmatpush3.bf16.msra.mxu0 %v18269_v18  ;;  %v18366_v18 = vld [vmem:[#allocation4 + $0x2bc] ss:$48 sps:$4 sm:$0xff]  }
  0xd6   :  { %18239 = vmatprep.subr.bf16.mxu0 %v21682_v1  ;;  %1283 = vmatpush1.bf16.msra.mxu1 %v18312_v25  ;;  %v18339_v1 = vld [vmem:[#allocation4 + $0x134] ss:$48 sps:$4 sm:$0xff]  }
  0xd7   :  { %1284 = vmatprep.subr.bf16.mxu1 %v18313_v26  ;;  %v18375_v25 = vld [vmem:[#allocation4 + $0x84] ss:$48 sps:$4 sm:$0xff]   ;;  %v18378_v26 = vld [vmem:[#allocation4 + $0x8c] ss:$48 sps:$4 sm:$0xff]  }
  0xd9   :  { %18240 = vmatpush3.bf16.msra.mxu0 %v18270_v21  ;;  %v18369_v21 = vld [vmem:[#allocation4 + $0x24] ss:$48 sps:$4 sm:$0xff]  }
  0xda   :  { %1311 = vmatprep.subr.bf16.mxu0 %v18275_v22  ;;  %1285 = vmatpush1.bf16.msra.mxu1 %v18318_v27  ;;  %v18372_v22 = vld [vmem:[#allocation4 + $0x2c] ss:$48 sps:$4 sm:$0xff]   ;;  %v18373_v27 = vld [vmem:[#allocation4 + $0x80] ss:$48 sps:$4 sm:$0xff]  }
  0xdb   :  { %1352 = vmatprep.subr.bf16.mxu1 %v18321_v47  ;;  %v18403_v47 = vld [vmem:[#allocation4 + $0x260] ss:$48 sps:$4 sm:$0xff]  }
 0x140   :  { %v209_v32 = vpop.permute.xlu0 %208 }
 0x141   :  { %vm210_vm1 = vcmp.eq.s32.totalorder %v209_v32, %v206_v29  ;;  %v18376_v29 = vld [vmem:[#allocation4 + $0x88] ss:$48 sps:$4 sm:$0xff]   ;;  %v18379_v32 = vld [vmem:[#allocation4 + $0xe0] ss:$48 sps:$4 sm:$0xff]  }
 0x142   :  { %vm16081_vm2 = vmpackc.low %vm210_vm1, %vm210_vm1 }
 0x143   :  { %18242 = vmatmul.mubr.msk.bf16.vlgmr.msra.gmra.mrb[0].mxu0 %vm16081_vm2, %v21684_v34  ;;  %v18387_v34 = vld [vmem:[#allocation4 + $0x144] ss:$48 sps:$4 sm:$0xff]  }
 0x144   :  { %1312 = vmatpush1.bf16.msra.mxu0 %v18273_v30  ;;  %1343 = vmatprep.mubr.bf16.mxu0 %v21681_v0  ;;  %v18381_v30 = vld [vmem:[#allocation4 + $0xe4] ss:$48 sps:$4 sm:$0xff]  }
 0x145   :  { %1313 = vmatprep.subr.bf16.mxu0 %v18281_v31  ;;  %v18384_v31 = vld [vmem:[#allocation4 + $0xec] ss:$48 sps:$4 sm:$0xff]  }
 0x148   :  { %1314 = vmatpush1.bf16.msra.mxu0 %v18279_v33  ;;  %v18382_v33 = vld [vmem:[#allocation4 + $0xe8] ss:$48 sps:$4 sm:$0xff]  }
 0x149   :  { %1315 = vmatprep.subr.bf16.mxu0 %v18287_v35  ;;  %v18390_v35 = vld [vmem:[#allocation4 + $0x14c] ss:$48 sps:$4 sm:$0xff]  }
 0x14c   :  { %1316 = vmatpush1.bf16.msra.mxu0 %v18285_v36  ;;  %v18385_v36 = vld [vmem:[#allocation4 + $0x140] ss:$48 sps:$4 sm:$0xff]  }
 0x14d   :  { %1317 = vmatprep.subr.bf16.mxu0 %v18293_v37  ;;  %v18388_v37 = vld [vmem:[#allocation4 + $0x148] ss:$48 sps:$4 sm:$0xff]  }
 0x150   :  { %1318 = vmatpush1.bf16.msra.mxu0 %v18291_v38  ;;  %v18393_v38 = vld [vmem:[#allocation4 + $0x1a4] ss:$48 sps:$4 sm:$0xff]  }
 0x151   :  { %1319 = vmatprep.subr.bf16.mxu0 %v18299_v39  ;;  %v18396_v39 = vld [vmem:[#allocation4 + $0x1ac] ss:$48 sps:$4 sm:$0xff]  }
 0x154   :  { %1320 = vmatpush1.bf16.msra.mxu0 %v18297_v40  ;;  %v18391_v40 = vld [vmem:[#allocation4 + $0x1a0] ss:$48 sps:$4 sm:$0xff]  }
 0x155   :  { %1321 = vmatprep.subr.bf16.mxu0 %v18305_v41  ;;  %v18399_v41 = vld [vmem:[#allocation4 + $0x204] ss:$48 sps:$4 sm:$0xff]  }
 0x158   :  { %1322 = vmatpush1.bf16.msra.mxu0 %v18303_v42  ;;  %v18402_v42 = vld [vmem:[#allocation4 + $0x20c] ss:$48 sps:$4 sm:$0xff]  }
 0x159   :  { %1323 = vmatprep.subr.bf16.mxu0 %v18311_v43  ;;  %v18397_v43 = vld [vmem:[#allocation4 + $0x200] ss:$48 sps:$4 sm:$0xff]  }
 0x15c   :  { %1324 = vmatpush1.bf16.msra.mxu0 %v18309_v44  ;;  %v18400_v44 = vld [vmem:[#allocation4 + $0x208] ss:$48 sps:$4 sm:$0xff]  }
 0x15d   :  { %1325 = vmatprep.subr.bf16.mxu0 %v18317_v45  ;;  %v18405_v45 = vld [vmem:[#allocation4 + $0x264] ss:$48 sps:$4 sm:$0xff]  }
 0x160   :  { %1326 = vmatpush1.bf16.msra.mxu0 %v18315_v46  ;;  %v18408_v46 = vld [vmem:[#allocation4 + $0x26c] ss:$48 sps:$4 sm:$0xff]  }
 0x161   :  { %1393 = vmatprep.subr.bf16.mxu0 %v18324_v48  ;;  %v18406_v48 = vld [vmem:[#allocation4 + $0x268] ss:$48 sps:$4 sm:$0xff]  }
 0x216   :  { %v296_v49 = vpop.f32.mrb[0].mxu0 }
 0x217   :  { %v21928_v52 = vpack.c.bf16 %v296_v49, %v296_v49  ;;  %v18243_v53 = vpop.f32.mrb[1].mxu0  ;;  %v18411_v49 = vld [vmem:[#allocation4 + $0x2c4] ss:$48 sps:$4 sm:$0xff]  }
 0x218   :  { %v299_v56 = vpop.f32.mrb[2].mxu0  ;;  %v18412_v53 = vld [vmem:[#allocation4 + $0x2c8] ss:$48 sps:$4 sm:$0xff]  }
 0x219   :  { %v18244_v57 = vpop.f32.mrb[3].mxu0  ;;  %1303 = vmatmul.mubr.bf16.vlgmr.msra.gmra.mrb[0].mxu1 %v21928_v52  ;;  %1344 = vmatmul.mubr.bf16.vlgmr.msra.gmra.mrb[4].mxu0 %v21928_v52  ;;  %v303_v56 = vld [vmem:[%s22726_s25 + $0x8] sm:$0xff] }
 0x21a   :  { %1353 = vmatpush1.bf16.msra.mxu1 %v18319_v50  ;;  %1394 = vmatpush1.bf16.msra.mxu0 %v18322_v51  ;;  %v18414_v50 = vld [vmem:[#allocation4 + $0x2cc] ss:$48 sps:$4 sm:$0xff]   ;;  %v18409_v51 = vld [vmem:[#allocation4 + $0x2c0] ss:$48 sps:$4 sm:$0xff]  }
 0x21b   :  { %1354 = vmatprep.subr.bf16.mxu1 %v18327_v54  ;;  %1395 = vmatprep.subr.bf16.mxu0 %v18330_v55  ;;  %v18417_v54 = vld [vmem:[#allocation6 + $0x4] ss:$48 sps:$4 sm:$0xff]   ;;  %v305_v57 = vld [vmem:[%s22726_s25 + $0x18] sm:$0xff] }
 0x21c   :  { %1384 = vmatprep.mubr.bf16.mxu1 %v21681_v0  ;;  %1425 = vmatprep.mubr.bf16.mxu0 %v21681_v0  ;;  %v18420_v55 = vld [vmem:[#allocation6 + $0x604] ss:$48 sps:$4 sm:$0xff]  }
 0x21e   :  { %1355 = vmatpush1.bf16.msra.mxu1 %v18325_v58  ;;  %1396 = vmatpush1.bf16.msra.mxu0 %v18328_v59  ;;  %v18415_v58 = vld [vmem:[#allocation6] ss:$48 sps:$4 sm:$0xff]  }
 0x21f   :  { %1356 = vmatprep.subr.bf16.mxu1 %v18333_v60  ;;  %1397 = vmatprep.subr.bf16.mxu0 %v18336_v61  ;;  %v18418_v59 = vld [vmem:[#allocation6 + $0x600] ss:$48 sps:$4 sm:$0xff]   ;;  %v18423_v60 = vld [vmem:[#allocation6 + $0x64] ss:$48 sps:$4 sm:$0xff]  }
 0x220   :  { %v18426_v61 = vld [vmem:[#allocation6 + $0x664] ss:$48 sps:$4 sm:$0xff]  }
 0x222   :  { %1357 = vmatpush1.bf16.msra.mxu1 %v18331_v62  ;;  %1398 = vmatpush1.bf16.msra.mxu0 %v18334_v63  ;;  %v21944_v62 = vpack.c.bf16 %v303_v56, %v303_v56  ;;  %v21946_v63 = vpack.c.bf16 %v305_v57, %v305_v57  ;;  %v18510_v56 = vld [vmem:[#allocation6 + $0xba4] ss:$48 sps:$4 sm:$0xff]   ;;  %v18505_v57 = vld [vmem:[#allocation6 + $0x5a0] ss:$48 sps:$4 sm:$0xff]  }
 0x223   :  { %1358 = vmatprep.subr.bf16.mxu1 %v18339_v1  ;;  %1399 = vmatprep.subr.bf16.mxu0 %v18342_v2  ;;  %v18421_v1 = vld [vmem:[#allocation6 + $0x60] ss:$48 sps:$4 sm:$0xff]  }
 0x224   :  { %v18424_v2 = vld [vmem:[#allocation6 + $0x660] ss:$48 sps:$4 sm:$0xff]  }
 0x226   :  { %1359 = vmatpush1.bf16.msra.mxu1 %v18337_v3  ;;  %1400 = vmatpush1.bf16.msra.mxu0 %v18340_v4  ;;  %v18429_v3 = vld [vmem:[#allocation6 + $0xc4] ss:$48 sps:$4 sm:$0xff]  }
 0x227   :  { %1360 = vmatprep.subr.bf16.mxu1 %v18345_v5  ;;  %1401 = vmatprep.subr.bf16.mxu0 %v18348_v6  ;;  %v18432_v4 = vld [vmem:[#allocation6 + $0x6c4] ss:$48 sps:$4 sm:$0xff]   ;;  %v18427_v5 = vld [vmem:[#allocation6 + $0xc0] ss:$48 sps:$4 sm:$0xff]  }
 0x228   :  { %v18430_v6 = vld [vmem:[#allocation6 + $0x6c0] ss:$48 sps:$4 sm:$0xff]  }
 0x22a   :  { %1361 = vmatpush1.bf16.msra.mxu1 %v18343_v7  ;;  %1402 = vmatpush1.bf16.msra.mxu0 %v18346_v8  ;;  %v18435_v7 = vld [vmem:[#allocation6 + $0x124] ss:$48 sps:$4 sm:$0xff]   ;;  %v18433_v8 = vld [vmem:[#allocation6 + $0x120] ss:$48 sps:$4 sm:$0xff]  }
 0x22b   :  { %1362 = vmatprep.subr.bf16.mxu1 %v18351_v9  ;;  %1403 = vmatprep.subr.bf16.mxu0 %v18354_v10  ;;  %v18436_v9 = vld [vmem:[#allocation6 + $0x720] ss:$48 sps:$4 sm:$0xff]   ;;  %v18441_v10 = vld [vmem:[#allocation6 + $0x184] ss:$48 sps:$4 sm:$0xff]  }
 0x22e   :  { %1363 = vmatpush1.bf16.msra.mxu1 %v18349_v11  ;;  %1404 = vmatpush1.bf16.msra.mxu0 %v18352_v12  ;;  %v18444_v11 = vld [vmem:[#allocation6 + $0x784] ss:$48 sps:$4 sm:$0xff]   ;;  %v18439_v12 = vld [vmem:[#allocation6 + $0x180] ss:$48 sps:$4 sm:$0xff]  }
 0x22f   :  { %1364 = vmatprep.subr.bf16.mxu1 %v18357_v13  ;;  %1405 = vmatprep.subr.bf16.mxu0 %v18360_v14  ;;  %v18442_v13 = vld [vmem:[#allocation6 + $0x780] ss:$48 sps:$4 sm:$0xff]   ;;  %v18447_v14 = vld [vmem:[#allocation6 + $0x1e4] ss:$48 sps:$4 sm:$0xff]  }
 0x232   :  { %1365 = vmatpush1.bf16.msra.mxu1 %v18355_v15  ;;  %1406 = vmatpush1.bf16.msra.mxu0 %v18358_v16  ;;  %v18450_v15 = vld [vmem:[#allocation6 + $0x7e4] ss:$48 sps:$4 sm:$0xff]   ;;  %v18445_v16 = vld [vmem:[#allocation6 + $0x1e0] ss:$48 sps:$4 sm:$0xff]  }
 0x233   :  { %1366 = vmatprep.subr.bf16.mxu1 %v18363_v17  ;;  %1407 = vmatprep.subr.bf16.mxu0 %v18366_v18  ;;  %v18448_v17 = vld [vmem:[#allocation6 + $0x7e0] ss:$48 sps:$4 sm:$0xff]   ;;  %v18453_v18 = vld [vmem:[#allocation6 + $0x244] ss:$48 sps:$4 sm:$0xff]  }
 0x236   :  { %1367 = vmatpush1.bf16.msra.mxu1 %v18361_v19  ;;  %1408 = vmatpush1.bf16.msra.mxu0 %v18364_v20  ;;  %v18456_v19 = vld [vmem:[#allocation6 + $0x844] ss:$48 sps:$4 sm:$0xff]   ;;  %v18451_v20 = vld [vmem:[#allocation6 + $0x240] ss:$48 sps:$4 sm:$0xff]  }
 0x237   :  { %1434 = vmatprep.subr.bf16.mxu1 %v18369_v21  ;;  %1475 = vmatprep.subr.bf16.mxu0 %v18372_v22  ;;  %v18454_v21 = vld [vmem:[#allocation6 + $0x840] ss:$48 sps:$4 sm:$0xff]   ;;  %v18459_v22 = vld [vmem:[#allocation6 + $0x2a4] ss:$48 sps:$4 sm:$0xff]  }
 0x239   :  { %1385 = vmatmul.mubr.bf16.vlgmr.msra.gmra.mrb[4].mxu1 %v21928_v52  ;;  %1426 = vmatmul.mubr.bf16.vlgmr.msra.gmra.mrb[8].mxu0 %v21928_v52 }
 0x23a   :  { %1435 = vmatpush1.bf16.msra.mxu1 %v18367_v23  ;;  %1476 = vmatpush1.bf16.msra.mxu0 %v18370_v24  ;;  %v18462_v23 = vld [vmem:[#allocation6 + $0x8a4] ss:$48 sps:$4 sm:$0xff]   ;;  %v18457_v24 = vld [vmem:[#allocation6 + $0x2a0] ss:$48 sps:$4 sm:$0xff]  }
 0x23b   :  { %1436 = vmatprep.subr.bf16.mxu1 %v18375_v25  ;;  %1477 = vmatprep.subr.bf16.mxu0 %v18378_v26  ;;  %v18460_v25 = vld [vmem:[#allocation6 + $0x8a0] ss:$48 sps:$4 sm:$0xff]   ;;  %v18465_v26 = vld [vmem:[#allocation6 + $0x304] ss:$48 sps:$4 sm:$0xff]  }
 0x23c   :  { %1466 = vmatprep.mubr.bf16.mxu1 %v21681_v0  ;;  %1507 = vmatprep.mubr.bf16.mxu0 %v21681_v0  ;;  %v18394_v0 = vld [vmem:[#allocation4 + $0x1a8] ss:$48 sps:$4 sm:$0xff]  }
 0x23e   :  { %1437 = vmatpush1.bf16.msra.mxu1 %v18373_v27  ;;  %1478 = vmatpush1.bf16.msra.mxu0 %v18376_v29  ;;  %v18468_v27 = vld [vmem:[#allocation6 + $0x904] ss:$48 sps:$4 sm:$0xff]   ;;  %v18463_v29 = vld [vmem:[#allocation6 + $0x300] ss:$48 sps:$4 sm:$0xff]  }
 0x23f   :  { %1438 = vmatprep.subr.bf16.mxu1 %v18381_v30  ;;  %1479 = vmatprep.subr.bf16.mxu0 %v18384_v31  ;;  %v18466_v30 = vld [vmem:[#allocation6 + $0x900] ss:$48 sps:$4 sm:$0xff]   ;;  %v18471_v31 = vld [vmem:[#allocation6 + $0x364] ss:$48 sps:$4 sm:$0xff]  }
 0x242   :  { %1439 = vmatpush1.bf16.msra.mxu1 %v18379_v32  ;;  %1480 = vmatpush1.bf16.msra.mxu0 %v18382_v33  ;;  %v18474_v32 = vld [vmem:[#allocation6 + $0x964] ss:$48 sps:$4 sm:$0xff]   ;;  %v18469_v33 = vld [vmem:[#allocation6 + $0x360] ss:$48 sps:$4 sm:$0xff]  }
 0x243   :  { %1440 = vmatprep.subr.bf16.mxu1 %v18387_v34  ;;  %1481 = vmatprep.subr.bf16.mxu0 %v18390_v35  ;;  %v18472_v34 = vld [vmem:[#allocation6 + $0x960] ss:$48 sps:$4 sm:$0xff]   ;;  %v18477_v35 = vld [vmem:[#allocation6 + $0x3c4] ss:$48 sps:$4 sm:$0xff]  }
 0x246   :  { %1441 = vmatpush1.bf16.msra.mxu1 %v18385_v36  ;;  %1482 = vmatpush1.bf16.msra.mxu0 %v18388_v37  ;;  %v18480_v36 = vld [vmem:[#allocation6 + $0x9c4] ss:$48 sps:$4 sm:$0xff]   ;;  %v18475_v37 = vld [vmem:[#allocation6 + $0x3c0] ss:$48 sps:$4 sm:$0xff]  }
 0x247   :  { %1442 = vmatprep.subr.bf16.mxu1 %v18393_v38  ;;  %1483 = vmatprep.subr.bf16.mxu0 %v18396_v39  ;;  %v18478_v38 = vld [vmem:[#allocation6 + $0x9c0] ss:$48 sps:$4 sm:$0xff]   ;;  %v18483_v39 = vld [vmem:[#allocation6 + $0x424] ss:$48 sps:$4 sm:$0xff]  }
 0x24a   :  { %1443 = vmatpush1.bf16.msra.mxu1 %v18391_v40  ;;  %1484 = vmatpush1.bf16.msra.mxu0 %v18394_v0  ;;  %v18486_v40 = vld [vmem:[#allocation6 + $0xa24] ss:$48 sps:$4 sm:$0xff]   ;;  %v18481_v0 = vld [vmem:[#allocation6 + $0x420] ss:$48 sps:$4 sm:$0xff]  }
 0x24b   :  { %1444 = vmatprep.subr.bf16.mxu1 %v18399_v41  ;;  %1485 = vmatprep.subr.bf16.mxu0 %v18402_v42  ;;  %v18484_v41 = vld [vmem:[#allocation6 + $0xa20] ss:$48 sps:$4 sm:$0xff]   ;;  %v18489_v42 = vld [vmem:[#allocation6 + $0x484] ss:$48 sps:$4 sm:$0xff]  }
 0x24e   :  { %1445 = vmatpush1.bf16.msra.mxu1 %v18397_v43  ;;  %1486 = vmatpush1.bf16.msra.mxu0 %v18400_v44  ;;  %v18492_v43 = vld [vmem:[#allocation6 + $0xa84] ss:$48 sps:$4 sm:$0xff]   ;;  %v18487_v44 = vld [vmem:[#allocation6 + $0x480] ss:$48 sps:$4 sm:$0xff]  }
 0x24f   :  { %1446 = vmatprep.subr.bf16.mxu1 %v18405_v45  ;;  %1487 = vmatprep.subr.bf16.mxu0 %v18408_v46  ;;  %v18490_v45 = vld [vmem:[#allocation6 + $0xa80] ss:$48 sps:$4 sm:$0xff]   ;;  %v18495_v46 = vld [vmem:[#allocation6 + $0x4e4] ss:$48 sps:$4 sm:$0xff]  }
 0x252   :  { %1447 = vmatpush1.bf16.msra.mxu1 %v18403_v47  ;;  %1488 = vmatpush1.bf16.msra.mxu0 %v18406_v48  ;;  %v18498_v47 = vld [vmem:[#allocation6 + $0xae4] ss:$48 sps:$4 sm:$0xff]   ;;  %v18493_v48 = vld [vmem:[#allocation6 + $0x4e0] ss:$48 sps:$4 sm:$0xff]  }
 0x253   :  { %1448 = vmatprep.subr.bf16.mxu1 %v18411_v49  ;;  %1489 = vmatprep.subr.bf16.mxu0 %v18414_v50  ;;  %v18496_v49 = vld [vmem:[#allocation6 + $0xae0] ss:$48 sps:$4 sm:$0xff]   ;;  %v18501_v50 = vld [vmem:[#allocation6 + $0x544] ss:$48 sps:$4 sm:$0xff]  }
 0x256   :  { %1449 = vmatpush1.bf16.msra.mxu1 %v18409_v51  ;;  %1490 = vmatpush1.bf16.msra.mxu0 %v18412_v53  ;;  %v18504_v51 = vld [vmem:[#allocation6 + $0xb44] ss:$48 sps:$4 sm:$0xff]   ;;  %v18499_v53 = vld [vmem:[#allocation6 + $0x540] ss:$48 sps:$4 sm:$0xff]  }
 0x257   :  { %3440 = vmatprep.subr.bf16.mxu1 %v18417_v54  ;;  %3481 = vmatprep.subr.bf16.mxu0 %v18420_v55  ;;  %v18502_v54 = vld [vmem:[#allocation6 + $0xb40] ss:$48 sps:$4 sm:$0xff]   ;;  %v18507_v55 = vld [vmem:[#allocation6 + $0x5a4] ss:$48 sps:$4 sm:$0xff]  }
 0x259   :  { %1467 = vmatmul.mubr.bf16.vlgmr.msra.gmra.mrb[8].mxu1 %v21928_v52  ;;  %1508 = vmatmul.mubr.bf16.vlgmr.msra.gmra.mrb[12].mxu0 %v21928_v52  ;;  %v18438_v52 = vld [vmem:[#allocation6 + $0x724] ss:$48 sps:$4 sm:$0xff]  }
 0x25a   :  { %3441 = vmatpush1.bf16.msra.mxu1 %v18415_v58  ;;  %3482 = vmatpush1.bf16.msra.mxu0 %v18418_v59  ;;  %v18508_v58 = vld [vmem:[#allocation6 + $0xba0] ss:$48 sps:$4 sm:$0xff]  }
 0x25b   :  { %3442 = vmatprep.subr.bf16.mxu1 %v18423_v60  ;;  %3483 = vmatprep.subr.bf16.mxu0 %v18426_v61  ;;  %v302_v59 = vld [vmem:[%s22726_s25] sm:$0xff]  ;;  %v304_v60 = vld [vmem:[%s22726_s25 + $0x10] sm:$0xff]  ;;  %v18513_v61 = vld [vmem:[#allocation6 + $0xc] ss:$48 sps:$4 sm:$0xff]  }
 0x25c   :  { %3472 = vmatprep.mubr.bf16.mxu1 %v21944_v62  ;;  %3513 = vmatprep.mubr.bf16.mxu0 %v21946_v63 }
 0x25e   :  { %3443 = vmatpush1.bf16.msra.mxu1 %v18421_v1  ;;  %3484 = vmatpush1.bf16.msra.mxu0 %v18424_v2  ;;  %v18516_v1 = vld [vmem:[#allocation6 + $0x60c] ss:$48 sps:$4 sm:$0xff]   ;;  %v18511_v2 = vld [vmem:[#allocation6 + $0x8] ss:$48 sps:$4 sm:$0xff]  }
 0x25f   :  { %3444 = vmatprep.subr.bf16.mxu1 %v18429_v3  ;;  %3485 = vmatprep.subr.bf16.mxu0 %v18432_v4  ;;  %v18514_v3 = vld [vmem:[#allocation6 + $0x608] ss:$48 sps:$4 sm:$0xff]   ;;  %v21958_v4 = vpack.c.bf16 %v302_v59, %v302_v59  ;;  %v18600_v59 = vld [vmem:[#allocation6 + $0xb4c] ss:$48 sps:$4 sm:$0xff]  }
 0x262   :  { %3445 = vmatpush1.bf16.msra.mxu1 %v18427_v5  ;;  %3486 = vmatpush1.bf16.msra.mxu0 %v18430_v6  ;;  %v21960_v5 = vpack.c.bf16 %v304_v60, %v304_v60  ;;  %v18519_v6 = vld [vmem:[#allocation6 + $0x6c] ss:$48 sps:$4 sm:$0xff]   ;;  %v18595_v60 = vld [vmem:[#allocation6 + $0x548] ss:$48 sps:$4 sm:$0xff]  }
 0x263   :  { %3446 = vmatprep.subr.bf16.mxu1 %v18435_v7  ;;  %3487 = vmatprep.subr.bf16.mxu0 %v18438_v52  ;;  %v18522_v7 = vld [vmem:[#allocation6 + $0x66c] ss:$48 sps:$4 sm:$0xff]   ;;  %v18517_v52 = vld [vmem:[#allocation6 + $0x68] ss:$48 sps:$4 sm:$0xff]  }
 0x266   :  { %3447 = vmatpush1.bf16.msra.mxu1 %v18433_v8  ;;  %3488 = vmatpush1.bf16.msra.mxu0 %v18436_v9  ;;  %v18520_v8 = vld [vmem:[#allocation6 + $0x668] ss:$48 sps:$4 sm:$0xff]   ;;  %v18525_v9 = vld [vmem:[#allocation6 + $0xcc] ss:$48 sps:$4 sm:$0xff]  }
 0x267   :  { %3448 = vmatprep.subr.bf16.mxu1 %v18441_v10  ;;  %3489 = vmatprep.subr.bf16.mxu0 %v18444_v11  ;;  %v18528_v10 = vld [vmem:[#allocation6 + $0x6cc] ss:$48 sps:$4 sm:$0xff]   ;;  %v18523_v11 = vld [vmem:[#allocation6 + $0xc8] ss:$48 sps:$4 sm:$0xff]  }
 0x26a   :  { %3449 = vmatpush1.bf16.msra.mxu1 %v18439_v12  ;;  %3490 = vmatpush1.bf16.msra.mxu0 %v18442_v13  ;;  %v18526_v12 = vld [vmem:[#allocation6 + $0x6c8] ss:$48 sps:$4 sm:$0xff]   ;;  %v18531_v13 = vld [vmem:[#allocation6 + $0x12c] ss:$48 sps:$4 sm:$0xff]  }
 0x26b   :  { %3450 = vmatprep.subr.bf16.mxu1 %v18447_v14  ;;  %3491 = vmatprep.subr.bf16.mxu0 %v18450_v15  ;;  %v18534_v14 = vld [vmem:[#allocation6 + $0x72c] ss:$48 sps:$4 sm:$0xff]   ;;  %v18529_v15 = vld [vmem:[#allocation6 + $0x128] ss:$48 sps:$4 sm:$0xff]  }
 0x26e   :  { %3451 = vmatpush1.bf16.msra.mxu1 %v18445_v16  ;;  %3492 = vmatpush1.bf16.msra.mxu0 %v18448_v17  ;;  %v18532_v16 = vld [vmem:[#allocation6 + $0x728] ss:$48 sps:$4 sm:$0xff]   ;;  %v18537_v17 = vld [vmem:[#allocation6 + $0x18c] ss:$48 sps:$4 sm:$0xff]  }
 0x26f   :  { %3452 = vmatprep.subr.bf16.mxu1 %v18453_v18  ;;  %3493 = vmatprep.subr.bf16.mxu0 %v18456_v19  ;;  %v18540_v18 = vld [vmem:[#allocation6 + $0x78c] ss:$48 sps:$4 sm:$0xff]   ;;  %v18535_v19 = vld [vmem:[#allocation6 + $0x188] ss:$48 sps:$4 sm:$0xff]  }
 0x272   :  { %3453 = vmatpush1.bf16.msra.mxu1 %v18451_v20  ;;  %3494 = vmatpush1.bf16.msra.mxu0 %v18454_v21  ;;  %v18538_v20 = vld [vmem:[#allocation6 + $0x788] ss:$48 sps:$4 sm:$0xff]   ;;  %v18543_v21 = vld [vmem:[#allocation6 + $0x1ec] ss:$48 sps:$4 sm:$0xff]  }
 0x273   :  { %3454 = vmatprep.subr.bf16.mxu1 %v18459_v22  ;;  %3495 = vmatprep.subr.bf16.mxu0 %v18462_v23  ;;  %v18546_v22 = vld [vmem:[#allocation6 + $0x7ec] ss:$48 sps:$4 sm:$0xff]   ;;  %v18541_v23 = vld [vmem:[#allocation6 + $0x1e8] ss:$48 sps:$4 sm:$0xff]  }
 0x276   :  { %3455 = vmatpush1.bf16.msra.mxu1 %v18457_v24  ;;  %3496 = vmatpush1.bf16.msra.mxu0 %v18460_v25  ;;  %v18544_v24 = vld [vmem:[#allocation6 + $0x7e8] ss:$48 sps:$4 sm:$0xff]   ;;  %v18549_v25 = vld [vmem:[#allocation6 + $0x24c] ss:$48 sps:$4 sm:$0xff]  }
 0x277   :  { %3456 = vmatprep.subr.bf16.mxu1 %v18465_v26  ;;  %3497 = vmatprep.subr.bf16.mxu0 %v18468_v27  ;;  %v18552_v26 = vld [vmem:[#allocation6 + $0x84c] ss:$48 sps:$4 sm:$0xff]   ;;  %v18547_v27 = vld [vmem:[#allocation6 + $0x248] ss:$48 sps:$4 sm:$0xff]  }
 0x27a   :  { %3457 = vmatpush1.bf16.msra.mxu1 %v18463_v29  ;;  %3498 = vmatpush1.bf16.msra.mxu0 %v18466_v30  ;;  %v18550_v29 = vld [vmem:[#allocation6 + $0x848] ss:$48 sps:$4 sm:$0xff]   ;;  %v18555_v30 = vld [vmem:[#allocation6 + $0x2ac] ss:$48 sps:$4 sm:$0xff]  }
 0x27b   :  { %3458 = vmatprep.subr.bf16.mxu1 %v18471_v31  ;;  %3499 = vmatprep.subr.bf16.mxu0 %v18474_v32  ;;  %v18558_v31 = vld [vmem:[#allocation6 + $0x8ac] ss:$48 sps:$4 sm:$0xff]   ;;  %v18553_v32 = vld [vmem:[#allocation6 + $0x2a8] ss:$48 sps:$4 sm:$0xff]  }
 0x27e   :  { %3459 = vmatpush1.bf16.msra.mxu1 %v18469_v33  ;;  %3500 = vmatpush1.bf16.msra.mxu0 %v18472_v34  ;;  %v18556_v33 = vld [vmem:[#allocation6 + $0x8a8] ss:$48 sps:$4 sm:$0xff]   ;;  %v18561_v34 = vld [vmem:[#allocation6 + $0x30c] ss:$48 sps:$4 sm:$0xff]  }
 0x27f   :  { %3460 = vmatprep.subr.bf16.mxu1 %v18477_v35  ;;  %3501 = vmatprep.subr.bf16.mxu0 %v18480_v36  ;;  %v18564_v35 = vld [vmem:[#allocation6 + $0x90c] ss:$48 sps:$4 sm:$0xff]   ;;  %v18559_v36 = vld [vmem:[#allocation6 + $0x308] ss:$48 sps:$4 sm:$0xff]  }
 0x282   :  { %3461 = vmatpush1.bf16.msra.mxu1 %v18475_v37  ;;  %3502 = vmatpush1.bf16.msra.mxu0 %v18478_v38  ;;  %v18562_v37 = vld [vmem:[#allocation6 + $0x908] ss:$48 sps:$4 sm:$0xff]   ;;  %v18567_v38 = vld [vmem:[#allocation6 + $0x36c] ss:$48 sps:$4 sm:$0xff]  }
 0x283   :  { %3462 = vmatprep.subr.bf16.mxu1 %v18483_v39  ;;  %3503 = vmatprep.subr.bf16.mxu0 %v18486_v40  ;;  %v18570_v39 = vld [vmem:[#allocation6 + $0x96c] ss:$48 sps:$4 sm:$0xff]   ;;  %v18565_v40 = vld [vmem:[#allocation6 + $0x368] ss:$48 sps:$4 sm:$0xff]  }
 0x286   :  { %3463 = vmatpush1.bf16.msra.mxu1 %v18481_v0  ;;  %3504 = vmatpush1.bf16.msra.mxu0 %v18484_v41  ;;  %v18568_v0 = vld [vmem:[#allocation6 + $0x968] ss:$48 sps:$4 sm:$0xff]   ;;  %v18573_v41 = vld [vmem:[#allocation6 + $0x3cc] ss:$48 sps:$4 sm:$0xff]  }
 0x287   :  { %3464 = vmatprep.subr.bf16.mxu1 %v18489_v42  ;;  %3505 = vmatprep.subr.bf16.mxu0 %v18492_v43  ;;  %v18576_v42 = vld [vmem:[#allocation6 + $0x9cc] ss:$48 sps:$4 sm:$0xff]   ;;  %v18571_v43 = vld [vmem:[#allocation6 + $0x3c8] ss:$48 sps:$4 sm:$0xff]  }
 0x28a   :  { %3465 = vmatpush1.bf16.msra.mxu1 %v18487_v44  ;;  %3506 = vmatpush1.bf16.msra.mxu0 %v18490_v45  ;;  %v18574_v44 = vld [vmem:[#allocation6 + $0x9c8] ss:$48 sps:$4 sm:$0xff]   ;;  %v18579_v45 = vld [vmem:[#allocation6 + $0x42c] ss:$48 sps:$4 sm:$0xff]  }
 0x28b   :  { %3466 = vmatprep.subr.bf16.mxu1 %v18495_v46  ;;  %3507 = vmatprep.subr.bf16.mxu0 %v18498_v47  ;;  %v18582_v46 = vld [vmem:[#allocation6 + $0xa2c] ss:$48 sps:$4 sm:$0xff]   ;;  %v18577_v47 = vld [vmem:[#allocation6 + $0x428] ss:$48 sps:$4 sm:$0xff]  }
 0x28e   :  { %3467 = vmatpush1.bf16.msra.mxu1 %v18493_v48  ;;  %3508 = vmatpush1.bf16.msra.mxu0 %v18496_v49  ;;  %v18580_v48 = vld [vmem:[#allocation6 + $0xa28] ss:$48 sps:$4 sm:$0xff]   ;;  %v18585_v49 = vld [vmem:[#allocation6 + $0x48c] ss:$48 sps:$4 sm:$0xff]  }
 0x28f   :  { %3468 = vmatprep.subr.bf16.mxu1 %v18501_v50  ;;  %3509 = vmatprep.subr.bf16.mxu0 %v18504_v51  ;;  %v18588_v50 = vld [vmem:[#allocation6 + $0xa8c] ss:$48 sps:$4 sm:$0xff]   ;;  %v18583_v51 = vld [vmem:[#allocation6 + $0x488] ss:$48 sps:$4 sm:$0xff]  }
 0x292   :  { %3469 = vmatpush1.bf16.msra.mxu1 %v18499_v53  ;;  %3510 = vmatpush1.bf16.msra.mxu0 %v18502_v54  ;;  %v18586_v53 = vld [vmem:[#allocation6 + $0xa88] ss:$48 sps:$4 sm:$0xff]   ;;  %v18591_v54 = vld [vmem:[#allocation6 + $0x4ec] ss:$48 sps:$4 sm:$0xff]  }
 0x293   :  { %3470 = vmatprep.subr.bf16.mxu1 %v18507_v55  ;;  %3511 = vmatprep.subr.bf16.mxu0 %v18510_v56  ;;  %v18594_v55 = vld [vmem:[#allocation6 + $0xaec] ss:$48 sps:$4 sm:$0xff]   ;;  %v18589_v56 = vld [vmem:[#allocation6 + $0x4e8] ss:$48 sps:$4 sm:$0xff]  }
 0x296   :  { %3471 = vmatpush1.bf16.msra.mxu1 %v18505_v57  ;;  %3512 = vmatpush1.bf16.msra.mxu0 %v18508_v58  ;;  %v18592_v57 = vld [vmem:[#allocation6 + $0xae8] ss:$48 sps:$4 sm:$0xff]   ;;  %v18597_v58 = vld [vmem:[#allocation6 + $0x54c] ss:$48 sps:$4 sm:$0xff]  }
 0x297   :  { %3522 = vmatprep.subr.bf16.mxu1 %v18513_v61  ;;  %3563 = vmatprep.subr.bf16.mxu0 %v18516_v1  ;;  %v18598_v61 = vld [vmem:[#allocation6 + $0xb48] ss:$48 sps:$4 sm:$0xff]   ;;  %v18603_v1 = vld [vmem:[#allocation6 + $0x5ac] ss:$48 sps:$4 sm:$0xff]  }
 0x299   :  { %3473 = vmatmul.mubr.bf16.vlgmr.msra.gmra.mrb[12].mxu1 %v21958_v4  ;;  %3514 = vmatmul.mubr.bf16.vlgmr.msra.gmra.mrb[16].mxu0 %v21960_v5 }
 0x29a   :  { %3523 = vmatpush1.bf16.msra.mxu1 %v18511_v2  ;;  %3564 = vmatpush1.bf16.msra.mxu0 %v18514_v3  ;;  %v18606_v2 = vld [vmem:[#allocation6 + $0xbac] ss:$48 sps:$4 sm:$0xff]   ;;  %v18601_v3 = vld [vmem:[#allocation6 + $0x5a8] ss:$48 sps:$4 sm:$0xff]  }
 0x29b   :  { %3524 = vmatprep.subr.bf16.mxu1 %v18519_v6  ;;  %3565 = vmatprep.subr.bf16.mxu0 %v18522_v7  ;;  %v18604_v6 = vld [vmem:[#allocation6 + $0xba8] ss:$48 sps:$4 sm:$0xff]   ;;  %v18609_v7 = vld [vmem:[#allocation6 + $0x14] ss:$48 sps:$4 sm:$0xff]  }
 0x29c   :  { %3554 = vmatprep.mubr.bf16.mxu1 %v21944_v62  ;;  %3595 = vmatprep.mubr.bf16.mxu0 %v21946_v63 }
 0x29e   :  { %3525 = vmatpush1.bf16.msra.mxu1 %v18517_v52  ;;  %3566 = vmatpush1.bf16.msra.mxu0 %v18520_v8  ;;  %v18612_v52 = vld [vmem:[#allocation6 + $0x614] ss:$48 sps:$4 sm:$0xff]   ;;  %v18607_v8 = vld [vmem:[#allocation6 + $0x10] ss:$48 sps:$4 sm:$0xff]  }
 0x29f   :  { %3526 = vmatprep.subr.bf16.mxu1 %v18525_v9  ;;  %3567 = vmatprep.subr.bf16.mxu0 %v18528_v10  ;;  %v18610_v9 = vld [vmem:[#allocation6 + $0x610] ss:$48 sps:$4 sm:$0xff]   ;;  %v18615_v10 = vld [vmem:[#allocation6 + $0x74] ss:$48 sps:$4 sm:$0xff]  }
 0x2a2   :  { %3527 = vmatpush1.bf16.msra.mxu1 %v18523_v11  ;;  %3568 = vmatpush1.bf16.msra.mxu0 %v18526_v12  ;;  %v18618_v11 = vld [vmem:[#allocation6 + $0x674] ss:$48 sps:$4 sm:$0xff]   ;;  %v18613_v12 = vld [vmem:[#allocation6 + $0x70] ss:$48 sps:$4 sm:$0xff]  }
 0x2a3   :  { %3528 = vmatprep.subr.bf16.mxu1 %v18531_v13  ;;  %3569 = vmatprep.subr.bf16.mxu0 %v18534_v14  ;;  %v18616_v13 = vld [vmem:[#allocation6 + $0x670] ss:$48 sps:$4 sm:$0xff]   ;;  %v18621_v14 = vld [vmem:[#allocation6 + $0xd4] ss:$48 sps:$4 sm:$0xff]  }
 0x2a6   :  { %3529 = vmatpush1.bf16.msra.mxu1 %v18529_v15  ;;  %3570 = vmatpush1.bf16.msra.mxu0 %v18532_v16  ;;  %v18624_v15 = vld [vmem:[#allocation6 + $0x6d4] ss:$48 sps:$4 sm:$0xff]   ;;  %v18619_v16 = vld [vmem:[#allocation6 + $0xd0] ss:$48 sps:$4 sm:$0xff]  }
 0x2a7   :  { %3530 = vmatprep.subr.bf16.mxu1 %v18537_v17  ;;  %3571 = vmatprep.subr.bf16.mxu0 %v18540_v18  ;;  %v18622_v17 = vld [vmem:[#allocation6 + $0x6d0] ss:$48 sps:$4 sm:$0xff]   ;;  %v18627_v18 = vld [vmem:[#allocation6 + $0x134] ss:$48 sps:$4 sm:$0xff]  }
 0x2aa   :  { %3531 = vmatpush1.bf16.msra.mxu1 %v18535_v19  ;;  %3572 = vmatpush1.bf16.msra.mxu0 %v18538_v20  ;;  %v18630_v19 = vld [vmem:[#allocation6 + $0x734] ss:$48 sps:$4 sm:$0xff]   ;;  %v18625_v20 = vld [vmem:[#allocation6 + $0x130] ss:$48 sps:$4 sm:$0xff]  }
 0x2ab   :  { %3532 = vmatprep.subr.bf16.mxu1 %v18543_v21  ;;  %3573 = vmatprep.subr.bf16.mxu0 %v18546_v22  ;;  %v18628_v21 = vld [vmem:[#allocation6 + $0x730] ss:$48 sps:$4 sm:$0xff]   ;;  %v18633_v22 = vld [vmem:[#allocation6 + $0x194] ss:$48 sps:$4 sm:$0xff]  }
 0x2ae   :  { %3533 = vmatpush1.bf16.msra.mxu1 %v18541_v23  ;;  %3574 = vmatpush1.bf16.msra.mxu0 %v18544_v24  ;;  %v18636_v23 = vld [vmem:[#allocation6 + $0x794] ss:$48 sps:$4 sm:$0xff]   ;;  %v18631_v24 = vld [vmem:[#allocation6 + $0x190] ss:$48 sps:$4 sm:$0xff]  }
 0x2af   :  { %3534 = vmatprep.subr.bf16.mxu1 %v18549_v25  ;;  %3575 = vmatprep.subr.bf16.mxu0 %v18552_v26  ;;  %v18634_v25 = vld [vmem:[#allocation6 + $0x790] ss:$48 sps:$4 sm:$0xff]   ;;  %v18639_v26 = vld [vmem:[#allocation6 + $0x1f4] ss:$48 sps:$4 sm:$0xff]  }
 0x2b2   :  { %3535 = vmatpush1.bf16.msra.mxu1 %v18547_v27  ;;  %3576 = vmatpush1.bf16.msra.mxu0 %v18550_v29  ;;  %v18642_v27 = vld [vmem:[#allocation6 + $0x7f4] ss:$48 sps:$4 sm:$0xff]   ;;  %v18637_v29 = vld [vmem:[#allocation6 + $0x1f0] ss:$48 sps:$4 sm:$0xff]  }
 0x2b3   :  { %3536 = vmatprep.subr.bf16.mxu1 %v18555_v30  ;;  %3577 = vmatprep.subr.bf16.mxu0 %v18558_v31  ;;  %v18640_v30 = vld [vmem:[#allocation6 + $0x7f0] ss:$48 sps:$4 sm:$0xff]   ;;  %v18645_v31 = vld [vmem:[#allocation6 + $0x254] ss:$48 sps:$4 sm:$0xff]  }
 0x2b6   :  { %3537 = vmatpush1.bf16.msra.mxu1 %v18553_v32  ;;  %3578 = vmatpush1.bf16.msra.mxu0 %v18556_v33  ;;  %v18648_v32 = vld [vmem:[#allocation6 + $0x854] ss:$48 sps:$4 sm:$0xff]  }
 0x2b7   :  { %3538 = vmatprep.subr.bf16.mxu1 %v18561_v34  ;;  %3579 = vmatprep.subr.bf16.mxu0 %v18564_v35  ;;  %v18643_v35 = vld [vmem:[#allocation6 + $0x250] ss:$48 sps:$4 sm:$0xff]  }
 0x2ba   :  { %3539 = vmatpush1.bf16.msra.mxu1 %v18559_v36  ;;  %3580 = vmatpush1.bf16.msra.mxu0 %v18562_v37 }
 0x2bb   :  { %3540 = vmatprep.subr.bf16.mxu1 %v18567_v38  ;;  %3581 = vmatprep.subr.bf16.mxu0 %v18570_v39  ;;  %v18646_v38 = vld [vmem:[#allocation6 + $0x850] ss:$48 sps:$4 sm:$0xff]  }
 0x2be   :  { %3541 = vmatpush1.bf16.msra.mxu1 %v18565_v40  ;;  %3582 = vmatpush1.bf16.msra.mxu0 %v18568_v0 }
 0x2bf   :  { %3542 = vmatprep.subr.bf16.mxu1 %v18573_v41  ;;  %3583 = vmatprep.subr.bf16.mxu0 %v18576_v42  ;;  %v18651_v42 = vld [vmem:[#allocation6 + $0x2b4] ss:$48 sps:$4 sm:$0xff]  }
 0x2c2   :  { %3543 = vmatpush1.bf16.msra.mxu1 %v18571_v43  ;;  %3584 = vmatpush1.bf16.msra.mxu0 %v18574_v44  ;;  %v18654_v43 = vld [vmem:[#allocation6 + $0x8b4] ss:$48 sps:$4 sm:$0xff]   ;;  %v18649_v44 = vld [vmem:[#allocation6 + $0x2b0] ss:$48 sps:$4 sm:$0xff]  }
 0x2c3   :  { %3544 = vmatprep.subr.bf16.mxu1 %v18579_v45  ;;  %3585 = vmatprep.subr.bf16.mxu0 %v18582_v46  ;;  %v18652_v45 = vld [vmem:[#allocation6 + $0x8b0] ss:$48 sps:$4 sm:$0xff]   ;;  %v18657_v46 = vld [vmem:[#allocation6 + $0x314] ss:$48 sps:$4 sm:$0xff]  }
 0x2c6   :  { %3545 = vmatpush1.bf16.msra.mxu1 %v18577_v47  ;;  %3586 = vmatpush1.bf16.msra.mxu0 %v18580_v48  ;;  %v18660_v47 = vld [vmem:[#allocation6 + $0x914] ss:$48 sps:$4 sm:$0xff]   ;;  %v18655_v48 = vld [vmem:[#allocation6 + $0x310] ss:$48 sps:$4 sm:$0xff]  }
 0x2c7   :  { %3546 = vmatprep.subr.bf16.mxu1 %v18585_v49  ;;  %3587 = vmatprep.subr.bf16.mxu0 %v18588_v50  ;;  %v18658_v49 = vld [vmem:[#allocation6 + $0x910] ss:$48 sps:$4 sm:$0xff]   ;;  %v18663_v50 = vld [vmem:[#allocation6 + $0x374] ss:$48 sps:$4 sm:$0xff]  }
 0x2ca   :  { %3547 = vmatpush1.bf16.msra.mxu1 %v18583_v51  ;;  %3588 = vmatpush1.bf16.msra.mxu0 %v18586_v53  ;;  %v18666_v51 = vld [vmem:[#allocation6 + $0x974] ss:$48 sps:$4 sm:$0xff]   ;;  %v18661_v53 = vld [vmem:[#allocation6 + $0x370] ss:$48 sps:$4 sm:$0xff]  }
 0x2cb   :  { %3548 = vmatprep.subr.bf16.mxu1 %v18591_v54  ;;  %3589 = vmatprep.subr.bf16.mxu0 %v18594_v55  ;;  %v18664_v54 = vld [vmem:[#allocation6 + $0x970] ss:$48 sps:$4 sm:$0xff]   ;;  %v18669_v55 = vld [vmem:[#allocation6 + $0x3d4] ss:$48 sps:$4 sm:$0xff]  }
 0x2ce   :  { %3549 = vmatpush1.bf16.msra.mxu1 %v18589_v56  ;;  %3590 = vmatpush1.bf16.msra.mxu0 %v18592_v57  ;;  %v18672_v56 = vld [vmem:[#allocation6 + $0x9d4] ss:$48 sps:$4 sm:$0xff]   ;;  %v18667_v57 = vld [vmem:[#allocation6 + $0x3d0] ss:$48 sps:$4 sm:$0xff]  }
 0x2cf   :  { %3550 = vmatprep.subr.bf16.mxu1 %v18597_v58  ;;  %3591 = vmatprep.subr.bf16.mxu0 %v18600_v59  ;;  %v18670_v58 = vld [vmem:[#allocation6 + $0x9d0] ss:$48 sps:$4 sm:$0xff]   ;;  %v18675_v59 = vld [vmem:[#allocation6 + $0x434] ss:$48 sps:$4 sm:$0xff]  }
 0x2d2   :  { %3551 = vmatpush1.bf16.msra.mxu1 %v18595_v60  ;;  %3592 = vmatpush1.bf16.msra.mxu0 %v18598_v61  ;;  %v18678_v60 = vld [vmem:[#allocation6 + $0xa34] ss:$48 sps:$4 sm:$0xff]   ;;  %v18673_v61 = vld [vmem:[#allocation6 + $0x430] ss:$48 sps:$4 sm:$0xff]  }
 0x2d3   :  { %3552 = vmatprep.subr.bf16.mxu1 %v18603_v1  ;;  %3593 = vmatprep.subr.bf16.mxu0 %v18606_v2  ;;  %v18676_v1 = vld [vmem:[#allocation6 + $0xa30] ss:$48 sps:$4 sm:$0xff]   ;;  %v18681_v2 = vld [vmem:[#allocation6 + $0x494] ss:$48 sps:$4 sm:$0xff]  }
 0x2d6   :  { %3553 = vmatpush1.bf16.msra.mxu1 %v18601_v3  ;;  %3594 = vmatpush1.bf16.msra.mxu0 %v18604_v6  ;;  %v18684_v3 = vld [vmem:[#allocation6 + $0xa94] ss:$48 sps:$4 sm:$0xff]   ;;  %v18679_v6 = vld [vmem:[#allocation6 + $0x490] ss:$48 sps:$4 sm:$0xff]  }
 0x2d7   :  { %3604 = vmatprep.subr.bf16.mxu1 %v18609_v7  ;;  %3645 = vmatprep.subr.bf16.mxu0 %v18612_v52  ;;  %v18682_v7 = vld [vmem:[#allocation6 + $0xa90] ss:$48 sps:$4 sm:$0xff]   ;;  %v18687_v52 = vld [vmem:[#allocation6 + $0x4f4] ss:$48 sps:$4 sm:$0xff]  }
 0x2d9   :  { %3555 = vmatmul.mubr.bf16.vlgmr.msra.gmra.mrb[16].mxu1 %v21958_v4  ;;  %3596 = vmatmul.mubr.bf16.vlgmr.msra.gmra.mrb[20].mxu0 %v21960_v5 }
 0x2da   :  { %3605 = vmatpush1.bf16.msra.mxu1 %v18607_v8  ;;  %3646 = vmatpush1.bf16.msra.mxu0 %v18610_v9  ;;  %v18690_v8 = vld [vmem:[#allocation6 + $0xaf4] ss:$48 sps:$4 sm:$0xff]   ;;  %v18685_v9 = vld [vmem:[#allocation6 + $0x4f0] ss:$48 sps:$4 sm:$0xff]  }
 0x2db   :  { %3606 = vmatprep.subr.bf16.mxu1 %v18615_v10  ;;  %3647 = vmatprep.subr.bf16.mxu0 %v18618_v11  ;;  %v18688_v10 = vld [vmem:[#allocation6 + $0xaf0] ss:$48 sps:$4 sm:$0xff]   ;;  %v18693_v11 = vld [vmem:[#allocation6 + $0x554] ss:$48 sps:$4 sm:$0xff]  }
 0x2dc   :  { %3636 = vmatprep.mubr.bf16.mxu1 %v21944_v62  ;;  %3677 = vmatprep.mubr.bf16.mxu0 %v21946_v63 }
 0x2de   :  { %3607 = vmatpush1.bf16.msra.mxu1 %v18613_v12  ;;  %3648 = vmatpush1.bf16.msra.mxu0 %v18616_v13  ;;  %v18696_v12 = vld [vmem:[#allocation6 + $0xb54] ss:$48 sps:$4 sm:$0xff]  }
 0x2df   :  { %3608 = vmatprep.subr.bf16.mxu1 %v18621_v14  ;;  %3649 = vmatprep.subr.bf16.mxu0 %v18624_v15 }
 0x2e2   :  { %3609 = vmatpush1.bf16.msra.mxu1 %v18619_v16  ;;  %3650 = vmatpush1.bf16.msra.mxu0 %v18622_v17 }
 0x2e3   :  { %3610 = vmatprep.subr.bf16.mxu1 %v18627_v18  ;;  %3651 = vmatprep.subr.bf16.mxu0 %v18630_v19  ;;  %v18691_v19 = vld [vmem:[#allocation6 + $0x550] ss:$48 sps:$4 sm:$0xff]  }
 0x2e6   :  { %3611 = vmatpush1.bf16.msra.mxu1 %v18625_v20  ;;  %3652 = vmatpush1.bf16.msra.mxu0 %v18628_v21  ;;  %v18694_v20 = vld [vmem:[#allocation6 + $0xb50] ss:$48 sps:$4 sm:$0xff]  }
 0x2e7   :  { %3612 = vmatprep.subr.bf16.mxu1 %v18633_v22  ;;  %3653 = vmatprep.subr.bf16.mxu0 %v18636_v23  ;;  %v18699_v23 = vld [vmem:[#allocation6 + $0x5b4] ss:$48 sps:$4 sm:$0xff]  }
 0x2ea   :  { %3613 = vmatpush1.bf16.msra.mxu1 %v18631_v24  ;;  %3654 = vmatpush1.bf16.msra.mxu0 %v18634_v25  ;;  %v18702_v24 = vld [vmem:[#allocation6 + $0xbb4] ss:$48 sps:$4 sm:$0xff]   ;;  %v18697_v25 = vld [vmem:[#allocation6 + $0x5b0] ss:$48 sps:$4 sm:$0xff]  }
 0x2eb   :  { %3614 = vmatprep.subr.bf16.mxu1 %v18639_v26  ;;  %3655 = vmatprep.subr.bf16.mxu0 %v18642_v27  ;;  %v18700_v26 = vld [vmem:[#allocation6 + $0xbb0] ss:$48 sps:$4 sm:$0xff]   ;;  %v18705_v27 = vld [vmem:[#allocation6 + $0x1c] ss:$48 sps:$4 sm:$0xff]  }
 0x2ec   :  { %v21970_v33 = vpop.f32.mrb[0].mxu1  ;;  %v21972_v34 = vpop.f32.mrb[4].mxu0 }
 0x2ed   :  { %v21974_v36 = vpop.f32.mrb[1].mxu1  ;;  %v21976_v37 = vpop.f32.mrb[5].mxu0 }
 0x2ee   :  { %3615 = vmatpush1.bf16.msra.mxu1 %v18637_v29  ;;  %3656 = vmatpush1.bf16.msra.mxu0 %v18640_v30  ;;  %v1308_v39 = vpop.f32.mrb[2].mxu1  ;;  %v1349_v40 = vpop.f32.mrb[6].mxu0  ;;  %v18708_v29 = vld [vmem:[#allocation6 + $0x61c] ss:$48 sps:$4 sm:$0xff]   ;;  %v18703_v30 = vld [vmem:[#allocation6 + $0x18] ss:$48 sps:$4 sm:$0xff]  }
 0x2ef   :  { %v1309_v0 = vpop.f32.mrb[3].mxu1  ;;  %v1350_v41 = vpop.f32.mrb[7].mxu0  ;;  %3616 = vmatprep.subr.bf16.mxu1 %v18645_v31  ;;  %3657 = vmatprep.subr.bf16.mxu0 %v18648_v32  ;;  %v18706_v31 = vld [vmem:[#allocation6 + $0x618] ss:$48 sps:$4 sm:$0xff]   ;;  %v18711_v32 = vld [vmem:[#allocation6 + $0x7c] ss:$48 sps:$4 sm:$0xff]  }
 0x2f0   :  { %v18712_v39 = vld [vmem:[#allocation6 + $0x678] ss:$48 sps:$4 sm:$0xff]   ;;  %v18717_v40 = vld [vmem:[#allocation6 + $0xdc] ss:$48 sps:$4 sm:$0xff]  }
 0x2f1   :  { %v18720_v0 = vld [vmem:[#allocation6 + $0x6dc] ss:$48 sps:$4 sm:$0xff]   ;;  %v18715_v41 = vld [vmem:[#allocation6 + $0xd8] ss:$48 sps:$4 sm:$0xff]  }
 0x2f2   :  { %3617 = vmatpush1.bf16.msra.mxu1 %v18643_v35  ;;  %3658 = vmatpush1.bf16.msra.mxu0 %v18646_v38  ;;  %v18714_v35 = vld [vmem:[#allocation6 + $0x67c] ss:$48 sps:$4 sm:$0xff]   ;;  %v18709_v38 = vld [vmem:[#allocation6 + $0x78] ss:$48 sps:$4 sm:$0xff]  }
 0x2f3   :  { %3618 = vmatprep.subr.bf16.mxu1 %v18651_v42  ;;  %3659 = vmatprep.subr.bf16.mxu0 %v18654_v43  ;;  %v18718_v42 = vld [vmem:[#allocation6 + $0x6d8] ss:$48 sps:$4 sm:$0xff]   ;;  %v18723_v43 = vld [vmem:[#allocation6 + $0x13c] ss:$48 sps:$4 sm:$0xff]  }
 0x2f6   :  { %3619 = vmatpush1.bf16.msra.mxu1 %v18649_v44  ;;  %3660 = vmatpush1.bf16.msra.mxu0 %v18652_v45  ;;  %v18726_v44 = vld [vmem:[#allocation6 + $0x73c] ss:$48 sps:$4 sm:$0xff]   ;;  %v21991_v45 = vshrl.u32 %v205_v28, 7  ;;  %v787_v28 = vld [vmem:[%s22694_s6] sm:$0xf] }
 0x2f7   :  { %3620 = vmatprep.subr.bf16.mxu1 %v18657_v46  ;;  %3661 = vmatprep.subr.bf16.mxu0 %v18660_v47  ;;  %v18721_v46 = vld [vmem:[#allocation6 + $0x138] ss:$48 sps:$4 sm:$0xff]  }
 0x2f8   :  { %v18724_v47 = vld [vmem:[#allocation6 + $0x738] ss:$48 sps:$4 sm:$0xff]  }
 0x2fa   :  { %3621 = vmatpush1.bf16.msra.mxu1 %v18655_v48  ;;  %3662 = vmatpush1.bf16.msra.mxu0 %v18658_v49  ;;  %v18729_v48 = vld [vmem:[#allocation6 + $0x19c] ss:$48 sps:$4 sm:$0xff]  }
 0x2fb   :  { %3622 = vmatprep.subr.bf16.mxu1 %v18663_v50  ;;  %3663 = vmatprep.subr.bf16.mxu0 %v18666_v51  ;;  %v18732_v49 = vld [vmem:[#allocation6 + $0x79c] ss:$48 sps:$4 sm:$0xff]   ;;  %v18727_v50 = vld [vmem:[#allocation6 + $0x198] ss:$48 sps:$4 sm:$0xff]   ;;  %v21994_v51 = vsub.s32 2, %v21991_v45 }
 0x2fe   :  { %3623 = vmatpush1.bf16.msra.mxu1 %v18661_v53  ;;  %3664 = vmatpush1.bf16.msra.mxu0 %v18664_v54  ;;  %v21997_v53 = vsub.s32 3, %v21991_v45  ;;  %v18730_v54 = vld [vmem:[#allocation6 + $0x798] ss:$48 sps:$4 sm:$0xff]  }
 0x2ff   :  { %3624 = vmatprep.subr.bf16.mxu1 %v18669_v55  ;;  %3665 = vmatprep.subr.bf16.mxu0 %v18672_v56  ;;  %v18735_v55 = vld [vmem:[#allocation6 + $0x1fc] ss:$48 sps:$4 sm:$0xff]  }
 0x300   :  { %v18738_v56 = vld [vmem:[#allocation6 + $0x7fc] ss:$48 sps:$4 sm:$0xff]  }
 0x302   :  { %3625 = vmatpush1.bf16.msra.mxu1 %v18667_v57  ;;  %3666 = vmatpush1.bf16.msra.mxu0 %v18670_v58  ;;  %v18733_v57 = vld [vmem:[#allocation6 + $0x1f8] ss:$48 sps:$4 sm:$0xff]  }
 0x303   :  { %3626 = vmatprep.subr.bf16.mxu1 %v18675_v59  ;;  %3667 = vmatprep.subr.bf16.mxu0 %v18678_v60  ;;  %v18736_v58 = vld [vmem:[#allocation6 + $0x7f8] ss:$48 sps:$4 sm:$0xff]   ;;  %v4049_v59 = vrot.slane %v787_v28, %v21994_v51  ;;  %v4053_v60 = vrot.slane %v787_v28, %v21997_v53  ;;  %v18789_v28 = vld [vmem:[#allocation6 + $0x55c] ss:$48 sps:$4 sm:$0xff]  }
 0x306   :  { %3627 = vmatpush1.bf16.msra.mxu1 %v18673_v61  ;;  %3668 = vmatpush1.bf16.msra.mxu0 %v18676_v1  ;;  %v18741_v61 = vld [vmem:[#allocation6 + $0x25c] ss:$48 sps:$4 sm:$0xff]  }
 0x307   :  { %3628 = vmatprep.subr.bf16.mxu1 %v18681_v2  ;;  %3669 = vmatprep.subr.bf16.mxu0 %v18684_v3  ;;  %v18744_v1 = vld [vmem:[#allocation6 + $0x85c] ss:$48 sps:$4 sm:$0xff]  }
 0x30a   :  { %3629 = vmatpush1.bf16.msra.mxu1 %v18679_v6  ;;  %3670 = vmatpush1.bf16.msra.mxu0 %v18682_v7  ;;  %v18739_v6 = vld [vmem:[#allocation6 + $0x258] ss:$48 sps:$4 sm:$0xff]  }
 0x30b   :  { %3630 = vmatprep.subr.bf16.mxu1 %v18687_v52  ;;  %3671 = vmatprep.subr.bf16.mxu0 %v18690_v8  ;;  %v18742_v7 = vld [vmem:[#allocation6 + $0x858] ss:$48 sps:$4 sm:$0xff]  }
 0x30c   :  { %v21978_v13 = vpop.f32.mrb[4].mxu1  ;;  %v21980_v14 = vpop.f32.mrb[8].mxu0 }
 0x30d   :  { %v21982_v15 = vpop.f32.mrb[5].mxu1  ;;  %v21984_v16 = vpop.f32.mrb[9].mxu0 }
 0x30e   :  { %v1390_v17 = vpop.f32.mrb[6].mxu1  ;;  %v1431_v18 = vpop.f32.mrb[10].mxu0  ;;  %3631 = vmatpush1.bf16.msra.mxu1 %v18685_v9  ;;  %3672 = vmatpush1.bf16.msra.mxu0 %v18688_v10 }
 0x30f   :  { %v1391_v21 = vpop.f32.mrb[7].mxu1  ;;  %v1432_v22 = vpop.f32.mrb[11].mxu0  ;;  %3632 = vmatprep.subr.bf16.mxu1 %v18693_v11  ;;  %3673 = vmatprep.subr.bf16.mxu0 %v18696_v12 }
 0x310   :  { %v18745_v21 = vld [vmem:[#allocation6 + $0x2b8] ss:$48 sps:$4 sm:$0xff]  }
 0x311   :  { %v18748_v22 = vld [vmem:[#allocation6 + $0x8b8] ss:$48 sps:$4 sm:$0xff]  }
 0x312   :  { %3633 = vmatpush1.bf16.msra.mxu1 %v18691_v19  ;;  %3674 = vmatpush1.bf16.msra.mxu0 %v18694_v20  ;;  %v18747_v19 = vld [vmem:[#allocation6 + $0x2bc] ss:$48 sps:$4 sm:$0xff]  }
 0x313   :  { %3634 = vmatprep.subr.bf16.mxu1 %v18699_v23  ;;  %3675 = vmatprep.subr.bf16.mxu0 %v18702_v24  ;;  %v18750_v20 = vld [vmem:[#allocation6 + $0x8bc] ss:$48 sps:$4 sm:$0xff]  }
 0x314   :  { %v18753_v23 = vld [vmem:[#allocation6 + $0x31c] ss:$48 sps:$4 sm:$0xff]  }
 0x315   :  { %v18756_v24 = vld [vmem:[#allocation6 + $0x91c] ss:$48 sps:$4 sm:$0xff]  }
 0x316   :  { %3635 = vmatpush1.bf16.msra.mxu1 %v18697_v25  ;;  %3676 = vmatpush1.bf16.msra.mxu0 %v18700_v26  ;;  %v18751_v25 = vld [vmem:[#allocation6 + $0x318] ss:$48 sps:$4 sm:$0xff]  }
 0x317   :  { %3686 = vmatprep.subr.bf16.mxu1 %v18705_v27  ;;  %3727 = vmatprep.subr.bf16.mxu0 %v18708_v29  ;;  %v18754_v26 = vld [vmem:[#allocation6 + $0x918] ss:$48 sps:$4 sm:$0xff]   ;;  %v18759_v27 = vld [vmem:[#allocation6 + $0x37c] ss:$48 sps:$4 sm:$0xff]  }
 0x318   :  { %v18762_v29 = vld [vmem:[#allocation6 + $0x97c] ss:$48 sps:$4 sm:$0xff]  }
 0x319   :  { %3637 = vmatmul.mubr.bf16.vlgmr.msra.gmra.mrb[20].mxu1 %v21958_v4  ;;  %3678 = vmatmul.mubr.bf16.vlgmr.msra.gmra.mrb[24].mxu0 %v21960_v5 }
 0x31a   :  { %3687 = vmatpush1.bf16.msra.mxu1 %v18703_v30  ;;  %3728 = vmatpush1.bf16.msra.mxu0 %v18706_v31  ;;  %v18757_v30 = vld [vmem:[#allocation6 + $0x378] ss:$48 sps:$4 sm:$0xff]  }
 0x31b   :  { %3688 = vmatprep.subr.bf16.mxu1 %v18711_v32  ;;  %3729 = vmatprep.subr.bf16.mxu0 %v18714_v35  ;;  %v18760_v31 = vld [vmem:[#allocation6 + $0x978] ss:$48 sps:$4 sm:$0xff]   ;;  %v18765_v32 = vld [vmem:[#allocation6 + $0x3dc] ss:$48 sps:$4 sm:$0xff]  }
 0x31c   :  { %3718 = vmatprep.mubr.bf16.mxu1 %v21944_v62  ;;  %3759 = vmatprep.mubr.bf16.mxu0 %v21946_v63  ;;  %v18768_v35 = vld [vmem:[#allocation6 + $0x9dc] ss:$48 sps:$4 sm:$0xff]  }
 0x31e   :  { %3689 = vmatpush1.bf16.msra.mxu1 %v18709_v38  ;;  %3730 = vmatpush1.bf16.msra.mxu0 %v18712_v39  ;;  %v18763_v38 = vld [vmem:[#allocation6 + $0x3d8] ss:$48 sps:$4 sm:$0xff]  }
 0x31f   :  { %3690 = vmatprep.subr.bf16.mxu1 %v18717_v40  ;;  %3731 = vmatprep.subr.bf16.mxu0 %v18720_v0  ;;  %v18766_v39 = vld [vmem:[#allocation6 + $0x9d8] ss:$48 sps:$4 sm:$0xff]   ;;  %v18771_v40 = vld [vmem:[#allocation6 + $0x43c] ss:$48 sps:$4 sm:$0xff]  }
 0x320   :  { %v18774_v0 = vld [vmem:[#allocation6 + $0xa3c] ss:$48 sps:$4 sm:$0xff]  }
 0x322   :  { %3691 = vmatpush1.bf16.msra.mxu1 %v18715_v41  ;;  %3732 = vmatpush1.bf16.msra.mxu0 %v18718_v42  ;;  %v18769_v41 = vld [vmem:[#allocation6 + $0x438] ss:$48 sps:$4 sm:$0xff]  }
 0x323   :  { %3692 = vmatprep.subr.bf16.mxu1 %v18723_v43  ;;  %3733 = vmatprep.subr.bf16.mxu0 %v18726_v44  ;;  %v18772_v42 = vld [vmem:[#allocation6 + $0xa38] ss:$48 sps:$4 sm:$0xff]   ;;  %v18777_v43 = vld [vmem:[#allocation6 + $0x49c] ss:$48 sps:$4 sm:$0xff]  }
 0x324   :  { %v18780_v44 = vld [vmem:[#allocation6 + $0xa9c] ss:$48 sps:$4 sm:$0xff]  }
 0x326   :  { %3693 = vmatpush1.bf16.msra.mxu1 %v18721_v46  ;;  %3734 = vmatpush1.bf16.msra.mxu0 %v18724_v47  ;;  %v18775_v46 = vld [vmem:[#allocation6 + $0x498] ss:$48 sps:$4 sm:$0xff]  }
 0x327   :  { %3694 = vmatprep.subr.bf16.mxu1 %v18729_v48  ;;  %3735 = vmatprep.subr.bf16.mxu0 %v18732_v49  ;;  %v18778_v47 = vld [vmem:[#allocation6 + $0xa98] ss:$48 sps:$4 sm:$0xff]   ;;  %v18783_v48 = vld [vmem:[#allocation6 + $0x4fc] ss:$48 sps:$4 sm:$0xff]  }
 0x328   :  { %v18786_v49 = vld [vmem:[#allocation6 + $0xafc] ss:$48 sps:$4 sm:$0xff]  }
 0x32a   :  { %3695 = vmatpush1.bf16.msra.mxu1 %v18727_v50  ;;  %3736 = vmatpush1.bf16.msra.mxu0 %v18730_v54  ;;  %v18781_v50 = vld [vmem:[#allocation6 + $0x4f8] ss:$48 sps:$4 sm:$0xff]  }
 0x32b   :  { %3696 = vmatprep.subr.bf16.mxu1 %v18735_v55  ;;  %3737 = vmatprep.subr.bf16.mxu0 %v18738_v56  ;;  %v18784_v54 = vld [vmem:[#allocation6 + $0xaf8] ss:$48 sps:$4 sm:$0xff]   ;;  %v18792_v55 = vld [vmem:[#allocation6 + $0xb5c] ss:$48 sps:$4 sm:$0xff]  }
 0x32c   :  { %v22004_v2 = vpop.f32.mrb[8].mxu1  ;;  %v1509_v3 = vpop.f32.mrb[12].mxu0  ;;  %v18787_v56 = vld [vmem:[#allocation6 + $0x558] ss:$48 sps:$4 sm:$0xff]  }
 0x32d   :  { %v22006_v52 = vadd.f32 %v4049_v59, %v1509_v3  ;;  %v22008_v8 = vpop.f32.mrb[9].mxu1  ;;  %v1511_v9 = vpop.f32.mrb[13].mxu0  ;;  %v18798_v59 = vld [vmem:[#allocation6 + $0xbbc] ss:$48 sps:$4 sm:$0xff]   ;;  %v18804_v3 = vld [vmem:[#allocation6 + $0x624] ss:$48 sps:$4 sm:$0xff]  }
 0x32e   :  { %v22010_v10 = vadd.f32 %v4053_v60, %v1511_v9  ;;  %v1472_v11 = vpop.f32.mrb[10].mxu1  ;;  %v1513_v12 = vpop.f32.mrb[14].mxu0  ;;  %3697 = vmatpush1.bf16.msra.mxu1 %v18733_v57  ;;  %3738 = vmatpush1.bf16.msra.mxu0 %v18736_v58  ;;  %v18790_v57 = vld [vmem:[#allocation6 + $0xb58] ss:$48 sps:$4 sm:$0xff]   ;;  %v18795_v58 = vld [vmem:[#allocation6 + $0x5bc] ss:$48 sps:$4 sm:$0xff]  }
 0x32f   :  { %v1473_v17 = vpop.f32.mrb[11].mxu1  ;;  %v1514_v18 = vpop.f32.mrb[15].mxu0  ;;  %3698 = vmatprep.subr.bf16.mxu1 %v18741_v61  ;;  %3739 = vmatprep.subr.bf16.mxu0 %v18744_v1  ;;  %v18793_v60 = vld [vmem:[#allocation6 + $0x5b8] ss:$48 sps:$4 sm:$0xff]   ;;  %v18801_v1 = vld [vmem:[#allocation6 + $0x24] ss:$48 sps:$4 sm:$0xff]  }
 0x330   :  { %v18796_v61 = vld [vmem:[#allocation6 + $0xbb8] ss:$48 sps:$4 sm:$0xff]   ;;  %v18807_v9 = vld [vmem:[#allocation6 + $0x84] ss:$48 sps:$4 sm:$0xff]   ;;  %v18805_v12 = vld [vmem:[#allocation6 + $0x80] ss:$48 sps:$4 sm:$0xff]  }
 0x331   :  { %v18810_v11 = vld [vmem:[#allocation6 + $0x684] ss:$48 sps:$4 sm:$0xff]   ;;  %v18808_v17 = vld [vmem:[#allocation6 + $0x680] ss:$48 sps:$4 sm:$0xff]  }
 0x332   :  { %3699 = vmatpush1.bf16.msra.mxu1 %v18739_v6  ;;  %3740 = vmatpush1.bf16.msra.mxu0 %v18742_v7  ;;  %v18799_v6 = vld [vmem:[#allocation6 + $0x20] ss:$48 sps:$4 sm:$0xff]   ;;  %v18813_v18 = vld [vmem:[#allocation6 + $0xe4] ss:$48 sps:$4 sm:$0xff]  }
 0x333   :  { %3700 = vmatprep.subr.bf16.mxu1 %v18747_v19  ;;  %3741 = vmatprep.subr.bf16.mxu0 %v18750_v20  ;;  %v18802_v7 = vld [vmem:[#allocation6 + $0x620] ss:$48 sps:$4 sm:$0xff]   ;;  %v18816_v19 = vld [vmem:[#allocation6 + $0x6e4] ss:$48 sps:$4 sm:$0xff]  }
 0x334   :  { %v18811_v20 = vld [vmem:[#allocation6 + $0xe0] ss:$48 sps:$4 sm:$0xff]  }
 0x336   :  { %3701 = vmatpush1.bf16.msra.mxu1 %v18745_v21  ;;  %3742 = vmatpush1.bf16.msra.mxu0 %v18748_v22  ;;  %v18814_v21 = vld [vmem:[#allocation6 + $0x6e0] ss:$48 sps:$4 sm:$0xff]   ;;  %v18819_v22 = vld [vmem:[#allocation6 + $0x144] ss:$48 sps:$4 sm:$0xff]  }
 0x337   :  { %3702 = vmatprep.subr.bf16.mxu1 %v18753_v23  ;;  %3743 = vmatprep.subr.bf16.mxu0 %v18756_v24  ;;  %v18822_v23 = vld [vmem:[#allocation6 + $0x744] ss:$48 sps:$4 sm:$0xff]   ;;  %v18817_v24 = vld [vmem:[#allocation6 + $0x140] ss:$48 sps:$4 sm:$0xff]  }
 0x33a   :  { %3703 = vmatpush1.bf16.msra.mxu1 %v18751_v25  ;;  %3744 = vmatpush1.bf16.msra.mxu0 %v18754_v26  ;;  %v18820_v25 = vld [vmem:[#allocation6 + $0x740] ss:$48 sps:$4 sm:$0xff]   ;;  %v18825_v26 = vld [vmem:[#allocation6 + $0x1a4] ss:$48 sps:$4 sm:$0xff]  }
 0x33b   :  { %3704 = vmatprep.subr.bf16.mxu1 %v18759_v27  ;;  %3745 = vmatprep.subr.bf16.mxu0 %v18762_v29  ;;  %v18828_v27 = vld [vmem:[#allocation6 + $0x7a4] ss:$48 sps:$4 sm:$0xff]   ;;  %v18823_v29 = vld [vmem:[#allocation6 + $0x1a0] ss:$48 sps:$4 sm:$0xff]  }
 0x33e   :  { %3705 = vmatpush1.bf16.msra.mxu1 %v18757_v30  ;;  %3746 = vmatpush1.bf16.msra.mxu0 %v18760_v31  ;;  %v18826_v30 = vld [vmem:[#allocation6 + $0x7a0] ss:$48 sps:$4 sm:$0xff]   ;;  %v18831_v31 = vld [vmem:[#allocation6 + $0x204] ss:$48 sps:$4 sm:$0xff]  }
 0x33f   :  { %3706 = vmatprep.subr.bf16.mxu1 %v18765_v32  ;;  %3747 = vmatprep.subr.bf16.mxu0 %v18768_v35  ;;  %v18834_v32 = vld [vmem:[#allocation6 + $0x804] ss:$48 sps:$4 sm:$0xff]   ;;  %v18829_v35 = vld [vmem:[#allocation6 + $0x200] ss:$48 sps:$4 sm:$0xff]  }
 0x342   :  { %3707 = vmatpush1.bf16.msra.mxu1 %v18763_v38  ;;  %3748 = vmatpush1.bf16.msra.mxu0 %v18766_v39  ;;  %v18832_v38 = vld [vmem:[#allocation6 + $0x800] ss:$48 sps:$4 sm:$0xff]   ;;  %v18837_v39 = vld [vmem:[#allocation6 + $0x264] ss:$48 sps:$4 sm:$0xff]  }
 0x343   :  { %3708 = vmatprep.subr.bf16.mxu1 %v18771_v40  ;;  %3749 = vmatprep.subr.bf16.mxu0 %v18774_v0  ;;  %v18840_v40 = vld [vmem:[#allocation6 + $0x864] ss:$48 sps:$4 sm:$0xff]  }
 0x346   :  { %3709 = vmatpush1.bf16.msra.mxu1 %v18769_v41  ;;  %3750 = vmatpush1.bf16.msra.mxu0 %v18772_v42  ;;  %v18835_v42 = vld [vmem:[#allocation6 + $0x260] ss:$48 sps:$4 sm:$0xff]  }
 0x347   :  { %3710 = vmatprep.subr.bf16.mxu1 %v18777_v43  ;;  %3751 = vmatprep.subr.bf16.mxu0 %v18780_v44  ;;  %v18838_v43 = vld [vmem:[#allocation6 + $0x860] ss:$48 sps:$4 sm:$0xff]  }
 0x34a   :  { %3711 = vmatpush1.bf16.msra.mxu1 %v18775_v46  ;;  %3752 = vmatpush1.bf16.msra.mxu0 %v18778_v47 }
 0x34b   :  { %3712 = vmatprep.subr.bf16.mxu1 %v18783_v48  ;;  %3753 = vmatprep.subr.bf16.mxu0 %v18786_v49  ;;  %v18843_v48 = vld [vmem:[#allocation6 + $0x2c4] ss:$48 sps:$4 sm:$0xff]  }
 0x34c   :  { %v18846_v49 = vld [vmem:[#allocation6 + $0x8c4] ss:$48 sps:$4 sm:$0xff]  }
 0x34e   :  { %3713 = vmatpush1.bf16.msra.mxu1 %v18781_v50  ;;  %3754 = vmatpush1.bf16.msra.mxu0 %v18784_v54 }
 0x34f   :  { %3714 = vmatprep.subr.bf16.mxu1 %v18789_v28  ;;  %3755 = vmatprep.subr.bf16.mxu0 %v18792_v55 }
 0x352   :  { %3715 = vmatpush1.bf16.msra.mxu1 %v18787_v56  ;;  %3756 = vmatpush1.bf16.msra.mxu0 %v18790_v57 }
 0x353   :  { %3716 = vmatprep.subr.bf16.mxu1 %v18795_v58  ;;  %3757 = vmatprep.subr.bf16.mxu0 %v18798_v59  ;;  %v18841_v59 = vld [vmem:[#allocation6 + $0x2c0] ss:$48 sps:$4 sm:$0xff]  }
 0x356   :  { %3717 = vmatpush1.bf16.msra.mxu1 %v18793_v60  ;;  %3758 = vmatpush1.bf16.msra.mxu0 %v18796_v61  ;;  %v18844_v60 = vld [vmem:[#allocation6 + $0x8c0] ss:$48 sps:$4 sm:$0xff]   ;;  %v18849_v61 = vld [vmem:[#allocation6 + $0x324] ss:$48 sps:$4 sm:$0xff]  }
 0x357   :  { %3768 = vmatprep.subr.bf16.mxu1 %v18801_v1  ;;  %3809 = vmatprep.subr.bf16.mxu0 %v18804_v3  ;;  %v18852_v1 = vld [vmem:[#allocation6 + $0x924] ss:$48 sps:$4 sm:$0xff]   ;;  %v18847_v3 = vld [vmem:[#allocation6 + $0x320] ss:$48 sps:$4 sm:$0xff]  }
 0x359   :  { %3719 = vmatmul.mubr.bf16.vlgmr.msra.gmra.mrb[24].mxu1 %v21958_v4  ;;  %3760 = vmatmul.mubr.bf16.vlgmr.msra.gmra.mrb[28].mxu0 %v21960_v5 }
 0x35a   :  { %3769 = vmatpush1.bf16.msra.mxu1 %v18799_v6  ;;  %3810 = vmatpush1.bf16.msra.mxu0 %v18802_v7  ;;  %v18850_v6 = vld [vmem:[#allocation6 + $0x920] ss:$48 sps:$4 sm:$0xff]   ;;  %v18855_v7 = vld [vmem:[#allocation6 + $0x384] ss:$48 sps:$4 sm:$0xff]  }
 0x35b   :  { %3770 = vmatprep.subr.bf16.mxu1 %v18807_v9  ;;  %3811 = vmatprep.subr.bf16.mxu0 %v18810_v11  ;;  %v18853_v9 = vld [vmem:[#allocation6 + $0x380] ss:$48 sps:$4 sm:$0xff]  }
 0x35c   :  { %3800 = vmatprep.mubr.bf16.mxu1 %v21944_v62  ;;  %3841 = vmatprep.mubr.bf16.mxu0 %v21946_v63  ;;  %v18856_v11 = vld [vmem:[#allocation6 + $0x980] ss:$48 sps:$4 sm:$0xff]  }
 0x35e   :  { %3771 = vmatpush1.bf16.msra.mxu1 %v18805_v12  ;;  %3812 = vmatpush1.bf16.msra.mxu0 %v18808_v17  ;;  %v18864_v12 = vld [vmem:[#allocation6 + $0x9e4] ss:$48 sps:$4 sm:$0xff]   ;;  %v18859_v17 = vld [vmem:[#allocation6 + $0x3e0] ss:$48 sps:$4 sm:$0xff]  }
 0x35f   :  { %3772 = vmatprep.subr.bf16.mxu1 %v18813_v18  ;;  %3813 = vmatprep.subr.bf16.mxu0 %v18816_v19  ;;  %v18862_v18 = vld [vmem:[#allocation6 + $0x9e0] ss:$48 sps:$4 sm:$0xff]   ;;  %v18867_v19 = vld [vmem:[#allocation6 + $0x444] ss:$48 sps:$4 sm:$0xff]  }
 0x362   :  { %3773 = vmatpush1.bf16.msra.mxu1 %v18811_v20  ;;  %3814 = vmatpush1.bf16.msra.mxu0 %v18814_v21  ;;  %v18870_v20 = vld [vmem:[#allocation6 + $0xa44] ss:$48 sps:$4 sm:$0xff]   ;;  %v18865_v21 = vld [vmem:[#allocation6 + $0x440] ss:$48 sps:$4 sm:$0xff]  }
 0x363   :  { %3774 = vmatprep.subr.bf16.mxu1 %v18819_v22  ;;  %3815 = vmatprep.subr.bf16.mxu0 %v18822_v23  ;;  %v18868_v22 = vld [vmem:[#allocation6 + $0xa40] ss:$48 sps:$4 sm:$0xff]   ;;  %v18873_v23 = vld [vmem:[#allocation6 + $0x4a4] ss:$48 sps:$4 sm:$0xff]  }
 0x366   :  { %3775 = vmatpush1.bf16.msra.mxu1 %v18817_v24  ;;  %3816 = vmatpush1.bf16.msra.mxu0 %v18820_v25  ;;  %v18876_v24 = vld [vmem:[#allocation6 + $0xaa4] ss:$48 sps:$4 sm:$0xff]   ;;  %v18871_v25 = vld [vmem:[#allocation6 + $0x4a0] ss:$48 sps:$4 sm:$0xff]  }
 0x367   :  { %3776 = vmatprep.subr.bf16.mxu1 %v18825_v26  ;;  %3817 = vmatprep.subr.bf16.mxu0 %v18828_v27  ;;  %v18874_v26 = vld [vmem:[#allocation6 + $0xaa0] ss:$48 sps:$4 sm:$0xff]   ;;  %v18879_v27 = vld [vmem:[#allocation6 + $0x504] ss:$48 sps:$4 sm:$0xff]  }
 0x36a   :  { %3777 = vmatpush1.bf16.msra.mxu1 %v18823_v29  ;;  %3818 = vmatpush1.bf16.msra.mxu0 %v18826_v30  ;;  %v18882_v29 = vld [vmem:[#allocation6 + $0xb04] ss:$48 sps:$4 sm:$0xff]   ;;  %v18877_v30 = vld [vmem:[#allocation6 + $0x500] ss:$48 sps:$4 sm:$0xff]  }
 0x36b   :  { %3778 = vmatprep.subr.bf16.mxu1 %v18831_v31  ;;  %3819 = vmatprep.subr.bf16.mxu0 %v18834_v32  ;;  %v18880_v31 = vld [vmem:[#allocation6 + $0xb00] ss:$48 sps:$4 sm:$0xff]   ;;  %v18885_v32 = vld [vmem:[#allocation6 + $0x564] ss:$48 sps:$4 sm:$0xff]  }
 0x36c   :  { %v3474_v0 = vpop.f32.mrb[12].mxu1  ;;  %v3515_v41 = vpop.f32.mrb[16].mxu0 }
 0x36d   :  { %v3516_v44 = vadd.f32 %v3515_v41, %v3474_v0  ;;  %v3476_v46 = vpop.f32.mrb[13].mxu1  ;;  %v3517_v47 = vpop.f32.mrb[17].mxu0  ;;  %v18894_v0 = vld [vmem:[#allocation6 + $0xbc4] ss:$48 sps:$4 sm:$0xff]   ;;  %v18889_v41 = vld [vmem:[#allocation6 + $0x5c0] ss:$48 sps:$4 sm:$0xff]  }
 0x36e   :  { %v3518_v50 = vadd.f32 %v3517_v47, %v3476_v46  ;;  %v3478_v54 = vpop.f32.mrb[14].mxu1  ;;  %v3519_v28 = vpop.f32.mrb[18].mxu0  ;;  %3779 = vmatpush1.bf16.msra.mxu1 %v18829_v35  ;;  %3820 = vmatpush1.bf16.msra.mxu0 %v18832_v38  ;;  %v18888_v35 = vld [vmem:[#allocation6 + $0xb64] ss:$48 sps:$4 sm:$0xff]   ;;  %v18883_v38 = vld [vmem:[#allocation6 + $0x560] ss:$48 sps:$4 sm:$0xff]  }
 0x36f   :  { %v22017_v55 = vadd.f32 %v3516_v44, %v21970_v33  ;;  %v3479_v56 = vpop.f32.mrb[15].mxu1  ;;  %v3520_v57 = vpop.f32.mrb[19].mxu0  ;;  %3780 = vmatprep.subr.bf16.mxu1 %v18837_v39  ;;  %3821 = vmatprep.subr.bf16.mxu0 %v18840_v40  ;;  %v18858_v33 = vld [vmem:[#allocation6 + $0x984] ss:$48 sps:$4 sm:$0xff]   ;;  %v18886_v39 = vld [vmem:[#allocation6 + $0xb60] ss:$48 sps:$4 sm:$0xff]  }
 0x370   :  { %v22020_v58 = vadd.f32 %v3518_v50, %v21974_v36  ;;  %v18861_v36 = vld [vmem:[#allocation6 + $0x3e4] ss:$48 sps:$4 sm:$0xff]   ;;  %v18900_v44 = vld [vmem:[#allocation6 + $0x62c] ss:$48 sps:$4 sm:$0xff]   ;;  %v18895_v46 = vld [vmem:[#allocation6 + $0x28] ss:$48 sps:$4 sm:$0xff]  }
 0x371   :  { %v18891_v40 = vld [vmem:[#allocation6 + $0x5c4] ss:$48 sps:$4 sm:$0xff]   ;;  %v18898_v47 = vld [vmem:[#allocation6 + $0x628] ss:$48 sps:$4 sm:$0xff]   ;;  %v18909_v28 = vld [vmem:[#allocation6 + $0xec] ss:$48 sps:$4 sm:$0xff]  }
 0x372   :  { %3781 = vmatpush1.bf16.msra.mxu1 %v18835_v42  ;;  %3822 = vmatpush1.bf16.msra.mxu0 %v18838_v43  ;;  %v18892_v42 = vld [vmem:[#allocation6 + $0xbc0] ss:$48 sps:$4 sm:$0xff]   ;;  %v18897_v43 = vld [vmem:[#allocation6 + $0x2c] ss:$48 sps:$4 sm:$0xff]   ;;  %v18901_v50 = vld [vmem:[#allocation6 + $0x88] ss:$48 sps:$4 sm:$0xff]  }
 0x373   :  { %3782 = vmatprep.subr.bf16.mxu1 %v18843_v48  ;;  %3823 = vmatprep.subr.bf16.mxu0 %v18846_v49  ;;  %v18903_v48 = vld [vmem:[#allocation6 + $0x8c] ss:$48 sps:$4 sm:$0xff]   ;;  %v18904_v54 = vld [vmem:[#allocation6 + $0x688] ss:$48 sps:$4 sm:$0xff]  }
 0x374   :  { %v18906_v49 = vld [vmem:[#allocation6 + $0x68c] ss:$48 sps:$4 sm:$0xff]   ;;  %v18907_v57 = vld [vmem:[#allocation6 + $0xe8] ss:$48 sps:$4 sm:$0xff]  }
 0x375   :  { %v18912_v56 = vld [vmem:[#allocation6 + $0x6ec] ss:$48 sps:$4 sm:$0xff]  }
 0x376   :  { %3783 = vmatpush1.bf16.msra.mxu1 %v18841_v59  ;;  %3824 = vmatpush1.bf16.msra.mxu0 %v18844_v60  ;;  %v18910_v59 = vld [vmem:[#allocation6 + $0x6e8] ss:$48 sps:$4 sm:$0xff]   ;;  %v18915_v60 = vld [vmem:[#allocation6 + $0x14c] ss:$48 sps:$4 sm:$0xff]  }
 0x377   :  { %3784 = vmatprep.subr.bf16.mxu1 %v18849_v61  ;;  %3825 = vmatprep.subr.bf16.mxu0 %v18852_v1  ;;  %v18918_v61 = vld [vmem:[#allocation6 + $0x74c] ss:$48 sps:$4 sm:$0xff]   ;;  %v18913_v1 = vld [vmem:[#allocation6 + $0x148] ss:$48 sps:$4 sm:$0xff]  }
 0x37a   :  { %3785 = vmatpush1.bf16.msra.mxu1 %v18847_v3  ;;  %3826 = vmatpush1.bf16.msra.mxu0 %v18850_v6  ;;  %v18916_v3 = vld [vmem:[#allocation6 + $0x748] ss:$48 sps:$4 sm:$0xff]   ;;  %v18921_v6 = vld [vmem:[#allocation6 + $0x1ac] ss:$48 sps:$4 sm:$0xff]  }
 0x37b   :  { %3786 = vmatprep.subr.bf16.mxu1 %v18855_v7  ;;  %3827 = vmatprep.subr.bf16.mxu0 %v18858_v33  ;;  %v18924_v7 = vld [vmem:[#allocation6 + $0x7ac] ss:$48 sps:$4 sm:$0xff]   ;;  %v18919_v33 = vld [vmem:[#allocation6 + $0x1a8] ss:$48 sps:$4 sm:$0xff]  }
 0x37e   :  { %3787 = vmatpush1.bf16.msra.mxu1 %v18853_v9  ;;  %3828 = vmatpush1.bf16.msra.mxu0 %v18856_v11  ;;  %v18922_v9 = vld [vmem:[#allocation6 + $0x7a8] ss:$48 sps:$4 sm:$0xff]   ;;  %v18927_v11 = vld [vmem:[#allocation6 + $0x20c] ss:$48 sps:$4 sm:$0xff]  }
 0x37f   :  { %3788 = vmatprep.subr.bf16.mxu1 %v18861_v36  ;;  %3829 = vmatprep.subr.bf16.mxu0 %v18864_v12  ;;  %v18928_v36 = vld [vmem:[#allocation6 + $0x808] ss:$48 sps:$4 sm:$0xff]   ;;  %v18933_v12 = vld [vmem:[#allocation6 + $0x26c] ss:$48 sps:$4 sm:$0xff]  }
 0x382   :  { %3789 = vmatpush1.bf16.msra.mxu1 %v18859_v17  ;;  %3830 = vmatpush1.bf16.msra.mxu0 %v18862_v18  ;;  %v18936_v17 = vld [vmem:[#allocation6 + $0x86c] ss:$48 sps:$4 sm:$0xff]  }
 0x383   :  { %3790 = vmatprep.subr.bf16.mxu1 %v18867_v19  ;;  %3831 = vmatprep.subr.bf16.mxu0 %v18870_v20  ;;  %v18931_v20 = vld [vmem:[#allocation6 + $0x268] ss:$48 sps:$4 sm:$0xff]  }
 0x386   :  { %3791 = vmatpush1.bf16.msra.mxu1 %v18865_v21  ;;  %3832 = vmatpush1.bf16.msra.mxu0 %v18868_v22  ;;  %v18934_v21 = vld [vmem:[#allocation6 + $0x868] ss:$48 sps:$4 sm:$0xff]  }
 0x387   :  { %3792 = vmatprep.subr.bf16.mxu1 %v18873_v23  ;;  %3833 = vmatprep.subr.bf16.mxu0 %v18876_v24 }
 0x38a   :  { %3793 = vmatpush1.bf16.msra.mxu1 %v18871_v25  ;;  %3834 = vmatpush1.bf16.msra.mxu0 %v18874_v26  ;;  %v18939_v25 = vld [vmem:[#allocation6 + $0x2cc] ss:$48 sps:$4 sm:$0xff]  }
 0x38b   :  { %3794 = vmatprep.subr.bf16.mxu1 %v18879_v27  ;;  %3835 = vmatprep.subr.bf16.mxu0 %v18882_v29  ;;  %v18942_v26 = vld [vmem:[#allocation6 + $0x8cc] ss:$48 sps:$4 sm:$0xff]  }
 0x38e   :  { %3795 = vmatpush1.bf16.msra.mxu1 %v18877_v30  ;;  %3836 = vmatpush1.bf16.msra.mxu0 %v18880_v31 }
 0x38f   :  { %3796 = vmatprep.subr.bf16.mxu1 %v18885_v32  ;;  %3837 = vmatprep.subr.bf16.mxu0 %v18888_v35 }
 0x392   :  { %3797 = vmatpush1.bf16.msra.mxu1 %v18883_v38  ;;  %3838 = vmatpush1.bf16.msra.mxu0 %v18886_v39  ;;  %v18937_v39 = vld [vmem:[#allocation6 + $0x2c8] ss:$48 sps:$4 sm:$0xff]  }
 0x393   :  { %3798 = vmatprep.subr.bf16.mxu1 %v18891_v40  ;;  %3839 = vmatprep.subr.bf16.mxu0 %v18894_v0  ;;  %v18940_v40 = vld [vmem:[#allocation6 + $0x8c8] ss:$48 sps:$4 sm:$0xff]   ;;  %v18945_v0 = vld [vmem:[#allocation6 + $0x32c] ss:$48 sps:$4 sm:$0xff]  }
 0x396   :  { %3799 = vmatpush1.bf16.msra.mxu1 %v18889_v41  ;;  %3840 = vmatpush1.bf16.msra.mxu0 %v18892_v42  ;;  %v18948_v41 = vld [vmem:[#allocation6 + $0x92c] ss:$48 sps:$4 sm:$0xff]   ;;  %v18943_v42 = vld [vmem:[#allocation6 + $0x328] ss:$48 sps:$4 sm:$0xff]  }
 0x397   :  { %3850 = vmatprep.subr.bf16.mxu1 %v18897_v43  ;;  %3891 = vmatprep.subr.bf16.mxu0 %v18900_v44  ;;  %v18946_v43 = vld [vmem:[#allocation6 + $0x928] ss:$48 sps:$4 sm:$0xff]   ;;  %v18951_v44 = vld [vmem:[#allocation6 + $0x38c] ss:$48 sps:$4 sm:$0xff]  }
 0x399   :  { %3801 = vmatmul.mubr.bf16.vlgmr.msra.gmra.mrb[28].mxu1 %v21958_v4  ;;  %3842 = vmatmul.mubr.bf16.vlgmr.msra.gmra.mrb[32].mxu0 %v21960_v5 }
 0x39a   :  { %3851 = vmatpush1.bf16.msra.mxu1 %v18895_v46  ;;  %3892 = vmatpush1.bf16.msra.mxu0 %v18898_v47  ;;  %v18949_v46 = vld [vmem:[#allocation6 + $0x388] ss:$48 sps:$4 sm:$0xff]  }
 0x39b   :  { %3852 = vmatprep.subr.bf16.mxu1 %v18903_v48  ;;  %3893 = vmatprep.subr.bf16.mxu0 %v18906_v49  ;;  %v18952_v47 = vld [vmem:[#allocation6 + $0x988] ss:$48 sps:$4 sm:$0xff]   ;;  %v18960_v48 = vld [vmem:[#allocation6 + $0x9ec] ss:$48 sps:$4 sm:$0xff]  }
 0x39c   :  { %3882 = vmatprep.mubr.bf16.mxu1 %v21944_v62  ;;  %3923 = vmatprep.mubr.bf16.mxu0 %v21946_v63  ;;  %v18930_v62 = vld [vmem:[#allocation6 + $0x80c] ss:$48 sps:$4 sm:$0xff]   ;;  %v18925_v63 = vld [vmem:[#allocation6 + $0x208] ss:$48 sps:$4 sm:$0xff]  }
 0x39d   :  { %v18955_v49 = vld [vmem:[#allocation6 + $0x3e8] ss:$48 sps:$4 sm:$0xff]  }
 0x39e   :  { %3853 = vmatpush1.bf16.msra.mxu1 %v18901_v50  ;;  %3894 = vmatpush1.bf16.msra.mxu0 %v18904_v54  ;;  %v18958_v50 = vld [vmem:[#allocation6 + $0x9e8] ss:$48 sps:$4 sm:$0xff]   ;;  %v18963_v54 = vld [vmem:[#allocation6 + $0x44c] ss:$48 sps:$4 sm:$0xff]  }
 0x39f   :  { %3854 = vmatprep.subr.bf16.mxu1 %v18909_v28  ;;  %3895 = vmatprep.subr.bf16.mxu0 %v18912_v56  ;;  %v18966_v28 = vld [vmem:[#allocation6 + $0xa4c] ss:$48 sps:$4 sm:$0xff]   ;;  %v18961_v56 = vld [vmem:[#allocation6 + $0x448] ss:$48 sps:$4 sm:$0xff]  }
 0x3a2   :  { %3855 = vmatpush1.bf16.msra.mxu1 %v18907_v57  ;;  %3896 = vmatpush1.bf16.msra.mxu0 %v18910_v59  ;;  %v18964_v57 = vld [vmem:[#allocation6 + $0xa48] ss:$48 sps:$4 sm:$0xff]   ;;  %v18969_v59 = vld [vmem:[#allocation6 + $0x4ac] ss:$48 sps:$4 sm:$0xff]  }
 0x3a3   :  { %3856 = vmatprep.subr.bf16.mxu1 %v18915_v60  ;;  %3897 = vmatprep.subr.bf16.mxu0 %v18918_v61  ;;  %v18972_v60 = vld [vmem:[#allocation6 + $0xaac] ss:$48 sps:$4 sm:$0xff]   ;;  %v18967_v61 = vld [vmem:[#allocation6 + $0x4a8] ss:$48 sps:$4 sm:$0xff]  }
 0x3a6   :  { %3857 = vmatpush1.bf16.msra.mxu1 %v18913_v1  ;;  %3898 = vmatpush1.bf16.msra.mxu0 %v18916_v3  ;;  %v18970_v1 = vld [vmem:[#allocation6 + $0xaa8] ss:$48 sps:$4 sm:$0xff]   ;;  %v18975_v3 = vld [vmem:[#allocation6 + $0x50c] ss:$48 sps:$4 sm:$0xff]  }
 0x3a7   :  { %3858 = vmatprep.subr.bf16.mxu1 %v18921_v6  ;;  %3899 = vmatprep.subr.bf16.mxu0 %v18924_v7  ;;  %v18978_v6 = vld [vmem:[#allocation6 + $0xb0c] ss:$48 sps:$4 sm:$0xff]   ;;  %v18973_v7 = vld [vmem:[#allocation6 + $0x508] ss:$48 sps:$4 sm:$0xff]  }
 0x3aa   :  { %3859 = vmatpush1.bf16.msra.mxu1 %v18919_v33  ;;  %3900 = vmatpush1.bf16.msra.mxu0 %v18922_v9  ;;  %v18976_v33 = vld [vmem:[#allocation6 + $0xb08] ss:$48 sps:$4 sm:$0xff]   ;;  %v18981_v9 = vld [vmem:[#allocation6 + $0x56c] ss:$48 sps:$4 sm:$0xff]  }
 0x3ab   :  { %3860 = vmatprep.subr.bf16.mxu1 %v18927_v11  ;;  %3901 = vmatprep.subr.bf16.mxu0 %v18930_v62  ;;  %v18984_v11 = vld [vmem:[#allocation6 + $0xb6c] ss:$48 sps:$4 sm:$0xff]   ;;  %v18979_v62 = vld [vmem:[#allocation6 + $0x568] ss:$48 sps:$4 sm:$0xff]  }
 0x3ac   :  { %v3556_v18 = vpop.f32.mrb[16].mxu1  ;;  %v3597_v19 = vpop.f32.mrb[20].mxu0 }
 0x3ad   :  { %v3598_v22 = vadd.f32 %v3597_v19, %v3556_v18  ;;  %v3558_v23 = vpop.f32.mrb[17].mxu1  ;;  %v3599_v24 = vpop.f32.mrb[21].mxu0  ;;  %v18988_v18 = vld [vmem:[#allocation6 + $0xbc8] ss:$48 sps:$4 sm:$0xff]   ;;  %v18993_v19 = vld [vmem:[#allocation7 + $0x4] ss:$48 sps:$4 sm:$0xff]  }
 0x3ae   :  { %v3600_v27 = vadd.f32 %v3599_v24, %v3558_v23  ;;  %v3560_v29 = vpop.f32.mrb[18].mxu1  ;;  %v3601_v30 = vpop.f32.mrb[22].mxu0  ;;  %3861 = vmatpush1.bf16.msra.mxu1 %v18925_v63  ;;  %3902 = vmatpush1.bf16.msra.mxu0 %v18928_v36  ;;  %v18982_v63 = vld [vmem:[#allocation6 + $0xb68] ss:$48 sps:$4 sm:$0xff]   ;;  %v18987_v36 = vld [vmem:[#allocation6 + $0x5cc] ss:$48 sps:$4 sm:$0xff]  }
 0x3af   :  { %v22027_v31 = vadd.f32 %v3598_v22, %v21972_v34  ;;  %v3561_v32 = vpop.f32.mrb[19].mxu1  ;;  %v3602_v35 = vpop.f32.mrb[23].mxu0  ;;  %3862 = vmatprep.subr.bf16.mxu1 %v18933_v12  ;;  %3903 = vmatprep.subr.bf16.mxu0 %v18936_v17  ;;  %v18954_v34 = vld [vmem:[#allocation6 + $0x98c] ss:$48 sps:$4 sm:$0xff]   ;;  %v18985_v17 = vld [vmem:[#allocation6 + $0x5c8] ss:$48 sps:$4 sm:$0xff]  }
 0x3b0   :  { %v22030_v38 = vadd.f32 %v3600_v27, %v21976_v37  ;;  %v18957_v37 = vld [vmem:[#allocation6 + $0x3ec] ss:$48 sps:$4 sm:$0xff]   ;;  %v18994_v22 = vld [vmem:[#allocation7 + $0x60] ss:$48 sps:$4 sm:$0xff]   ;;  %v18999_v23 = vld [vmem:[#allocation7 + $0xc4] ss:$48 sps:$4 sm:$0xff]  }
 0x3b1   :  { %v18990_v12 = vld [vmem:[#allocation6 + $0xbcc] ss:$48 sps:$4 sm:$0xff]   ;;  %v18997_v24 = vld [vmem:[#allocation7 + $0xc0] ss:$48 sps:$4 sm:$0xff]   ;;  %v19005_v27 = vld [vmem:[#allocation7 + $0x184] ss:$48 sps:$4 sm:$0xff]  }
 0x3b2   :  { %3863 = vmatpush1.bf16.msra.mxu1 %v18931_v20  ;;  %3904 = vmatpush1.bf16.msra.mxu0 %v18934_v21  ;;  %v18991_v20 = vld [vmem:[#allocation7] ss:$48 sps:$4 sm:$0xff]   ;;  %v18996_v21 = vld [vmem:[#allocation7 + $0x64] ss:$48 sps:$4 sm:$0xff]  }
 0x3b3   :  { %3864 = vmatprep.subr.bf16.mxu1 %v18939_v25  ;;  %3905 = vmatprep.subr.bf16.mxu0 %v18942_v26  ;;  %v19002_v25 = vld [vmem:[#allocation7 + $0x124] ss:$48 sps:$4 sm:$0xff]   ;;  %v19000_v26 = vld [vmem:[#allocation7 + $0x120] ss:$48 sps:$4 sm:$0xff]  }
 0x3b4   :  { %v19003_v29 = vld [vmem:[#allocation7 + $0x180] ss:$48 sps:$4 sm:$0xff]   ;;  %v19008_v30 = vld [vmem:[#allocation7 + $0x1e4] ss:$48 sps:$4 sm:$0xff]  }
 0x3b5   :  { %v19006_v32 = vld [vmem:[#allocation7 + $0x1e0] ss:$48 sps:$4 sm:$0xff]   ;;  %v19011_v35 = vld [vmem:[#allocation7 + $0x244] ss:$48 sps:$4 sm:$0xff]  }
 0x3b6   :  { %3865 = vmatpush1.bf16.msra.mxu1 %v18937_v39  ;;  %3906 = vmatpush1.bf16.msra.mxu0 %v18940_v40 }
 0x3b7   :  { %3866 = vmatprep.subr.bf16.mxu1 %v18945_v0  ;;  %3907 = vmatprep.subr.bf16.mxu0 %v18948_v41  ;;  %v19009_v41 = vld [vmem:[#allocation7 + $0x240] ss:$48 sps:$4 sm:$0xff]  }
 0x3ba   :  { %3867 = vmatpush1.bf16.msra.mxu1 %v18943_v42  ;;  %3908 = vmatpush1.bf16.msra.mxu0 %v18946_v43 }
 0x3bb   :  { %3868 = vmatprep.subr.bf16.mxu1 %v18951_v44  ;;  %3909 = vmatprep.subr.bf16.mxu0 %v18954_v34  ;;  %v19014_v34 = vld [vmem:[#allocation7 + $0x2a4] ss:$48 sps:$4 sm:$0xff]  }
 0x3be   :  { %3869 = vmatpush1.bf16.msra.mxu1 %v18949_v46  ;;  %3910 = vmatpush1.bf16.msra.mxu0 %v18952_v47 }
 0x3bf   :  { %3870 = vmatprep.subr.bf16.mxu1 %v18957_v37  ;;  %3911 = vmatprep.subr.bf16.mxu0 %v18960_v48 }
 0x3c2   :  { %3871 = vmatpush1.bf16.msra.mxu1 %v18955_v49  ;;  %3912 = vmatpush1.bf16.msra.mxu0 %v18958_v50  ;;  %v19012_v49 = vld [vmem:[#allocation7 + $0x2a0] ss:$48 sps:$4 sm:$0xff]   ;;  %v19017_v50 = vld [vmem:[#allocation7 + $0x304] ss:$48 sps:$4 sm:$0xff]  }
 0x3c3   :  { %3872 = vmatprep.subr.bf16.mxu1 %v18963_v54  ;;  %3913 = vmatprep.subr.bf16.mxu0 %v18966_v28  ;;  %v19015_v54 = vld [vmem:[#allocation7 + $0x300] ss:$48 sps:$4 sm:$0xff]   ;;  %v19020_v28 = vld [vmem:[#allocation7 + $0x364] ss:$48 sps:$4 sm:$0xff]  }
 0x3c6   :  { %3873 = vmatpush1.bf16.msra.mxu1 %v18961_v56  ;;  %3914 = vmatpush1.bf16.msra.mxu0 %v18964_v57  ;;  %v19018_v56 = vld [vmem:[#allocation7 + $0x360] ss:$48 sps:$4 sm:$0xff]   ;;  %v19023_v57 = vld [vmem:[#allocation7 + $0x3c4] ss:$48 sps:$4 sm:$0xff]  }
 0x3c7   :  { %3874 = vmatprep.subr.bf16.mxu1 %v18969_v59  ;;  %3915 = vmatprep.subr.bf16.mxu0 %v18972_v60  ;;  %v19026_v59 = vld [vmem:[#allocation7 + $0x424] ss:$48 sps:$4 sm:$0xff]   ;;  %v19024_v60 = vld [vmem:[#allocation7 + $0x420] ss:$48 sps:$4 sm:$0xff]  }
 0x3ca   :  { %3875 = vmatpush1.bf16.msra.mxu1 %v18967_v61  ;;  %3916 = vmatpush1.bf16.msra.mxu0 %v18970_v1  ;;  %v19029_v61 = vld [vmem:[#allocation7 + $0x484] ss:$48 sps:$4 sm:$0xff]  }
 0x3cb   :  { %3876 = vmatprep.subr.bf16.mxu1 %v18975_v3  ;;  %3917 = vmatprep.subr.bf16.mxu0 %v18978_v6  ;;  %v19041_v1 = vld [vmem:[#allocation7 + $0x604] ss:$48 sps:$4 sm:$0xff]   ;;  %v19039_v6 = vld [vmem:[#allocation7 + $0x600] ss:$48 sps:$4 sm:$0xff]  }
 0x3cc   :  { %v19032_v3 = vld [vmem:[#allocation7 + $0x4e4] ss:$48 sps:$4 sm:$0xff]  }
 0x3ce   :  { %3877 = vmatpush1.bf16.msra.mxu1 %v18973_v7  ;;  %3918 = vmatpush1.bf16.msra.mxu0 %v18976_v33  ;;  %v19030_v7 = vld [vmem:[#allocation7 + $0x4e0] ss:$48 sps:$4 sm:$0xff]  }
 0x3cf   :  { %3878 = vmatprep.subr.bf16.mxu1 %v18981_v9  ;;  %3919 = vmatprep.subr.bf16.mxu0 %v18984_v11  ;;  %v19045_v33 = vld [vmem:[#allocation7 + $0x660] ss:$48 sps:$4 sm:$0xff]   ;;  %v19047_v9 = vld [vmem:[#allocation7 + $0x664] ss:$48 sps:$4 sm:$0xff]  }
 0x3d0   :  { %v19035_v11 = vld [vmem:[#allocation7 + $0x544] ss:$48 sps:$4 sm:$0xff]  }
 0x3d2   :  { %3879 = vmatpush1.bf16.msra.mxu1 %v18979_v62  ;;  %3920 = vmatpush1.bf16.msra.mxu0 %v18982_v63  ;;  %v19051_v62 = vld [vmem:[#allocation7 + $0x6c0] ss:$48 sps:$4 sm:$0xff]   ;;  %v19053_v63 = vld [vmem:[#allocation7 + $0x6c4] ss:$48 sps:$4 sm:$0xff]  }
 0x3d3   :  { %3880 = vmatprep.subr.bf16.mxu1 %v18987_v36  ;;  %3921 = vmatprep.subr.bf16.mxu0 %v18990_v12  ;;  %v19033_v36 = vld [vmem:[#allocation7 + $0x540] ss:$48 sps:$4 sm:$0xff]   ;;  %v19038_v12 = vld [vmem:[#allocation7 + $0x5a4] ss:$48 sps:$4 sm:$0xff]  }
 0x3d6   :  { %3881 = vmatpush1.bf16.msra.mxu1 %v18985_v17  ;;  %3922 = vmatpush1.bf16.msra.mxu0 %v18988_v18  ;;  %v19036_v17 = vld [vmem:[#allocation7 + $0x5a0] ss:$48 sps:$4 sm:$0xff]  }
 0x3d7   :  { %6815 = vmatprep.subr.bf16.mxu1 %v18993_v19  ;;  %6856 = vmatprep.subr.bf16.mxu0 %v19041_v1  ;;  %v19057_v18 = vld [vmem:[#allocation7 + $0x720] ss:$48 sps:$4 sm:$0xff]   ;;  %v19059_v19 = vld [vmem:[#allocation7 + $0x724] ss:$48 sps:$4 sm:$0xff]  }
 0x3d8   :  { %v22049_v1 = vld [vmem:[%s22727_s1] sm:$0xff] }
 0x3d9   :  { %3883 = vmatmul.mubr.bf16.vlgmr.msra.gmra.mrb[32].mxu1 %v21958_v4  ;;  %3924 = vmatmul.mubr.bf16.vlgmr.msra.gmra.mrb[36].mxu0 %v21960_v5 }
 0x3da   :  { %6816 = vmatpush1.bf16.msra.mxu1 %v18991_v20  ;;  %6857 = vmatpush1.bf16.msra.mxu0 %v19039_v6  ;;  %v19044_v20 = vld [vmem:[#allocation7 + $0xc] ss:$48 sps:$4 sm:$0xff]   ;;  %v22052_v6 = vsub.s32 0, %v21991_v45 }
 0x3db   :  { %6817 = vmatprep.subr.bf16.mxu1 %v18996_v21  ;;  %6858 = vmatprep.subr.bf16.mxu0 %v19047_v9  ;;  %v19063_v21 = vld [vmem:[#allocation7 + $0x780] ss:$48 sps:$4 sm:$0xff]  }
 0x3de   :  { %6818 = vmatpush1.bf16.msra.mxu1 %v18994_v22  ;;  %6859 = vmatpush1.bf16.msra.mxu0 %v19045_v33  ;;  %v19065_v22 = vld [vmem:[#allocation7 + $0x784] ss:$48 sps:$4 sm:$0xff]   ;;  %v3944_v33 = vrot.slane %v22049_v1, %v22052_v6 }
 0x3df   :  { %6819 = vmatprep.subr.bf16.mxu1 %v18999_v23  ;;  %6860 = vmatprep.subr.bf16.mxu0 %v19053_v63  ;;  %v19069_v23 = vld [vmem:[#allocation7 + $0x7e0] ss:$48 sps:$4 sm:$0xff]   ;;  %v22064_v63 = vsub.s32 4, %v21991_v45 }
 0x3e2   :  { %6820 = vmatpush1.bf16.msra.mxu1 %v18997_v24  ;;  %6861 = vmatpush1.bf16.msra.mxu0 %v19051_v62  ;;  %v19071_v24 = vld [vmem:[#allocation7 + $0x7e4] ss:$48 sps:$4 sm:$0xff]  }
 0x3e3   :  { %6821 = vmatprep.subr.bf16.mxu1 %v19002_v25  ;;  %6862 = vmatprep.subr.bf16.mxu0 %v19059_v19  ;;  %v19075_v25 = vld [vmem:[#allocation7 + $0x840] ss:$48 sps:$4 sm:$0xff]  }
 0x3e6   :  { %6822 = vmatpush1.bf16.msra.mxu1 %v19000_v26  ;;  %6863 = vmatpush1.bf16.msra.mxu0 %v19057_v18  ;;  %v19077_v26 = vld [vmem:[#allocation7 + $0x844] ss:$48 sps:$4 sm:$0xff]   ;;  %v3960_v18 = vrot.slane %v22049_v1, %v22064_v63 }
 0x3e7   :  { %6823 = vmatprep.subr.bf16.mxu1 %v19005_v27  ;;  %6864 = vmatprep.subr.bf16.mxu0 %v19065_v22  ;;  %v19081_v27 = vld [vmem:[#allocation7 + $0x8a0] ss:$48 sps:$4 sm:$0xff]  }
 0x3ea   :  { %6824 = vmatpush1.bf16.msra.mxu1 %v19003_v29  ;;  %6865 = vmatpush1.bf16.msra.mxu0 %v19063_v21  ;;  %v19083_v29 = vld [vmem:[#allocation7 + $0x8a4] ss:$48 sps:$4 sm:$0xff]  }
 0x3eb   :  { %6825 = vmatprep.subr.bf16.mxu1 %v19008_v30  ;;  %6866 = vmatprep.subr.bf16.mxu0 %v19071_v24  ;;  %v19087_v30 = vld [vmem:[#allocation7 + $0x900] ss:$48 sps:$4 sm:$0xff]  }
 0x3ec   :  { %v3638_v4 = vpop.f32.mrb[20].mxu1  ;;  %v3679_v5 = vpop.f32.mrb[24].mxu0 }
 0x3ed   :  { %v3680_v39 = vadd.f32 %v3679_v5, %v3638_v4  ;;  %v3640_v40 = vpop.f32.mrb[21].mxu1  ;;  %v3681_v0 = vpop.f32.mrb[25].mxu0  ;;  %v19095_v4 = vld [vmem:[#allocation7 + $0x964] ss:$48 sps:$4 sm:$0xff]  }
 0x3ee   :  { %v3682_v42 = vadd.f32 %v3681_v0, %v3640_v40  ;;  %v3642_v43 = vpop.f32.mrb[22].mxu1  ;;  %v3683_v44 = vpop.f32.mrb[26].mxu0  ;;  %6826 = vmatpush1.bf16.msra.mxu1 %v19006_v32  ;;  %6867 = vmatpush1.bf16.msra.mxu0 %v19069_v23  ;;  %v19089_v32 = vld [vmem:[#allocation7 + $0x904] ss:$48 sps:$4 sm:$0xff]  }
 0x3ef   :  { %v22035_v46 = vadd.f32 %v3680_v39, %v21978_v13  ;;  %v3643_v47 = vpop.f32.mrb[23].mxu1  ;;  %v3684_v37 = vpop.f32.mrb[27].mxu0  ;;  %6827 = vmatprep.subr.bf16.mxu1 %v19011_v35  ;;  %v19021_v13 = vld [vmem:[#allocation7 + $0x3c0] ss:$48 sps:$4 sm:$0xff]   ;;  %6868 = vmatprep.subr.bf16.mxu0 %v19077_v26 }
 0x3f0   :  { %v22038_v48 = vadd.f32 %v3682_v42, %v21982_v15  ;;  %v19027_v15 = vld [vmem:[#allocation7 + $0x480] ss:$48 sps:$4 sm:$0xff]  }
 0x3f1   :  { %v19093_v35 = vld [vmem:[#allocation7 + $0x960] ss:$48 sps:$4 sm:$0xff]  }
 0x3f2   :  { %6828 = vmatpush1.bf16.msra.mxu1 %v19009_v41  ;;  %6869 = vmatpush1.bf16.msra.mxu0 %v19075_v25  ;;  %v22078_v26 = vld [vmem:[%s22695_s7] sm:$0xf] }
 0x3f3   :  { %6829 = vmatprep.subr.bf16.mxu1 %v19014_v34  ;;  %6870 = vmatprep.subr.bf16.mxu0 %v19083_v29  ;;  %v19101_v34 = vld [vmem:[#allocation7 + $0x9c4] ss:$48 sps:$4 sm:$0xff]  }
 0x3f6   :  { %6830 = vmatpush1.bf16.msra.mxu1 %v19012_v49  ;;  %6871 = vmatpush1.bf16.msra.mxu0 %v19081_v27 }
 0x3f7   :  { %6831 = vmatprep.subr.bf16.mxu1 %v19017_v50  ;;  %6872 = vmatprep.subr.bf16.mxu0 %v19089_v32  ;;  %v19099_v50 = vld [vmem:[#allocation7 + $0x9c0] ss:$48 sps:$4 sm:$0xff]  }
 0x3fa   :  { %6832 = vmatpush1.bf16.msra.mxu1 %v19015_v54  ;;  %6873 = vmatpush1.bf16.msra.mxu0 %v19087_v30 }
 0x3fb   :  { %6833 = vmatprep.subr.bf16.mxu1 %v19020_v28  ;;  %6874 = vmatprep.subr.bf16.mxu0 %v19095_v4  ;;  %v19107_v28 = vld [vmem:[#allocation7 + $0xa24] ss:$48 sps:$4 sm:$0xff]  }
 0x3fe   :  { %6834 = vmatpush1.bf16.msra.mxu1 %v19018_v56  ;;  %6875 = vmatpush1.bf16.msra.mxu0 %v19093_v35  ;;  %v19105_v56 = vld [vmem:[#allocation7 + $0xa20] ss:$48 sps:$4 sm:$0xff]  }
 0x3ff   :  { %6835 = vmatprep.subr.bf16.mxu1 %v19023_v57  ;;  %6876 = vmatprep.subr.bf16.mxu0 %v19101_v34  ;;  %v19113_v57 = vld [vmem:[#allocation7 + $0xa84] ss:$48 sps:$4 sm:$0xff]   ;;  %v21447_v35 = vld [vmem:[%s22694_s6] sm:$0xf] }
 0x400   :  { %v4041_v4 = vrot.slane %v21447_v35, %v22052_v6 }
 0x402   :  { %6836 = vmatpush1.bf16.msra.mxu1 %v19021_v13  ;;  %6877 = vmatpush1.bf16.msra.mxu0 %v19099_v50  ;;  %v19111_v13 = vld [vmem:[#allocation7 + $0xa80] ss:$48 sps:$4 sm:$0xff]  }
 0x403   :  { %6837 = vmatprep.subr.bf16.mxu1 %v19026_v59  ;;  %6878 = vmatprep.subr.bf16.mxu0 %v19107_v28  ;;  %v19119_v59 = vld [vmem:[#allocation7 + $0xae4] ss:$48 sps:$4 sm:$0xff]  }
 0x406   :  { %6838 = vmatpush1.bf16.msra.mxu1 %v19024_v60  ;;  %6879 = vmatpush1.bf16.msra.mxu0 %v19105_v56  ;;  %v19117_v60 = vld [vmem:[#allocation7 + $0xae0] ss:$48 sps:$4 sm:$0xff]  }
 0x407   :  { %6839 = vmatprep.subr.bf16.mxu1 %v19029_v61  ;;  %6880 = vmatprep.subr.bf16.mxu0 %v19113_v57  ;;  %v19123_v61 = vld [vmem:[#allocation7 + $0xb40] ss:$48 sps:$4 sm:$0xff]  }
 0x40a   :  { %6840 = vmatpush1.bf16.msra.mxu1 %v19027_v15  ;;  %6881 = vmatpush1.bf16.msra.mxu0 %v19111_v13  ;;  %v19131_v15 = vld [vmem:[#allocation7 + $0xba4] ss:$48 sps:$4 sm:$0xff]   ;;  %v4058_v13 = vadd.f32 %v4041_v4, %v22004_v2 }
 0x40b   :  { %6841 = vmatprep.subr.bf16.mxu1 %v19032_v3  ;;  %6882 = vmatprep.subr.bf16.mxu0 %v19119_v59  ;;  %v19137_v3 = vld [vmem:[#allocation7 + $0x60c] ss:$48 sps:$4 sm:$0xff]   ;;  %v21448_v2 = vld [vmem:[%s22726_s25] sm:$0xff] }
 0x40e   :  { %6842 = vmatpush1.bf16.msra.mxu1 %v19030_v7  ;;  %6883 = vmatpush1.bf16.msra.mxu0 %v19117_v60  ;;  %v22055_v7 = vsub.s32 1, %v21991_v45 }
 0x40f   :  { %6843 = vmatprep.subr.bf16.mxu1 %v19035_v11  ;;  %v3981_v11 = vadd.f32 %v3944_v33, %v22017_v55  ;;  %v3985_v55 = vadd.f32 %v3960_v18, %v22035_v46  ;;  %v4066_v46 = vrot.slane %v22078_v26, %v22052_v6 }
 0x410   :  { %v3948_v9 = vrot.slane %v22049_v1, %v22055_v7  ;;  %v4070_v32 = vrot.slane %v22078_v26, %v22055_v7 }
 0x412   :  { %6844 = vmatpush1.bf16.msra.mxu1 %v19033_v36  ;;  %v3982_v62 = vadd.f32 %v3948_v9, %v22020_v58  ;;  %v16563_v36 = vmul.f32 -1.442695, %v3981_v11 }
 0x413   :  { %6845 = vmatprep.subr.bf16.mxu1 %v19038_v12  ;;  %v22067_v12 = vsub.s32 5, %v21991_v45 }
 0x414   :  { %21327 = vpow2.f32 %v16563_v36 }
 0x415   :  { %v3964_v19 = vrot.slane %v22049_v1, %v22067_v12 }
 0x416   :  { %6846 = vmatpush1.bf16.msra.mxu1 %v19036_v17  ;;  %v16564_v17 = vmul.f32 -1.442695, %v3982_v62 }
 0x417   :  { %6897 = vmatprep.subr.bf16.mxu1 %v19044_v20  ;;  %v3986_v58 = vadd.f32 %v3964_v19, %v22038_v48  ;;  %v16567_v20 = vmul.f32 -1.442695, %v3985_v55 }
 0x418   :  { %21329 = vpow2.f32 %v16564_v17 }
 0x419   :  { %v16568_v21 = vmul.f32 -1.442695, %v3986_v58  ;;  %21331 = vpow2.f32 %v16567_v20 }
 0x41b   :  { %21333 = vpow2.f32 %v16568_v21  ;;  %v19042_v21 = vld [vmem:[#allocation7 + $0x8] ss:$48 sps:$4 sm:$0xff]  }
 0x41e   :  { %v21328_v22 = vpop.eup %21327 }
 0x41f   :  { %v4013_v24 = vadd.f32 1.0, %v21328_v22 }
 0x421   :  { %21335 = vrcp.f32 %v4013_v24  ;;  %v3952_v24 = vrot.slane %v22049_v1, %v21994_v51 }
 0x422   :  { %v21330_v23 = vpop.eup %21329 }
 0x423   :  { %v4014_v25 = vadd.f32 1.0, %v21330_v23  ;;  %v21332_v27 = vpop.eup %21331  ;;  %v19050_v23 = vld [vmem:[#allocation7 + $0x6c] ss:$48 sps:$4 sm:$0xff]  }
 0x425   :  { %21337 = vrcp.f32 %v4014_v25  ;;  %v21334_v29 = vpop.eup %21333  ;;  %v19048_v25 = vld [vmem:[#allocation7 + $0x68] ss:$48 sps:$4 sm:$0xff]  }
 0x42b   :  { %v21336_v28 = vpop.eup %21335 }
 0x42c   :  { %v3720_v5 = vpop.f32.mrb[24].mxu1  ;;  %v3761_v39 = vpop.f32.mrb[28].mxu0 }
 0x42d   :  { %v3762_v40 = vadd.f32 %v3761_v39, %v3720_v5  ;;  %v3722_v0 = vpop.f32.mrb[25].mxu1  ;;  %v3763_v41 = vpop.f32.mrb[29].mxu0  ;;  %v4017_v5 = vadd.f32 1.0, %v21332_v27  ;;  %v3956_v27 = vrot.slane %v22049_v1, %v21997_v53 }
 0x42e   :  { %v3764_v42 = vadd.f32 %v3763_v41, %v3722_v0  ;;  %v3724_v43 = vpop.f32.mrb[26].mxu1  ;;  %v3765_v44 = vpop.f32.mrb[30].mxu0  ;;  %v4045_v41 = vrot.slane %v21447_v35, %v22055_v7  ;;  %v22117_v35 = vsub.s32 6, %v21991_v45 }
 0x42f   :  { %v22041_v47 = vadd.f32 %v3762_v40, %v21980_v14  ;;  %v3725_v37 = vpop.f32.mrb[27].mxu1  ;;  %v3766_v49 = vpop.f32.mrb[31].mxu0  ;;  %v19125_v14 = vld [vmem:[#allocation7 + $0xb44] ss:$48 sps:$4 sm:$0xff]   ;;  %21339 = vrcp.f32 %v4017_v5  ;;  %v22120_v5 = vsub.s32 7, %v21991_v45 }
 0x430   :  { %v22044_v54 = vadd.f32 %v3764_v42, %v21984_v16  ;;  %6884 = vmatprep.subr.bf16.mxu0 %v19125_v14  ;;  %v19129_v16 = vld [vmem:[#allocation7 + $0xba0] ss:$48 sps:$4 sm:$0xff]   ;;  %v4018_v42 = vadd.f32 1.0, %v21334_v29  ;;  %v21338_v57 = vpop.eup %21337  ;;  %v4059_v60 = vadd.f32 %v4045_v41, %v22008_v8  ;;  %v21449_v8 = vld [vmem:[%s22726_s25 + $0x8] sm:$0xff] }
 0x431   :  { %6885 = vmatpush1.bf16.msra.mxu0 %v19123_v61  ;;  %v19056_v29 = vld [vmem:[#allocation7 + $0xcc] ss:$48 sps:$4 sm:$0xff]   ;;  %v19066_v41 = vld [vmem:[#allocation7 + $0x188] ss:$48 sps:$4 sm:$0xff]  }
 0x432   :  { %6886 = vmatprep.subr.bf16.mxu0 %v19131_v15  ;;  %21341 = vrcp.f32 %v4018_v42  ;;  %v19074_v42 = vld [vmem:[#allocation7 + $0x1ec] ss:$48 sps:$4 sm:$0xff]  }
 0x435   :  { %6887 = vmatpush1.bf16.msra.mxu0 %v19129_v16 }
 0x436   :  { %6938 = vmatprep.subr.bf16.mxu0 %v19137_v3 }
 0x439   :  { %v21340_v15 = vpop.eup %21339 }
 0x43a   :  { %v4099_v33 = vsub.f32 1.0, %v21340_v15  ;;  %v4107_v36 = vmul.f32 %v21448_v2, %v21340_v15 }
 0x43c   :  { %v21342_v3 = vpop.eup %21341 }
 0x43d   :  { %v4100_v11 = vsub.f32 1.0, %v21342_v3  ;;  %v4108_v18 = vmul.f32 %v21449_v8, %v21342_v3  ;;  %v4074_v3 = vrot.slane %v22078_v26, %v21994_v51  ;;  %v19102_v8 = vld [vmem:[#allocation7 + $0x3c8] ss:$48 sps:$4 sm:$0xff]  }
 0x46c   :  { %v3802_v48 = vpop.f32.mrb[28].mxu1  ;;  %v3843_v30 = vpop.f32.mrb[32].mxu0 }
 0x46d   :  { %v3844_v39 = vadd.f32 %v3843_v30, %v3802_v48  ;;  %v3804_v40 = vpop.f32.mrb[29].mxu1  ;;  %v3845_v0 = vpop.f32.mrb[33].mxu0  ;;  %v19054_v48 = vld [vmem:[#allocation7 + $0xc8] ss:$48 sps:$4 sm:$0xff]   ;;  %v3984_v30 = vadd.f32 %v3956_v27, %v22030_v38  ;;  %v3972_v38 = vrot.slane %v22049_v1, %v22120_v5 }
 0x46e   :  { %v3846_v43 = vadd.f32 %v3845_v0, %v3804_v40  ;;  %v3806_v44 = vpop.f32.mrb[30].mxu1  ;;  %v3847_v34 = vpop.f32.mrb[34].mxu0  ;;  %v19068_v0 = vld [vmem:[#allocation7 + $0x18c] ss:$48 sps:$4 sm:$0xff]  }
 0x46f   :  { %v4083_v37 = vadd.f32 %v4066_v46, %v3844_v39  ;;  %v3807_v49 = vpop.f32.mrb[31].mxu1  ;;  %v3848_v50 = vpop.f32.mrb[35].mxu0  ;;  %v3983_v46 = vadd.f32 %v3952_v24, %v22027_v31  ;;  %v19060_v39 = vld [vmem:[#allocation7 + $0x128] ss:$48 sps:$4 sm:$0xff]   ;;  %v16566_v40 = vmul.f32 -1.442695, %v3984_v30  ;;  %v3968_v31 = vrot.slane %v22049_v1, %v22117_v35 }
 0x470   :  { %v4084_v56 = vadd.f32 %v4070_v32, %v3846_v43  ;;  %v19062_v32 = vld [vmem:[#allocation7 + $0x12c] ss:$48 sps:$4 sm:$0xff]   ;;  %v3988_v43 = vadd.f32 %v3972_v38, %v22044_v54  ;;  %v19072_v44 = vld [vmem:[#allocation7 + $0x1e8] ss:$48 sps:$4 sm:$0xff]  }
 0x471   :  { %v4087_v59 = vmul.f32 %v21336_v28, %v4083_v37  ;;  %v16565_v4 = vmul.f32 -1.442695, %v3983_v46  ;;  %v3987_v45 = vadd.f32 %v3968_v31, %v22041_v47  ;;  %v19080_v34 = vld [vmem:[#allocation7 + $0x24c] ss:$48 sps:$4 sm:$0xff]   ;;  %v19078_v50 = vld [vmem:[#allocation7 + $0x248] ss:$48 sps:$4 sm:$0xff]  }
 0x472   :  { %v4088_v14 = vmul.f32 %v21338_v57, %v4084_v56  ;;  %v16570_v49 = vmul.f32 -1.442695, %v3988_v43  ;;  %v19086_v28 = vld [vmem:[#allocation7 + $0x2ac] ss:$48 sps:$4 sm:$0xff]   ;;  %v19084_v57 = vld [vmem:[#allocation7 + $0x2a8] ss:$48 sps:$4 sm:$0xff]  }
 0x473   :  { %v4091_v61 = vadd.f32 %v4087_v59, %v4058_v13  ;;  %v16569_v37 = vmul.f32 -1.442695, %v3987_v45  ;;  %v19092_v47 = vld [vmem:[#allocation7 + $0x30c] ss:$48 sps:$4 sm:$0xff]   ;;  %v19090_v59 = vld [vmem:[#allocation7 + $0x308] ss:$48 sps:$4 sm:$0xff]  }
 0x474   :  { %v4092_v16 = vadd.f32 %v4088_v14, %v4059_v60  ;;  %v19098_v60 = vld [vmem:[#allocation7 + $0x36c] ss:$48 sps:$4 sm:$0xff]   ;;  %v19096_v14 = vld [vmem:[#allocation7 + $0x368] ss:$48 sps:$4 sm:$0xff]  }
 0x475   :  { %21343 = vtanh.f32 %v4091_v61  ;;  %v19120_v31 = vld [vmem:[#allocation7 + $0x4e8] ss:$48 sps:$4 sm:$0xff]   ;;  %v19128_v38 = vld [vmem:[#allocation7 + $0x54c] ss:$48 sps:$4 sm:$0xff]  }
 0x476   :  { %21345 = vtanh.f32 %v4092_v16  ;;  %v19104_v16 = vld [vmem:[#allocation7 + $0x3cc] ss:$48 sps:$4 sm:$0xff]   ;;  %v19126_v45 = vld [vmem:[#allocation7 + $0x548] ss:$48 sps:$4 sm:$0xff]  }
 0x477   :  { %21347 = vpow2.f32 %v16565_v4 }
 0x478   :  { %21349 = vpow2.f32 %v16566_v40  ;;  %v19114_v40 = vld [vmem:[#allocation7 + $0x488] ss:$48 sps:$4 sm:$0xff]  }
 0x479   :  { %21351 = vpow2.f32 %v16569_v37 }
 0x47a   :  { %21353 = vpow2.f32 %v16570_v49 }
 0x47f   :  { %v21344_v9 = vpop.eup %21343 }
 0x480   :  { %v21346_v62 = vpop.eup %21345  ;;  %v4103_v17 = vmul.f32 %v21344_v9, %v4099_v33 }
 0x481   :  { %v4104_v19 = vmul.f32 %v21346_v62, %v4100_v11  ;;  %v21348_v1 = vpop.eup %21347  ;;  %v4078_v11 = vrot.slane %v22078_v26, %v21997_v53 }
 0x482   :  { %v4111_v55 = vadd.f32 %v4107_v36, %v4103_v17  ;;  %v21350_v56 = vpop.eup %21349  ;;  %v4015_v13 = vadd.f32 1.0, %v21348_v1 }
 0x483   :  { %v4112_v58 = vadd.f32 %v4108_v18, %v4104_v19  ;;  %v4016_v54 = vadd.f32 1.0, %v21350_v56  ;;  %v21352_v61 = vpop.eup %21351 }
 0x484   :  { %15697 = vst [vmem:[%s22709_s21] sm:$0xff] %v4111_v55  ;;  %v22105_v22 = vpack.c.bf16 %v4111_v55, %v4111_v55  ;;  %21355 = vrcp.f32 %v4015_v13  ;;  %v21354_v15 = vpop.eup %21353  ;;  %v4019_v62 = vadd.f32 1.0, %v21352_v61  ;;  %v19140_v13 = vld [vmem:[#allocation7 + $0x14] ss:$48 sps:$4 sm:$0xff]  }
 0x485   :  { %v22100_v20 = vpack.c.bf16 %v4112_v58, %v4112_v58  ;;  %15698 = vst [vmem:[%s22709_s21 + $0x8] sm:$0xff] %v4112_v58  ;;  %21357 = vrcp.f32 %v4016_v54  ;;  %v4020_v18 = vadd.f32 1.0, %v21354_v15  ;;  %v19146_v15 = vld [vmem:[#allocation7 + $0x74] ss:$48 sps:$4 sm:$0xff]  }
 0x486   :  { %21359 = vrcp.f32 %v4019_v62  ;;  %v19147_v62 = vld [vmem:[#allocation7 + $0x6c8] ss:$48 sps:$4 sm:$0xff]  }
 0x487   :  { %6847 = vmatprep.mubr.bf16.mxu1 %v22100_v20  ;;  %21361 = vrcp.f32 %v4020_v18  ;;  %v19156_v18 = vld [vmem:[#allocation7 + $0x130] ss:$48 sps:$4 sm:$0xff]  }
 0x488   :  { %6848 = vmatmul.mubr.bf16.vlgmr.msra.gmra.mrb[36].mxu1 %v22105_v22 }
 0x489   :  { %6898 = vmatpush1.bf16.msra.mxu1 %v19042_v21  ;;  %6929 = vmatprep.mubr.bf16.mxu1 %v22100_v20  ;;  %v19110_v21 = vld [vmem:[#allocation7 + $0x42c] ss:$48 sps:$4 sm:$0xff]  }
 0x48a   :  { %6899 = vmatprep.subr.bf16.mxu1 %v19050_v23 }
 0x48c   :  { %v21450_v37 = vld [vmem:[%s22726_s25 + $0x10] sm:$0xff] }
 0x48d   :  { %6900 = vmatpush1.bf16.msra.mxu1 %v19048_v25 }
 0x48e   :  { %6901 = vmatprep.subr.bf16.mxu1 %v19056_v29  ;;  %v21356_v27 = vpop.eup %21355 }
 0x48f   :  { %v21358_v46 = vpop.eup %21357 }
 0x491   :  { %6902 = vmatpush1.bf16.msra.mxu1 %v19054_v48  ;;  %v19108_v48 = vld [vmem:[#allocation7 + $0x428] ss:$48 sps:$4 sm:$0xff]  }
 0x492   :  { %6903 = vmatprep.subr.bf16.mxu1 %v19062_v32  ;;  %v19116_v32 = vld [vmem:[#allocation7 + $0x48c] ss:$48 sps:$4 sm:$0xff]  }
 0x495   :  { %6904 = vmatpush1.bf16.msra.mxu1 %v19060_v39 }
 0x496   :  { %6905 = vmatprep.subr.bf16.mxu1 %v19068_v0  ;;  %v19122_v0 = vld [vmem:[#allocation7 + $0x4ec] ss:$48 sps:$4 sm:$0xff]  }
 0x499   :  { %6906 = vmatpush1.bf16.msra.mxu1 %v19066_v41  ;;  %v21360_v41 = vpop.eup %21359 }
 0x49a   :  { %6907 = vmatprep.subr.bf16.mxu1 %v19074_v42  ;;  %v21362_v42 = vpop.eup %21361  ;;  %v4101_v43 = vsub.f32 1.0, %v21360_v41  ;;  %v4109_v49 = vmul.f32 %v21450_v37, %v21360_v41  ;;  %v19191_v41 = vld [vmem:[#allocation7 + $0x96c] ss:$48 sps:$4 sm:$0xff]  }
 0x49b   :  { %v19203_v37 = vld [vmem:[#allocation7 + $0xa2c] ss:$48 sps:$4 sm:$0xff]  }
 0x49d   :  { %6908 = vmatpush1.bf16.msra.mxu1 %v19072_v44  ;;  %v19134_v44 = vld [vmem:[#allocation7 + $0x5ac] ss:$48 sps:$4 sm:$0xff]  }
 0x49e   :  { %6909 = vmatprep.subr.bf16.mxu1 %v19080_v34  ;;  %v4102_v34 = vsub.f32 1.0, %v21362_v42 }
 0x4a1   :  { %6910 = vmatpush1.bf16.msra.mxu1 %v19078_v50 }
 0x4a2   :  { %6911 = vmatprep.subr.bf16.mxu1 %v19086_v28  ;;  %v21451_v28 = vld [vmem:[%s22726_s25 + $0x18] sm:$0xff] }
 0x4a3   :  { %v4110_v1 = vmul.f32 %v21451_v28, %v21362_v42  ;;  %v19194_v42 = vld [vmem:[#allocation7 + $0x374] ss:$48 sps:$4 sm:$0xff]   ;;  %v19204_v28 = vld [vmem:[#allocation7 + $0x430] ss:$48 sps:$4 sm:$0xff]  }
 0x4a5   :  { %6912 = vmatpush1.bf16.msra.mxu1 %v19084_v57  ;;  %v19132_v57 = vld [vmem:[#allocation7 + $0x5a8] ss:$48 sps:$4 sm:$0xff]  }
 0x4a6   :  { %6913 = vmatprep.subr.bf16.mxu1 %v19092_v47 }
 0x4a9   :  { %6914 = vmatpush1.bf16.msra.mxu1 %v19090_v59 }
 0x4aa   :  { %6915 = vmatprep.subr.bf16.mxu1 %v19098_v60  ;;  %v19135_v60 = vld [vmem:[#allocation7 + $0x608] ss:$48 sps:$4 sm:$0xff]  }
 0x4ac   :  { %v3884_v33 = vpop.f32.mrb[32].mxu1  ;;  %v3925_v9 = vpop.f32.mrb[36].mxu0 }
 0x4ad   :  { %v3926_v2 = vadd.f32 %v3925_v9, %v3884_v33  ;;  %6916 = vmatpush1.bf16.msra.mxu1 %v19096_v14  ;;  %v3886_v36 = vpop.f32.mrb[33].mxu1  ;;  %v3927_v17 = vpop.f32.mrb[37].mxu0  ;;  %v19138_v14 = vld [vmem:[#allocation7 + $0x10] ss:$48 sps:$4 sm:$0xff]   ;;  %v19149_v9 = vld [vmem:[#allocation7 + $0x6cc] ss:$48 sps:$4 sm:$0xff]  }
 0x4ae   :  { %v3928_v19 = vadd.f32 %v3927_v17, %v3886_v36  ;;  %v3888_v55 = vpop.f32.mrb[34].mxu1  ;;  %v3929_v58 = vpop.f32.mrb[38].mxu0  ;;  %6917 = vmatprep.subr.bf16.mxu1 %v19104_v16  ;;  %v19143_v16 = vld [vmem:[#allocation7 + $0x66c] ss:$48 sps:$4 sm:$0xff]   ;;  %v19144_v33 = vld [vmem:[#allocation7 + $0x70] ss:$48 sps:$4 sm:$0xff]  }
 0x4af   :  { %v4085_v23 = vadd.f32 %v4074_v3, %v3926_v2  ;;  %v3889_v24 = vpop.f32.mrb[35].mxu1  ;;  %v3930_v25 = vpop.f32.mrb[39].mxu0  ;;  %v19141_v3 = vld [vmem:[#allocation7 + $0x668] ss:$48 sps:$4 sm:$0xff]   ;;  %v19150_v2 = vld [vmem:[#allocation7 + $0xd0] ss:$48 sps:$4 sm:$0xff]  }
 0x4b0   :  { %v4086_v29 = vadd.f32 %v4078_v11, %v3928_v19  ;;  %v19152_v11 = vld [vmem:[#allocation7 + $0xd4] ss:$48 sps:$4 sm:$0xff]   ;;  %v19155_v36 = vld [vmem:[#allocation7 + $0x72c] ss:$48 sps:$4 sm:$0xff]   ;;  %v19159_v58 = vld [vmem:[#allocation7 + $0x788] ss:$48 sps:$4 sm:$0xff]  }
 0x4b1   :  { %v4089_v26 = vmul.f32 %v21356_v27, %v4085_v23  ;;  %6918 = vmatpush1.bf16.msra.mxu1 %v19102_v8  ;;  %v19158_v17 = vld [vmem:[#allocation7 + $0x134] ss:$48 sps:$4 sm:$0xff]   ;;  %v19153_v8 = vld [vmem:[#allocation7 + $0x728] ss:$48 sps:$4 sm:$0xff]   ;;  %v19161_v19 = vld [vmem:[#allocation7 + $0x78c] ss:$48 sps:$4 sm:$0xff]  }
 0x4b2   :  { %v4090_v30 = vmul.f32 %v21358_v46, %v4086_v29  ;;  %6919 = vmatprep.subr.bf16.mxu1 %v19110_v21  ;;  %v19164_v55 = vld [vmem:[#allocation7 + $0x194] ss:$48 sps:$4 sm:$0xff]   ;;  %v19162_v21 = vld [vmem:[#allocation7 + $0x190] ss:$48 sps:$4 sm:$0xff]   ;;  %v19167_v23 = vld [vmem:[#allocation7 + $0x7ec] ss:$48 sps:$4 sm:$0xff]  }
 0x4b3   :  { %v4093_v4 = vadd.f32 %v4089_v26, %v22006_v52  ;;  %v19170_v24 = vld [vmem:[#allocation7 + $0x1f4] ss:$48 sps:$4 sm:$0xff]   ;;  %v19165_v25 = vld [vmem:[#allocation7 + $0x7e8] ss:$48 sps:$4 sm:$0xff]   ;;  %v19168_v27 = vld [vmem:[#allocation7 + $0x1f0] ss:$48 sps:$4 sm:$0xff]  }
 0x4b4   :  { %v4094_v39 = vadd.f32 %v4090_v30, %v22010_v10  ;;  %v19173_v29 = vld [vmem:[#allocation7 + $0x84c] ss:$48 sps:$4 sm:$0xff]   ;;  %v19176_v46 = vld [vmem:[#allocation7 + $0x254] ss:$48 sps:$4 sm:$0xff]   ;;  %v19171_v26 = vld [vmem:[#allocation7 + $0x848] ss:$48 sps:$4 sm:$0xff]  }
 0x4b5   :  { %21363 = vtanh.f32 %v4093_v4  ;;  %6920 = vmatpush1.bf16.msra.mxu1 %v19108_v48  ;;  %v19174_v48 = vld [vmem:[#allocation7 + $0x250] ss:$48 sps:$4 sm:$0xff]   ;;  %v19179_v30 = vld [vmem:[#allocation7 + $0x8ac] ss:$48 sps:$4 sm:$0xff]   ;;  %v19177_v4 = vld [vmem:[#allocation7 + $0x8a8] ss:$48 sps:$4 sm:$0xff]  }
 0x4b6   :  { %21365 = vtanh.f32 %v4094_v39  ;;  %6921 = vmatprep.subr.bf16.mxu1 %v19116_v32  ;;  %v19182_v32 = vld [vmem:[#allocation7 + $0x2b4] ss:$48 sps:$4 sm:$0xff]   ;;  %v19180_v39 = vld [vmem:[#allocation7 + $0x2b0] ss:$48 sps:$4 sm:$0xff]  }
 0x4b9   :  { %6922 = vmatpush1.bf16.msra.mxu1 %v19114_v40  ;;  %v19185_v40 = vld [vmem:[#allocation7 + $0x90c] ss:$48 sps:$4 sm:$0xff]  }
 0x4ba   :  { %6923 = vmatprep.subr.bf16.mxu1 %v19122_v0  ;;  %v19188_v0 = vld [vmem:[#allocation7 + $0x314] ss:$48 sps:$4 sm:$0xff]  }
 0x4bd   :  { %6924 = vmatpush1.bf16.msra.mxu1 %v19120_v31  ;;  %v19183_v31 = vld [vmem:[#allocation7 + $0x908] ss:$48 sps:$4 sm:$0xff]  }
 0x4be   :  { %6925 = vmatprep.subr.bf16.mxu1 %v19128_v38  ;;  %v19186_v38 = vld [vmem:[#allocation7 + $0x310] ss:$48 sps:$4 sm:$0xff]  }
 0x4bf   :  { %v21364_v52 = vpop.eup %21363 }
 0x4c0   :  { %v21366_v10 = vpop.eup %21365  ;;  %v4105_v50 = vmul.f32 %v21364_v52, %v4101_v43  ;;  %v19192_v43 = vld [vmem:[#allocation7 + $0x370] ss:$48 sps:$4 sm:$0xff]   ;;  %v19200_v52 = vld [vmem:[#allocation7 + $0x3d4] ss:$48 sps:$4 sm:$0xff]  }
 0x4c1   :  { %v4106_v56 = vmul.f32 %v21366_v10, %v4102_v34  ;;  %6926 = vmatpush1.bf16.msra.mxu1 %v19126_v45  ;;  %v19189_v45 = vld [vmem:[#allocation7 + $0x968] ss:$48 sps:$4 sm:$0xff]   ;;  %v19198_v10 = vld [vmem:[#allocation7 + $0x3d0] ss:$48 sps:$4 sm:$0xff]  }
 0x4c2   :  { %6927 = vmatprep.subr.bf16.mxu1 %v19134_v44  ;;  %v4113_v47 = vadd.f32 %v4109_v49, %v4105_v50  ;;  %v19197_v44 = vld [vmem:[#allocation7 + $0x9cc] ss:$48 sps:$4 sm:$0xff]   ;;  %v19195_v34 = vld [vmem:[#allocation7 + $0x9c8] ss:$48 sps:$4 sm:$0xff]   ;;  %v19206_v49 = vld [vmem:[#allocation7 + $0x434] ss:$48 sps:$4 sm:$0xff]  }
 0x4c3   :  { %v4114_v54 = vadd.f32 %v4110_v1, %v4106_v56  ;;  %v19201_v50 = vld [vmem:[#allocation7 + $0xa28] ss:$48 sps:$4 sm:$0xff]   ;;  %v19209_v1 = vld [vmem:[#allocation7 + $0xa8c] ss:$48 sps:$4 sm:$0xff]   ;;  %v19212_v56 = vld [vmem:[#allocation7 + $0x494] ss:$48 sps:$4 sm:$0xff]  }
 0x4c4   :  { %15699 = vst [vmem:[%s22709_s21 + $0x10] sm:$0xff] %v4113_v47  ;;  %v22148_v61 = vpack.c.bf16 %v4113_v47, %v4113_v47  ;;  %v19215_v47 = vld [vmem:[#allocation7 + $0xaec] ss:$48 sps:$4 sm:$0xff]  }
 0x4c5   :  { %6928 = vmatpush1.bf16.msra.mxu1 %v19132_v57  ;;  %v22143_v59 = vpack.c.bf16 %v4114_v54, %v4114_v54  ;;  %15700 = vst [vmem:[%s22709_s21 + $0x18] sm:$0xff] %v4114_v54  ;;  %v19207_v57 = vld [vmem:[#allocation7 + $0xa88] ss:$48 sps:$4 sm:$0xff]   ;;  %v19218_v54 = vld [vmem:[#allocation7 + $0x4f4] ss:$48 sps:$4 sm:$0xff]  }
 0x4c6   :  { %6979 = vmatprep.subr.bf16.mxu1 %v19140_v13  ;;  %v19210_v13 = vld [vmem:[#allocation7 + $0x490] ss:$48 sps:$4 sm:$0xff]  }
 0x4c7   :  { %6888 = vmatprep.mubr.bf16.mxu0 %v22143_v59 }
 0x4c8   :  { %6930 = vmatmul.mubr.bf16.vlgmr.msra.gmra.mrb[40].mxu1 %v22105_v22  ;;  %6889 = vmatmul.mubr.bf16.vlgmr.msra.gmra.mrb[40].mxu0 %v22148_v61 }
 0x4c9   :  { %6939 = vmatpush1.bf16.msra.mxu0 %v19135_v60  ;;  %6980 = vmatpush1.bf16.msra.mxu1 %v19138_v14  ;;  %v19213_v60 = vld [vmem:[#allocation7 + $0xae8] ss:$48 sps:$4 sm:$0xff]   ;;  %v19216_v14 = vld [vmem:[#allocation7 + $0x4f0] ss:$48 sps:$4 sm:$0xff]  }
 0x4ca   :  { %7011 = vmatprep.mubr.bf16.mxu1 %v22100_v20  ;;  %6970 = vmatprep.mubr.bf16.mxu0 %v22143_v59 }
 0x4cb   :  { %6940 = vmatprep.subr.bf16.mxu0 %v19143_v16  ;;  %6981 = vmatprep.subr.bf16.mxu1 %v19146_v15  ;;  %v19221_v16 = vld [vmem:[#allocation7 + $0xb4c] ss:$48 sps:$4 sm:$0xff]   ;;  %v19224_v15 = vld [vmem:[#allocation7 + $0x554] ss:$48 sps:$4 sm:$0xff]  }
 0x4cd   :  { %6941 = vmatpush1.bf16.msra.mxu0 %v19141_v3  ;;  %6982 = vmatpush1.bf16.msra.mxu1 %v19144_v33  ;;  %v19219_v3 = vld [vmem:[#allocation7 + $0xb48] ss:$48 sps:$4 sm:$0xff]   ;;  %v19222_v33 = vld [vmem:[#allocation7 + $0x550] ss:$48 sps:$4 sm:$0xff]  }
 0x4ce   :  { %6942 = vmatprep.subr.bf16.mxu0 %v19149_v9  ;;  %6983 = vmatprep.subr.bf16.mxu1 %v19152_v11  ;;  %v19227_v9 = vld [vmem:[#allocation7 + $0xbac] ss:$48 sps:$4 sm:$0xff]   ;;  %v19230_v11 = vld [vmem:[#allocation7 + $0x5b4] ss:$48 sps:$4 sm:$0xff]  }
 0x4d1   :  { %6943 = vmatpush1.bf16.msra.mxu0 %v19147_v62  ;;  %6984 = vmatpush1.bf16.msra.mxu1 %v19150_v2  ;;  %v19225_v62 = vld [vmem:[#allocation7 + $0xba8] ss:$48 sps:$4 sm:$0xff]   ;;  %v19228_v2 = vld [vmem:[#allocation7 + $0x5b0] ss:$48 sps:$4 sm:$0xff]  }
 0x4d2   :  { %6944 = vmatprep.subr.bf16.mxu0 %v19155_v36  ;;  %6985 = vmatprep.subr.bf16.mxu1 %v19158_v17  ;;  %v19233_v36 = vld [vmem:[#allocation7 + $0x614] ss:$48 sps:$4 sm:$0xff]   ;;  %v19236_v17 = vld [vmem:[#allocation7 + $0x1c] ss:$48 sps:$4 sm:$0xff]  }
 0x4d5   :  { %6945 = vmatpush1.bf16.msra.mxu0 %v19153_v8  ;;  %6986 = vmatpush1.bf16.msra.mxu1 %v19156_v18  ;;  %v19231_v8 = vld [vmem:[#allocation7 + $0x610] ss:$48 sps:$4 sm:$0xff]   ;;  %v19234_v18 = vld [vmem:[#allocation7 + $0x18] ss:$48 sps:$4 sm:$0xff]  }
 0x4d6   :  { %6946 = vmatprep.subr.bf16.mxu0 %v19161_v19  ;;  %6987 = vmatprep.subr.bf16.mxu1 %v19164_v55  ;;  %v19239_v19 = vld [vmem:[#allocation7 + $0x674] ss:$48 sps:$4 sm:$0xff]   ;;  %v19242_v55 = vld [vmem:[#allocation7 + $0x7c] ss:$48 sps:$4 sm:$0xff]  }
 0x4d9   :  { %6947 = vmatpush1.bf16.msra.mxu0 %v19159_v58  ;;  %6988 = vmatpush1.bf16.msra.mxu1 %v19162_v21  ;;  %v19237_v58 = vld [vmem:[#allocation7 + $0x670] ss:$48 sps:$4 sm:$0xff]   ;;  %v19240_v21 = vld [vmem:[#allocation7 + $0x78] ss:$48 sps:$4 sm:$0xff]  }
 0x4da   :  { %6948 = vmatprep.subr.bf16.mxu0 %v19167_v23  ;;  %6989 = vmatprep.subr.bf16.mxu1 %v19170_v24  ;;  %v19245_v23 = vld [vmem:[#allocation7 + $0x6d4] ss:$48 sps:$4 sm:$0xff]   ;;  %v19248_v24 = vld [vmem:[#allocation7 + $0xdc] ss:$48 sps:$4 sm:$0xff]  }
 0x4dd   :  { %6949 = vmatpush1.bf16.msra.mxu0 %v19165_v25  ;;  %6990 = vmatpush1.bf16.msra.mxu1 %v19168_v27  ;;  %v19243_v25 = vld [vmem:[#allocation7 + $0x6d0] ss:$48 sps:$4 sm:$0xff]   ;;  %v19246_v27 = vld [vmem:[#allocation7 + $0xd8] ss:$48 sps:$4 sm:$0xff]  }
 0x4de   :  { %6950 = vmatprep.subr.bf16.mxu0 %v19173_v29  ;;  %6991 = vmatprep.subr.bf16.mxu1 %v19176_v46  ;;  %v19251_v29 = vld [vmem:[#allocation7 + $0x734] ss:$48 sps:$4 sm:$0xff]   ;;  %v19254_v46 = vld [vmem:[#allocation7 + $0x13c] ss:$48 sps:$4 sm:$0xff]  }
 0x4e1   :  { %6951 = vmatpush1.bf16.msra.mxu0 %v19171_v26  ;;  %6992 = vmatpush1.bf16.msra.mxu1 %v19174_v48  ;;  %v19249_v26 = vld [vmem:[#allocation7 + $0x730] ss:$48 sps:$4 sm:$0xff]   ;;  %v19252_v48 = vld [vmem:[#allocation7 + $0x138] ss:$48 sps:$4 sm:$0xff]  }
 0x4e2   :  { %6952 = vmatprep.subr.bf16.mxu0 %v19179_v30  ;;  %6993 = vmatprep.subr.bf16.mxu1 %v19182_v32  ;;  %v19257_v30 = vld [vmem:[#allocation7 + $0x794] ss:$48 sps:$4 sm:$0xff]   ;;  %v19260_v32 = vld [vmem:[#allocation7 + $0x19c] ss:$48 sps:$4 sm:$0xff]  }
 0x4e5   :  { %6953 = vmatpush1.bf16.msra.mxu0 %v19177_v4  ;;  %6994 = vmatpush1.bf16.msra.mxu1 %v19180_v39  ;;  %v19255_v4 = vld [vmem:[#allocation7 + $0x790] ss:$48 sps:$4 sm:$0xff]   ;;  %v19258_v39 = vld [vmem:[#allocation7 + $0x198] ss:$48 sps:$4 sm:$0xff]  }
 0x4e6   :  { %6954 = vmatprep.subr.bf16.mxu0 %v19185_v40  ;;  %6995 = vmatprep.subr.bf16.mxu1 %v19188_v0  ;;  %v19263_v40 = vld [vmem:[#allocation7 + $0x7f4] ss:$48 sps:$4 sm:$0xff]   ;;  %v19266_v0 = vld [vmem:[#allocation7 + $0x1fc] ss:$48 sps:$4 sm:$0xff]  }
 0x4e9   :  { %6955 = vmatpush1.bf16.msra.mxu0 %v19183_v31  ;;  %6996 = vmatpush1.bf16.msra.mxu1 %v19186_v38  ;;  %v19261_v31 = vld [vmem:[#allocation7 + $0x7f0] ss:$48 sps:$4 sm:$0xff]   ;;  %v19264_v38 = vld [vmem:[#allocation7 + $0x1f8] ss:$48 sps:$4 sm:$0xff]  }
 0x4ea   :  { %6956 = vmatprep.subr.bf16.mxu0 %v19191_v41  ;;  %6997 = vmatprep.subr.bf16.mxu1 %v19194_v42  ;;  %v19269_v41 = vld [vmem:[#allocation7 + $0x854] ss:$48 sps:$4 sm:$0xff]   ;;  %v19272_v42 = vld [vmem:[#allocation7 + $0x25c] ss:$48 sps:$4 sm:$0xff]  }
 0x4ed   :  { %6957 = vmatpush1.bf16.msra.mxu0 %v19189_v45  ;;  %6998 = vmatpush1.bf16.msra.mxu1 %v19192_v43  ;;  %v19267_v45 = vld [vmem:[#allocation7 + $0x850] ss:$48 sps:$4 sm:$0xff]   ;;  %v19270_v43 = vld [vmem:[#allocation7 + $0x258] ss:$48 sps:$4 sm:$0xff]  }
 0x4ee   :  { %6958 = vmatprep.subr.bf16.mxu0 %v19197_v44  ;;  %6999 = vmatprep.subr.bf16.mxu1 %v19200_v52  ;;  %v19275_v44 = vld [vmem:[#allocation7 + $0x8b4] ss:$48 sps:$4 sm:$0xff]   ;;  %v19278_v52 = vld [vmem:[#allocation7 + $0x2bc] ss:$48 sps:$4 sm:$0xff]  }
 0x4f1   :  { %6959 = vmatpush1.bf16.msra.mxu0 %v19195_v34  ;;  %7000 = vmatpush1.bf16.msra.mxu1 %v19198_v10  ;;  %v19273_v34 = vld [vmem:[#allocation7 + $0x8b0] ss:$48 sps:$4 sm:$0xff]   ;;  %v19276_v10 = vld [vmem:[#allocation7 + $0x2b8] ss:$48 sps:$4 sm:$0xff]  }
 0x4f2   :  { %6960 = vmatprep.subr.bf16.mxu0 %v19203_v37  ;;  %7001 = vmatprep.subr.bf16.mxu1 %v19206_v49  ;;  %v19281_v37 = vld [vmem:[#allocation7 + $0x914] ss:$48 sps:$4 sm:$0xff]   ;;  %v19284_v49 = vld [vmem:[#allocation7 + $0x31c] ss:$48 sps:$4 sm:$0xff]  }
 0x4f5   :  { %6961 = vmatpush1.bf16.msra.mxu0 %v19201_v50  ;;  %7002 = vmatpush1.bf16.msra.mxu1 %v19204_v28  ;;  %v19279_v50 = vld [vmem:[#allocation7 + $0x910] ss:$48 sps:$4 sm:$0xff]   ;;  %v19282_v28 = vld [vmem:[#allocation7 + $0x318] ss:$48 sps:$4 sm:$0xff]  }
 0x4f6   :  { %6962 = vmatprep.subr.bf16.mxu0 %v19209_v1  ;;  %7003 = vmatprep.subr.bf16.mxu1 %v19212_v56  ;;  %v19287_v1 = vld [vmem:[#allocation7 + $0x974] ss:$48 sps:$4 sm:$0xff]   ;;  %v19290_v56 = vld [vmem:[#allocation7 + $0x37c] ss:$48 sps:$4 sm:$0xff]  }
 0x4f9   :  { %6963 = vmatpush1.bf16.msra.mxu0 %v19207_v57  ;;  %7004 = vmatpush1.bf16.msra.mxu1 %v19210_v13  ;;  %v19285_v57 = vld [vmem:[#allocation7 + $0x970] ss:$48 sps:$4 sm:$0xff]   ;;  %v19288_v13 = vld [vmem:[#allocation7 + $0x378] ss:$48 sps:$4 sm:$0xff]  }
 0x4fa   :  { %6964 = vmatprep.subr.bf16.mxu0 %v19215_v47  ;;  %7005 = vmatprep.subr.bf16.mxu1 %v19218_v54  ;;  %v19293_v47 = vld [vmem:[#allocation7 + $0x9d4] ss:$48 sps:$4 sm:$0xff]   ;;  %v19296_v54 = vld [vmem:[#allocation7 + $0x3dc] ss:$48 sps:$4 sm:$0xff]  }
 0x4fd   :  { %6965 = vmatpush1.bf16.msra.mxu0 %v19213_v60  ;;  %7006 = vmatpush1.bf16.msra.mxu1 %v19216_v14  ;;  %v19291_v60 = vld [vmem:[#allocation7 + $0x9d0] ss:$48 sps:$4 sm:$0xff]   ;;  %v19294_v14 = vld [vmem:[#allocation7 + $0x3d8] ss:$48 sps:$4 sm:$0xff]  }
 0x4fe   :  { %6966 = vmatprep.subr.bf16.mxu0 %v19221_v16  ;;  %7007 = vmatprep.subr.bf16.mxu1 %v19224_v15  ;;  %v19299_v16 = vld [vmem:[#allocation7 + $0xa34] ss:$48 sps:$4 sm:$0xff]   ;;  %v19302_v15 = vld [vmem:[#allocation7 + $0x43c] ss:$48 sps:$4 sm:$0xff]  }
 0x501   :  { %6967 = vmatpush1.bf16.msra.mxu0 %v19219_v3  ;;  %7008 = vmatpush1.bf16.msra.mxu1 %v19222_v33  ;;  %v19297_v3 = vld [vmem:[#allocation7 + $0xa30] ss:$48 sps:$4 sm:$0xff]   ;;  %v19300_v33 = vld [vmem:[#allocation7 + $0x438] ss:$48 sps:$4 sm:$0xff]  }
 0x502   :  { %6968 = vmatprep.subr.bf16.mxu0 %v19227_v9  ;;  %7009 = vmatprep.subr.bf16.mxu1 %v19230_v11  ;;  %v19305_v9 = vld [vmem:[#allocation7 + $0xa94] ss:$48 sps:$4 sm:$0xff]   ;;  %v19308_v11 = vld [vmem:[#allocation7 + $0x49c] ss:$48 sps:$4 sm:$0xff]  }
 0x505   :  { %6969 = vmatpush1.bf16.msra.mxu0 %v19225_v62  ;;  %7010 = vmatpush1.bf16.msra.mxu1 %v19228_v2  ;;  %v19303_v62 = vld [vmem:[#allocation7 + $0xa90] ss:$48 sps:$4 sm:$0xff]   ;;  %v19306_v2 = vld [vmem:[#allocation7 + $0x498] ss:$48 sps:$4 sm:$0xff]  }
 0x506   :  { %7020 = vmatprep.subr.bf16.mxu0 %v19233_v36  ;;  %7061 = vmatprep.subr.bf16.mxu1 %v19236_v17  ;;  %v19311_v36 = vld [vmem:[#allocation7 + $0xaf4] ss:$48 sps:$4 sm:$0xff]   ;;  %v19314_v17 = vld [vmem:[#allocation7 + $0x4fc] ss:$48 sps:$4 sm:$0xff]  }
 0x508   :  { %6971 = vmatmul.mubr.bf16.vlgmr.msra.gmra.mrb[44].mxu0 %v22148_v61  ;;  %7012 = vmatmul.mubr.bf16.vlgmr.msra.gmra.mrb[44].mxu1 %v22105_v22 }
 0x509   :  { %7021 = vmatpush1.bf16.msra.mxu0 %v19231_v8  ;;  %7052 = vmatprep.mubr.bf16.mxu0 %v22143_v59  ;;  %v19309_v8 = vld [vmem:[#allocation7 + $0xaf0] ss:$48 sps:$4 sm:$0xff]  }
 0x50a   :  { %7062 = vmatpush1.bf16.msra.mxu1 %v19234_v18  ;;  %7093 = vmatprep.mubr.bf16.mxu1 %v22100_v20  ;;  %v19312_v18 = vld [vmem:[#allocation7 + $0x4f8] ss:$48 sps:$4 sm:$0xff]  }
 0x50b   :  { %7022 = vmatprep.subr.bf16.mxu0 %v19239_v19  ;;  %7063 = vmatprep.subr.bf16.mxu1 %v19242_v55  ;;  %v19317_v19 = vld [vmem:[#allocation7 + $0xb54] ss:$48 sps:$4 sm:$0xff]   ;;  %v19320_v55 = vld [vmem:[#allocation7 + $0x55c] ss:$48 sps:$4 sm:$0xff]  }
 0x50d   :  { %7023 = vmatpush1.bf16.msra.mxu0 %v19237_v58  ;;  %v19315_v58 = vld [vmem:[#allocation7 + $0xb50] ss:$48 sps:$4 sm:$0xff]  }
 0x50e   :  { %7064 = vmatpush1.bf16.msra.mxu1 %v19240_v21  ;;  %7024 = vmatprep.subr.bf16.mxu0 %v19245_v23  ;;  %v19318_v21 = vld [vmem:[#allocation7 + $0x558] ss:$48 sps:$4 sm:$0xff]   ;;  %v19323_v23 = vld [vmem:[#allocation7 + $0xbb4] ss:$48 sps:$4 sm:$0xff]  }
 0x50f   :  { %7065 = vmatprep.subr.bf16.mxu1 %v19248_v24  ;;  %v19326_v24 = vld [vmem:[#allocation7 + $0x5bc] ss:$48 sps:$4 sm:$0xff]  }
 0x511   :  { %7025 = vmatpush1.bf16.msra.mxu0 %v19243_v25  ;;  %v19321_v25 = vld [vmem:[#allocation7 + $0xbb0] ss:$48 sps:$4 sm:$0xff]  }
 0x512   :  { %7066 = vmatpush1.bf16.msra.mxu1 %v19246_v27  ;;  %7026 = vmatprep.subr.bf16.mxu0 %v19251_v29  ;;  %v19324_v27 = vld [vmem:[#allocation7 + $0x5b8] ss:$48 sps:$4 sm:$0xff]   ;;  %v19329_v29 = vld [vmem:[#allocation7 + $0x61c] ss:$48 sps:$4 sm:$0xff]  }
 0x513   :  { %7067 = vmatprep.subr.bf16.mxu1 %v19254_v46  ;;  %v19332_v46 = vld [vmem:[#allocation7 + $0x24] ss:$48 sps:$4 sm:$0xff]  }
 0x515   :  { %7027 = vmatpush1.bf16.msra.mxu0 %v19249_v26  ;;  %v19327_v26 = vld [vmem:[#allocation7 + $0x618] ss:$48 sps:$4 sm:$0xff]  }
 0x516   :  { %7068 = vmatpush1.bf16.msra.mxu1 %v19252_v48  ;;  %7028 = vmatprep.subr.bf16.mxu0 %v19257_v30  ;;  %v19330_v48 = vld [vmem:[#allocation7 + $0x20] ss:$48 sps:$4 sm:$0xff]   ;;  %v19335_v30 = vld [vmem:[#allocation7 + $0x67c] ss:$48 sps:$4 sm:$0xff]  }
 0x517   :  { %7069 = vmatprep.subr.bf16.mxu1 %v19260_v32  ;;  %v19338_v32 = vld [vmem:[#allocation7 + $0x84] ss:$48 sps:$4 sm:$0xff]  }
 0x519   :  { %7029 = vmatpush1.bf16.msra.mxu0 %v19255_v4  ;;  %v19333_v4 = vld [vmem:[#allocation7 + $0x678] ss:$48 sps:$4 sm:$0xff]  }
 0x51a   :  { %7070 = vmatpush1.bf16.msra.mxu1 %v19258_v39  ;;  %7030 = vmatprep.subr.bf16.mxu0 %v19263_v40  ;;  %v19336_v39 = vld [vmem:[#allocation7 + $0x80] ss:$48 sps:$4 sm:$0xff]   ;;  %v19341_v40 = vld [vmem:[#allocation7 + $0x6dc] ss:$48 sps:$4 sm:$0xff]  }
 0x51b   :  { %7071 = vmatprep.subr.bf16.mxu1 %v19266_v0  ;;  %v19344_v0 = vld [vmem:[#allocation7 + $0xe4] ss:$48 sps:$4 sm:$0xff]  }
 0x51d   :  { %7031 = vmatpush1.bf16.msra.mxu0 %v19261_v31  ;;  %v19339_v31 = vld [vmem:[#allocation7 + $0x6d8] ss:$48 sps:$4 sm:$0xff]  }
 0x51e   :  { %7072 = vmatpush1.bf16.msra.mxu1 %v19264_v38  ;;  %7032 = vmatprep.subr.bf16.mxu0 %v19269_v41  ;;  %v19342_v38 = vld [vmem:[#allocation7 + $0xe0] ss:$48 sps:$4 sm:$0xff]   ;;  %v19347_v41 = vld [vmem:[#allocation7 + $0x73c] ss:$48 sps:$4 sm:$0xff]  }
 0x51f   :  { %7073 = vmatprep.subr.bf16.mxu1 %v19272_v42  ;;  %v19350_v42 = vld [vmem:[#allocation7 + $0x144] ss:$48 sps:$4 sm:$0xff]  }
 0x521   :  { %7033 = vmatpush1.bf16.msra.mxu0 %v19267_v45  ;;  %v19345_v45 = vld [vmem:[#allocation7 + $0x738] ss:$48 sps:$4 sm:$0xff]  }
 0x522   :  { %7074 = vmatpush1.bf16.msra.mxu1 %v19270_v43  ;;  %7034 = vmatprep.subr.bf16.mxu0 %v19275_v44  ;;  %v19348_v43 = vld [vmem:[#allocation7 + $0x140] ss:$48 sps:$4 sm:$0xff]   ;;  %v19353_v44 = vld [vmem:[#allocation7 + $0x79c] ss:$48 sps:$4 sm:$0xff]  }
 0x523   :  { %7075 = vmatprep.subr.bf16.mxu1 %v19278_v52  ;;  %v19356_v52 = vld [vmem:[#allocation7 + $0x1a4] ss:$48 sps:$4 sm:$0xff]  }
 0x525   :  { %7035 = vmatpush1.bf16.msra.mxu0 %v19273_v34  ;;  %v19351_v34 = vld [vmem:[#allocation7 + $0x798] ss:$48 sps:$4 sm:$0xff]  }
 0x526   :  { %7076 = vmatpush1.bf16.msra.mxu1 %v19276_v10  ;;  %7036 = vmatprep.subr.bf16.mxu0 %v19281_v37  ;;  %v19354_v10 = vld [vmem:[#allocation7 + $0x1a0] ss:$48 sps:$4 sm:$0xff]   ;;  %v19359_v37 = vld [vmem:[#allocation7 + $0x7fc] ss:$48 sps:$4 sm:$0xff]  }
 0x527   :  { %7077 = vmatprep.subr.bf16.mxu1 %v19284_v49  ;;  %v19362_v49 = vld [vmem:[#allocation7 + $0x204] ss:$48 sps:$4 sm:$0xff]  }
 0x529   :  { %7037 = vmatpush1.bf16.msra.mxu0 %v19279_v50  ;;  %v19357_v50 = vld [vmem:[#allocation7 + $0x7f8] ss:$48 sps:$4 sm:$0xff]  }
 0x52a   :  { %7078 = vmatpush1.bf16.msra.mxu1 %v19282_v28  ;;  %7038 = vmatprep.subr.bf16.mxu0 %v19287_v1  ;;  %v19360_v28 = vld [vmem:[#allocation7 + $0x200] ss:$48 sps:$4 sm:$0xff]   ;;  %v19365_v1 = vld [vmem:[#allocation7 + $0x85c] ss:$48 sps:$4 sm:$0xff]  }
 0x52b   :  { %7079 = vmatprep.subr.bf16.mxu1 %v19290_v56 }
 0x52d   :  { %7039 = vmatpush1.bf16.msra.mxu0 %v19285_v57  ;;  %v19368_v57 = vld [vmem:[#allocation7 + $0x264] ss:$48 sps:$4 sm:$0xff]  }
 0x52e   :  { %7080 = vmatpush1.bf16.msra.mxu1 %v19288_v13  ;;  %7040 = vmatprep.subr.bf16.mxu0 %v19293_v47 }
 0x52f   :  { %7081 = vmatprep.subr.bf16.mxu1 %v19296_v54  ;;  %v19363_v54 = vld [vmem:[#allocation7 + $0x858] ss:$48 sps:$4 sm:$0xff]  }
 0x531   :  { %7041 = vmatpush1.bf16.msra.mxu0 %v19291_v60 }
 0x532   :  { %7082 = vmatpush1.bf16.msra.mxu1 %v19294_v14  ;;  %7042 = vmatprep.subr.bf16.mxu0 %v19299_v16  ;;  %v19366_v14 = vld [vmem:[#allocation7 + $0x260] ss:$48 sps:$4 sm:$0xff]   ;;  %v19371_v16 = vld [vmem:[#allocation7 + $0x8bc] ss:$48 sps:$4 sm:$0xff]  }
 0x533   :  { %7083 = vmatprep.subr.bf16.mxu1 %v19302_v15  ;;  %v19374_v15 = vld [vmem:[#allocation7 + $0x2c4] ss:$48 sps:$4 sm:$0xff]  }
 0x535   :  { %7043 = vmatpush1.bf16.msra.mxu0 %v19297_v3  ;;  %v19369_v3 = vld [vmem:[#allocation7 + $0x8b8] ss:$48 sps:$4 sm:$0xff]  }
 0x536   :  { %7084 = vmatpush1.bf16.msra.mxu1 %v19300_v33  ;;  %7044 = vmatprep.subr.bf16.mxu0 %v19305_v9  ;;  %v19372_v33 = vld [vmem:[#allocation7 + $0x2c0] ss:$48 sps:$4 sm:$0xff]   ;;  %v19377_v9 = vld [vmem:[#allocation7 + $0x91c] ss:$48 sps:$4 sm:$0xff]  }
 0x537   :  { %7085 = vmatprep.subr.bf16.mxu1 %v19308_v11  ;;  %v19380_v11 = vld [vmem:[#allocation7 + $0x324] ss:$48 sps:$4 sm:$0xff]  }
 0x539   :  { %7045 = vmatpush1.bf16.msra.mxu0 %v19303_v62  ;;  %v19375_v62 = vld [vmem:[#allocation7 + $0x918] ss:$48 sps:$4 sm:$0xff]  }
 0x53a   :  { %7086 = vmatpush1.bf16.msra.mxu1 %v19306_v2  ;;  %7046 = vmatprep.subr.bf16.mxu0 %v19311_v36  ;;  %v19378_v2 = vld [vmem:[#allocation7 + $0x320] ss:$48 sps:$4 sm:$0xff]   ;;  %v19383_v36 = vld [vmem:[#allocation7 + $0x97c] ss:$48 sps:$4 sm:$0xff]  }
 0x53b   :  { %7087 = vmatprep.subr.bf16.mxu1 %v19314_v17  ;;  %v19386_v17 = vld [vmem:[#allocation7 + $0x384] ss:$48 sps:$4 sm:$0xff]  }
 0x53d   :  { %7047 = vmatpush1.bf16.msra.mxu0 %v19309_v8  ;;  %v19381_v8 = vld [vmem:[#allocation7 + $0x978] ss:$48 sps:$4 sm:$0xff]  }
 0x53e   :  { %7088 = vmatpush1.bf16.msra.mxu1 %v19312_v18  ;;  %7048 = vmatprep.subr.bf16.mxu0 %v19317_v19  ;;  %v19384_v18 = vld [vmem:[#allocation7 + $0x380] ss:$48 sps:$4 sm:$0xff]   ;;  %v19389_v19 = vld [vmem:[#allocation7 + $0x9dc] ss:$48 sps:$4 sm:$0xff]  }
 0x53f   :  { %7089 = vmatprep.subr.bf16.mxu1 %v19320_v55  ;;  %v19392_v55 = vld [vmem:[#allocation7 + $0x3e4] ss:$48 sps:$4 sm:$0xff]  }
 0x541   :  { %7049 = vmatpush1.bf16.msra.mxu0 %v19315_v58  ;;  %v19387_v58 = vld [vmem:[#allocation7 + $0x9d8] ss:$48 sps:$4 sm:$0xff]  }
 0x542   :  { %7090 = vmatpush1.bf16.msra.mxu1 %v19318_v21  ;;  %7050 = vmatprep.subr.bf16.mxu0 %v19323_v23  ;;  %v19390_v21 = vld [vmem:[#allocation7 + $0x3e0] ss:$48 sps:$4 sm:$0xff]   ;;  %v19395_v23 = vld [vmem:[#allocation7 + $0xa3c] ss:$48 sps:$4 sm:$0xff]  }
 0x543   :  { %7091 = vmatprep.subr.bf16.mxu1 %v19326_v24  ;;  %v19398_v24 = vld [vmem:[#allocation7 + $0x444] ss:$48 sps:$4 sm:$0xff]  }
 0x545   :  { %7051 = vmatpush1.bf16.msra.mxu0 %v19321_v25  ;;  %v19393_v25 = vld [vmem:[#allocation7 + $0xa38] ss:$48 sps:$4 sm:$0xff]  }
 0x546   :  { %7092 = vmatpush1.bf16.msra.mxu1 %v19324_v27  ;;  %7102 = vmatprep.subr.bf16.mxu0 %v19329_v29  ;;  %v19396_v27 = vld [vmem:[#allocation7 + $0x440] ss:$48 sps:$4 sm:$0xff]   ;;  %v19401_v29 = vld [vmem:[#allocation7 + $0xa9c] ss:$48 sps:$4 sm:$0xff]  }
 0x547   :  { %7143 = vmatprep.subr.bf16.mxu1 %v19332_v46  ;;  %v19404_v46 = vld [vmem:[#allocation7 + $0x4a4] ss:$48 sps:$4 sm:$0xff]  }
 0x548   :  { %7053 = vmatmul.mubr.bf16.vlgmr.msra.gmra.mrb[48].mxu0 %v22148_v61 }
 0x549   :  { %7094 = vmatmul.mubr.bf16.vlgmr.msra.gmra.mrb[48].mxu1 %v22105_v22  ;;  %7103 = vmatpush1.bf16.msra.mxu0 %v19327_v26  ;;  %v19399_v26 = vld [vmem:[#allocation7 + $0xa98] ss:$48 sps:$4 sm:$0xff]  }
 0x54a   :  { %7134 = vmatprep.mubr.bf16.mxu0 %v22143_v59  ;;  %7144 = vmatpush1.bf16.msra.mxu1 %v19330_v48  ;;  %v19402_v48 = vld [vmem:[#allocation7 + $0x4a0] ss:$48 sps:$4 sm:$0xff]  }
 0x54b   :  { %7175 = vmatprep.mubr.bf16.mxu1 %v22100_v20  ;;  %7104 = vmatprep.subr.bf16.mxu0 %v19335_v30  ;;  %v19407_v30 = vld [vmem:[#allocation7 + $0xafc] ss:$48 sps:$4 sm:$0xff]  }
 0x54c   :  { %7145 = vmatprep.subr.bf16.mxu1 %v19338_v32  ;;  %v19410_v32 = vld [vmem:[#allocation7 + $0x504] ss:$48 sps:$4 sm:$0xff]  }
 0x54d   :  { %7105 = vmatpush1.bf16.msra.mxu0 %v19333_v4  ;;  %v19405_v4 = vld [vmem:[#allocation7 + $0xaf8] ss:$48 sps:$4 sm:$0xff]  }
 0x54e   :  { %7146 = vmatpush1.bf16.msra.mxu1 %v19336_v39  ;;  %7106 = vmatprep.subr.bf16.mxu0 %v19341_v40  ;;  %v19408_v39 = vld [vmem:[#allocation7 + $0x500] ss:$48 sps:$4 sm:$0xff]   ;;  %v19413_v40 = vld [vmem:[#allocation7 + $0xb5c] ss:$48 sps:$4 sm:$0xff]  }
 0x54f   :  { %7147 = vmatprep.subr.bf16.mxu1 %v19344_v0  ;;  %v19416_v0 = vld [vmem:[#allocation7 + $0x564] ss:$48 sps:$4 sm:$0xff]  }
 0x551   :  { %7107 = vmatpush1.bf16.msra.mxu0 %v19339_v31  ;;  %v19411_v31 = vld [vmem:[#allocation7 + $0xb58] ss:$48 sps:$4 sm:$0xff]  }
 0x552   :  { %7148 = vmatpush1.bf16.msra.mxu1 %v19342_v38  ;;  %7108 = vmatprep.subr.bf16.mxu0 %v19347_v41  ;;  %v19414_v38 = vld [vmem:[#allocation7 + $0x560] ss:$48 sps:$4 sm:$0xff]   ;;  %v19419_v41 = vld [vmem:[#allocation7 + $0xbbc] ss:$48 sps:$4 sm:$0xff]  }
 0x553   :  { %7149 = vmatprep.subr.bf16.mxu1 %v19350_v42  ;;  %v19422_v42 = vld [vmem:[#allocation7 + $0x5c4] ss:$48 sps:$4 sm:$0xff]  }
 0x555   :  { %7109 = vmatpush1.bf16.msra.mxu0 %v19345_v45  ;;  %v19417_v45 = vld [vmem:[#allocation7 + $0xbb8] ss:$48 sps:$4 sm:$0xff]  }
 0x556   :  { %7150 = vmatpush1.bf16.msra.mxu1 %v19348_v43  ;;  %7110 = vmatprep.subr.bf16.mxu0 %v19353_v44  ;;  %v19420_v43 = vld [vmem:[#allocation7 + $0x5c0] ss:$48 sps:$4 sm:$0xff]   ;;  %v19425_v44 = vld [vmem:[#allocation7 + $0x624] ss:$48 sps:$4 sm:$0xff]  }
 0x557   :  { %7151 = vmatprep.subr.bf16.mxu1 %v19356_v52  ;;  %v19428_v52 = vld [vmem:[#allocation7 + $0x2c] ss:$48 sps:$4 sm:$0xff]  }
 0x559   :  { %7111 = vmatpush1.bf16.msra.mxu0 %v19351_v34  ;;  %v19423_v34 = vld [vmem:[#allocation7 + $0x620] ss:$48 sps:$4 sm:$0xff]  }
 0x55a   :  { %7152 = vmatpush1.bf16.msra.mxu1 %v19354_v10  ;;  %7112 = vmatprep.subr.bf16.mxu0 %v19359_v37  ;;  %v19426_v10 = vld [vmem:[#allocation7 + $0x28] ss:$48 sps:$4 sm:$0xff]   ;;  %v19431_v37 = vld [vmem:[#allocation7 + $0x684] ss:$48 sps:$4 sm:$0xff]  }
 0x55b   :  { %v22163_v56 = vpop.f32.mrb[36].mxu1  ;;  %7153 = vmatprep.subr.bf16.mxu1 %v19362_v49  ;;  %v19434_v49 = vld [vmem:[#allocation7 + $0x8c] ss:$48 sps:$4 sm:$0xff]  }
 0x55c   :  { %v22165_v13 = vpop.f32.mrb[37].mxu1 }
 0x55d   :  { %7113 = vmatpush1.bf16.msra.mxu0 %v19357_v50  ;;  %v6853_v47 = vpop.f32.mrb[38].mxu1  ;;  %v19429_v50 = vld [vmem:[#allocation7 + $0x680] ss:$48 sps:$4 sm:$0xff]  }
 0x55e   :  { %7154 = vmatpush1.bf16.msra.mxu1 %v19360_v28  ;;  %v6854_v60 = vpop.f32.mrb[39].mxu1  ;;  %7114 = vmatprep.subr.bf16.mxu0 %v19365_v1  ;;  %v19432_v28 = vld [vmem:[#allocation7 + $0x88] ss:$48 sps:$4 sm:$0xff]   ;;  %v19437_v1 = vld [vmem:[#allocation7 + $0x6e4] ss:$48 sps:$4 sm:$0xff]  }
 0x55f   :  { %7155 = vmatprep.subr.bf16.mxu1 %v19368_v57  ;;  %v19440_v57 = vld [vmem:[#allocation7 + $0xec] ss:$48 sps:$4 sm:$0xff]   ;;  %v19435_v47 = vld [vmem:[#allocation7 + $0x6e0] ss:$48 sps:$4 sm:$0xff]   ;;  %v19443_v60 = vld [vmem:[#allocation7 + $0x744] ss:$48 sps:$4 sm:$0xff]  }
 0x561   :  { %7115 = vmatpush1.bf16.msra.mxu0 %v19363_v54  ;;  %v19438_v54 = vld [vmem:[#allocation7 + $0xe8] ss:$48 sps:$4 sm:$0xff]  }
 0x562   :  { %7156 = vmatpush1.bf16.msra.mxu1 %v19366_v14  ;;  %7116 = vmatprep.subr.bf16.mxu0 %v19371_v16  ;;  %v19446_v14 = vld [vmem:[#allocation7 + $0x14c] ss:$48 sps:$4 sm:$0xff]   ;;  %v19441_v16 = vld [vmem:[#allocation7 + $0x740] ss:$48 sps:$4 sm:$0xff]  }
 0x563   :  { %7157 = vmatprep.subr.bf16.mxu1 %v19374_v15  ;;  %v19444_v15 = vld [vmem:[#allocation7 + $0x148] ss:$48 sps:$4 sm:$0xff]  }
 0x565   :  { %7117 = vmatpush1.bf16.msra.mxu0 %v19369_v3  ;;  %v19449_v3 = vld [vmem:[#allocation7 + $0x7a4] ss:$48 sps:$4 sm:$0xff]  }
 0x566   :  { %7158 = vmatpush1.bf16.msra.mxu1 %v19372_v33  ;;  %7118 = vmatprep.subr.bf16.mxu0 %v19377_v9  ;;  %v19452_v33 = vld [vmem:[#allocation7 + $0x1ac] ss:$48 sps:$4 sm:$0xff]   ;;  %v19450_v9 = vld [vmem:[#allocation7 + $0x1a8] ss:$48 sps:$4 sm:$0xff]  }
 0x567   :  { %7159 = vmatprep.subr.bf16.mxu1 %v19380_v11  ;;  %v19455_v11 = vld [vmem:[#allocation7 + $0x804] ss:$48 sps:$4 sm:$0xff]  }
 0x569   :  { %7119 = vmatpush1.bf16.msra.mxu0 %v19375_v62  ;;  %v19458_v62 = vld [vmem:[#allocation7 + $0x20c] ss:$48 sps:$4 sm:$0xff]  }
 0x56a   :  { %7160 = vmatpush1.bf16.msra.mxu1 %v19378_v2  ;;  %7120 = vmatprep.subr.bf16.mxu0 %v19383_v36  ;;  %v19453_v2 = vld [vmem:[#allocation7 + $0x800] ss:$48 sps:$4 sm:$0xff]   ;;  %v19456_v36 = vld [vmem:[#allocation7 + $0x208] ss:$48 sps:$4 sm:$0xff]  }
 0x56b   :  { %7161 = vmatprep.subr.bf16.mxu1 %v19386_v17  ;;  %v19461_v17 = vld [vmem:[#allocation7 + $0x864] ss:$48 sps:$4 sm:$0xff]  }
 0x56d   :  { %7121 = vmatpush1.bf16.msra.mxu0 %v19381_v8 }
 0x56e   :  { %7162 = vmatpush1.bf16.msra.mxu1 %v19384_v18  ;;  %7122 = vmatprep.subr.bf16.mxu0 %v19389_v19  ;;  %v19464_v19 = vld [vmem:[#allocation7 + $0x26c] ss:$48 sps:$4 sm:$0xff]  }
 0x56f   :  { %7163 = vmatprep.subr.bf16.mxu1 %v19392_v55 }
 0x571   :  { %7123 = vmatpush1.bf16.msra.mxu0 %v19387_v58 }
 0x572   :  { %7164 = vmatpush1.bf16.msra.mxu1 %v19390_v21  ;;  %7124 = vmatprep.subr.bf16.mxu0 %v19395_v23 }
 0x573   :  { %7165 = vmatprep.subr.bf16.mxu1 %v19398_v24 }
 0x575   :  { %7125 = vmatpush1.bf16.msra.mxu0 %v19393_v25 }
 0x576   :  { %7166 = vmatpush1.bf16.msra.mxu1 %v19396_v27  ;;  %7126 = vmatprep.subr.bf16.mxu0 %v19401_v29  ;;  %v19459_v27 = vld [vmem:[#allocation7 + $0x860] ss:$48 sps:$4 sm:$0xff]  }
 0x577   :  { %7167 = vmatprep.subr.bf16.mxu1 %v19404_v46 }
 0x579   :  { %7127 = vmatpush1.bf16.msra.mxu0 %v19399_v26  ;;  %v19462_v26 = vld [vmem:[#allocation7 + $0x268] ss:$48 sps:$4 sm:$0xff]  }
 0x57a   :  { %7168 = vmatpush1.bf16.msra.mxu1 %v19402_v48  ;;  %7128 = vmatprep.subr.bf16.mxu0 %v19407_v30  ;;  %v19467_v48 = vld [vmem:[#allocation7 + $0x8c4] ss:$48 sps:$4 sm:$0xff]   ;;  %v19470_v30 = vld [vmem:[#allocation7 + $0x2cc] ss:$48 sps:$4 sm:$0xff]  }
 0x57b   :  { %7169 = vmatprep.subr.bf16.mxu1 %v19410_v32  ;;  %v19468_v32 = vld [vmem:[#allocation7 + $0x2c8] ss:$48 sps:$4 sm:$0xff]  }
 0x57d   :  { %7129 = vmatpush1.bf16.msra.mxu0 %v19405_v4  ;;  %v19473_v4 = vld [vmem:[#allocation7 + $0x924] ss:$48 sps:$4 sm:$0xff]  }
 0x57e   :  { %7170 = vmatpush1.bf16.msra.mxu1 %v19408_v39  ;;  %7130 = vmatprep.subr.bf16.mxu0 %v19413_v40  ;;  %v19471_v39 = vld [vmem:[#allocation7 + $0x920] ss:$48 sps:$4 sm:$0xff]   ;;  %v19474_v40 = vld [vmem:[#allocation7 + $0x328] ss:$48 sps:$4 sm:$0xff]  }
 0x57f   :  { %7171 = vmatprep.subr.bf16.mxu1 %v19416_v0  ;;  %v19479_v0 = vld [vmem:[#allocation7 + $0x984] ss:$48 sps:$4 sm:$0xff]  }
 0x581   :  { %7131 = vmatpush1.bf16.msra.mxu0 %v19411_v31  ;;  %v19482_v31 = vld [vmem:[#allocation7 + $0x38c] ss:$48 sps:$4 sm:$0xff]  }
 0x582   :  { %7172 = vmatpush1.bf16.msra.mxu1 %v19414_v38  ;;  %7132 = vmatprep.subr.bf16.mxu0 %v19419_v41  ;;  %v19477_v38 = vld [vmem:[#allocation7 + $0x980] ss:$48 sps:$4 sm:$0xff]   ;;  %v19480_v41 = vld [vmem:[#allocation7 + $0x388] ss:$48 sps:$4 sm:$0xff]  }
 0x583   :  { %7173 = vmatprep.subr.bf16.mxu1 %v19422_v42  ;;  %v19485_v42 = vld [vmem:[#allocation7 + $0x9e4] ss:$48 sps:$4 sm:$0xff]  }
 0x585   :  { %7133 = vmatpush1.bf16.msra.mxu0 %v19417_v45  ;;  %v19488_v45 = vld [vmem:[#allocation7 + $0x3ec] ss:$48 sps:$4 sm:$0xff]  }
 0x586   :  { %7174 = vmatpush1.bf16.msra.mxu1 %v19420_v43  ;;  %7184 = vmatprep.subr.bf16.mxu0 %v19425_v44  ;;  %v19483_v43 = vld [vmem:[#allocation7 + $0x9e0] ss:$48 sps:$4 sm:$0xff]   ;;  %v19486_v44 = vld [vmem:[#allocation7 + $0x3e8] ss:$48 sps:$4 sm:$0xff]  }
 0x587   :  { %7225 = vmatprep.subr.bf16.mxu1 %v19428_v52  ;;  %v19491_v52 = vld [vmem:[#allocation7 + $0xa44] ss:$48 sps:$4 sm:$0xff]  }
 0x588   :  { %7135 = vmatmul.mubr.bf16.vlgmr.msra.gmra.mrb[52].mxu0 %v22148_v61 }
 0x589   :  { %7176 = vmatmul.mubr.bf16.vlgmr.msra.gmra.mrb[52].mxu1 %v22105_v22  ;;  %7185 = vmatpush1.bf16.msra.mxu0 %v19423_v34  ;;  %v19494_v34 = vld [vmem:[#allocation7 + $0x44c] ss:$48 sps:$4 sm:$0xff]  }
 0x58a   :  { %7216 = vmatprep.mubr.bf16.mxu0 %v22143_v59  ;;  %7226 = vmatpush1.bf16.msra.mxu1 %v19426_v10  ;;  %v19489_v10 = vld [vmem:[#allocation7 + $0xa40] ss:$48 sps:$4 sm:$0xff]  }
 0x58b   :  { %7257 = vmatprep.mubr.bf16.mxu1 %v22100_v20  ;;  %7186 = vmatprep.subr.bf16.mxu0 %v19431_v37  ;;  %v19447_v20 = vld [vmem:[#allocation7 + $0x7a0] ss:$48 sps:$4 sm:$0xff]   ;;  %v19492_v37 = vld [vmem:[#allocation7 + $0x448] ss:$48 sps:$4 sm:$0xff]  }
 0x58c   :  { %7227 = vmatprep.subr.bf16.mxu1 %v19434_v49  ;;  %v19497_v49 = vld [vmem:[#allocation7 + $0xaa4] ss:$48 sps:$4 sm:$0xff]  }
 0x58d   :  { %7187 = vmatpush1.bf16.msra.mxu0 %v19429_v50  ;;  %v19500_v50 = vld [vmem:[#allocation7 + $0x4ac] ss:$48 sps:$4 sm:$0xff]  }
 0x58e   :  { %7228 = vmatpush1.bf16.msra.mxu1 %v19432_v28  ;;  %7188 = vmatprep.subr.bf16.mxu0 %v19437_v1  ;;  %v19495_v28 = vld [vmem:[#allocation7 + $0xaa0] ss:$48 sps:$4 sm:$0xff]   ;;  %v19498_v1 = vld [vmem:[#allocation7 + $0x4a8] ss:$48 sps:$4 sm:$0xff]  }
 0x58f   :  { %7229 = vmatprep.subr.bf16.mxu1 %v19440_v57  ;;  %v19503_v57 = vld [vmem:[#allocation7 + $0xb04] ss:$48 sps:$4 sm:$0xff]  }
 0x591   :  { %7189 = vmatpush1.bf16.msra.mxu0 %v19435_v47  ;;  %v19506_v47 = vld [vmem:[#allocation7 + $0x50c] ss:$48 sps:$4 sm:$0xff]  }
 0x592   :  { %7230 = vmatpush1.bf16.msra.mxu1 %v19438_v54  ;;  %7190 = vmatprep.subr.bf16.mxu0 %v19443_v60  ;;  %v19501_v54 = vld [vmem:[#allocation7 + $0xb00] ss:$48 sps:$4 sm:$0xff]   ;;  %v19504_v60 = vld [vmem:[#allocation7 + $0x508] ss:$48 sps:$4 sm:$0xff]  }
 0x593   :  { %7231 = vmatprep.subr.bf16.mxu1 %v19446_v14  ;;  %v19509_v14 = vld [vmem:[#allocation7 + $0xb64] ss:$48 sps:$4 sm:$0xff]  }
 0x595   :  { %7191 = vmatpush1.bf16.msra.mxu0 %v19441_v16  ;;  %v19512_v16 = vld [vmem:[#allocation7 + $0x56c] ss:$48 sps:$4 sm:$0xff]  }
 0x596   :  { %7232 = vmatpush1.bf16.msra.mxu1 %v19444_v15  ;;  %7192 = vmatprep.subr.bf16.mxu0 %v19449_v3  ;;  %v19507_v15 = vld [vmem:[#allocation7 + $0xb60] ss:$48 sps:$4 sm:$0xff]   ;;  %v19510_v3 = vld [vmem:[#allocation7 + $0x568] ss:$48 sps:$4 sm:$0xff]  }
 0x597   :  { %7233 = vmatprep.subr.bf16.mxu1 %v19452_v33  ;;  %v19515_v33 = vld [vmem:[#allocation7 + $0xbc4] ss:$48 sps:$4 sm:$0xff]  }
 0x599   :  { %7193 = vmatpush1.bf16.msra.mxu0 %v19447_v20  ;;  %v19518_v20 = vld [vmem:[#allocation7 + $0x5cc] ss:$48 sps:$4 sm:$0xff]  }
 0x59a   :  { %7234 = vmatpush1.bf16.msra.mxu1 %v19450_v9  ;;  %7194 = vmatprep.subr.bf16.mxu0 %v19455_v11  ;;  %v19513_v9 = vld [vmem:[#allocation7 + $0xbc0] ss:$48 sps:$4 sm:$0xff]   ;;  %v19516_v11 = vld [vmem:[#allocation7 + $0x5c8] ss:$48 sps:$4 sm:$0xff]  }
 0x59b   :  { %v22171_v8 = vpop.f32.mrb[40].mxu1  ;;  %v6890_v18 = vpop.f32.mrb[40].mxu0  ;;  %7235 = vmatprep.subr.bf16.mxu1 %v19458_v62  ;;  %v19521_v62 = vld [vmem:[#allocation7 + $0x62c] ss:$48 sps:$4 sm:$0xff]  }
 0x59c   :  { %v22174_v55 = vadd.f32 %v6890_v18, %v22163_v56  ;;  %v22176_v58 = vpop.f32.mrb[41].mxu1  ;;  %v6892_v21 = vpop.f32.mrb[41].mxu0  ;;  %v19465_v56 = vld [vmem:[#allocation7 + $0x8c0] ss:$48 sps:$4 sm:$0xff]   ;;  %v19524_v18 = vld [vmem:[#allocation7 + $0x68c] ss:$48 sps:$4 sm:$0xff]  }
 0x59d   :  { %v22179_v23 = vadd.f32 %v6892_v21, %v22165_v13  ;;  %v6935_v24 = vpop.f32.mrb[42].mxu1  ;;  %7195 = vmatpush1.bf16.msra.mxu0 %v19453_v2  ;;  %v6894_v25 = vpop.f32.mrb[42].mxu0  ;;  %v19476_v13 = vld [vmem:[#allocation7 + $0x32c] ss:$48 sps:$4 sm:$0xff]   ;;  %v19569_v2 = vld [vmem:[#allocation9 + $0x4] ss:$48 sps:$4 sm:$0xff]  }
 0x59e   :  { %7236 = vmatpush1.bf16.msra.mxu1 %v19456_v36  ;;  %v6936_v29 = vpop.f32.mrb[43].mxu1  ;;  %v6895_v46 = vpop.f32.mrb[43].mxu0  ;;  %7196 = vmatprep.subr.bf16.mxu0 %v19461_v17  ;;  %v16572_v36 = vld [vmem:[%s22726_s25 + $0x28] sm:$0xff]  ;;  %v19575_v24 = vld [vmem:[#allocation9 + $0x64] ss:$48 sps:$4 sm:$0xff]  }
 0x59f   :  { %7237 = vmatprep.subr.bf16.mxu1 %v19464_v19  ;;  %v19519_v17 = vld [vmem:[#allocation7 + $0x628] ss:$48 sps:$4 sm:$0xff]   ;;  %v19567_v19 = vld [vmem:[#allocation9] ss:$48 sps:$4 sm:$0xff]   ;;  %v22184_v21 = vpack.c.bf16 %v16572_v36, %v16572_v36  ;;  %v19581_v46 = vld [vmem:[#allocation9 + $0xc4] ss:$48 sps:$4 sm:$0xff]  }
 0x5a0   :  { %v19522_v25 = vld [vmem:[#allocation7 + $0x688] ss:$48 sps:$4 sm:$0xff]   ;;  %v19573_v29 = vld [vmem:[#allocation9 + $0x60] ss:$48 sps:$4 sm:$0xff]   ;;  %v19554_v36 = vld [vmem:[#allocation7 + $0xa4c] ss:$48 sps:$4 sm:$0xff]  }
 0x5a1   :  { %7197 = vmatpush1.bf16.msra.mxu0 %v19459_v27  ;;  %v19527_v27 = vld [vmem:[#allocation7 + $0x6ec] ss:$48 sps:$4 sm:$0xff]  }
 0x5a2   :  { %7238 = vmatpush1.bf16.msra.mxu1 %v19462_v26  ;;  %7198 = vmatprep.subr.bf16.mxu0 %v19467_v48  ;;  %v19525_v26 = vld [vmem:[#allocation7 + $0x6e8] ss:$48 sps:$4 sm:$0xff]   ;;  %v19530_v48 = vld [vmem:[#allocation7 + $0x74c] ss:$48 sps:$4 sm:$0xff]  }
 0x5a3   :  { %7239 = vmatprep.subr.bf16.mxu1 %v19470_v30  ;;  %v19579_v30 = vld [vmem:[#allocation9 + $0xc0] ss:$48 sps:$4 sm:$0xff]  }
 0x5a5   :  { %7199 = vmatpush1.bf16.msra.mxu0 %v19465_v56  ;;  %v19528_v56 = vld [vmem:[#allocation7 + $0x748] ss:$48 sps:$4 sm:$0xff]  }
 0x5a6   :  { %7240 = vmatpush1.bf16.msra.mxu1 %v19468_v32  ;;  %7200 = vmatprep.subr.bf16.mxu0 %v19473_v4  ;;  %v19585_v32 = vld [vmem:[#allocation9 + $0x120] ss:$48 sps:$4 sm:$0xff]   ;;  %v19593_v4 = vld [vmem:[#allocation9 + $0x184] ss:$48 sps:$4 sm:$0xff]  }
 0x5a7   :  { %7241 = vmatprep.subr.bf16.mxu1 %v19476_v13  ;;  %v19531_v13 = vld [vmem:[#allocation7 + $0x7a8] ss:$48 sps:$4 sm:$0xff]  }
 0x5a9   :  { %7201 = vmatpush1.bf16.msra.mxu0 %v19471_v39  ;;  %v19536_v39 = vld [vmem:[#allocation7 + $0x80c] ss:$48 sps:$4 sm:$0xff]  }
 0x5aa   :  { %7242 = vmatpush1.bf16.msra.mxu1 %v19474_v40  ;;  %7202 = vmatprep.subr.bf16.mxu0 %v19479_v0  ;;  %v19591_v40 = vld [vmem:[#allocation9 + $0x180] ss:$48 sps:$4 sm:$0xff]   ;;  %v19599_v0 = vld [vmem:[#allocation9 + $0x1e4] ss:$48 sps:$4 sm:$0xff]  }
 0x5ab   :  { %7243 = vmatprep.subr.bf16.mxu1 %v19482_v31  ;;  %v19534_v31 = vld [vmem:[#allocation7 + $0x808] ss:$48 sps:$4 sm:$0xff]  }
 0x5ad   :  { %7203 = vmatpush1.bf16.msra.mxu0 %v19477_v38  ;;  %v19539_v38 = vld [vmem:[#allocation7 + $0x86c] ss:$48 sps:$4 sm:$0xff]  }
 0x5ae   :  { %7244 = vmatpush1.bf16.msra.mxu1 %v19480_v41  ;;  %7204 = vmatprep.subr.bf16.mxu0 %v19485_v42 }
 0x5af   :  { %7245 = vmatprep.subr.bf16.mxu1 %v19488_v45  ;;  %v19597_v45 = vld [vmem:[#allocation9 + $0x1e0] ss:$48 sps:$4 sm:$0xff]  }
 0x5b1   :  { %7205 = vmatpush1.bf16.msra.mxu0 %v19483_v43 }
 0x5b2   :  { %7246 = vmatpush1.bf16.msra.mxu1 %v19486_v44  ;;  %7206 = vmatprep.subr.bf16.mxu0 %v19491_v52 }
 0x5b3   :  { %7247 = vmatprep.subr.bf16.mxu1 %v19494_v34  ;;  %v19605_v34 = vld [vmem:[#allocation9 + $0x244] ss:$48 sps:$4 sm:$0xff]  }
 0x5b5   :  { %7207 = vmatpush1.bf16.msra.mxu0 %v19489_v10 }
 0x5b6   :  { %7248 = vmatpush1.bf16.msra.mxu1 %v19492_v37  ;;  %7208 = vmatprep.subr.bf16.mxu0 %v19497_v49 }
 0x5b7   :  { %7249 = vmatprep.subr.bf16.mxu1 %v19500_v50  ;;  %v19537_v50 = vld [vmem:[#allocation7 + $0x868] ss:$48 sps:$4 sm:$0xff]  }
 0x5b9   :  { %7209 = vmatpush1.bf16.msra.mxu0 %v19495_v28 }
 0x5ba   :  { %7250 = vmatpush1.bf16.msra.mxu1 %v19498_v1  ;;  %7210 = vmatprep.subr.bf16.mxu0 %v19503_v57  ;;  %v19542_v57 = vld [vmem:[#allocation7 + $0x8cc] ss:$48 sps:$4 sm:$0xff]  }
 0x5bb   :  { %7251 = vmatprep.subr.bf16.mxu1 %v19506_v47  ;;  %v19603_v47 = vld [vmem:[#allocation9 + $0x240] ss:$48 sps:$4 sm:$0xff]  }
 0x5bd   :  { %7211 = vmatpush1.bf16.msra.mxu0 %v19501_v54  ;;  %v19540_v54 = vld [vmem:[#allocation7 + $0x8c8] ss:$48 sps:$4 sm:$0xff]  }
 0x5be   :  { %7252 = vmatpush1.bf16.msra.mxu1 %v19504_v60  ;;  %7212 = vmatprep.subr.bf16.mxu0 %v19509_v14  ;;  %v19545_v60 = vld [vmem:[#allocation7 + $0x92c] ss:$48 sps:$4 sm:$0xff]   ;;  %v19609_v14 = vld [vmem:[#allocation9 + $0x2a0] ss:$48 sps:$4 sm:$0xff]  }
 0x5bf   :  { %7253 = vmatprep.subr.bf16.mxu1 %v19512_v16  ;;  %v19543_v16 = vld [vmem:[#allocation7 + $0x928] ss:$48 sps:$4 sm:$0xff]  }
 0x5c1   :  { %7213 = vmatpush1.bf16.msra.mxu0 %v19507_v15  ;;  %v19548_v15 = vld [vmem:[#allocation7 + $0x98c] ss:$48 sps:$4 sm:$0xff]  }
 0x5c2   :  { %7254 = vmatpush1.bf16.msra.mxu1 %v19510_v3  ;;  %7214 = vmatprep.subr.bf16.mxu0 %v19515_v33  ;;  %v19615_v3 = vld [vmem:[#allocation9 + $0x300] ss:$48 sps:$4 sm:$0xff]   ;;  %v19623_v33 = vld [vmem:[#allocation9 + $0x364] ss:$48 sps:$4 sm:$0xff]  }
 0x5c3   :  { %7255 = vmatprep.subr.bf16.mxu1 %v19518_v20  ;;  %v19546_v20 = vld [vmem:[#allocation7 + $0x988] ss:$48 sps:$4 sm:$0xff]  }
 0x5c5   :  { %7215 = vmatpush1.bf16.msra.mxu0 %v19513_v9  ;;  %v19551_v9 = vld [vmem:[#allocation7 + $0x9ec] ss:$48 sps:$4 sm:$0xff]  }
 0x5c6   :  { %7256 = vmatpush1.bf16.msra.mxu1 %v19516_v11  ;;  %7266 = vmatprep.subr.bf16.mxu0 %v19521_v62  ;;  %v19621_v11 = vld [vmem:[#allocation9 + $0x360] ss:$48 sps:$4 sm:$0xff]   ;;  %v19629_v62 = vld [vmem:[#allocation9 + $0x3c4] ss:$48 sps:$4 sm:$0xff]  }
 0x5c7   :  { %9231 = vmatprep.subr.bf16.mxu1 %v19569_v2  ;;  %v19549_v2 = vld [vmem:[#allocation7 + $0x9e8] ss:$48 sps:$4 sm:$0xff]  }
 0x5c8   :  { %7217 = vmatmul.mubr.bf16.vlgmr.msra.gmra.mrb[56].mxu0 %v22148_v61 }
 0x5c9   :  { %7258 = vmatmul.mubr.bf16.vlgmr.msra.gmra.mrb[56].mxu1 %v22105_v22  ;;  %7267 = vmatpush1.bf16.msra.mxu0 %v19519_v17  ;;  %v19587_v22 = vld [vmem:[#allocation9 + $0x124] ss:$48 sps:$4 sm:$0xff]   ;;  %v19627_v17 = vld [vmem:[#allocation9 + $0x3c0] ss:$48 sps:$4 sm:$0xff]  }
 0x5ca   :  { %7298 = vmatprep.mubr.bf16.mxu0 %v22143_v59  ;;  %7268 = vmatprep.subr.bf16.mxu0 %v19524_v18  ;;  %v19533_v59 = vld [vmem:[#allocation7 + $0x7ac] ss:$48 sps:$4 sm:$0xff]   ;;  %v19635_v18 = vld [vmem:[#allocation9 + $0x424] ss:$48 sps:$4 sm:$0xff]  }
 0x5cb   :  { %9232 = vmatpush1.bf16.msra.mxu1 %v19567_v19  ;;  %9263 = vmatprep.mubr.bf16.mxu1 %v22184_v21  ;;  %v19552_v19 = vld [vmem:[#allocation7 + $0xa48] ss:$48 sps:$4 sm:$0xff]  }
 0x5cc   :  { %9233 = vmatprep.subr.bf16.mxu1 %v19575_v24  ;;  %v19557_v24 = vld [vmem:[#allocation7 + $0xaac] ss:$48 sps:$4 sm:$0xff]  }
 0x5cd   :  { %7269 = vmatpush1.bf16.msra.mxu0 %v19522_v25  ;;  %v19633_v25 = vld [vmem:[#allocation9 + $0x420] ss:$48 sps:$4 sm:$0xff]  }
 0x5ce   :  { %7270 = vmatprep.subr.bf16.mxu0 %v19527_v27  ;;  %v19641_v27 = vld [vmem:[#allocation9 + $0x484] ss:$48 sps:$4 sm:$0xff]  }
 0x5cf   :  { %9234 = vmatpush1.bf16.msra.mxu1 %v19573_v29  ;;  %v19555_v29 = vld [vmem:[#allocation7 + $0xaa8] ss:$48 sps:$4 sm:$0xff]  }
 0x5d0   :  { %9235 = vmatprep.subr.bf16.mxu1 %v19581_v46  ;;  %v19560_v46 = vld [vmem:[#allocation7 + $0xb0c] ss:$48 sps:$4 sm:$0xff]  }
 0x5d1   :  { %7271 = vmatpush1.bf16.msra.mxu0 %v19525_v26  ;;  %v19639_v26 = vld [vmem:[#allocation9 + $0x480] ss:$48 sps:$4 sm:$0xff]  }
 0x5d2   :  { %7272 = vmatprep.subr.bf16.mxu0 %v19530_v48  ;;  %v19647_v48 = vld [vmem:[#allocation9 + $0x4e4] ss:$48 sps:$4 sm:$0xff]  }
 0x5d3   :  { %9236 = vmatpush1.bf16.msra.mxu1 %v19579_v30  ;;  %v19558_v30 = vld [vmem:[#allocation7 + $0xb08] ss:$48 sps:$4 sm:$0xff]  }
 0x5d4   :  { %9237 = vmatprep.subr.bf16.mxu1 %v19587_v22  ;;  %v19563_v22 = vld [vmem:[#allocation7 + $0xb6c] ss:$48 sps:$4 sm:$0xff]  }
 0x5d5   :  { %7273 = vmatpush1.bf16.msra.mxu0 %v19528_v56  ;;  %v19645_v56 = vld [vmem:[#allocation9 + $0x4e0] ss:$48 sps:$4 sm:$0xff]  }
 0x5d6   :  { %7274 = vmatprep.subr.bf16.mxu0 %v19533_v59  ;;  %v19653_v59 = vld [vmem:[#allocation9 + $0x544] ss:$48 sps:$4 sm:$0xff]  }
 0x5d7   :  { %9238 = vmatpush1.bf16.msra.mxu1 %v19585_v32  ;;  %v19561_v32 = vld [vmem:[#allocation7 + $0xb68] ss:$48 sps:$4 sm:$0xff]  }
 0x5d8   :  { %9239 = vmatprep.subr.bf16.mxu1 %v19593_v4  ;;  %v19566_v4 = vld [vmem:[#allocation7 + $0xbcc] ss:$48 sps:$4 sm:$0xff]  }
 0x5d9   :  { %7275 = vmatpush1.bf16.msra.mxu0 %v19531_v13  ;;  %v19651_v13 = vld [vmem:[#allocation9 + $0x540] ss:$48 sps:$4 sm:$0xff]  }
 0x5da   :  { %7276 = vmatprep.subr.bf16.mxu0 %v19536_v39  ;;  %v19659_v39 = vld [vmem:[#allocation9 + $0x5a4] ss:$48 sps:$4 sm:$0xff]  }
 0x5db   :  { %v6972_v41 = vpop.f32.mrb[44].mxu0  ;;  %v22190_v42 = vpop.f32.mrb[44].mxu1  ;;  %9240 = vmatpush1.bf16.msra.mxu1 %v19591_v40  ;;  %v19564_v40 = vld [vmem:[#allocation7 + $0xbc8] ss:$48 sps:$4 sm:$0xff]  }
 0x5dc   :  { %v22193_v43 = vadd.f32 %v6972_v41, %v22171_v8  ;;  %v6974_v44 = vpop.f32.mrb[45].mxu0  ;;  %v22195_v52 = vpop.f32.mrb[45].mxu1  ;;  %9241 = vmatprep.subr.bf16.mxu1 %v19599_v0  ;;  %v19611_v8 = vld [vmem:[#allocation9 + $0x2a4] ss:$48 sps:$4 sm:$0xff]  }
 0x5dd   :  { %v22198_v10 = vadd.f32 %v6974_v44, %v22176_v58  ;;  %v6976_v37 = vpop.f32.mrb[46].mxu0  ;;  %v7017_v49 = vpop.f32.mrb[46].mxu1  ;;  %7277 = vmatpush1.bf16.msra.mxu0 %v19534_v31  ;;  %v19617_v58 = vld [vmem:[#allocation9 + $0x304] ss:$48 sps:$4 sm:$0xff]   ;;  %v16574_v31 = vld [vmem:[%s22726_s25 + $0x38] sm:$0xff] }
 0x5de   :  { %v6977_v28 = vpop.f32.mrb[47].mxu0  ;;  %v7018_v1 = vpop.f32.mrb[47].mxu1  ;;  %7278 = vmatprep.subr.bf16.mxu0 %v19539_v38  ;;  %v19572_v0 = vld [vmem:[#allocation9 + $0x604] ss:$48 sps:$4 sm:$0xff]   ;;  %v19657_v38 = vld [vmem:[#allocation9 + $0x5a0] ss:$48 sps:$4 sm:$0xff]  }
 0x5df   :  { %9242 = vmatpush1.bf16.msra.mxu1 %v19597_v45  ;;  %v16571_v41 = vld [vmem:[%s22726_s25 + $0x20] sm:$0xff]  ;;  %v19665_v45 = vld [vmem:[#allocation9 + $0xc] ss:$48 sps:$4 sm:$0xff]  }
 0x5e0   :  { %9243 = vmatprep.subr.bf16.mxu1 %v19605_v34  ;;  %v19570_v44 = vld [vmem:[#allocation9 + $0x600] ss:$48 sps:$4 sm:$0xff]   ;;  %v22206_v34 = vpack.c.bf16 %v16574_v31, %v16574_v31  ;;  %v19578_v37 = vld [vmem:[#allocation9 + $0x664] ss:$48 sps:$4 sm:$0xff]   ;;  %v22208_v49 = vpack.c.bf16 %v16571_v41, %v16571_v41  ;;  %v19671_v28 = vld [vmem:[#allocation9 + $0x6c] ss:$48 sps:$4 sm:$0xff]  }
 0x5e1   :  { %7279 = vmatpush1.bf16.msra.mxu0 %v19537_v50  ;;  %v19663_v50 = vld [vmem:[#allocation9 + $0x8] ss:$48 sps:$4 sm:$0xff]   ;;  %v19576_v1 = vld [vmem:[#allocation9 + $0x660] ss:$48 sps:$4 sm:$0xff]   ;;  %v19719_v31 = vld [vmem:[#allocation9 + $0x36c] ss:$48 sps:$4 sm:$0xff]  }
 0x5e2   :  { %7280 = vmatprep.subr.bf16.mxu0 %v19542_v57  ;;  %v19584_v57 = vld [vmem:[#allocation9 + $0x6c4] ss:$48 sps:$4 sm:$0xff]  }
 0x5e3   :  { %9244 = vmatpush1.bf16.msra.mxu1 %v19603_v47  ;;  %v19669_v47 = vld [vmem:[#allocation9 + $0x68] ss:$48 sps:$4 sm:$0xff]   ;;  %v19632_v41 = vld [vmem:[#allocation9 + $0x9c4] ss:$48 sps:$4 sm:$0xff]  }
 0x5e4   :  { %9245 = vmatprep.subr.bf16.mxu1 %v19611_v8  ;;  %v19677_v8 = vld [vmem:[#allocation9 + $0xcc] ss:$48 sps:$4 sm:$0xff]  }
 0x5e5   :  { %7281 = vmatpush1.bf16.msra.mxu0 %v19540_v54  ;;  %v19582_v54 = vld [vmem:[#allocation9 + $0x6c0] ss:$48 sps:$4 sm:$0xff]  }
 0x5e6   :  { %7282 = vmatprep.subr.bf16.mxu0 %v19545_v60  ;;  %v19675_v60 = vld [vmem:[#allocation9 + $0xc8] ss:$48 sps:$4 sm:$0xff]  }
 0x5e7   :  { %9246 = vmatpush1.bf16.msra.mxu1 %v19609_v14  ;;  %v19683_v14 = vld [vmem:[#allocation9 + $0x12c] ss:$48 sps:$4 sm:$0xff]  }
 0x5e8   :  { %9247 = vmatprep.subr.bf16.mxu1 %v19617_v58  ;;  %v19588_v58 = vld [vmem:[#allocation9 + $0x720] ss:$48 sps:$4 sm:$0xff]  }
 0x5e9   :  { %7283 = vmatpush1.bf16.msra.mxu0 %v19543_v16  ;;  %v19596_v16 = vld [vmem:[#allocation9 + $0x784] ss:$48 sps:$4 sm:$0xff]  }
 0x5ea   :  { %7284 = vmatprep.subr.bf16.mxu0 %v19548_v15  ;;  %v19681_v15 = vld [vmem:[#allocation9 + $0x128] ss:$48 sps:$4 sm:$0xff]  }
 0x5eb   :  { %9248 = vmatpush1.bf16.msra.mxu1 %v19615_v3  ;;  %v19689_v3 = vld [vmem:[#allocation9 + $0x18c] ss:$48 sps:$4 sm:$0xff]  }
 0x5ec   :  { %9249 = vmatprep.subr.bf16.mxu1 %v19623_v33  ;;  %v19594_v33 = vld [vmem:[#allocation9 + $0x780] ss:$48 sps:$4 sm:$0xff]  }
 0x5ed   :  { %7285 = vmatpush1.bf16.msra.mxu0 %v19546_v20  ;;  %v19602_v20 = vld [vmem:[#allocation9 + $0x7e4] ss:$48 sps:$4 sm:$0xff]  }
 0x5ee   :  { %7286 = vmatprep.subr.bf16.mxu0 %v19551_v9  ;;  %v19687_v9 = vld [vmem:[#allocation9 + $0x188] ss:$48 sps:$4 sm:$0xff]  }
 0x5ef   :  { %9250 = vmatpush1.bf16.msra.mxu1 %v19621_v11  ;;  %v19695_v11 = vld [vmem:[#allocation9 + $0x1ec] ss:$48 sps:$4 sm:$0xff]  }
 0x5f0   :  { %9251 = vmatprep.subr.bf16.mxu1 %v19629_v62  ;;  %v19600_v62 = vld [vmem:[#allocation9 + $0x7e0] ss:$48 sps:$4 sm:$0xff]  }
 0x5f1   :  { %7287 = vmatpush1.bf16.msra.mxu0 %v19549_v2  ;;  %v19608_v2 = vld [vmem:[#allocation9 + $0x844] ss:$48 sps:$4 sm:$0xff]  }
 0x5f2   :  { %7288 = vmatprep.subr.bf16.mxu0 %v19554_v36 }
 0x5f3   :  { %9252 = vmatpush1.bf16.msra.mxu1 %v19627_v17  ;;  %v19693_v17 = vld [vmem:[#allocation9 + $0x1e8] ss:$48 sps:$4 sm:$0xff]  }
 0x5f4   :  { %9253 = vmatprep.subr.bf16.mxu1 %v19635_v18 }
 0x5f5   :  { %7289 = vmatpush1.bf16.msra.mxu0 %v19552_v19 }
 0x5f6   :  { %7290 = vmatprep.subr.bf16.mxu0 %v19557_v24 }
 0x5f7   :  { %9254 = vmatpush1.bf16.msra.mxu1 %v19633_v25  ;;  %v19701_v25 = vld [vmem:[#allocation9 + $0x24c] ss:$48 sps:$4 sm:$0xff]  }
 0x5f8   :  { %9255 = vmatprep.subr.bf16.mxu1 %v19641_v27 }
 0x5f9   :  { %7291 = vmatpush1.bf16.msra.mxu0 %v19555_v29 }
 0x5fa   :  { %7292 = vmatprep.subr.bf16.mxu0 %v19560_v46 }
 0x5fb   :  { %9256 = vmatpush1.bf16.msra.mxu1 %v19639_v26  ;;  %v19606_v26 = vld [vmem:[#allocation9 + $0x840] ss:$48 sps:$4 sm:$0xff]  }
 0x5fc   :  { %9257 = vmatprep.subr.bf16.mxu1 %v19647_v48 }
 0x5fd   :  { %7293 = vmatpush1.bf16.msra.mxu0 %v19558_v30 }
 0x5fe   :  { %7294 = vmatprep.subr.bf16.mxu0 %v19563_v22  ;;  %v19614_v22 = vld [vmem:[#allocation9 + $0x8a4] ss:$48 sps:$4 sm:$0xff]  }
 0x5ff   :  { %9258 = vmatpush1.bf16.msra.mxu1 %v19645_v56 }
 0x600   :  { %9259 = vmatprep.subr.bf16.mxu1 %v19653_v59  ;;  %v19707_v59 = vld [vmem:[#allocation9 + $0x2ac] ss:$48 sps:$4 sm:$0xff]  }
 0x601   :  { %7295 = vmatpush1.bf16.msra.mxu0 %v19561_v32  ;;  %v19612_v32 = vld [vmem:[#allocation9 + $0x8a0] ss:$48 sps:$4 sm:$0xff]  }
 0x602   :  { %7296 = vmatprep.subr.bf16.mxu0 %v19566_v4  ;;  %v19620_v4 = vld [vmem:[#allocation9 + $0x904] ss:$48 sps:$4 sm:$0xff]  }
 0x603   :  { %9260 = vmatpush1.bf16.msra.mxu1 %v19651_v13  ;;  %v19713_v13 = vld [vmem:[#allocation9 + $0x30c] ss:$48 sps:$4 sm:$0xff]  }
 0x604   :  { %9261 = vmatprep.subr.bf16.mxu1 %v19659_v39  ;;  %v19618_v39 = vld [vmem:[#allocation9 + $0x900] ss:$48 sps:$4 sm:$0xff]  }
 0x605   :  { %7297 = vmatpush1.bf16.msra.mxu0 %v19564_v40  ;;  %v19626_v40 = vld [vmem:[#allocation9 + $0x964] ss:$48 sps:$4 sm:$0xff]  }
 0x606   :  { %9272 = vmatprep.subr.bf16.mxu0 %v19572_v0  ;;  %v19711_v0 = vld [vmem:[#allocation9 + $0x308] ss:$48 sps:$4 sm:$0xff]  }
 0x607   :  { %9262 = vmatpush1.bf16.msra.mxu1 %v19657_v38  ;;  %v19624_v38 = vld [vmem:[#allocation9 + $0x960] ss:$48 sps:$4 sm:$0xff]  }
 0x608   :  { %7299 = vmatmul.mubr.bf16.vlgmr.msra.gmra.mrb[60].mxu0 %v22148_v61  ;;  %9313 = vmatprep.subr.bf16.mxu1 %v19665_v45  ;;  %v19590_v61 = vld [vmem:[#allocation9 + $0x724] ss:$48 sps:$4 sm:$0xff]   ;;  %v19717_v45 = vld [vmem:[#allocation9 + $0x368] ss:$48 sps:$4 sm:$0xff]  }
 0x609   :  { %9273 = vmatpush1.bf16.msra.mxu0 %v19570_v44  ;;  %9304 = vmatprep.mubr.bf16.mxu0 %v22206_v34  ;;  %v19725_v44 = vld [vmem:[#allocation9 + $0x3cc] ss:$48 sps:$4 sm:$0xff]  }
 0x60a   :  { %9274 = vmatprep.subr.bf16.mxu0 %v19578_v37  ;;  %9264 = vmatmul.mubr.bf16.vlgmr.msra.gmra.mrb[60].mxu1 %v22208_v49  ;;  %v19630_v37 = vld [vmem:[#allocation9 + $0x9c0] ss:$48 sps:$4 sm:$0xff]  }
 0x60b   :  { %9314 = vmatpush1.bf16.msra.mxu1 %v19663_v50  ;;  %9345 = vmatprep.mubr.bf16.mxu1 %v22184_v21  ;;  %v19638_v50 = vld [vmem:[#allocation9 + $0xa24] ss:$48 sps:$4 sm:$0xff]  }
 0x60c   :  { %9315 = vmatprep.subr.bf16.mxu1 %v19671_v28  ;;  %v19723_v28 = vld [vmem:[#allocation9 + $0x3c8] ss:$48 sps:$4 sm:$0xff]  }
 0x60d   :  { %9275 = vmatpush1.bf16.msra.mxu0 %v19576_v1  ;;  %v19731_v1 = vld [vmem:[#allocation9 + $0x42c] ss:$48 sps:$4 sm:$0xff]  }
 0x60e   :  { %9276 = vmatprep.subr.bf16.mxu0 %v19584_v57  ;;  %v19636_v57 = vld [vmem:[#allocation9 + $0xa20] ss:$48 sps:$4 sm:$0xff]  }
 0x60f   :  { %9316 = vmatpush1.bf16.msra.mxu1 %v19669_v47  ;;  %v19644_v47 = vld [vmem:[#allocation9 + $0xa84] ss:$48 sps:$4 sm:$0xff]  }
 0x610   :  { %9317 = vmatprep.subr.bf16.mxu1 %v19677_v8  ;;  %v19729_v8 = vld [vmem:[#allocation9 + $0x428] ss:$48 sps:$4 sm:$0xff]  }
 0x611   :  { %9277 = vmatpush1.bf16.msra.mxu0 %v19582_v54  ;;  %v19737_v54 = vld [vmem:[#allocation9 + $0x48c] ss:$48 sps:$4 sm:$0xff]  }
 0x612   :  { %9278 = vmatprep.subr.bf16.mxu0 %v19590_v61  ;;  %v19642_v61 = vld [vmem:[#allocation9 + $0xa80] ss:$48 sps:$4 sm:$0xff]  }
 0x613   :  { %9318 = vmatpush1.bf16.msra.mxu1 %v19675_v60  ;;  %v19650_v60 = vld [vmem:[#allocation9 + $0xae4] ss:$48 sps:$4 sm:$0xff]  }
 0x614   :  { %9319 = vmatprep.subr.bf16.mxu1 %v19683_v14  ;;  %v19735_v14 = vld [vmem:[#allocation9 + $0x488] ss:$48 sps:$4 sm:$0xff]  }
 0x615   :  { %9279 = vmatpush1.bf16.msra.mxu0 %v19588_v58  ;;  %v19743_v58 = vld [vmem:[#allocation9 + $0x4ec] ss:$48 sps:$4 sm:$0xff]  }
 0x616   :  { %9280 = vmatprep.subr.bf16.mxu0 %v19596_v16  ;;  %v19648_v16 = vld [vmem:[#allocation9 + $0xae0] ss:$48 sps:$4 sm:$0xff]  }
 0x617   :  { %9320 = vmatpush1.bf16.msra.mxu1 %v19681_v15  ;;  %v19656_v15 = vld [vmem:[#allocation9 + $0xb44] ss:$48 sps:$4 sm:$0xff]  }
 0x618   :  { %9321 = vmatprep.subr.bf16.mxu1 %v19689_v3  ;;  %v19741_v3 = vld [vmem:[#allocation9 + $0x4e8] ss:$48 sps:$4 sm:$0xff]  }
 0x619   :  { %9281 = vmatpush1.bf16.msra.mxu0 %v19594_v33  ;;  %v19749_v33 = vld [vmem:[#allocation9 + $0x54c] ss:$48 sps:$4 sm:$0xff]  }
 0x61a   :  { %9282 = vmatprep.subr.bf16.mxu0 %v19602_v20  ;;  %v19654_v20 = vld [vmem:[#allocation9 + $0xb40] ss:$48 sps:$4 sm:$0xff]  }
 0x61b   :  { %v7054_v36 = vpop.f32.mrb[48].mxu0  ;;  %9322 = vmatpush1.bf16.msra.mxu1 %v19687_v9  ;;  %v19662_v9 = vld [vmem:[#allocation9 + $0xba4] ss:$48 sps:$4 sm:$0xff]  }
 0x61c   :  { %v22215_v18 = vadd.f32 %v7054_v36, %v22190_v42  ;;  %v22217_v19 = vpop.f32.mrb[48].mxu1  ;;  %v7056_v24 = vpop.f32.mrb[49].mxu0  ;;  %9323 = vmatprep.subr.bf16.mxu1 %v19695_v11  ;;  %v19699_v42 = vld [vmem:[#allocation9 + $0x248] ss:$48 sps:$4 sm:$0xff]   ;;  %v16573_v36 = vld [vmem:[%s22726_s25 + $0x30] sm:$0xff] }
 0x61d   :  { %v22220_v27 = vadd.f32 %v7056_v24, %v22195_v52  ;;  %v22222_v29 = vpop.f32.mrb[49].mxu1  ;;  %v7058_v46 = vpop.f32.mrb[50].mxu0  ;;  %9283 = vmatpush1.bf16.msra.mxu0 %v19600_v62  ;;  %v19705_v52 = vld [vmem:[#allocation9 + $0x2a8] ss:$48 sps:$4 sm:$0xff]   ;;  %v19755_v62 = vld [vmem:[#allocation9 + $0x5ac] ss:$48 sps:$4 sm:$0xff]  }
 0x61e   :  { %v7099_v48 = vpop.f32.mrb[50].mxu1  ;;  %v7059_v30 = vpop.f32.mrb[51].mxu0  ;;  %9284 = vmatprep.subr.bf16.mxu0 %v19608_v2  ;;  %v19747_v11 = vld [vmem:[#allocation9 + $0x548] ss:$48 sps:$4 sm:$0xff]   ;;  %v19660_v2 = vld [vmem:[#allocation9 + $0xba0] ss:$48 sps:$4 sm:$0xff]  }
 0x61f   :  { %v7100_v56 = vpop.f32.mrb[51].mxu1  ;;  %9324 = vmatpush1.bf16.msra.mxu1 %v19693_v17  ;;  %v19668_v17 = vld [vmem:[#allocation9 + $0x60c] ss:$48 sps:$4 sm:$0xff]   ;;  %v19753_v24 = vld [vmem:[#allocation9 + $0x5a8] ss:$48 sps:$4 sm:$0xff]  }
 0x620   :  { %9325 = vmatprep.subr.bf16.mxu1 %v19701_v25  ;;  %v22227_v25 = vpack.c.bf16 %v16573_v36, %v16573_v36  ;;  %v19761_v46 = vld [vmem:[#allocation9 + $0x14] ss:$48 sps:$4 sm:$0xff]   ;;  %v19674_v48 = vld [vmem:[#allocation9 + $0x66c] ss:$48 sps:$4 sm:$0xff]   ;;  %v19759_v30 = vld [vmem:[#allocation9 + $0x10] ss:$48 sps:$4 sm:$0xff]  }
 0x621   :  { %9285 = vmatpush1.bf16.msra.mxu0 %v19606_v26  ;;  %v19666_v26 = vld [vmem:[#allocation9 + $0x608] ss:$48 sps:$4 sm:$0xff]  }
 0x622   :  { %9286 = vmatprep.subr.bf16.mxu0 %v19614_v22  ;;  %v19767_v22 = vld [vmem:[#allocation9 + $0x74] ss:$48 sps:$4 sm:$0xff]   ;;  %v19672_v56 = vld [vmem:[#allocation9 + $0x668] ss:$48 sps:$4 sm:$0xff]  }
 0x623   :  { %9326 = vmatpush1.bf16.msra.mxu1 %v19699_v42  ;;  %v19680_v42 = vld [vmem:[#allocation9 + $0x6cc] ss:$48 sps:$4 sm:$0xff]   ;;  %v19714_v36 = vld [vmem:[#allocation9 + $0x908] ss:$48 sps:$4 sm:$0xff]  }
 0x624   :  { %9327 = vmatprep.subr.bf16.mxu1 %v19707_v59  ;;  %v19765_v59 = vld [vmem:[#allocation9 + $0x70] ss:$48 sps:$4 sm:$0xff]  }
 0x625   :  { %9287 = vmatpush1.bf16.msra.mxu0 %v19612_v32  ;;  %v19773_v32 = vld [vmem:[#allocation9 + $0xd4] ss:$48 sps:$4 sm:$0xff]  }
 0x626   :  { %9288 = vmatprep.subr.bf16.mxu0 %v19620_v4  ;;  %v19678_v4 = vld [vmem:[#allocation9 + $0x6c8] ss:$48 sps:$4 sm:$0xff]  }
 0x627   :  { %9328 = vmatpush1.bf16.msra.mxu1 %v19705_v52  ;;  %v19686_v52 = vld [vmem:[#allocation9 + $0x72c] ss:$48 sps:$4 sm:$0xff]  }
 0x628   :  { %9329 = vmatprep.subr.bf16.mxu1 %v19713_v13  ;;  %v19771_v13 = vld [vmem:[#allocation9 + $0xd0] ss:$48 sps:$4 sm:$0xff]  }
 0x629   :  { %9289 = vmatpush1.bf16.msra.mxu0 %v19618_v39  ;;  %v19779_v39 = vld [vmem:[#allocation9 + $0x134] ss:$48 sps:$4 sm:$0xff]  }
 0x62a   :  { %9290 = vmatprep.subr.bf16.mxu0 %v19626_v40  ;;  %v19684_v40 = vld [vmem:[#allocation9 + $0x728] ss:$48 sps:$4 sm:$0xff]  }
 0x62b   :  { %9330 = vmatpush1.bf16.msra.mxu1 %v19711_v0  ;;  %v19692_v0 = vld [vmem:[#allocation9 + $0x78c] ss:$48 sps:$4 sm:$0xff]  }
 0x62c   :  { %9331 = vmatprep.subr.bf16.mxu1 %v19719_v31  ;;  %v19777_v31 = vld [vmem:[#allocation9 + $0x130] ss:$48 sps:$4 sm:$0xff]  }
 0x62d   :  { %9291 = vmatpush1.bf16.msra.mxu0 %v19624_v38  ;;  %v19785_v38 = vld [vmem:[#allocation9 + $0x194] ss:$48 sps:$4 sm:$0xff]  }
 0x62e   :  { %9292 = vmatprep.subr.bf16.mxu0 %v19632_v41  ;;  %v19690_v41 = vld [vmem:[#allocation9 + $0x788] ss:$48 sps:$4 sm:$0xff]  }
 0x62f   :  { %9332 = vmatpush1.bf16.msra.mxu1 %v19717_v45  ;;  %v19698_v45 = vld [vmem:[#allocation9 + $0x7ec] ss:$48 sps:$4 sm:$0xff]  }
 0x630   :  { %9333 = vmatprep.subr.bf16.mxu1 %v19725_v44  ;;  %v19783_v44 = vld [vmem:[#allocation9 + $0x190] ss:$48 sps:$4 sm:$0xff]  }
 0x631   :  { %9293 = vmatpush1.bf16.msra.mxu0 %v19630_v37  ;;  %v19791_v37 = vld [vmem:[#allocation9 + $0x1f4] ss:$48 sps:$4 sm:$0xff]  }
 0x632   :  { %9294 = vmatprep.subr.bf16.mxu0 %v19638_v50  ;;  %v19696_v50 = vld [vmem:[#allocation9 + $0x7e8] ss:$48 sps:$4 sm:$0xff]  }
 0x633   :  { %9334 = vmatpush1.bf16.msra.mxu1 %v19723_v28  ;;  %v19704_v28 = vld [vmem:[#allocation9 + $0x84c] ss:$48 sps:$4 sm:$0xff]  }
 0x634   :  { %9335 = vmatprep.subr.bf16.mxu1 %v19731_v1 }
 0x635   :  { %9295 = vmatpush1.bf16.msra.mxu0 %v19636_v57  ;;  %v19789_v57 = vld [vmem:[#allocation9 + $0x1f0] ss:$48 sps:$4 sm:$0xff]  }
 0x636   :  { %9296 = vmatprep.subr.bf16.mxu0 %v19644_v47 }
 0x637   :  { %9336 = vmatpush1.bf16.msra.mxu1 %v19729_v8 }
 0x638   :  { %9337 = vmatprep.subr.bf16.mxu1 %v19737_v54 }
 0x639   :  { %9297 = vmatpush1.bf16.msra.mxu0 %v19642_v61  ;;  %v19797_v61 = vld [vmem:[#allocation9 + $0x254] ss:$48 sps:$4 sm:$0xff]  }
 0x63a   :  { %9298 = vmatprep.subr.bf16.mxu0 %v19650_v60 }
 0x63b   :  { %9338 = vmatpush1.bf16.msra.mxu1 %v19735_v14 }
 0x63c   :  { %9339 = vmatprep.subr.bf16.mxu1 %v19743_v58 }
 0x63d   :  { %9299 = vmatpush1.bf16.msra.mxu0 %v19648_v16  ;;  %v19702_v16 = vld [vmem:[#allocation9 + $0x848] ss:$48 sps:$4 sm:$0xff]  }
 0x63e   :  { %9300 = vmatprep.subr.bf16.mxu0 %v19656_v15 }
 0x63f   :  { %9340 = vmatpush1.bf16.msra.mxu1 %v19741_v3 }
 0x640   :  { %9341 = vmatprep.subr.bf16.mxu1 %v19749_v33  ;;  %v19710_v33 = vld [vmem:[#allocation9 + $0x8ac] ss:$48 sps:$4 sm:$0xff]  }
 0x641   :  { %9301 = vmatpush1.bf16.msra.mxu0 %v19654_v20 }
 0x642   :  { %9302 = vmatprep.subr.bf16.mxu0 %v19662_v9  ;;  %v19803_v9 = vld [vmem:[#allocation9 + $0x2b4] ss:$48 sps:$4 sm:$0xff]  }
 0x643   :  { %9342 = vmatpush1.bf16.msra.mxu1 %v19747_v11  ;;  %v19708_v11 = vld [vmem:[#allocation9 + $0x8a8] ss:$48 sps:$4 sm:$0xff]  }
 0x644   :  { %9343 = vmatprep.subr.bf16.mxu1 %v19755_v62  ;;  %v19716_v62 = vld [vmem:[#allocation9 + $0x90c] ss:$48 sps:$4 sm:$0xff]  }
 0x645   :  { %9303 = vmatpush1.bf16.msra.mxu0 %v19660_v2  ;;  %v19809_v2 = vld [vmem:[#allocation9 + $0x314] ss:$48 sps:$4 sm:$0xff]  }
 0x646   :  { %9354 = vmatprep.subr.bf16.mxu0 %v19668_v17  ;;  %v19722_v17 = vld [vmem:[#allocation9 + $0x96c] ss:$48 sps:$4 sm:$0xff]  }
 0x647   :  { %9344 = vmatpush1.bf16.msra.mxu1 %v19753_v24  ;;  %v19807_v24 = vld [vmem:[#allocation9 + $0x310] ss:$48 sps:$4 sm:$0xff]  }
 0x648   :  { %9305 = vmatmul.mubr.bf16.vlgmr.msra.gmra.mrb[64].mxu0 %v22227_v25  ;;  %9395 = vmatprep.subr.bf16.mxu1 %v19761_v46  ;;  %v19815_v46 = vld [vmem:[#allocation9 + $0x374] ss:$48 sps:$4 sm:$0xff]  }
 0x649   :  { %9355 = vmatpush1.bf16.msra.mxu0 %v19666_v26  ;;  %9386 = vmatprep.mubr.bf16.mxu0 %v22206_v34  ;;  %v19720_v26 = vld [vmem:[#allocation9 + $0x968] ss:$48 sps:$4 sm:$0xff]  }
 0x64a   :  { %9356 = vmatprep.subr.bf16.mxu0 %v19674_v48  ;;  %9346 = vmatmul.mubr.bf16.vlgmr.msra.gmra.mrb[64].mxu1 %v22208_v49  ;;  %v19728_v48 = vld [vmem:[#allocation9 + $0x9cc] ss:$48 sps:$4 sm:$0xff]  }
 0x64b   :  { %9396 = vmatpush1.bf16.msra.mxu1 %v19759_v30  ;;  %9427 = vmatprep.mubr.bf16.mxu1 %v22184_v21  ;;  %v19813_v30 = vld [vmem:[#allocation9 + $0x370] ss:$48 sps:$4 sm:$0xff]  }
 0x64c   :  { %9397 = vmatprep.subr.bf16.mxu1 %v19767_v22  ;;  %v19821_v22 = vld [vmem:[#allocation9 + $0x3d4] ss:$48 sps:$4 sm:$0xff]  }
 0x64d   :  { %9357 = vmatpush1.bf16.msra.mxu0 %v19672_v56  ;;  %v19726_v56 = vld [vmem:[#allocation9 + $0x9c8] ss:$48 sps:$4 sm:$0xff]  }
 0x64e   :  { %9358 = vmatprep.subr.bf16.mxu0 %v19680_v42  ;;  %v19734_v42 = vld [vmem:[#allocation9 + $0xa2c] ss:$48 sps:$4 sm:$0xff]  }
 0x64f   :  { %9398 = vmatpush1.bf16.msra.mxu1 %v19765_v59  ;;  %v19819_v59 = vld [vmem:[#allocation9 + $0x3d0] ss:$48 sps:$4 sm:$0xff]  }
 0x650   :  { %9399 = vmatprep.subr.bf16.mxu1 %v19773_v32  ;;  %v19827_v32 = vld [vmem:[#allocation9 + $0x434] ss:$48 sps:$4 sm:$0xff]  }
 0x651   :  { %9359 = vmatpush1.bf16.msra.mxu0 %v19678_v4  ;;  %v19732_v4 = vld [vmem:[#allocation9 + $0xa28] ss:$48 sps:$4 sm:$0xff]  }
 0x652   :  { %9360 = vmatprep.subr.bf16.mxu0 %v19686_v52  ;;  %v19740_v52 = vld [vmem:[#allocation9 + $0xa8c] ss:$48 sps:$4 sm:$0xff]  }
 0x653   :  { %9400 = vmatpush1.bf16.msra.mxu1 %v19771_v13  ;;  %v19825_v13 = vld [vmem:[#allocation9 + $0x430] ss:$48 sps:$4 sm:$0xff]  }
 0x654   :  { %9401 = vmatprep.subr.bf16.mxu1 %v19779_v39  ;;  %v19833_v39 = vld [vmem:[#allocation9 + $0x494] ss:$48 sps:$4 sm:$0xff]  }
 0x655   :  { %9361 = vmatpush1.bf16.msra.mxu0 %v19684_v40  ;;  %v19738_v40 = vld [vmem:[#allocation9 + $0xa88] ss:$48 sps:$4 sm:$0xff]  }
 0x656   :  { %9362 = vmatprep.subr.bf16.mxu0 %v19692_v0  ;;  %v19746_v0 = vld [vmem:[#allocation9 + $0xaec] ss:$48 sps:$4 sm:$0xff]  }
 0x657   :  { %9402 = vmatpush1.bf16.msra.mxu1 %v19777_v31  ;;  %v19831_v31 = vld [vmem:[#allocation9 + $0x490] ss:$48 sps:$4 sm:$0xff]  }
 0x658   :  { %9403 = vmatprep.subr.bf16.mxu1 %v19785_v38  ;;  %v19839_v38 = vld [vmem:[#allocation9 + $0x4f4] ss:$48 sps:$4 sm:$0xff]  }
 0x659   :  { %9363 = vmatpush1.bf16.msra.mxu0 %v19690_v41  ;;  %v19744_v41 = vld [vmem:[#allocation9 + $0xae8] ss:$48 sps:$4 sm:$0xff]  }
 0x65a   :  { %9364 = vmatprep.subr.bf16.mxu0 %v19698_v45  ;;  %v19752_v45 = vld [vmem:[#allocation9 + $0xb4c] ss:$48 sps:$4 sm:$0xff]  }
 0x65b   :  { %v7136_v1 = vpop.f32.mrb[52].mxu0  ;;  %9404 = vmatpush1.bf16.msra.mxu1 %v19783_v44  ;;  %v19837_v44 = vld [vmem:[#allocation9 + $0x4f0] ss:$48 sps:$4 sm:$0xff]  }
 0x65c   :  { %v22234_v47 = vadd.f32 %v7136_v1, %v22217_v19  ;;  %v22236_v8 = vpop.f32.mrb[52].mxu1  ;;  %v7138_v54 = vpop.f32.mrb[53].mxu0  ;;  %9405 = vmatprep.subr.bf16.mxu1 %v19791_v37  ;;  %v19795_v19 = vld [vmem:[#allocation9 + $0x250] ss:$48 sps:$4 sm:$0xff]   ;;  %v19845_v37 = vld [vmem:[#allocation9 + $0x554] ss:$48 sps:$4 sm:$0xff]  }
 0x65d   :  { %v22239_v60 = vadd.f32 %v7138_v54, %v22222_v29  ;;  %v22241_v14 = vpop.f32.mrb[53].mxu1  ;;  %v7140_v58 = vpop.f32.mrb[54].mxu0  ;;  %9365 = vmatpush1.bf16.msra.mxu0 %v19696_v50  ;;  %v19801_v29 = vld [vmem:[#allocation9 + $0x2b0] ss:$48 sps:$4 sm:$0xff]   ;;  %v19750_v50 = vld [vmem:[#allocation9 + $0xb48] ss:$48 sps:$4 sm:$0xff]  }
 0x65e   :  { %v7181_v15 = vpop.f32.mrb[54].mxu1  ;;  %v7141_v3 = vpop.f32.mrb[55].mxu0  ;;  %9366 = vmatprep.subr.bf16.mxu0 %v19704_v28  ;;  %v19758_v28 = vld [vmem:[#allocation9 + $0xbac] ss:$48 sps:$4 sm:$0xff]   ;;  %v19843_v1 = vld [vmem:[#allocation9 + $0x550] ss:$48 sps:$4 sm:$0xff]  }
 0x65f   :  { %v7182_v20 = vpop.f32.mrb[55].mxu1  ;;  %9406 = vmatpush1.bf16.msra.mxu1 %v19789_v57  ;;  %v19851_v57 = vld [vmem:[#allocation9 + $0x5b4] ss:$48 sps:$4 sm:$0xff]   ;;  %v19756_v54 = vld [vmem:[#allocation9 + $0xba8] ss:$48 sps:$4 sm:$0xff]  }
 0x660   :  { %9407 = vmatprep.subr.bf16.mxu1 %v19797_v61  ;;  %v19764_v61 = vld [vmem:[#allocation9 + $0x614] ss:$48 sps:$4 sm:$0xff]   ;;  %v19849_v58 = vld [vmem:[#allocation9 + $0x5b0] ss:$48 sps:$4 sm:$0xff]   ;;  %v19863_v20 = vld [vmem:[#allocation9 + $0x7c] ss:$48 sps:$4 sm:$0xff]  }
 0x661   :  { %9367 = vmatpush1.bf16.msra.mxu0 %v19702_v16  ;;  %v19857_v16 = vld [vmem:[#allocation9 + $0x1c] ss:$48 sps:$4 sm:$0xff]   ;;  %v19762_v15 = vld [vmem:[#allocation9 + $0x610] ss:$48 sps:$4 sm:$0xff]   ;;  %v19770_v3 = vld [vmem:[#allocation9 + $0x674] ss:$48 sps:$4 sm:$0xff]  }
 0x662   :  { %9368 = vmatprep.subr.bf16.mxu0 %v19710_v33  ;;  %v19855_v33 = vld [vmem:[#allocation9 + $0x18] ss:$48 sps:$4 sm:$0xff]  }
 0x663   :  { %9408 = vmatpush1.bf16.msra.mxu1 %v19795_v19  ;;  %v19768_v19 = vld [vmem:[#allocation9 + $0x670] ss:$48 sps:$4 sm:$0xff]  }
 0x664   :  { %9409 = vmatprep.subr.bf16.mxu1 %v19803_v9  ;;  %v19776_v9 = vld [vmem:[#allocation9 + $0x6d4] ss:$48 sps:$4 sm:$0xff]  }
 0x665   :  { %9369 = vmatpush1.bf16.msra.mxu0 %v19708_v11  ;;  %v19861_v11 = vld [vmem:[#allocation9 + $0x78] ss:$48 sps:$4 sm:$0xff]  }
 0x666   :  { %9370 = vmatprep.subr.bf16.mxu0 %v19716_v62  ;;  %v19869_v62 = vld [vmem:[#allocation9 + $0xdc] ss:$48 sps:$4 sm:$0xff]  }
 0x667   :  { %9410 = vmatpush1.bf16.msra.mxu1 %v19801_v29  ;;  %v19774_v29 = vld [vmem:[#allocation9 + $0x6d0] ss:$48 sps:$4 sm:$0xff]  }
 0x668   :  { %9411 = vmatprep.subr.bf16.mxu1 %v19809_v2  ;;  %v19782_v2 = vld [vmem:[#allocation9 + $0x734] ss:$48 sps:$4 sm:$0xff]  }
 0x669   :  { %9371 = vmatpush1.bf16.msra.mxu0 %v19714_v36  ;;  %v19867_v36 = vld [vmem:[#allocation9 + $0xd8] ss:$48 sps:$4 sm:$0xff]  }
 0x66a   :  { %9372 = vmatprep.subr.bf16.mxu0 %v19722_v17  ;;  %v19875_v17 = vld [vmem:[#allocation9 + $0x13c] ss:$48 sps:$4 sm:$0xff]  }
 0x66b   :  { %9412 = vmatpush1.bf16.msra.mxu1 %v19807_v24  ;;  %v19780_v24 = vld [vmem:[#allocation9 + $0x730] ss:$48 sps:$4 sm:$0xff]  }
 0x66c   :  { %9413 = vmatprep.subr.bf16.mxu1 %v19815_v46  ;;  %v19788_v46 = vld [vmem:[#allocation9 + $0x794] ss:$48 sps:$4 sm:$0xff]  }
 0x66d   :  { %9373 = vmatpush1.bf16.msra.mxu0 %v19720_v26  ;;  %v19873_v26 = vld [vmem:[#allocation9 + $0x138] ss:$48 sps:$4 sm:$0xff]  }
 0x66e   :  { %9374 = vmatprep.subr.bf16.mxu0 %v19728_v48  ;;  %v19881_v48 = vld [vmem:[#allocation9 + $0x19c] ss:$48 sps:$4 sm:$0xff]  }
 0x66f   :  { %9414 = vmatpush1.bf16.msra.mxu1 %v19813_v30  ;;  %v19786_v30 = vld [vmem:[#allocation9 + $0x790] ss:$48 sps:$4 sm:$0xff]  }
 0x670   :  { %9415 = vmatprep.subr.bf16.mxu1 %v19821_v22  ;;  %v19794_v22 = vld [vmem:[#allocation9 + $0x7f4] ss:$48 sps:$4 sm:$0xff]  }
 0x671   :  { %9375 = vmatpush1.bf16.msra.mxu0 %v19726_v56  ;;  %v19879_v56 = vld [vmem:[#allocation9 + $0x198] ss:$48 sps:$4 sm:$0xff]  }
 0x672   :  { %9376 = vmatprep.subr.bf16.mxu0 %v19734_v42  ;;  %v19887_v42 = vld [vmem:[#allocation9 + $0x1fc] ss:$48 sps:$4 sm:$0xff]  }
 0x673   :  { %9416 = vmatpush1.bf16.msra.mxu1 %v19819_v59  ;;  %v19792_v59 = vld [vmem:[#allocation9 + $0x7f0] ss:$48 sps:$4 sm:$0xff]  }
 0x674   :  { %9417 = vmatprep.subr.bf16.mxu1 %v19827_v32  ;;  %v19800_v32 = vld [vmem:[#allocation9 + $0x854] ss:$48 sps:$4 sm:$0xff]  }
 0x675   :  { %9377 = vmatpush1.bf16.msra.mxu0 %v19732_v4 }
 0x676   :  { %9378 = vmatprep.subr.bf16.mxu0 %v19740_v52  ;;  %v19885_v52 = vld [vmem:[#allocation9 + $0x1f8] ss:$48 sps:$4 sm:$0xff]  }
 0x677   :  { %9418 = vmatpush1.bf16.msra.mxu1 %v19825_v13 }
 0x678   :  { %9419 = vmatprep.subr.bf16.mxu1 %v19833_v39 }
 0x679   :  { %9379 = vmatpush1.bf16.msra.mxu0 %v19738_v40 }
 0x67a   :  { %9380 = vmatprep.subr.bf16.mxu0 %v19746_v0  ;;  %v19893_v0 = vld [vmem:[#allocation9 + $0x25c] ss:$48 sps:$4 sm:$0xff]  }
 0x67b   :  { %9420 = vmatpush1.bf16.msra.mxu1 %v19831_v31 }
 0x67c   :  { %9421 = vmatprep.subr.bf16.mxu1 %v19839_v38 }
 0x67d   :  { %9381 = vmatpush1.bf16.msra.mxu0 %v19744_v41 }
 0x67e   :  { %9382 = vmatprep.subr.bf16.mxu0 %v19752_v45  ;;  %v19798_v45 = vld [vmem:[#allocation9 + $0x850] ss:$48 sps:$4 sm:$0xff]  }
 0x67f   :  { %9422 = vmatpush1.bf16.msra.mxu1 %v19837_v44 }
 0x680   :  { %9423 = vmatprep.subr.bf16.mxu1 %v19845_v37 }
 0x681   :  { %9383 = vmatpush1.bf16.msra.mxu0 %v19750_v50  ;;  %v19806_v50 = vld [vmem:[#allocation9 + $0x8b4] ss:$48 sps:$4 sm:$0xff]  }
 0x682   :  { %9384 = vmatprep.subr.bf16.mxu0 %v19758_v28 }
 0x683   :  { %9424 = vmatpush1.bf16.msra.mxu1 %v19843_v1  ;;  %v19899_v1 = vld [vmem:[#allocation9 + $0x2bc] ss:$48 sps:$4 sm:$0xff]  }
 0x684   :  { %9425 = vmatprep.subr.bf16.mxu1 %v19851_v57  ;;  %v19804_v57 = vld [vmem:[#allocation9 + $0x8b0] ss:$48 sps:$4 sm:$0xff]  }
 0x685   :  { %9385 = vmatpush1.bf16.msra.mxu0 %v19756_v54  ;;  %v19812_v54 = vld [vmem:[#allocation9 + $0x914] ss:$48 sps:$4 sm:$0xff]  }
 0x686   :  { %9436 = vmatprep.subr.bf16.mxu0 %v19764_v61  ;;  %v19905_v61 = vld [vmem:[#allocation9 + $0x31c] ss:$48 sps:$4 sm:$0xff]  }
 0x687   :  { %9426 = vmatpush1.bf16.msra.mxu1 %v19849_v58  ;;  %v19810_v58 = vld [vmem:[#allocation9 + $0x910] ss:$48 sps:$4 sm:$0xff]  }
 0x688   :  { %9387 = vmatmul.mubr.bf16.vlgmr.msra.gmra.mrb[68].mxu0 %v22227_v25  ;;  %9477 = vmatprep.subr.bf16.mxu1 %v19857_v16  ;;  %v19818_v16 = vld [vmem:[#allocation9 + $0x974] ss:$48 sps:$4 sm:$0xff]  }
 0x689   :  { %9437 = vmatpush1.bf16.msra.mxu0 %v19762_v15  ;;  %9468 = vmatprep.mubr.bf16.mxu0 %v22206_v34  ;;  %v19903_v15 = vld [vmem:[#allocation9 + $0x318] ss:$48 sps:$4 sm:$0xff]  }
 0x68a   :  { %9438 = vmatprep.subr.bf16.mxu0 %v19770_v3  ;;  %9428 = vmatmul.mubr.bf16.vlgmr.msra.gmra.mrb[68].mxu1 %v22208_v49  ;;  %v19911_v3 = vld [vmem:[#allocation9 + $0x37c] ss:$48 sps:$4 sm:$0xff]  }
 0x68b   :  { %9478 = vmatpush1.bf16.msra.mxu1 %v19855_v33  ;;  %9509 = vmatprep.mubr.bf16.mxu1 %v22184_v21  ;;  %v19816_v33 = vld [vmem:[#allocation9 + $0x970] ss:$48 sps:$4 sm:$0xff]  }
 0x68c   :  { %9479 = vmatprep.subr.bf16.mxu1 %v19863_v20  ;;  %v19824_v20 = vld [vmem:[#allocation9 + $0x9d4] ss:$48 sps:$4 sm:$0xff]  }
 0x68d   :  { %9439 = vmatpush1.bf16.msra.mxu0 %v19768_v19  ;;  %v19909_v19 = vld [vmem:[#allocation9 + $0x378] ss:$48 sps:$4 sm:$0xff]  }
 0x68e   :  { %9440 = vmatprep.subr.bf16.mxu0 %v19776_v9  ;;  %v19917_v9 = vld [vmem:[#allocation9 + $0x3dc] ss:$48 sps:$4 sm:$0xff]  }
 0x68f   :  { %9480 = vmatpush1.bf16.msra.mxu1 %v19861_v11  ;;  %v19822_v11 = vld [vmem:[#allocation9 + $0x9d0] ss:$48 sps:$4 sm:$0xff]  }
 0x690   :  { %9481 = vmatprep.subr.bf16.mxu1 %v19869_v62  ;;  %v19830_v62 = vld [vmem:[#allocation9 + $0xa34] ss:$48 sps:$4 sm:$0xff]  }
 0x691   :  { %9441 = vmatpush1.bf16.msra.mxu0 %v19774_v29  ;;  %v19915_v29 = vld [vmem:[#allocation9 + $0x3d8] ss:$48 sps:$4 sm:$0xff]  }
 0x692   :  { %9442 = vmatprep.subr.bf16.mxu0 %v19782_v2  ;;  %v19923_v2 = vld [vmem:[#allocation9 + $0x43c] ss:$48 sps:$4 sm:$0xff]  }
 0x693   :  { %9482 = vmatpush1.bf16.msra.mxu1 %v19867_v36  ;;  %v19828_v36 = vld [vmem:[#allocation9 + $0xa30] ss:$48 sps:$4 sm:$0xff]  }
 0x694   :  { %9483 = vmatprep.subr.bf16.mxu1 %v19875_v17  ;;  %v19836_v17 = vld [vmem:[#allocation9 + $0xa94] ss:$48 sps:$4 sm:$0xff]  }
 0x695   :  { %9443 = vmatpush1.bf16.msra.mxu0 %v19780_v24  ;;  %v19921_v24 = vld [vmem:[#allocation9 + $0x438] ss:$48 sps:$4 sm:$0xff]  }
 0x696   :  { %9444 = vmatprep.subr.bf16.mxu0 %v19788_v46  ;;  %v19929_v46 = vld [vmem:[#allocation9 + $0x49c] ss:$48 sps:$4 sm:$0xff]  }
 0x697   :  { %9484 = vmatpush1.bf16.msra.mxu1 %v19873_v26  ;;  %v19834_v26 = vld [vmem:[#allocation9 + $0xa90] ss:$48 sps:$4 sm:$0xff]  }
 0x698   :  { %9485 = vmatprep.subr.bf16.mxu1 %v19881_v48  ;;  %v19842_v48 = vld [vmem:[#allocation9 + $0xaf4] ss:$48 sps:$4 sm:$0xff]  }
 0x699   :  { %9445 = vmatpush1.bf16.msra.mxu0 %v19786_v30  ;;  %v19927_v30 = vld [vmem:[#allocation9 + $0x498] ss:$48 sps:$4 sm:$0xff]  }
 0x69a   :  { %9446 = vmatprep.subr.bf16.mxu0 %v19794_v22  ;;  %v19935_v22 = vld [vmem:[#allocation9 + $0x4fc] ss:$48 sps:$4 sm:$0xff]  }
 0x69b   :  { %v7218_v4 = vpop.f32.mrb[56].mxu0  ;;  %9486 = vmatpush1.bf16.msra.mxu1 %v19879_v56  ;;  %v19840_v56 = vld [vmem:[#allocation9 + $0xaf0] ss:$48 sps:$4 sm:$0xff]  }
 0x69c   :  { %v22248_v13 = vadd.f32 %v7218_v4, %v22236_v8  ;;  %v22250_v39 = vpop.f32.mrb[56].mxu1  ;;  %v7220_v40 = vpop.f32.mrb[57].mxu0  ;;  %9487 = vmatprep.subr.bf16.mxu1 %v19887_v42  ;;  %v19891_v8 = vld [vmem:[#allocation9 + $0x258] ss:$48 sps:$4 sm:$0xff]   ;;  %v19848_v42 = vld [vmem:[#allocation9 + $0xb54] ss:$48 sps:$4 sm:$0xff]  }
 0x69d   :  { %v22253_v31 = vadd.f32 %v7220_v40, %v22241_v14  ;;  %v22255_v38 = vpop.f32.mrb[57].mxu1  ;;  %v7222_v41 = vpop.f32.mrb[58].mxu0  ;;  %9447 = vmatpush1.bf16.msra.mxu0 %v19792_v59  ;;  %v19897_v14 = vld [vmem:[#allocation9 + $0x2b8] ss:$48 sps:$4 sm:$0xff]   ;;  %v19846_v4 = vld [vmem:[#allocation9 + $0xb50] ss:$48 sps:$4 sm:$0xff]  }
 0x69e   :  { %v7263_v44 = vpop.f32.mrb[58].mxu1  ;;  %v7223_v37 = vpop.f32.mrb[59].mxu0  ;;  %9448 = vmatprep.subr.bf16.mxu0 %v19800_v32  ;;  %v19933_v59 = vld [vmem:[#allocation9 + $0x4f8] ss:$48 sps:$4 sm:$0xff]   ;;  %v19941_v32 = vld [vmem:[#allocation9 + $0x55c] ss:$48 sps:$4 sm:$0xff]  }
 0x69f   :  { %v7264_v28 = vpop.f32.mrb[59].mxu1  ;;  %9488 = vmatpush1.bf16.msra.mxu1 %v19885_v52  ;;  %v19854_v52 = vld [vmem:[#allocation9 + $0xbb4] ss:$48 sps:$4 sm:$0xff]   ;;  %v19939_v40 = vld [vmem:[#allocation9 + $0x558] ss:$48 sps:$4 sm:$0xff]  }
 0x6a0   :  { %9489 = vmatprep.subr.bf16.mxu1 %v19893_v0  ;;  %v19947_v0 = vld [vmem:[#allocation9 + $0x5bc] ss:$48 sps:$4 sm:$0xff]   ;;  %v19852_v41 = vld [vmem:[#allocation9 + $0xbb0] ss:$48 sps:$4 sm:$0xff]   ;;  %v19945_v44 = vld [vmem:[#allocation9 + $0x5b8] ss:$48 sps:$4 sm:$0xff]  }
 0x6a1   :  { %9449 = vmatpush1.bf16.msra.mxu0 %v19798_v45  ;;  %v19860_v45 = vld [vmem:[#allocation9 + $0x61c] ss:$48 sps:$4 sm:$0xff]   ;;  %v19953_v37 = vld [vmem:[#allocation9 + $0x24] ss:$48 sps:$4 sm:$0xff]  }
 0x6a2   :  { %9450 = vmatprep.subr.bf16.mxu0 %v19806_v50  ;;  %v19858_v50 = vld [vmem:[#allocation9 + $0x618] ss:$48 sps:$4 sm:$0xff]   ;;  %v19866_v28 = vld [vmem:[#allocation9 + $0x67c] ss:$48 sps:$4 sm:$0xff]  }
 0x6a3   :  { %9490 = vmatpush1.bf16.msra.mxu1 %v19891_v8  ;;  %v19951_v8 = vld [vmem:[#allocation9 + $0x20] ss:$48 sps:$4 sm:$0xff]  }
 0x6a4   :  { %9491 = vmatprep.subr.bf16.mxu1 %v19899_v1  ;;  %v19959_v1 = vld [vmem:[#allocation9 + $0x84] ss:$48 sps:$4 sm:$0xff]  }
 0x6a5   :  { %9451 = vmatpush1.bf16.msra.mxu0 %v19804_v57  ;;  %v19864_v57 = vld [vmem:[#allocation9 + $0x678] ss:$48 sps:$4 sm:$0xff]  }
 0x6a6   :  { %9452 = vmatprep.subr.bf16.mxu0 %v19812_v54  ;;  %v19872_v54 = vld [vmem:[#allocation9 + $0x6dc] ss:$48 sps:$4 sm:$0xff]  }
 0x6a7   :  { %9492 = vmatpush1.bf16.msra.mxu1 %v19897_v14  ;;  %v19957_v14 = vld [vmem:[#allocation9 + $0x80] ss:$48 sps:$4 sm:$0xff]  }
 0x6a8   :  { %9493 = vmatprep.subr.bf16.mxu1 %v19905_v61  ;;  %v19965_v61 = vld [vmem:[#allocation9 + $0xe4] ss:$48 sps:$4 sm:$0xff]  }
 0x6a9   :  { %9453 = vmatpush1.bf16.msra.mxu0 %v19810_v58  ;;  %v19870_v58 = vld [vmem:[#allocation9 + $0x6d8] ss:$48 sps:$4 sm:$0xff]  }
 0x6aa   :  { %9454 = vmatprep.subr.bf16.mxu0 %v19818_v16  ;;  %v19878_v16 = vld [vmem:[#allocation9 + $0x73c] ss:$48 sps:$4 sm:$0xff]  }
 0x6ab   :  { %9494 = vmatpush1.bf16.msra.mxu1 %v19903_v15  ;;  %v19963_v15 = vld [vmem:[#allocation9 + $0xe0] ss:$48 sps:$4 sm:$0xff]  }
 0x6ac   :  { %9495 = vmatprep.subr.bf16.mxu1 %v19911_v3  ;;  %v19971_v3 = vld [vmem:[#allocation9 + $0x144] ss:$48 sps:$4 sm:$0xff]  }
 0x6ad   :  { %9455 = vmatpush1.bf16.msra.mxu0 %v19816_v33  ;;  %v19876_v33 = vld [vmem:[#allocation9 + $0x738] ss:$48 sps:$4 sm:$0xff]  }
 0x6ae   :  { %9456 = vmatprep.subr.bf16.mxu0 %v19824_v20  ;;  %v19884_v20 = vld [vmem:[#allocation9 + $0x79c] ss:$48 sps:$4 sm:$0xff]  }
 0x6af   :  { %9496 = vmatpush1.bf16.msra.mxu1 %v19909_v19  ;;  %v19969_v19 = vld [vmem:[#allocation9 + $0x140] ss:$48 sps:$4 sm:$0xff]  }
 0x6b0   :  { %9497 = vmatprep.subr.bf16.mxu1 %v19917_v9  ;;  %v19977_v9 = vld [vmem:[#allocation9 + $0x1a4] ss:$48 sps:$4 sm:$0xff]  }
 0x6b1   :  { %9457 = vmatpush1.bf16.msra.mxu0 %v19822_v11  ;;  %v19882_v11 = vld [vmem:[#allocation9 + $0x798] ss:$48 sps:$4 sm:$0xff]  }
 0x6b2   :  { %9458 = vmatprep.subr.bf16.mxu0 %v19830_v62  ;;  %v19890_v62 = vld [vmem:[#allocation9 + $0x7fc] ss:$48 sps:$4 sm:$0xff]  }
 0x6b3   :  { %9498 = vmatpush1.bf16.msra.mxu1 %v19915_v29  ;;  %v19975_v29 = vld [vmem:[#allocation9 + $0x1a0] ss:$48 sps:$4 sm:$0xff]  }
 0x6b4   :  { %9499 = vmatprep.subr.bf16.mxu1 %v19923_v2  ;;  %v19983_v2 = vld [vmem:[#allocation9 + $0x204] ss:$48 sps:$4 sm:$0xff]  }
 0x6b5   :  { %9459 = vmatpush1.bf16.msra.mxu0 %v19828_v36  ;;  %v19888_v36 = vld [vmem:[#allocation9 + $0x7f8] ss:$48 sps:$4 sm:$0xff]  }
 0x6b6   :  { %9460 = vmatprep.subr.bf16.mxu0 %v19836_v17  ;;  %v19896_v17 = vld [vmem:[#allocation9 + $0x85c] ss:$48 sps:$4 sm:$0xff]  }
 0x6b7   :  { %9500 = vmatpush1.bf16.msra.mxu1 %v19921_v24 }
 0x6b8   :  { %9501 = vmatprep.subr.bf16.mxu1 %v19929_v46  ;;  %v19981_v46 = vld [vmem:[#allocation9 + $0x200] ss:$48 sps:$4 sm:$0xff]  }
 0x6b9   :  { %9461 = vmatpush1.bf16.msra.mxu0 %v19834_v26 }
 0x6ba   :  { %9462 = vmatprep.subr.bf16.mxu0 %v19842_v48 }
 0x6bb   :  { %9502 = vmatpush1.bf16.msra.mxu1 %v19927_v30  ;;  %v19989_v30 = vld [vmem:[#allocation9 + $0x264] ss:$48 sps:$4 sm:$0xff]  }
 0x6bc   :  { %9503 = vmatprep.subr.bf16.mxu1 %v19935_v22 }
 0x6bd   :  { %9463 = vmatpush1.bf16.msra.mxu0 %v19840_v56 }
 0x6be   :  { %9464 = vmatprep.subr.bf16.mxu0 %v19848_v42  ;;  %v19894_v42 = vld [vmem:[#allocation9 + $0x858] ss:$48 sps:$4 sm:$0xff]  }
 0x6bf   :  { %9504 = vmatpush1.bf16.msra.mxu1 %v19933_v59 }
 0x6c0   :  { %9505 = vmatprep.subr.bf16.mxu1 %v19941_v32 }
 0x6c1   :  { %9465 = vmatpush1.bf16.msra.mxu0 %v19846_v4  ;;  %v19902_v4 = vld [vmem:[#allocation9 + $0x8bc] ss:$48 sps:$4 sm:$0xff]  }
 0x6c2   :  { %9466 = vmatprep.subr.bf16.mxu0 %v19854_v52 }
 0x6c3   :  { %9506 = vmatpush1.bf16.msra.mxu1 %v19939_v40 }
 0x6c4   :  { %9507 = vmatprep.subr.bf16.mxu1 %v19947_v0 }
 0x6c5   :  { %9467 = vmatpush1.bf16.msra.mxu0 %v19852_v41  ;;  %v19995_v41 = vld [vmem:[#allocation9 + $0x2c4] ss:$48 sps:$4 sm:$0xff]  }
 0x6c6   :  { %9518 = vmatprep.subr.bf16.mxu0 %v19860_v45  ;;  %v19900_v45 = vld [vmem:[#allocation9 + $0x8b8] ss:$48 sps:$4 sm:$0xff]  }
 0x6c7   :  { %9508 = vmatpush1.bf16.msra.mxu1 %v19945_v44  ;;  %v19993_v44 = vld [vmem:[#allocation9 + $0x2c0] ss:$48 sps:$4 sm:$0xff]  }
 0x6c8   :  { %9469 = vmatmul.mubr.bf16.vlgmr.msra.gmra.mrb[72].mxu0 %v22227_v25  ;;  %9559 = vmatprep.subr.bf16.mxu1 %v19953_v37  ;;  %v20001_v37 = vld [vmem:[#allocation9 + $0x324] ss:$48 sps:$4 sm:$0xff]  }
 0x6c9   :  { %9519 = vmatpush1.bf16.msra.mxu0 %v19858_v50  ;;  %9550 = vmatprep.mubr.bf16.mxu0 %v22206_v34  ;;  %v19906_v50 = vld [vmem:[#allocation9 + $0x918] ss:$48 sps:$4 sm:$0xff]  }
 0x6ca   :  { %9520 = vmatprep.subr.bf16.mxu0 %v19866_v28  ;;  %9510 = vmatmul.mubr.bf16.vlgmr.msra.gmra.mrb[72].mxu1 %v22208_v49  ;;  %v19914_v28 = vld [vmem:[#allocation9 + $0x97c] ss:$48 sps:$4 sm:$0xff]  }
 0x6cb   :  { %9560 = vmatpush1.bf16.msra.mxu1 %v19951_v8  ;;  %9591 = vmatprep.mubr.bf16.mxu1 %v22184_v21  ;;  %v19999_v8 = vld [vmem:[#allocation9 + $0x320] ss:$48 sps:$4 sm:$0xff]  }
 0x6cc   :  { %9561 = vmatprep.subr.bf16.mxu1 %v19959_v1  ;;  %v20007_v1 = vld [vmem:[#allocation9 + $0x384] ss:$48 sps:$4 sm:$0xff]  }
 0x6cd   :  { %9521 = vmatpush1.bf16.msra.mxu0 %v19864_v57  ;;  %v19912_v57 = vld [vmem:[#allocation9 + $0x978] ss:$48 sps:$4 sm:$0xff]  }
 0x6ce   :  { %9522 = vmatprep.subr.bf16.mxu0 %v19872_v54  ;;  %v19920_v54 = vld [vmem:[#allocation9 + $0x9dc] ss:$48 sps:$4 sm:$0xff]  }
 0x6cf   :  { %9562 = vmatpush1.bf16.msra.mxu1 %v19957_v14  ;;  %v20005_v14 = vld [vmem:[#allocation9 + $0x380] ss:$48 sps:$4 sm:$0xff]  }
 0x6d0   :  { %9563 = vmatprep.subr.bf16.mxu1 %v19965_v61  ;;  %v20013_v61 = vld [vmem:[#allocation9 + $0x3e4] ss:$48 sps:$4 sm:$0xff]  }
 0x6d1   :  { %9523 = vmatpush1.bf16.msra.mxu0 %v19870_v58  ;;  %v19918_v58 = vld [vmem:[#allocation9 + $0x9d8] ss:$48 sps:$4 sm:$0xff]  }
 0x6d2   :  { %9524 = vmatprep.subr.bf16.mxu0 %v19878_v16  ;;  %v19926_v16 = vld [vmem:[#allocation9 + $0xa3c] ss:$48 sps:$4 sm:$0xff]  }
 0x6d3   :  { %9564 = vmatpush1.bf16.msra.mxu1 %v19963_v15  ;;  %v20011_v15 = vld [vmem:[#allocation9 + $0x3e0] ss:$48 sps:$4 sm:$0xff]  }
 0x6d4   :  { %9565 = vmatprep.subr.bf16.mxu1 %v19971_v3  ;;  %v20019_v3 = vld [vmem:[#allocation9 + $0x444] ss:$48 sps:$4 sm:$0xff]  }
 0x6d5   :  { %9525 = vmatpush1.bf16.msra.mxu0 %v19876_v33  ;;  %v19924_v33 = vld [vmem:[#allocation9 + $0xa38] ss:$48 sps:$4 sm:$0xff]  }
 0x6d6   :  { %9526 = vmatprep.subr.bf16.mxu0 %v19884_v20  ;;  %v19932_v20 = vld [vmem:[#allocation9 + $0xa9c] ss:$48 sps:$4 sm:$0xff]  }
 0x6d7   :  { %9566 = vmatpush1.bf16.msra.mxu1 %v19969_v19  ;;  %v20017_v19 = vld [vmem:[#allocation9 + $0x440] ss:$48 sps:$4 sm:$0xff]  }
 0x6d8   :  { %9567 = vmatprep.subr.bf16.mxu1 %v19977_v9  ;;  %v20025_v9 = vld [vmem:[#allocation9 + $0x4a4] ss:$48 sps:$4 sm:$0xff]  }
 0x6d9   :  { %9527 = vmatpush1.bf16.msra.mxu0 %v19882_v11  ;;  %v19930_v11 = vld [vmem:[#allocation9 + $0xa98] ss:$48 sps:$4 sm:$0xff]  }
 0x6da   :  { %9528 = vmatprep.subr.bf16.mxu0 %v19890_v62  ;;  %v19938_v62 = vld [vmem:[#allocation9 + $0xafc] ss:$48 sps:$4 sm:$0xff]  }
 0x6db   :  { %v7300_v24 = vpop.f32.mrb[60].mxu0  ;;  %9568 = vmatpush1.bf16.msra.mxu1 %v19975_v29  ;;  %v20023_v29 = vld [vmem:[#allocation9 + $0x4a0] ss:$48 sps:$4 sm:$0xff]  }
 0x6dc   :  { %v22262_v26 = vadd.f32 %v7300_v24, %v22250_v39  ;;  %v7302_v48 = vpop.f32.mrb[61].mxu0  ;;  %9569 = vmatprep.subr.bf16.mxu1 %v19983_v2  ;;  %v19987_v39 = vld [vmem:[#allocation9 + $0x260] ss:$48 sps:$4 sm:$0xff]   ;;  %v20031_v2 = vld [vmem:[#allocation9 + $0x504] ss:$48 sps:$4 sm:$0xff]  }
 0x6dd   :  { %v22265_v22 = vadd.f32 %v7302_v48, %v22255_v38  ;;  %v7304_v56 = vpop.f32.mrb[62].mxu0  ;;  %9529 = vmatpush1.bf16.msra.mxu0 %v19888_v36  ;;  %v22267_v59 = vpop.f32.mrb[60].mxu1  ;;  %v19908_v38 = vld [vmem:[#allocation9 + $0x91c] ss:$48 sps:$4 sm:$0xff]   ;;  %v19936_v36 = vld [vmem:[#allocation9 + $0xaf8] ss:$48 sps:$4 sm:$0xff]  }
 0x6de   :  { %v7305_v32 = vpop.f32.mrb[63].mxu0  ;;  %9530 = vmatprep.subr.bf16.mxu0 %v19896_v17  ;;  %v22269_v52 = vpop.f32.mrb[61].mxu1  ;;  %v19944_v17 = vld [vmem:[#allocation9 + $0xb5c] ss:$48 sps:$4 sm:$0xff]   ;;  %v20029_v24 = vld [vmem:[#allocation9 + $0x500] ss:$48 sps:$4 sm:$0xff]  }
 0x6df   :  { %9570 = vmatpush1.bf16.msra.mxu1 %v19981_v46  ;;  %v9269_v40 = vpop.f32.mrb[62].mxu1  ;;  %v20037_v46 = vld [vmem:[#allocation9 + $0x564] ss:$48 sps:$4 sm:$0xff]   ;;  %v19942_v48 = vld [vmem:[#allocation9 + $0xb58] ss:$48 sps:$4 sm:$0xff]  }
 0x6e0   :  { %v9270_v0 = vpop.f32.mrb[63].mxu1  ;;  %9571 = vmatprep.subr.bf16.mxu1 %v19989_v30  ;;  %v19950_v30 = vld [vmem:[#allocation9 + $0xbbc] ss:$48 sps:$4 sm:$0xff]   ;;  %v20035_v56 = vld [vmem:[#allocation9 + $0x560] ss:$48 sps:$4 sm:$0xff]  }
 0x6e1   :  { %9531 = vmatpush1.bf16.msra.mxu0 %v19894_v42  ;;  %v20043_v42 = vld [vmem:[#allocation9 + $0x5c4] ss:$48 sps:$4 sm:$0xff]   ;;  %v19948_v32 = vld [vmem:[#allocation9 + $0xbb8] ss:$48 sps:$4 sm:$0xff]   ;;  %v20041_v40 = vld [vmem:[#allocation9 + $0x5c0] ss:$48 sps:$4 sm:$0xff]  }
 0x6e2   :  { %9532 = vmatprep.subr.bf16.mxu0 %v19902_v4  ;;  %v19956_v4 = vld [vmem:[#allocation9 + $0x624] ss:$48 sps:$4 sm:$0xff]   ;;  %v19954_v0 = vld [vmem:[#allocation9 + $0x620] ss:$48 sps:$4 sm:$0xff]  }
 0x6e3   :  { %9572 = vmatpush1.bf16.msra.mxu1 %v19987_v39  ;;  %v20049_v39 = vld [vmem:[#allocation9 + $0x2c] ss:$48 sps:$4 sm:$0xff]  }
 0x6e4   :  { %9573 = vmatprep.subr.bf16.mxu1 %v19995_v41  ;;  %v19962_v41 = vld [vmem:[#allocation9 + $0x684] ss:$48 sps:$4 sm:$0xff]  }
 0x6e5   :  { %9533 = vmatpush1.bf16.msra.mxu0 %v19900_v45  ;;  %v20047_v45 = vld [vmem:[#allocation9 + $0x28] ss:$48 sps:$4 sm:$0xff]  }
 0x6e6   :  { %9534 = vmatprep.subr.bf16.mxu0 %v19908_v38  ;;  %v20055_v38 = vld [vmem:[#allocation9 + $0x8c] ss:$48 sps:$4 sm:$0xff]  }
 0x6e7   :  { %9574 = vmatpush1.bf16.msra.mxu1 %v19993_v44  ;;  %v19960_v44 = vld [vmem:[#allocation9 + $0x680] ss:$48 sps:$4 sm:$0xff]  }
 0x6e8   :  { %9575 = vmatprep.subr.bf16.mxu1 %v20001_v37  ;;  %v19968_v37 = vld [vmem:[#allocation9 + $0x6e4] ss:$48 sps:$4 sm:$0xff]  }
 0x6e9   :  { %9535 = vmatpush1.bf16.msra.mxu0 %v19906_v50  ;;  %v20053_v50 = vld [vmem:[#allocation9 + $0x88] ss:$48 sps:$4 sm:$0xff]  }
 0x6ea   :  { %9536 = vmatprep.subr.bf16.mxu0 %v19914_v28  ;;  %v20061_v28 = vld [vmem:[#allocation9 + $0xec] ss:$48 sps:$4 sm:$0xff]  }
 0x6eb   :  { %9576 = vmatpush1.bf16.msra.mxu1 %v19999_v8  ;;  %v19966_v8 = vld [vmem:[#allocation9 + $0x6e0] ss:$48 sps:$4 sm:$0xff]  }
 0x6ec   :  { %9577 = vmatprep.subr.bf16.mxu1 %v20007_v1  ;;  %v19974_v1 = vld [vmem:[#allocation9 + $0x744] ss:$48 sps:$4 sm:$0xff]  }
 0x6ed   :  { %9537 = vmatpush1.bf16.msra.mxu0 %v19912_v57  ;;  %v20059_v57 = vld [vmem:[#allocation9 + $0xe8] ss:$48 sps:$4 sm:$0xff]  }
 0x6ee   :  { %9538 = vmatprep.subr.bf16.mxu0 %v19920_v54  ;;  %v20067_v54 = vld [vmem:[#allocation9 + $0x14c] ss:$48 sps:$4 sm:$0xff]  }
 0x6ef   :  { %9578 = vmatpush1.bf16.msra.mxu1 %v20005_v14  ;;  %v19972_v14 = vld [vmem:[#allocation9 + $0x740] ss:$48 sps:$4 sm:$0xff]  }
 0x6f0   :  { %9579 = vmatprep.subr.bf16.mxu1 %v20013_v61  ;;  %v19980_v61 = vld [vmem:[#allocation9 + $0x7a4] ss:$48 sps:$4 sm:$0xff]  }
 0x6f1   :  { %9539 = vmatpush1.bf16.msra.mxu0 %v19918_v58  ;;  %v20065_v58 = vld [vmem:[#allocation9 + $0x148] ss:$48 sps:$4 sm:$0xff]  }
 0x6f2   :  { %9540 = vmatprep.subr.bf16.mxu0 %v19926_v16  ;;  %v20073_v16 = vld [vmem:[#allocation9 + $0x1ac] ss:$48 sps:$4 sm:$0xff]  }
 0x6f3   :  { %9580 = vmatpush1.bf16.msra.mxu1 %v20011_v15  ;;  %v19986_v15 = vld [vmem:[#allocation9 + $0x804] ss:$48 sps:$4 sm:$0xff]  }
 0x6f4   :  { %9581 = vmatprep.subr.bf16.mxu1 %v20019_v3  ;;  %v20071_v3 = vld [vmem:[#allocation9 + $0x1a8] ss:$48 sps:$4 sm:$0xff]  }
 0x6f5   :  { %9541 = vmatpush1.bf16.msra.mxu0 %v19924_v33  ;;  %v20079_v33 = vld [vmem:[#allocation9 + $0x20c] ss:$48 sps:$4 sm:$0xff]  }
 0x6f6   :  { %9542 = vmatprep.subr.bf16.mxu0 %v19932_v20  ;;  %v19984_v20 = vld [vmem:[#allocation9 + $0x800] ss:$48 sps:$4 sm:$0xff]  }
 0x6f7   :  { %9582 = vmatpush1.bf16.msra.mxu1 %v20017_v19  ;;  %v19992_v19 = vld [vmem:[#allocation9 + $0x864] ss:$48 sps:$4 sm:$0xff]  }
 0x6f8   :  { %9583 = vmatprep.subr.bf16.mxu1 %v20025_v9 }
 0x6f9   :  { %9543 = vmatpush1.bf16.msra.mxu0 %v19930_v11  ;;  %v20077_v11 = vld [vmem:[#allocation9 + $0x208] ss:$48 sps:$4 sm:$0xff]  }
 0x6fa   :  { %9544 = vmatprep.subr.bf16.mxu0 %v19938_v62 }
 0x6fb   :  { %9584 = vmatpush1.bf16.msra.mxu1 %v20023_v29 }
 0x6fc   :  { %9585 = vmatprep.subr.bf16.mxu1 %v20031_v2  ;;  %v20085_v2 = vld [vmem:[#allocation9 + $0x26c] ss:$48 sps:$4 sm:$0xff]  }
 0x6fd   :  { %9545 = vmatpush1.bf16.msra.mxu0 %v19936_v36 }
 0x6fe   :  { %9546 = vmatprep.subr.bf16.mxu0 %v19944_v17 }
 0x6ff   :  { %9586 = vmatpush1.bf16.msra.mxu1 %v20029_v24  ;;  %v19990_v24 = vld [vmem:[#allocation9 + $0x860] ss:$48 sps:$4 sm:$0xff]  }
 0x700   :  { %9587 = vmatprep.subr.bf16.mxu1 %v20037_v46 }
 0x701   :  { %9547 = vmatpush1.bf16.msra.mxu0 %v19942_v48 }
 0x702   :  { %9548 = vmatprep.subr.bf16.mxu0 %v19950_v30 }
 0x703   :  { %9588 = vmatpush1.bf16.msra.mxu1 %v20035_v56  ;;  %v19998_v56 = vld [vmem:[#allocation9 + $0x8c4] ss:$48 sps:$4 sm:$0xff]  }
 0x704   :  { %9589 = vmatprep.subr.bf16.mxu1 %v20043_v42 }
 0x705   :  { %9549 = vmatpush1.bf16.msra.mxu0 %v19948_v32 }
 0x706   :  { %9600 = vmatprep.subr.bf16.mxu0 %v19956_v4  ;;  %v20083_v4 = vld [vmem:[#allocation9 + $0x268] ss:$48 sps:$4 sm:$0xff]  }
 0x707   :  { %9590 = vmatpush1.bf16.msra.mxu1 %v20041_v40  ;;  %v20091_v40 = vld [vmem:[#allocation9 + $0x2cc] ss:$48 sps:$4 sm:$0xff]  }
 0x708   :  { %9551 = vmatmul.mubr.bf16.vlgmr.msra.gmra.mrb[76].mxu0 %v22227_v25  ;;  %9641 = vmatprep.subr.bf16.mxu1 %v20049_v39  ;;  %v19996_v39 = vld [vmem:[#allocation9 + $0x8c0] ss:$48 sps:$4 sm:$0xff]  }
 0x709   :  { %9601 = vmatpush1.bf16.msra.mxu0 %v19954_v0  ;;  %9632 = vmatprep.mubr.bf16.mxu0 %v22206_v34  ;;  %v20004_v0 = vld [vmem:[#allocation9 + $0x924] ss:$48 sps:$4 sm:$0xff]  }
 0x70a   :  { %9602 = vmatprep.subr.bf16.mxu0 %v19962_v41  ;;  %9592 = vmatmul.mubr.bf16.vlgmr.msra.gmra.mrb[76].mxu1 %v22208_v49  ;;  %v20097_v41 = vld [vmem:[#allocation9 + $0x32c] ss:$48 sps:$4 sm:$0xff]  }
 0x70b   :  { %9642 = vmatpush1.bf16.msra.mxu1 %v20047_v45  ;;  %9673 = vmatprep.mubr.bf16.mxu1 %v22184_v21  ;;  %v19978_v21 = vld [vmem:[#allocation9 + $0x7a0] ss:$48 sps:$4 sm:$0xff]  }
 0x70c   :  { %9643 = vmatprep.subr.bf16.mxu1 %v20055_v38  ;;  %v20002_v45 = vld [vmem:[#allocation9 + $0x920] ss:$48 sps:$4 sm:$0xff]   ;;  %v20010_v38 = vld [vmem:[#allocation9 + $0x984] ss:$48 sps:$4 sm:$0xff]  }
 0x70d   :  { %9603 = vmatpush1.bf16.msra.mxu0 %v19960_v44  ;;  %v20103_v44 = vld [vmem:[#allocation9 + $0x38c] ss:$48 sps:$4 sm:$0xff]  }
 0x70e   :  { %9604 = vmatprep.subr.bf16.mxu0 %v19968_v37  ;;  %v20008_v37 = vld [vmem:[#allocation9 + $0x980] ss:$48 sps:$4 sm:$0xff]  }
 0x70f   :  { %9644 = vmatpush1.bf16.msra.mxu1 %v20053_v50  ;;  %v20016_v50 = vld [vmem:[#allocation9 + $0x9e4] ss:$48 sps:$4 sm:$0xff]  }
 0x710   :  { %9645 = vmatprep.subr.bf16.mxu1 %v20061_v28  ;;  %v20101_v28 = vld [vmem:[#allocation9 + $0x388] ss:$48 sps:$4 sm:$0xff]  }
 0x711   :  { %9605 = vmatpush1.bf16.msra.mxu0 %v19966_v8  ;;  %v20109_v8 = vld [vmem:[#allocation9 + $0x3ec] ss:$48 sps:$4 sm:$0xff]  }
 0x712   :  { %9606 = vmatprep.subr.bf16.mxu0 %v19974_v1  ;;  %v20014_v1 = vld [vmem:[#allocation9 + $0x9e0] ss:$48 sps:$4 sm:$0xff]  }
 0x713   :  { %9646 = vmatpush1.bf16.msra.mxu1 %v20059_v57  ;;  %v20022_v57 = vld [vmem:[#allocation9 + $0xa44] ss:$48 sps:$4 sm:$0xff]  }
 0x714   :  { %9647 = vmatprep.subr.bf16.mxu1 %v20067_v54  ;;  %v20107_v54 = vld [vmem:[#allocation9 + $0x3e8] ss:$48 sps:$4 sm:$0xff]  }
 0x715   :  { %9607 = vmatpush1.bf16.msra.mxu0 %v19972_v14  ;;  %v20115_v14 = vld [vmem:[#allocation9 + $0x44c] ss:$48 sps:$4 sm:$0xff]  }
 0x716   :  { %9608 = vmatprep.subr.bf16.mxu0 %v19980_v61  ;;  %v20020_v61 = vld [vmem:[#allocation9 + $0xa40] ss:$48 sps:$4 sm:$0xff]  }
 0x717   :  { %9648 = vmatpush1.bf16.msra.mxu1 %v20065_v58  ;;  %v20028_v58 = vld [vmem:[#allocation9 + $0xaa4] ss:$48 sps:$4 sm:$0xff]  }
 0x718   :  { %9649 = vmatprep.subr.bf16.mxu1 %v20073_v16  ;;  %v20113_v16 = vld [vmem:[#allocation9 + $0x448] ss:$48 sps:$4 sm:$0xff]  }
 0x719   :  { %9609 = vmatpush1.bf16.msra.mxu0 %v19978_v21  ;;  %v20121_v21 = vld [vmem:[#allocation9 + $0x4ac] ss:$48 sps:$4 sm:$0xff]  }
 0x71a   :  { %9610 = vmatprep.subr.bf16.mxu0 %v19986_v15  ;;  %v20026_v15 = vld [vmem:[#allocation9 + $0xaa0] ss:$48 sps:$4 sm:$0xff]  }
 0x71b   :  { %v9306_v9 = vpop.f32.mrb[64].mxu0  ;;  %9650 = vmatpush1.bf16.msra.mxu1 %v20071_v3  ;;  %v20034_v3 = vld [vmem:[#allocation9 + $0xb04] ss:$48 sps:$4 sm:$0xff]  }
 0x71c   :  { %v9307_v62 = vadd.f32 %v9306_v9, %v22267_v59  ;;  %v9308_v29 = vpop.f32.mrb[65].mxu0  ;;  %9651 = vmatprep.subr.bf16.mxu1 %v20079_v33  ;;  %v20119_v33 = vld [vmem:[#allocation9 + $0x4a8] ss:$48 sps:$4 sm:$0xff]   ;;  %v20040_v9 = vld [vmem:[#allocation9 + $0xb64] ss:$48 sps:$4 sm:$0xff]  }
 0x71d   :  { %v9309_v36 = vadd.f32 %v9308_v29, %v22269_v52  ;;  %v9310_v17 = vpop.f32.mrb[66].mxu0  ;;  %9611 = vmatpush1.bf16.msra.mxu0 %v19984_v20  ;;  %v22277_v46 = vpop.f32.mrb[64].mxu1  ;;  %v20127_v20 = vld [vmem:[#allocation9 + $0x50c] ss:$48 sps:$4 sm:$0xff]   ;;  %v20038_v29 = vld [vmem:[#allocation9 + $0xb60] ss:$48 sps:$4 sm:$0xff]  }
 0x71e   :  { %v22280_v48 = vadd.f32 %v9307_v62, %v22174_v55  ;;  %v9311_v30 = vpop.f32.mrb[67].mxu0  ;;  %9612 = vmatprep.subr.bf16.mxu0 %v19992_v19  ;;  %v22282_v42 = vpop.f32.mrb[65].mxu1  ;;  %v20089_v55 = vld [vmem:[#allocation9 + $0x2c8] ss:$48 sps:$4 sm:$0xff]   ;;  %v20032_v19 = vld [vmem:[#allocation9 + $0xb00] ss:$48 sps:$4 sm:$0xff]  }
 0x71f   :  { %v22285_v59 = vadd.f32 %v9309_v36, %v22179_v23  ;;  %9652 = vmatpush1.bf16.msra.mxu1 %v20077_v11  ;;  %v9351_v32 = vpop.f32.mrb[66].mxu1  ;;  %v20095_v23 = vld [vmem:[#allocation9 + $0x328] ss:$48 sps:$4 sm:$0xff]   ;;  %v20133_v62 = vld [vmem:[#allocation9 + $0x56c] ss:$48 sps:$4 sm:$0xff]  }
 0x720   :  { %v9352_v52 = vpop.f32.mrb[67].mxu1  ;;  %9653 = vmatprep.subr.bf16.mxu1 %v20085_v2  ;;  %v20125_v11 = vld [vmem:[#allocation9 + $0x508] ss:$48 sps:$4 sm:$0xff]   ;;  %v20046_v2 = vld [vmem:[#allocation9 + $0xbc4] ss:$48 sps:$4 sm:$0xff]  }
 0x721   :  { %9613 = vmatpush1.bf16.msra.mxu0 %v19990_v24  ;;  %v20131_v36 = vld [vmem:[#allocation9 + $0x568] ss:$48 sps:$4 sm:$0xff]   ;;  %v20139_v17 = vld [vmem:[#allocation9 + $0x5cc] ss:$48 sps:$4 sm:$0xff]   ;;  %v20044_v24 = vld [vmem:[#allocation9 + $0xbc0] ss:$48 sps:$4 sm:$0xff]  }
 0x722   :  { %9614 = vmatprep.subr.bf16.mxu0 %v19998_v56  ;;  %v20052_v30 = vld [vmem:[#allocation9 + $0x62c] ss:$48 sps:$4 sm:$0xff]   ;;  %v20137_v56 = vld [vmem:[#allocation9 + $0x5c8] ss:$48 sps:$4 sm:$0xff]  }
 0x723   :  { %9654 = vmatpush1.bf16.msra.mxu1 %v20083_v4  ;;  %v20050_v32 = vld [vmem:[#allocation9 + $0x628] ss:$48 sps:$4 sm:$0xff]   ;;  %v20058_v4 = vld [vmem:[#allocation9 + $0x68c] ss:$48 sps:$4 sm:$0xff]  }
 0x724   :  { %9655 = vmatprep.subr.bf16.mxu1 %v20091_v40  ;;  %v20056_v52 = vld [vmem:[#allocation9 + $0x688] ss:$48 sps:$4 sm:$0xff]   ;;  %v20064_v40 = vld [vmem:[#allocation9 + $0x6ec] ss:$48 sps:$4 sm:$0xff]  }
 0x725   :  { %9615 = vmatpush1.bf16.msra.mxu0 %v19996_v39  ;;  %v20062_v39 = vld [vmem:[#allocation9 + $0x6e8] ss:$48 sps:$4 sm:$0xff]  }
 0x726   :  { %9616 = vmatprep.subr.bf16.mxu0 %v20004_v0  ;;  %v20070_v0 = vld [vmem:[#allocation9 + $0x74c] ss:$48 sps:$4 sm:$0xff]  }
 0x727   :  { %9656 = vmatpush1.bf16.msra.mxu1 %v20089_v55  ;;  %v20068_v55 = vld [vmem:[#allocation9 + $0x748] ss:$48 sps:$4 sm:$0xff]  }
 0x728   :  { %9657 = vmatprep.subr.bf16.mxu1 %v20097_v41  ;;  %v20076_v41 = vld [vmem:[#allocation9 + $0x7ac] ss:$48 sps:$4 sm:$0xff]  }
 0x729   :  { %9617 = vmatpush1.bf16.msra.mxu0 %v20002_v45  ;;  %v20074_v45 = vld [vmem:[#allocation9 + $0x7a8] ss:$48 sps:$4 sm:$0xff]  }
 0x72a   :  { %9618 = vmatprep.subr.bf16.mxu0 %v20010_v38  ;;  %v20082_v38 = vld [vmem:[#allocation9 + $0x80c] ss:$48 sps:$4 sm:$0xff]  }
 0x72b   :  { %9658 = vmatpush1.bf16.msra.mxu1 %v20095_v23  ;;  %v20080_v23 = vld [vmem:[#allocation9 + $0x808] ss:$48 sps:$4 sm:$0xff]  }
 0x72c   :  { %9659 = vmatprep.subr.bf16.mxu1 %v20103_v44 }
 0x72d   :  { %9619 = vmatpush1.bf16.msra.mxu0 %v20008_v37 }
 0x72e   :  { %9620 = vmatprep.subr.bf16.mxu0 %v20016_v50 }
 0x72f   :  { %9660 = vmatpush1.bf16.msra.mxu1 %v20101_v28 }
 0x730   :  { %9661 = vmatprep.subr.bf16.mxu1 %v20109_v8  ;;  %v20086_v8 = vld [vmem:[#allocation9 + $0x868] ss:$48 sps:$4 sm:$0xff]  }
 0x731   :  { %9621 = vmatpush1.bf16.msra.mxu0 %v20014_v1 }
 0x732   :  { %9622 = vmatprep.subr.bf16.mxu0 %v20022_v57 }
 0x733   :  { %9662 = vmatpush1.bf16.msra.mxu1 %v20107_v54 }
 0x734   :  { %9663 = vmatprep.subr.bf16.mxu1 %v20115_v14  ;;  %v20094_v14 = vld [vmem:[#allocation9 + $0x8cc] ss:$48 sps:$4 sm:$0xff]  }
 0x735   :  { %9623 = vmatpush1.bf16.msra.mxu0 %v20020_v61 }
 0x736   :  { %9624 = vmatprep.subr.bf16.mxu0 %v20028_v58 }
 0x737   :  { %9664 = vmatpush1.bf16.msra.mxu1 %v20113_v16 }
 0x738   :  { %9665 = vmatprep.subr.bf16.mxu1 %v20121_v21  ;;  %v20100_v21 = vld [vmem:[#allocation9 + $0x92c] ss:$48 sps:$4 sm:$0xff]  }
 0x739   :  { %9625 = vmatpush1.bf16.msra.mxu0 %v20026_v15  ;;  %v20098_v15 = vld [vmem:[#allocation9 + $0x928] ss:$48 sps:$4 sm:$0xff]  }
 0x73a   :  { %9626 = vmatprep.subr.bf16.mxu0 %v20034_v3  ;;  %v20106_v3 = vld [vmem:[#allocation9 + $0x98c] ss:$48 sps:$4 sm:$0xff]  }
 0x73b   :  { %9666 = vmatpush1.bf16.msra.mxu1 %v20119_v33  ;;  %v20112_v33 = vld [vmem:[#allocation9 + $0x9ec] ss:$48 sps:$4 sm:$0xff]  }
 0x73c   :  { %9667 = vmatprep.subr.bf16.mxu1 %v20127_v20  ;;  %v20110_v20 = vld [vmem:[#allocation9 + $0x9e8] ss:$48 sps:$4 sm:$0xff]  }
 0x73d   :  { %9627 = vmatpush1.bf16.msra.mxu0 %v20032_v19  ;;  %v20118_v19 = vld [vmem:[#allocation9 + $0xa4c] ss:$48 sps:$4 sm:$0xff]  }
 0x73e   :  { %9628 = vmatprep.subr.bf16.mxu0 %v20040_v9  ;;  %v20124_v9 = vld [vmem:[#allocation9 + $0xaac] ss:$48 sps:$4 sm:$0xff]  }
 0x73f   :  { %9668 = vmatpush1.bf16.msra.mxu1 %v20125_v11  ;;  %v20122_v11 = vld [vmem:[#allocation9 + $0xaa8] ss:$48 sps:$4 sm:$0xff]  }
 0x740   :  { %9669 = vmatprep.subr.bf16.mxu1 %v20133_v62  ;;  %v20130_v62 = vld [vmem:[#allocation9 + $0xb0c] ss:$48 sps:$4 sm:$0xff]  }
 0x741   :  { %9629 = vmatpush1.bf16.msra.mxu0 %v20038_v29  ;;  %v20145_v29 = vld [vmem:[#allocation10 + $0x4] ss:$48 sps:$4 sm:$0xff]  }
 0x742   :  { %9630 = vmatprep.subr.bf16.mxu0 %v20046_v2  ;;  %v20143_v2 = vld [vmem:[#allocation10] ss:$48 sps:$4 sm:$0xff]  }
 0x743   :  { %9670 = vmatpush1.bf16.msra.mxu1 %v20131_v36  ;;  %v20128_v36 = vld [vmem:[#allocation9 + $0xb08] ss:$48 sps:$4 sm:$0xff]  }
 0x744   :  { %9671 = vmatprep.subr.bf16.mxu1 %v20139_v17  ;;  %v20136_v17 = vld [vmem:[#allocation9 + $0xb6c] ss:$48 sps:$4 sm:$0xff]  }
 0x745   :  { %9631 = vmatpush1.bf16.msra.mxu0 %v20044_v24  ;;  %v20148_v24 = vld [vmem:[#allocation10 + $0x64] ss:$48 sps:$4 sm:$0xff]  }
 0x746   :  { %9682 = vmatprep.subr.bf16.mxu0 %v20052_v30  ;;  %v20146_v30 = vld [vmem:[#allocation10 + $0x60] ss:$48 sps:$4 sm:$0xff]  }
 0x747   :  { %9672 = vmatpush1.bf16.msra.mxu1 %v20137_v56  ;;  %v20134_v56 = vld [vmem:[#allocation9 + $0xb68] ss:$48 sps:$4 sm:$0xff]  }
 0x748   :  { %9633 = vmatmul.mubr.bf16.vlgmr.msra.gmra.mrb[80].mxu0 %v22227_v25  ;;  %12606 = vmatprep.subr.bf16.mxu1 %v20145_v29  ;;  %v20187_v29 = vld [vmem:[#allocation10 + $0x544] ss:$48 sps:$4 sm:$0xff]  }
 0x749   :  { %9683 = vmatpush1.bf16.msra.mxu0 %v20050_v32  ;;  %9714 = vmatprep.mubr.bf16.mxu0 %v22206_v34  ;;  %v20088_v34 = vld [vmem:[#allocation9 + $0x86c] ss:$48 sps:$4 sm:$0xff]   ;;  %v20149_v32 = vld [vmem:[#allocation10 + $0xc0] ss:$48 sps:$4 sm:$0xff]  }
 0x74a   :  { %9684 = vmatprep.subr.bf16.mxu0 %v20058_v4  ;;  %9674 = vmatmul.mubr.bf16.vlgmr.msra.gmra.mrb[80].mxu1 %v22208_v49  ;;  %v20151_v4 = vld [vmem:[#allocation10 + $0xc4] ss:$48 sps:$4 sm:$0xff]  }
 0x74b   :  { %12607 = vmatpush1.bf16.msra.mxu1 %v20143_v2  ;;  %v20190_v2 = vld [vmem:[#allocation10 + $0x5a4] ss:$48 sps:$4 sm:$0xff]  }
 0x74c   :  { %12608 = vmatprep.subr.bf16.mxu1 %v20148_v24  ;;  %v20193_v24 = vld [vmem:[#allocation10 + $0x604] ss:$48 sps:$4 sm:$0xff]  }
 0x74d   :  { %9685 = vmatpush1.bf16.msra.mxu0 %v20056_v52  ;;  %v20142_v52 = vld [vmem:[#allocation9 + $0xbcc] ss:$48 sps:$4 sm:$0xff]  }
 0x74e   :  { %9686 = vmatprep.subr.bf16.mxu0 %v20064_v40  ;;  %v20154_v40 = vld [vmem:[#allocation10 + $0x124] ss:$48 sps:$4 sm:$0xff]  }
 0x74f   :  { %12609 = vmatpush1.bf16.msra.mxu1 %v20146_v30  ;;  %v20196_v30 = vld [vmem:[#allocation10 + $0xc] ss:$48 sps:$4 sm:$0xff]  }
 0x750   :  { %12610 = vmatprep.subr.bf16.mxu1 %v20151_v4  ;;  %v20205_v4 = vld [vmem:[#allocation10 + $0x6c4] ss:$48 sps:$4 sm:$0xff]  }
 0x751   :  { %9687 = vmatpush1.bf16.msra.mxu0 %v20062_v39  ;;  %v20140_v39 = vld [vmem:[#allocation9 + $0xbc8] ss:$48 sps:$4 sm:$0xff]  }
 0x752   :  { %9688 = vmatprep.subr.bf16.mxu0 %v20070_v0  ;;  %v20152_v0 = vld [vmem:[#allocation10 + $0x120] ss:$48 sps:$4 sm:$0xff]  }
 0x753   :  { %12611 = vmatpush1.bf16.msra.mxu1 %v20149_v32  ;;  %v20197_v32 = vld [vmem:[#allocation10 + $0x660] ss:$48 sps:$4 sm:$0xff]  }
 0x754   :  { %12612 = vmatprep.subr.bf16.mxu1 %v20154_v40  ;;  %v20211_v40 = vld [vmem:[#allocation10 + $0x724] ss:$48 sps:$4 sm:$0xff]  }
 0x755   :  { %9689 = vmatpush1.bf16.msra.mxu0 %v20068_v55  ;;  %v20157_v55 = vld [vmem:[#allocation10 + $0x184] ss:$48 sps:$4 sm:$0xff]  }
 0x756   :  { %9690 = vmatprep.subr.bf16.mxu0 %v20076_v41  ;;  %v20155_v41 = vld [vmem:[#allocation10 + $0x180] ss:$48 sps:$4 sm:$0xff]  }
 0x757   :  { %12613 = vmatpush1.bf16.msra.mxu1 %v20152_v0  ;;  %v20217_v0 = vld [vmem:[#allocation10 + $0x784] ss:$48 sps:$4 sm:$0xff]  }
 0x758   :  { %12614 = vmatprep.subr.bf16.mxu1 %v20157_v55  ;;  %v20215_v55 = vld [vmem:[#allocation10 + $0x780] ss:$48 sps:$4 sm:$0xff]  }
 0x759   :  { %9691 = vmatpush1.bf16.msra.mxu0 %v20074_v45  ;;  %v20160_v45 = vld [vmem:[#allocation10 + $0x1e4] ss:$48 sps:$4 sm:$0xff]  }
 0x75a   :  { %9692 = vmatprep.subr.bf16.mxu0 %v20082_v38  ;;  %v20158_v38 = vld [vmem:[#allocation10 + $0x1e0] ss:$48 sps:$4 sm:$0xff]  }
 0x75b   :  { %v9388_v44 = vpop.f32.mrb[68].mxu0  ;;  %12615 = vmatpush1.bf16.msra.mxu1 %v20155_v41  ;;  %v20223_v41 = vld [vmem:[#allocation10 + $0x7e4] ss:$48 sps:$4 sm:$0xff]  }
 0x75c   :  { %v9389_v37 = vadd.f32 %v9388_v44, %v22277_v46  ;;  %v9390_v49 = vpop.f32.mrb[69].mxu0  ;;  %12616 = vmatprep.subr.bf16.mxu1 %v20160_v45  ;;  %v20166_v44 = vld [vmem:[#allocation10 + $0x2a4] ss:$48 sps:$4 sm:$0xff]   ;;  %v20221_v45 = vld [vmem:[#allocation10 + $0x7e0] ss:$48 sps:$4 sm:$0xff]  }
 0x75d   :  { %v9391_v50 = vadd.f32 %v9390_v49, %v22282_v42  ;;  %v9392_v28 = vpop.f32.mrb[70].mxu0  ;;  %9693 = vmatpush1.bf16.msra.mxu0 %v20080_v23  ;;  %v22292_v1 = vpop.f32.mrb[68].mxu1  ;;  %v20092_v42 = vld [vmem:[#allocation9 + $0x8c8] ss:$48 sps:$4 sm:$0xff]   ;;  %v20163_v23 = vld [vmem:[#allocation10 + $0x244] ss:$48 sps:$4 sm:$0xff]  }
 0x75e   :  { %v22295_v57 = vadd.f32 %v9389_v37, %v22193_v43  ;;  %v9393_v54 = vpop.f32.mrb[71].mxu0  ;;  %9694 = vmatprep.subr.bf16.mxu0 %v20088_v34  ;;  %v22297_v61 = vpop.f32.mrb[69].mxu1  ;;  %v20104_v43 = vld [vmem:[#allocation9 + $0x988] ss:$48 sps:$4 sm:$0xff]   ;;  %v20161_v34 = vld [vmem:[#allocation10 + $0x240] ss:$48 sps:$4 sm:$0xff]  }
 0x75f   :  { %v22300_v58 = vadd.f32 %v9391_v50, %v22198_v10  ;;  %v9433_v46 = vpop.f32.mrb[70].mxu1  ;;  %v20116_v10 = vld [vmem:[#allocation9 + $0xa48] ss:$48 sps:$4 sm:$0xff]   ;;  %12617 = vmatpush1.bf16.msra.mxu1 %v20158_v38  ;;  %v20164_v37 = vld [vmem:[#allocation10 + $0x2a0] ss:$48 sps:$4 sm:$0xff]  }
 0x760   :  { %v9434_v16 = vpop.f32.mrb[71].mxu1  ;;  %12618 = vmatprep.subr.bf16.mxu1 %v20163_v23  ;;  %v20169_v49 = vld [vmem:[#allocation10 + $0x304] ss:$48 sps:$4 sm:$0xff]   ;;  %v20167_v50 = vld [vmem:[#allocation10 + $0x300] ss:$48 sps:$4 sm:$0xff]  }
 0x761   :  { %9695 = vmatpush1.bf16.msra.mxu0 %v20086_v8  ;;  %v20172_v28 = vld [vmem:[#allocation10 + $0x364] ss:$48 sps:$4 sm:$0xff]   ;;  %v20170_v8 = vld [vmem:[#allocation10 + $0x360] ss:$48 sps:$4 sm:$0xff]  }
 0x762   :  { %9696 = vmatprep.subr.bf16.mxu0 %v20094_v14  ;;  %v20229_v38 = vld [vmem:[#allocation10 + $0x844] ss:$48 sps:$4 sm:$0xff]   ;;  %v20227_v23 = vld [vmem:[#allocation10 + $0x840] ss:$48 sps:$4 sm:$0xff]  }
 0x763   :  { %12619 = vmatpush1.bf16.msra.mxu1 %v20161_v34  ;;  %v20235_v34 = vld [vmem:[#allocation10 + $0x8a4] ss:$48 sps:$4 sm:$0xff]  }
 0x764   :  { %12620 = vmatprep.subr.bf16.mxu1 %v20166_v44  ;;  %v20233_v44 = vld [vmem:[#allocation10 + $0x8a0] ss:$48 sps:$4 sm:$0xff]  }
 0x765   :  { %9697 = vmatpush1.bf16.msra.mxu0 %v20092_v42 }
 0x766   :  { %9698 = vmatprep.subr.bf16.mxu0 %v20100_v21 }
 0x767   :  { %12621 = vmatpush1.bf16.msra.mxu1 %v20164_v37  ;;  %v20241_v37 = vld [vmem:[#allocation10 + $0x904] ss:$48 sps:$4 sm:$0xff]  }
 0x768   :  { %12622 = vmatprep.subr.bf16.mxu1 %v20169_v49  ;;  %v20239_v49 = vld [vmem:[#allocation10 + $0x900] ss:$48 sps:$4 sm:$0xff]  }
 0x769   :  { %9699 = vmatpush1.bf16.msra.mxu0 %v20098_v15 }
 0x76a   :  { %9700 = vmatprep.subr.bf16.mxu0 %v20106_v3 }
 0x76b   :  { %12623 = vmatpush1.bf16.msra.mxu1 %v20167_v50  ;;  %v20247_v50 = vld [vmem:[#allocation10 + $0x964] ss:$48 sps:$4 sm:$0xff]  }
 0x76c   :  { %12624 = vmatprep.subr.bf16.mxu1 %v20172_v28  ;;  %v20245_v28 = vld [vmem:[#allocation10 + $0x960] ss:$48 sps:$4 sm:$0xff]  }
 0x76d   :  { %9701 = vmatpush1.bf16.msra.mxu0 %v20104_v43  ;;  %v20175_v43 = vld [vmem:[#allocation10 + $0x3c4] ss:$48 sps:$4 sm:$0xff]  }
 0x76e   :  { %9702 = vmatprep.subr.bf16.mxu0 %v20112_v33 }
 0x76f   :  { %12625 = vmatpush1.bf16.msra.mxu1 %v20170_v8 }
 0x770   :  { %12626 = vmatprep.subr.bf16.mxu1 %v20175_v43 }
 0x771   :  { %9703 = vmatpush1.bf16.msra.mxu0 %v20110_v20 }
 0x772   :  { %9704 = vmatprep.subr.bf16.mxu0 %v20118_v19  ;;  %v20173_v19 = vld [vmem:[#allocation10 + $0x3c0] ss:$48 sps:$4 sm:$0xff]  }
 0x773   :  { %12627 = vmatpush1.bf16.msra.mxu1 %v20173_v19  ;;  %v20253_v19 = vld [vmem:[#allocation10 + $0x9c4] ss:$48 sps:$4 sm:$0xff]  }
 0x775   :  { %9705 = vmatpush1.bf16.msra.mxu0 %v20116_v10  ;;  %v20176_v10 = vld [vmem:[#allocation10 + $0x420] ss:$48 sps:$4 sm:$0xff]  }
 0x776   :  { %9706 = vmatprep.subr.bf16.mxu0 %v20124_v9  ;;  %v20181_v9 = vld [vmem:[#allocation10 + $0x484] ss:$48 sps:$4 sm:$0xff]  }
 0x779   :  { %9707 = vmatpush1.bf16.msra.mxu0 %v20122_v11  ;;  %v20179_v11 = vld [vmem:[#allocation10 + $0x480] ss:$48 sps:$4 sm:$0xff]  }
 0x77a   :  { %9708 = vmatprep.subr.bf16.mxu0 %v20130_v62  ;;  %v20182_v62 = vld [vmem:[#allocation10 + $0x4e0] ss:$48 sps:$4 sm:$0xff]  }
 0x77d   :  { %9709 = vmatpush1.bf16.msra.mxu0 %v20128_v36  ;;  %v20188_v36 = vld [vmem:[#allocation10 + $0x5a0] ss:$48 sps:$4 sm:$0xff]  }
 0x77e   :  { %9710 = vmatprep.subr.bf16.mxu0 %v20136_v17  ;;  %v20191_v17 = vld [vmem:[#allocation10 + $0x600] ss:$48 sps:$4 sm:$0xff]  }
 0x781   :  { %9711 = vmatpush1.bf16.msra.mxu0 %v20134_v56  ;;  %v20199_v56 = vld [vmem:[#allocation10 + $0x664] ss:$48 sps:$4 sm:$0xff]  }
 0x782   :  { %9712 = vmatprep.subr.bf16.mxu0 %v20142_v52  ;;  %v20203_v52 = vld [vmem:[#allocation10 + $0x6c0] ss:$48 sps:$4 sm:$0xff]  }
 0x785   :  { %9713 = vmatpush1.bf16.msra.mxu0 %v20140_v39  ;;  %v20209_v39 = vld [vmem:[#allocation10 + $0x720] ss:$48 sps:$4 sm:$0xff]  }
 0x786   :  { %12647 = vmatprep.subr.bf16.mxu0 %v20193_v24 }
 0x788   :  { %9715 = vmatmul.mubr.bf16.vlgmr.msra.gmra.mrb[84].mxu0 %v22227_v25 }
 0x789   :  { %12648 = vmatpush1.bf16.msra.mxu0 %v20191_v17  ;;  %v20289_v17 = vld [vmem:[#allocation10 + $0x60c] ss:$48 sps:$4 sm:$0xff]  }
 0x78a   :  { %12649 = vmatprep.subr.bf16.mxu0 %v20199_v56 }
 0x78d   :  { %12650 = vmatpush1.bf16.msra.mxu0 %v20197_v32 }
 0x78e   :  { %12651 = vmatprep.subr.bf16.mxu0 %v20205_v4 }
 0x791   :  { %12652 = vmatpush1.bf16.msra.mxu0 %v20203_v52 }
 0x792   :  { %12653 = vmatprep.subr.bf16.mxu0 %v20211_v40 }
 0x795   :  { %12654 = vmatpush1.bf16.msra.mxu0 %v20209_v39 }
 0x796   :  { %12655 = vmatprep.subr.bf16.mxu0 %v20217_v0 }
 0x799   :  { %12656 = vmatpush1.bf16.msra.mxu0 %v20215_v55 }
 0x79a   :  { %12657 = vmatprep.subr.bf16.mxu0 %v20223_v41 }
 0x79b   :  { %v9470_v25 = vpop.f32.mrb[72].mxu0 }
 0x79c   :  { %v9471_v54 = vadd.f32 %v9470_v25, %v22292_v1  ;;  %v9472_v14 = vpop.f32.mrb[73].mxu0 }
 0x79d   :  { %v9473_v46 = vadd.f32 %v9472_v14, %v22297_v61  ;;  %v9474_v16 = vpop.f32.mrb[74].mxu0  ;;  %v22305_v42 = vpop.f32.mrb[72].mxu1  ;;  %v20178_v61 = vld [vmem:[#allocation10 + $0x424] ss:$48 sps:$4 sm:$0xff]   ;;  %12658 = vmatpush1.bf16.msra.mxu0 %v20221_v45 }
 0x79e   :  { %v22308_v21 = vadd.f32 %v9471_v54, %v22215_v18  ;;  %v9475_v15 = vpop.f32.mrb[75].mxu0  ;;  %v22310_v3 = vpop.f32.mrb[73].mxu1  ;;  %12628 = vmatprep.subr.bf16.mxu1 %v20178_v61  ;;  %v20184_v18 = vld [vmem:[#allocation10 + $0x4e4] ss:$48 sps:$4 sm:$0xff]   ;;  %12659 = vmatprep.subr.bf16.mxu0 %v20229_v38 }
 0x79f   :  { %v22313_v33 = vadd.f32 %v9473_v46, %v22220_v27  ;;  %v9515_v20 = vpop.f32.mrb[74].mxu1  ;;  %12629 = vmatpush1.bf16.msra.mxu1 %v20176_v10  ;;  %v20185_v27 = vld [vmem:[#allocation10 + $0x540] ss:$48 sps:$4 sm:$0xff]  }
 0x7a0   :  { %v9516_v1 = vpop.f32.mrb[75].mxu1  ;;  %12630 = vmatprep.subr.bf16.mxu1 %v20181_v9  ;;  %v20251_v10 = vld [vmem:[#allocation10 + $0x9c0] ss:$48 sps:$4 sm:$0xff]  }
 0x7a1   :  { %12660 = vmatpush1.bf16.msra.mxu0 %v20227_v23  ;;  %v20257_v9 = vld [vmem:[#allocation10 + $0xa20] ss:$48 sps:$4 sm:$0xff]  }
 0x7a2   :  { %12661 = vmatprep.subr.bf16.mxu0 %v20235_v34  ;;  %v22347_v34 = vld [vmem:[%s22700_s12] sm:$0xf] }
 0x7a3   :  { %12631 = vmatpush1.bf16.msra.mxu1 %v20179_v11  ;;  %v20265_v11 = vld [vmem:[#allocation10 + $0xa84] ss:$48 sps:$4 sm:$0xff]  }
 0x7a4   :  { %12632 = vmatprep.subr.bf16.mxu1 %v20184_v18  ;;  %v20263_v18 = vld [vmem:[#allocation10 + $0xa80] ss:$48 sps:$4 sm:$0xff]  }
 0x7a5   :  { %12662 = vmatpush1.bf16.msra.mxu0 %v20233_v44 }
 0x7a6   :  { %12663 = vmatprep.subr.bf16.mxu0 %v20241_v37  ;;  %v9857_v37 = vrot.slane %v22347_v34, %v22052_v6 }
 0x7a7   :  { %12633 = vmatpush1.bf16.msra.mxu1 %v20182_v62  ;;  %v20269_v62 = vld [vmem:[#allocation10 + $0xae0] ss:$48 sps:$4 sm:$0xff]  }
 0x7a8   :  { %12634 = vmatprep.subr.bf16.mxu1 %v20187_v29  ;;  %v20277_v29 = vld [vmem:[#allocation10 + $0xb44] ss:$48 sps:$4 sm:$0xff]  }
 0x7a9   :  { %12664 = vmatpush1.bf16.msra.mxu0 %v20239_v49 }
 0x7aa   :  { %12665 = vmatprep.subr.bf16.mxu0 %v20247_v50  ;;  %v9861_v50 = vrot.slane %v22347_v34, %v22055_v7 }
 0x7ab   :  { %12635 = vmatpush1.bf16.msra.mxu1 %v20185_v27  ;;  %v20283_v27 = vld [vmem:[#allocation10 + $0xba4] ss:$48 sps:$4 sm:$0xff]  }
 0x7ac   :  { %12636 = vmatprep.subr.bf16.mxu1 %v20190_v2  ;;  %v20281_v2 = vld [vmem:[#allocation10 + $0xba0] ss:$48 sps:$4 sm:$0xff]  }
 0x7ad   :  { %12666 = vmatpush1.bf16.msra.mxu0 %v20245_v28 }
 0x7ae   :  { %12667 = vmatprep.subr.bf16.mxu0 %v20253_v19 }
 0x7af   :  { %12637 = vmatpush1.bf16.msra.mxu1 %v20188_v36  ;;  %v22330_v36 = vld [vmem:[%s22698_s10] sm:$0xff] }
 0x7b0   :  { %12688 = vmatprep.subr.bf16.mxu1 %v20196_v30  ;;  %v9735_v24 = vrot.slane %v22330_v36, %v22052_v6  ;;  %v9739_v30 = vrot.slane %v22330_v36, %v22055_v7  ;;  %v9751_v40 = vrot.slane %v22330_v36, %v22064_v63  ;;  %v9755_v39 = vrot.slane %v22330_v36, %v22067_v12 }
 0x7b1   :  { %12668 = vmatpush1.bf16.msra.mxu0 %v20251_v10 }
 0x7b2   :  { %v9772_v56 = vadd.f32 %v9735_v24, %v22280_v48  ;;  %v9773_v32 = vadd.f32 %v9739_v30, %v22285_v59  ;;  %v9776_v0 = vadd.f32 %v9751_v40, %v22308_v21  ;;  %v9777_v55 = vadd.f32 %v9755_v39, %v22313_v33  ;;  %v22352_v21 = vld [vmem:[%s22699_s11] sm:$0xf] }
 0x7b3   :  { %v9832_v28 = vrot.slane %v22352_v21, %v22052_v6 }
 0x7b4   :  { %v17343_v4 = vmul.f32 -1.442695, %v9772_v56  ;;  %v17344_v52 = vmul.f32 -1.442695, %v9773_v32  ;;  %v17347_v41 = vmul.f32 -1.442695, %v9776_v0 }
 0x7b5   :  { %v17348_v45 = vmul.f32 -1.442695, %v9777_v55 }
 0x7b6   :  { %21367 = vpow2.f32 %v17343_v4 }
 0x7b7   :  { %21369 = vpow2.f32 %v17344_v52 }
 0x7b8   :  { %21371 = vpow2.f32 %v17347_v41 }
 0x7b9   :  { %21373 = vpow2.f32 %v17348_v45 }
 0x7c0   :  { %v21368_v38 = vpop.eup %21367 }
 0x7c1   :  { %v21370_v48 = vpop.eup %21369  ;;  %v9804_v59 = vadd.f32 1.0, %v21368_v38  ;;  %v20194_v38 = vld [vmem:[#allocation10 + $0x8] ss:$48 sps:$4 sm:$0xff]  }
 0x7c2   :  { %v9805_v23 = vadd.f32 1.0, %v21370_v48  ;;  %v21372_v44 = vpop.eup %21371 }
 0x7c3   :  { %21375 = vrcp.f32 %v9804_v59  ;;  %v21374_v33 = vpop.eup %21373  ;;  %v20202_v59 = vld [vmem:[#allocation10 + $0x6c] ss:$48 sps:$4 sm:$0xff]  }
 0x7c4   :  { %21377 = vrcp.f32 %v9805_v23  ;;  %v9743_v23 = vrot.slane %v22330_v36, %v21994_v51 }
 0x7db   :  { %v9552_v8 = vpop.f32.mrb[76].mxu0 }
 0x7dc   :  { %v9553_v25 = vadd.f32 %v9552_v8, %v22305_v42  ;;  %v9554_v54 = vpop.f32.mrb[77].mxu0  ;;  %v9808_v8 = vadd.f32 1.0, %v21372_v44  ;;  %v20200_v44 = vld [vmem:[#allocation10 + $0x68] ss:$48 sps:$4 sm:$0xff]  }
 0x7dd   :  { %v9555_v14 = vadd.f32 %v9554_v54, %v22310_v3  ;;  %v9556_v46 = vpop.f32.mrb[78].mxu0  ;;  %v22317_v16 = vpop.f32.mrb[76].mxu1  ;;  %v20259_v3 = vld [vmem:[#allocation10 + $0xa24] ss:$48 sps:$4 sm:$0xff]  }
 0x7de   :  { %v22320_v15 = vadd.f32 %v9553_v25, %v22234_v47  ;;  %v9557_v43 = vpop.f32.mrb[79].mxu0  ;;  %v22322_v20 = vpop.f32.mrb[77].mxu1  ;;  %12669 = vmatprep.subr.bf16.mxu0 %v20259_v3  ;;  %v20271_v47 = vld [vmem:[#allocation10 + $0xae4] ss:$48 sps:$4 sm:$0xff]   ;;  %v9809_v46 = vadd.f32 1.0, %v21374_v33  ;;  %21379 = vrcp.f32 %v9808_v8  ;;  %v9747_v33 = vrot.slane %v22330_v36, %v21997_v53 }
 0x7df   :  { %v22325_v1 = vadd.f32 %v9555_v14, %v22239_v60  ;;  %v9597_v61 = vpop.f32.mrb[78].mxu1  ;;  %12670 = vmatpush1.bf16.msra.mxu0 %v20257_v9  ;;  %v20275_v60 = vld [vmem:[#allocation10 + $0xb40] ss:$48 sps:$4 sm:$0xff]   ;;  %v9836_v14 = vrot.slane %v22352_v21, %v22055_v7  ;;  %v21376_v9 = vpop.eup %21375  ;;  %v20214_v8 = vld [vmem:[#allocation10 + $0x12c] ss:$48 sps:$4 sm:$0xff]  }
 0x7e0   :  { %v9598_v42 = vpop.f32.mrb[79].mxu1  ;;  %12671 = vmatprep.subr.bf16.mxu0 %v20265_v11  ;;  %21381 = vrcp.f32 %v9809_v46  ;;  %v20220_v46 = vld [vmem:[#allocation10 + $0x18c] ss:$48 sps:$4 sm:$0xff]  }
 0x7e3   :  { %12672 = vmatpush1.bf16.msra.mxu0 %v20263_v18 }
 0x7e4   :  { %12673 = vmatprep.subr.bf16.mxu0 %v20271_v47  ;;  %v21378_v47 = vpop.eup %21377 }
 0x7e7   :  { %12674 = vmatpush1.bf16.msra.mxu0 %v20269_v62 }
 0x7e8   :  { %12675 = vmatprep.subr.bf16.mxu0 %v20277_v29 }
 0x7eb   :  { %12676 = vmatpush1.bf16.msra.mxu0 %v20275_v60  ;;  %v9850_v60 = vadd.f32 %v9836_v14, %v22253_v31  ;;  %v21453_v31 = vld [vmem:[%s22726_s25 + $0x28] sm:$0xff] }
 0x7ec   :  { %12677 = vmatprep.subr.bf16.mxu0 %v20283_v27 }
 0x7ef   :  { %12678 = vmatpush1.bf16.msra.mxu0 %v20281_v2 }
 0x7f0   :  { %12729 = vmatprep.subr.bf16.mxu0 %v20289_v17  ;;  %v21380_v17 = vpop.eup %21379 }
 0x7f1   :  { %v21382_v24 = vpop.eup %21381  ;;  %v9890_v30 = vsub.f32 1.0, %v21380_v17 }
 0x7f2   :  { %v9891_v32 = vsub.f32 1.0, %v21382_v24  ;;  %v9899_v39 = vmul.f32 %v21453_v31, %v21382_v24 }
 0x81b   :  { %v9634_v49 = vpop.f32.mrb[80].mxu0 }
 0x81c   :  { %v9635_v25 = vadd.f32 %v9634_v49, %v22317_v16  ;;  %v9636_v54 = vpop.f32.mrb[81].mxu0  ;;  %v9849_v16 = vadd.f32 %v9832_v28, %v22248_v13  ;;  %v21452_v13 = vld [vmem:[%s22726_s25 + $0x20] sm:$0xff]  ;;  %v9774_v49 = vadd.f32 %v9743_v23, %v22295_v57  ;;  %v9775_v28 = vadd.f32 %v9747_v33, %v22300_v58  ;;  %v20218_v57 = vld [vmem:[#allocation10 + $0x188] ss:$48 sps:$4 sm:$0xff]   ;;  %v20226_v58 = vld [vmem:[#allocation10 + $0x1ec] ss:$48 sps:$4 sm:$0xff]  }
 0x81d   :  { %v9637_v43 = vadd.f32 %v9636_v54, %v22322_v20  ;;  %v9638_v19 = vpop.f32.mrb[82].mxu0  ;;  %v22364_v61 = vpop.f32.mrb[80].mxu1  ;;  %v9898_v52 = vmul.f32 %v21452_v13, %v21380_v17  ;;  %v20212_v54 = vld [vmem:[#allocation10 + $0x128] ss:$48 sps:$4 sm:$0xff]   ;;  %v9869_v13 = vrot.slane %v22347_v34, %v21997_v53  ;;  %v20262_v23 = vld [vmem:[#allocation10 + $0x42c] ss:$48 sps:$4 sm:$0xff]  }
 0x81e   :  { %v9874_v10 = vadd.f32 %v9857_v37, %v9635_v25  ;;  %v9639_v42 = vpop.f32.mrb[83].mxu0  ;;  %v22366_v3 = vpop.f32.mrb[81].mxu1  ;;  %v20208_v37 = vld [vmem:[#allocation10 + $0xcc] ss:$48 sps:$4 sm:$0xff]   ;;  %v17345_v25 = vmul.f32 -1.442695, %v9774_v49  ;;  %v9763_v19 = vrot.slane %v22330_v36, %v22120_v5 }
 0x81f   :  { %v9875_v11 = vadd.f32 %v9861_v50, %v9637_v43  ;;  %v9679_v18 = vpop.f32.mrb[82].mxu1  ;;  %v20206_v50 = vld [vmem:[#allocation10 + $0xc8] ss:$48 sps:$4 sm:$0xff]   ;;  %v17346_v14 = vmul.f32 -1.442695, %v9775_v28  ;;  %v9759_v43 = vrot.slane %v22330_v36, %v22117_v35 }
 0x820   :  { %v9878_v62 = vmul.f32 %v21376_v9, %v9874_v10  ;;  %v9680_v29 = vpop.f32.mrb[83].mxu1  ;;  %v9779_v42 = vadd.f32 %v9763_v19, %v22325_v1  ;;  %v20224_v9 = vld [vmem:[#allocation10 + $0x1e8] ss:$48 sps:$4 sm:$0xff]  }
 0x821   :  { %v9879_v20 = vmul.f32 %v21378_v47, %v9875_v11  ;;  %v9778_v10 = vadd.f32 %v9759_v43, %v22320_v15  ;;  %v20232_v11 = vld [vmem:[#allocation10 + $0x24c] ss:$48 sps:$4 sm:$0xff]   ;;  %v20248_v17 = vld [vmem:[#allocation10 + $0x368] ss:$48 sps:$4 sm:$0xff]  }
 0x822   :  { %v9882_v27 = vadd.f32 %v9878_v62, %v9849_v16  ;;  %v17350_v47 = vmul.f32 -1.442695, %v9779_v42  ;;  %v20230_v16 = vld [vmem:[#allocation10 + $0x248] ss:$48 sps:$4 sm:$0xff]   ;;  %v20238_v62 = vld [vmem:[#allocation10 + $0x2ac] ss:$48 sps:$4 sm:$0xff]  }
 0x823   :  { %v9883_v2 = vadd.f32 %v9879_v20, %v9850_v60  ;;  %v17349_v18 = vmul.f32 -1.442695, %v9778_v10  ;;  %v20236_v60 = vld [vmem:[#allocation10 + $0x2a8] ss:$48 sps:$4 sm:$0xff]   ;;  %v20244_v15 = vld [vmem:[#allocation10 + $0x30c] ss:$48 sps:$4 sm:$0xff]  }
 0x824   :  { %21383 = vtanh.f32 %v9882_v27  ;;  %v20242_v27 = vld [vmem:[#allocation10 + $0x308] ss:$48 sps:$4 sm:$0xff]   ;;  %v20280_v43 = vld [vmem:[#allocation10 + $0x54c] ss:$48 sps:$4 sm:$0xff]  }
 0x825   :  { %21385 = vtanh.f32 %v9883_v2  ;;  %v20250_v2 = vld [vmem:[#allocation10 + $0x36c] ss:$48 sps:$4 sm:$0xff]   ;;  %v20260_v28 = vld [vmem:[#allocation10 + $0x428] ss:$48 sps:$4 sm:$0xff]  }
 0x826   :  { %21387 = vpow2.f32 %v17345_v25  ;;  %v20286_v10 = vld [vmem:[#allocation10 + $0x5ac] ss:$48 sps:$4 sm:$0xff]  }
 0x827   :  { %21389 = vpow2.f32 %v17346_v14  ;;  %v20266_v14 = vld [vmem:[#allocation10 + $0x488] ss:$48 sps:$4 sm:$0xff]  }
 0x828   :  { %21391 = vpow2.f32 %v17349_v18 }
 0x829   :  { %21393 = vpow2.f32 %v17350_v47 }
 0x82e   :  { %v21384_v56 = vpop.eup %21383 }
 0x82f   :  { %v21386_v4 = vpop.eup %21385  ;;  %v9894_v40 = vmul.f32 %v21384_v56, %v9890_v30  ;;  %v20256_v30 = vld [vmem:[#allocation10 + $0x3cc] ss:$48 sps:$4 sm:$0xff]  }
 0x830   :  { %v9895_v0 = vmul.f32 %v21386_v4, %v9891_v32  ;;  %v21388_v36 = vpop.eup %21387  ;;  %v9865_v32 = vrot.slane %v22347_v34, %v21994_v51 }
 0x831   :  { %v9902_v55 = vadd.f32 %v9898_v52, %v9894_v40  ;;  %v21390_v29 = vpop.eup %21389  ;;  %v9806_v20 = vadd.f32 1.0, %v21388_v36  ;;  %v9840_v52 = vrot.slane %v22352_v21, %v21994_v51 }
 0x832   :  { %v9903_v41 = vadd.f32 %v9899_v39, %v9895_v0  ;;  %v9807_v1 = vadd.f32 1.0, %v21390_v29  ;;  %v21392_v24 = vpop.eup %21391  ;;  %v20254_v0 = vld [vmem:[#allocation10 + $0x3c8] ss:$48 sps:$4 sm:$0xff]  }
 0x833   :  { %18131 = vst [vmem:[%s22709_s21 + $0x20] sm:$0xff] %v9902_v55  ;;  %v22384_v48 = vpack.c.bf16 %v9902_v55, %v9902_v55  ;;  %21395 = vrcp.f32 %v9806_v20  ;;  %v21394_v56 = vpop.eup %21393  ;;  %v9810_v40 = vadd.f32 1.0, %v21392_v24  ;;  %v9844_v55 = vrot.slane %v22352_v21, %v21997_v53  ;;  %v20292_v20 = vld [vmem:[#allocation10 + $0x14] ss:$48 sps:$4 sm:$0xff]  }
 0x834   :  { %v22379_v45 = vpack.c.bf16 %v9903_v41, %v9903_v41  ;;  %18132 = vst [vmem:[%s22709_s21 + $0x28] sm:$0xff] %v9903_v41  ;;  %21397 = vrcp.f32 %v9807_v1  ;;  %v9811_v41 = vadd.f32 1.0, %v21394_v56  ;;  %v20298_v56 = vld [vmem:[#allocation10 + $0x74] ss:$48 sps:$4 sm:$0xff]  }
 0x835   :  { %21399 = vrcp.f32 %v9810_v40  ;;  %v20299_v40 = vld [vmem:[#allocation10 + $0x6c8] ss:$48 sps:$4 sm:$0xff]  }
 0x836   :  { %12638 = vmatprep.mubr.bf16.mxu1 %v22379_v45  ;;  %21401 = vrcp.f32 %v9811_v41  ;;  %v20308_v41 = vld [vmem:[#allocation10 + $0x130] ss:$48 sps:$4 sm:$0xff]  }
 0x837   :  { %12639 = vmatmul.mubr.bf16.vlgmr.msra.gmra.mrb[84].mxu1 %v22384_v48 }
 0x838   :  { %12689 = vmatpush1.bf16.msra.mxu1 %v20194_v38  ;;  %12720 = vmatprep.mubr.bf16.mxu1 %v22379_v45 }
 0x839   :  { %12690 = vmatprep.subr.bf16.mxu1 %v20202_v59 }
 0x83b   :  { %v21454_v18 = vld [vmem:[%s22726_s25 + $0x30] sm:$0xff] }
 0x83c   :  { %12691 = vmatpush1.bf16.msra.mxu1 %v20200_v44 }
 0x83d   :  { %12692 = vmatprep.subr.bf16.mxu1 %v20208_v37  ;;  %v21396_v33 = vpop.eup %21395 }
 0x83e   :  { %v21398_v49 = vpop.eup %21397 }
 0x83f   :  { %v21400_v19 = vpop.eup %21399 }
 0x840   :  { %12693 = vmatpush1.bf16.msra.mxu1 %v20206_v50  ;;  %v9851_v50 = vadd.f32 %v9840_v52, %v22262_v26  ;;  %v20272_v26 = vld [vmem:[#allocation10 + $0x4e8] ss:$48 sps:$4 sm:$0xff]   ;;  %v9900_v47 = vmul.f32 %v21454_v18, %v21400_v19  ;;  %v20304_v52 = vld [vmem:[#allocation10 + $0xd4] ss:$48 sps:$4 sm:$0xff]   ;;  %v20355_v18 = vld [vmem:[#allocation10 + $0xa2c] ss:$48 sps:$4 sm:$0xff]  }
 0x841   :  { %12694 = vmatprep.subr.bf16.mxu1 %v20214_v8  ;;  %v9852_v8 = vadd.f32 %v9844_v55, %v22265_v22  ;;  %v20278_v22 = vld [vmem:[#allocation10 + $0x548] ss:$48 sps:$4 sm:$0xff]  }
 0x842   :  { %v20305_v55 = vld [vmem:[#allocation10 + $0x728] ss:$48 sps:$4 sm:$0xff]  }
 0x844   :  { %12695 = vmatpush1.bf16.msra.mxu1 %v20212_v54 }
 0x845   :  { %12696 = vmatprep.subr.bf16.mxu1 %v20220_v46  ;;  %v20274_v46 = vld [vmem:[#allocation10 + $0x4ec] ss:$48 sps:$4 sm:$0xff]  }
 0x848   :  { %12697 = vmatpush1.bf16.msra.mxu1 %v20218_v57  ;;  %v21402_v57 = vpop.eup %21401 }
 0x849   :  { %12698 = vmatprep.subr.bf16.mxu1 %v20226_v58  ;;  %v9892_v58 = vsub.f32 1.0, %v21400_v19  ;;  %v20343_v19 = vld [vmem:[#allocation10 + $0x96c] ss:$48 sps:$4 sm:$0xff]  }
 0x84c   :  { %12699 = vmatpush1.bf16.msra.mxu1 %v20224_v9  ;;  %v9893_v9 = vsub.f32 1.0, %v21402_v57 }
 0x84d   :  { %12700 = vmatprep.subr.bf16.mxu1 %v20232_v11 }
 0x850   :  { %12701 = vmatpush1.bf16.msra.mxu1 %v20230_v16 }
 0x851   :  { %12702 = vmatprep.subr.bf16.mxu1 %v20238_v62  ;;  %v21455_v62 = vld [vmem:[%s22726_s25 + $0x38] sm:$0xff] }
 0x852   :  { %v9901_v36 = vmul.f32 %v21455_v62, %v21402_v57  ;;  %v20346_v57 = vld [vmem:[#allocation10 + $0x374] ss:$48 sps:$4 sm:$0xff]   ;;  %v20356_v62 = vld [vmem:[#allocation10 + $0x430] ss:$48 sps:$4 sm:$0xff]  }
 0x854   :  { %12703 = vmatpush1.bf16.msra.mxu1 %v20236_v60  ;;  %v20284_v60 = vld [vmem:[#allocation10 + $0x5a8] ss:$48 sps:$4 sm:$0xff]  }
 0x855   :  { %12704 = vmatprep.subr.bf16.mxu1 %v20244_v15 }
 0x858   :  { %12705 = vmatpush1.bf16.msra.mxu1 %v20242_v27 }
 0x859   :  { %12706 = vmatprep.subr.bf16.mxu1 %v20250_v2  ;;  %v20287_v2 = vld [vmem:[#allocation10 + $0x608] ss:$48 sps:$4 sm:$0xff]  }
 0x85b   :  { %v9716_v4 = vpop.f32.mrb[84].mxu0 }
 0x85c   :  { %v9717_v31 = vadd.f32 %v9716_v4, %v22364_v61  ;;  %12707 = vmatpush1.bf16.msra.mxu1 %v20248_v17  ;;  %v9718_v39 = vpop.f32.mrb[85].mxu0  ;;  %v20290_v17 = vld [vmem:[#allocation10 + $0x10] ss:$48 sps:$4 sm:$0xff]  }
 0x85d   :  { %v9719_v38 = vadd.f32 %v9718_v39, %v22366_v3  ;;  %v9720_v59 = vpop.f32.mrb[86].mxu0  ;;  %12708 = vmatprep.subr.bf16.mxu1 %v20256_v30  ;;  %v20268_v3 = vld [vmem:[#allocation10 + $0x48c] ss:$48 sps:$4 sm:$0xff]   ;;  %v20296_v4 = vld [vmem:[#allocation10 + $0x70] ss:$48 sps:$4 sm:$0xff]  }
 0x85e   :  { %v9876_v44 = vadd.f32 %v9865_v32, %v9717_v31  ;;  %v9721_v34 = vpop.f32.mrb[87].mxu0  ;;  %v20295_v30 = vld [vmem:[#allocation10 + $0x66c] ss:$48 sps:$4 sm:$0xff]   ;;  %v20293_v32 = vld [vmem:[#allocation10 + $0x668] ss:$48 sps:$4 sm:$0xff]  }
 0x85f   :  { %v9877_v37 = vadd.f32 %v9869_v13, %v9719_v38  ;;  %v20301_v13 = vld [vmem:[#allocation10 + $0x6cc] ss:$48 sps:$4 sm:$0xff]   ;;  %v20302_v31 = vld [vmem:[#allocation10 + $0xd0] ss:$48 sps:$4 sm:$0xff]   ;;  %v20316_v59 = vld [vmem:[#allocation10 + $0x194] ss:$48 sps:$4 sm:$0xff]  }
 0x860   :  { %v9880_v61 = vmul.f32 %v21396_v33, %v9876_v44  ;;  %12709 = vmatpush1.bf16.msra.mxu1 %v20254_v0  ;;  %v20307_v39 = vld [vmem:[#allocation10 + $0x72c] ss:$48 sps:$4 sm:$0xff]   ;;  %v20310_v0 = vld [vmem:[#allocation10 + $0x134] ss:$48 sps:$4 sm:$0xff]   ;;  %v20314_v44 = vld [vmem:[#allocation10 + $0x190] ss:$48 sps:$4 sm:$0xff]  }
 0x861   :  { %v9881_v21 = vmul.f32 %v21398_v49, %v9877_v37  ;;  %12710 = vmatprep.subr.bf16.mxu1 %v20262_v23  ;;  %v20313_v38 = vld [vmem:[#allocation10 + $0x78c] ss:$48 sps:$4 sm:$0xff]   ;;  %v20311_v23 = vld [vmem:[#allocation10 + $0x788] ss:$48 sps:$4 sm:$0xff]   ;;  %v20322_v33 = vld [vmem:[#allocation10 + $0x1f4] ss:$48 sps:$4 sm:$0xff]  }
 0x862   :  { %v9884_v25 = vadd.f32 %v9880_v61, %v9851_v50  ;;  %v20319_v34 = vld [vmem:[#allocation10 + $0x7ec] ss:$48 sps:$4 sm:$0xff]   ;;  %v20317_v37 = vld [vmem:[#allocation10 + $0x7e8] ss:$48 sps:$4 sm:$0xff]   ;;  %v20320_v49 = vld [vmem:[#allocation10 + $0x1f0] ss:$48 sps:$4 sm:$0xff]  }
 0x863   :  { %v9885_v54 = vadd.f32 %v9881_v21, %v9852_v8  ;;  %v20325_v50 = vld [vmem:[#allocation10 + $0x84c] ss:$48 sps:$4 sm:$0xff]   ;;  %v20328_v61 = vld [vmem:[#allocation10 + $0x254] ss:$48 sps:$4 sm:$0xff]   ;;  %v20326_v8 = vld [vmem:[#allocation10 + $0x250] ss:$48 sps:$4 sm:$0xff]  }
 0x864   :  { %21403 = vtanh.f32 %v9884_v25  ;;  %12711 = vmatpush1.bf16.msra.mxu1 %v20260_v28  ;;  %v20323_v28 = vld [vmem:[#allocation10 + $0x848] ss:$48 sps:$4 sm:$0xff]   ;;  %v20331_v21 = vld [vmem:[#allocation10 + $0x8ac] ss:$48 sps:$4 sm:$0xff]  }
 0x865   :  { %21405 = vtanh.f32 %v9885_v54  ;;  %12712 = vmatprep.subr.bf16.mxu1 %v20268_v3  ;;  %v20334_v3 = vld [vmem:[#allocation10 + $0x2b4] ss:$48 sps:$4 sm:$0xff]   ;;  %v20329_v25 = vld [vmem:[#allocation10 + $0x8a8] ss:$48 sps:$4 sm:$0xff]   ;;  %v20332_v54 = vld [vmem:[#allocation10 + $0x2b0] ss:$48 sps:$4 sm:$0xff]  }
 0x868   :  { %12713 = vmatpush1.bf16.msra.mxu1 %v20266_v14  ;;  %v20337_v14 = vld [vmem:[#allocation10 + $0x90c] ss:$48 sps:$4 sm:$0xff]  }
 0x869   :  { %12714 = vmatprep.subr.bf16.mxu1 %v20274_v46  ;;  %v20340_v46 = vld [vmem:[#allocation10 + $0x314] ss:$48 sps:$4 sm:$0xff]  }
 0x86c   :  { %12715 = vmatpush1.bf16.msra.mxu1 %v20272_v26  ;;  %v20335_v26 = vld [vmem:[#allocation10 + $0x908] ss:$48 sps:$4 sm:$0xff]  }
 0x86d   :  { %12716 = vmatprep.subr.bf16.mxu1 %v20280_v43  ;;  %v20338_v43 = vld [vmem:[#allocation10 + $0x310] ss:$48 sps:$4 sm:$0xff]  }
 0x86e   :  { %v21404_v42 = vpop.eup %21403 }
 0x86f   :  { %v21406_v11 = vpop.eup %21405  ;;  %v9896_v16 = vmul.f32 %v21404_v42, %v9892_v58  ;;  %v20344_v58 = vld [vmem:[#allocation10 + $0x370] ss:$48 sps:$4 sm:$0xff]   ;;  %v20352_v42 = vld [vmem:[#allocation10 + $0x3d4] ss:$48 sps:$4 sm:$0xff]  }
 0x870   :  { %v9897_v29 = vmul.f32 %v21406_v11, %v9893_v9  ;;  %12717 = vmatpush1.bf16.msra.mxu1 %v20278_v22  ;;  %v20341_v22 = vld [vmem:[#allocation10 + $0x968] ss:$48 sps:$4 sm:$0xff]   ;;  %v20350_v11 = vld [vmem:[#allocation10 + $0x3d0] ss:$48 sps:$4 sm:$0xff]  }
 0x871   :  { %12718 = vmatprep.subr.bf16.mxu1 %v20286_v10  ;;  %v9904_v15 = vadd.f32 %v9900_v47, %v9896_v16  ;;  %v20349_v10 = vld [vmem:[#allocation10 + $0x9cc] ss:$48 sps:$4 sm:$0xff]   ;;  %v20347_v9 = vld [vmem:[#allocation10 + $0x9c8] ss:$48 sps:$4 sm:$0xff]   ;;  %v20358_v47 = vld [vmem:[#allocation10 + $0x434] ss:$48 sps:$4 sm:$0xff]  }
 0x872   :  { %v9905_v1 = vadd.f32 %v9901_v36, %v9897_v29  ;;  %v20353_v16 = vld [vmem:[#allocation10 + $0xa28] ss:$48 sps:$4 sm:$0xff]   ;;  %v20361_v36 = vld [vmem:[#allocation10 + $0xa8c] ss:$48 sps:$4 sm:$0xff]   ;;  %v20364_v29 = vld [vmem:[#allocation10 + $0x494] ss:$48 sps:$4 sm:$0xff]  }
 0x873   :  { %18133 = vst [vmem:[%s22709_s21 + $0x30] sm:$0xff] %v9904_v15  ;;  %v22427_v24 = vpack.c.bf16 %v9904_v15, %v9904_v15  ;;  %v20367_v15 = vld [vmem:[#allocation10 + $0xaec] ss:$48 sps:$4 sm:$0xff]  }
 0x874   :  { %12719 = vmatpush1.bf16.msra.mxu1 %v20284_v60  ;;  %v22422_v27 = vpack.c.bf16 %v9905_v1, %v9905_v1  ;;  %18134 = vst [vmem:[%s22709_s21 + $0x38] sm:$0xff] %v9905_v1  ;;  %v20359_v60 = vld [vmem:[#allocation10 + $0xa88] ss:$48 sps:$4 sm:$0xff]   ;;  %v20370_v1 = vld [vmem:[#allocation10 + $0x4f4] ss:$48 sps:$4 sm:$0xff]  }
 0x875   :  { %12770 = vmatprep.subr.bf16.mxu1 %v20292_v20  ;;  %v20362_v20 = vld [vmem:[#allocation10 + $0x490] ss:$48 sps:$4 sm:$0xff]  }
 0x876   :  { %12679 = vmatprep.mubr.bf16.mxu0 %v22422_v27 }
 0x877   :  { %12721 = vmatmul.mubr.bf16.vlgmr.msra.gmra.mrb[88].mxu1 %v22384_v48  ;;  %12680 = vmatmul.mubr.bf16.vlgmr.msra.gmra.mrb[88].mxu0 %v22427_v24 }
 0x878   :  { %12730 = vmatpush1.bf16.msra.mxu0 %v20287_v2  ;;  %12771 = vmatpush1.bf16.msra.mxu1 %v20290_v17  ;;  %v20365_v2 = vld [vmem:[#allocation10 + $0xae8] ss:$48 sps:$4 sm:$0xff]   ;;  %v20368_v17 = vld [vmem:[#allocation10 + $0x4f0] ss:$48 sps:$4 sm:$0xff]  }
 0x879   :  { %12802 = vmatprep.mubr.bf16.mxu1 %v22379_v45  ;;  %12761 = vmatprep.mubr.bf16.mxu0 %v22422_v27 }
 0x87a   :  { %12731 = vmatprep.subr.bf16.mxu0 %v20295_v30  ;;  %12772 = vmatprep.subr.bf16.mxu1 %v20298_v56  ;;  %v20373_v30 = vld [vmem:[#allocation10 + $0xb4c] ss:$48 sps:$4 sm:$0xff]   ;;  %v20376_v56 = vld [vmem:[#allocation10 + $0x554] ss:$48 sps:$4 sm:$0xff]  }
 0x87c   :  { %12732 = vmatpush1.bf16.msra.mxu0 %v20293_v32  ;;  %12773 = vmatpush1.bf16.msra.mxu1 %v20296_v4  ;;  %v20371_v32 = vld [vmem:[#allocation10 + $0xb48] ss:$48 sps:$4 sm:$0xff]   ;;  %v20374_v4 = vld [vmem:[#allocation10 + $0x550] ss:$48 sps:$4 sm:$0xff]  }
 0x87d   :  { %12733 = vmatprep.subr.bf16.mxu0 %v20301_v13  ;;  %12774 = vmatprep.subr.bf16.mxu1 %v20304_v52  ;;  %v20379_v13 = vld [vmem:[#allocation10 + $0xbac] ss:$48 sps:$4 sm:$0xff]   ;;  %v20382_v52 = vld [vmem:[#allocation10 + $0x5b4] ss:$48 sps:$4 sm:$0xff]  }
 0x880   :  { %12734 = vmatpush1.bf16.msra.mxu0 %v20299_v40  ;;  %12775 = vmatpush1.bf16.msra.mxu1 %v20302_v31  ;;  %v20377_v40 = vld [vmem:[#allocation10 + $0xba8] ss:$48 sps:$4 sm:$0xff]   ;;  %v20380_v31 = vld [vmem:[#allocation10 + $0x5b0] ss:$48 sps:$4 sm:$0xff]  }
 0x881   :  { %12735 = vmatprep.subr.bf16.mxu0 %v20307_v39  ;;  %12776 = vmatprep.subr.bf16.mxu1 %v20310_v0  ;;  %v20385_v39 = vld [vmem:[#allocation10 + $0x614] ss:$48 sps:$4 sm:$0xff]   ;;  %v20388_v0 = vld [vmem:[#allocation10 + $0x1c] ss:$48 sps:$4 sm:$0xff]  }
 0x884   :  { %12736 = vmatpush1.bf16.msra.mxu0 %v20305_v55  ;;  %12777 = vmatpush1.bf16.msra.mxu1 %v20308_v41  ;;  %v20383_v55 = vld [vmem:[#allocation10 + $0x610] ss:$48 sps:$4 sm:$0xff]   ;;  %v20386_v41 = vld [vmem:[#allocation10 + $0x18] ss:$48 sps:$4 sm:$0xff]  }
 0x885   :  { %12737 = vmatprep.subr.bf16.mxu0 %v20313_v38  ;;  %12778 = vmatprep.subr.bf16.mxu1 %v20316_v59  ;;  %v20391_v38 = vld [vmem:[#allocation10 + $0x674] ss:$48 sps:$4 sm:$0xff]   ;;  %v20394_v59 = vld [vmem:[#allocation10 + $0x7c] ss:$48 sps:$4 sm:$0xff]  }
 0x888   :  { %12738 = vmatpush1.bf16.msra.mxu0 %v20311_v23  ;;  %12779 = vmatpush1.bf16.msra.mxu1 %v20314_v44  ;;  %v20389_v23 = vld [vmem:[#allocation10 + $0x670] ss:$48 sps:$4 sm:$0xff]   ;;  %v20392_v44 = vld [vmem:[#allocation10 + $0x78] ss:$48 sps:$4 sm:$0xff]  }
 0x889   :  { %12739 = vmatprep.subr.bf16.mxu0 %v20319_v34  ;;  %12780 = vmatprep.subr.bf16.mxu1 %v20322_v33  ;;  %v20397_v34 = vld [vmem:[#allocation10 + $0x6d4] ss:$48 sps:$4 sm:$0xff]   ;;  %v20400_v33 = vld [vmem:[#allocation10 + $0xdc] ss:$48 sps:$4 sm:$0xff]  }
 0x88c   :  { %12740 = vmatpush1.bf16.msra.mxu0 %v20317_v37  ;;  %12781 = vmatpush1.bf16.msra.mxu1 %v20320_v49  ;;  %v20395_v37 = vld [vmem:[#allocation10 + $0x6d0] ss:$48 sps:$4 sm:$0xff]   ;;  %v20398_v49 = vld [vmem:[#allocation10 + $0xd8] ss:$48 sps:$4 sm:$0xff]  }
 0x88d   :  { %12741 = vmatprep.subr.bf16.mxu0 %v20325_v50  ;;  %12782 = vmatprep.subr.bf16.mxu1 %v20328_v61  ;;  %v20403_v50 = vld [vmem:[#allocation10 + $0x734] ss:$48 sps:$4 sm:$0xff]   ;;  %v20406_v61 = vld [vmem:[#allocation10 + $0x13c] ss:$48 sps:$4 sm:$0xff]  }
 0x890   :  { %12742 = vmatpush1.bf16.msra.mxu0 %v20323_v28  ;;  %12783 = vmatpush1.bf16.msra.mxu1 %v20326_v8  ;;  %v20401_v28 = vld [vmem:[#allocation10 + $0x730] ss:$48 sps:$4 sm:$0xff]   ;;  %v20404_v8 = vld [vmem:[#allocation10 + $0x138] ss:$48 sps:$4 sm:$0xff]  }
 0x891   :  { %12743 = vmatprep.subr.bf16.mxu0 %v20331_v21  ;;  %12784 = vmatprep.subr.bf16.mxu1 %v20334_v3  ;;  %v20409_v21 = vld [vmem:[#allocation10 + $0x794] ss:$48 sps:$4 sm:$0xff]   ;;  %v20412_v3 = vld [vmem:[#allocation10 + $0x19c] ss:$48 sps:$4 sm:$0xff]  }
 0x894   :  { %12744 = vmatpush1.bf16.msra.mxu0 %v20329_v25  ;;  %12785 = vmatpush1.bf16.msra.mxu1 %v20332_v54  ;;  %v20407_v25 = vld [vmem:[#allocation10 + $0x790] ss:$48 sps:$4 sm:$0xff]   ;;  %v20410_v54 = vld [vmem:[#allocation10 + $0x198] ss:$48 sps:$4 sm:$0xff]  }
 0x895   :  { %12745 = vmatprep.subr.bf16.mxu0 %v20337_v14  ;;  %12786 = vmatprep.subr.bf16.mxu1 %v20340_v46  ;;  %v20415_v14 = vld [vmem:[#allocation10 + $0x7f4] ss:$48 sps:$4 sm:$0xff]   ;;  %v20418_v46 = vld [vmem:[#allocation10 + $0x1fc] ss:$48 sps:$4 sm:$0xff]  }
 0x898   :  { %12746 = vmatpush1.bf16.msra.mxu0 %v20335_v26  ;;  %12787 = vmatpush1.bf16.msra.mxu1 %v20338_v43  ;;  %v20413_v26 = vld [vmem:[#allocation10 + $0x7f0] ss:$48 sps:$4 sm:$0xff]   ;;  %v20416_v43 = vld [vmem:[#allocation10 + $0x1f8] ss:$48 sps:$4 sm:$0xff]  }
 0x899   :  { %12747 = vmatprep.subr.bf16.mxu0 %v20343_v19  ;;  %12788 = vmatprep.subr.bf16.mxu1 %v20346_v57  ;;  %v20421_v19 = vld [vmem:[#allocation10 + $0x854] ss:$48 sps:$4 sm:$0xff]   ;;  %v20424_v57 = vld [vmem:[#allocation10 + $0x25c] ss:$48 sps:$4 sm:$0xff]  }
 0x89c   :  { %12748 = vmatpush1.bf16.msra.mxu0 %v20341_v22  ;;  %12789 = vmatpush1.bf16.msra.mxu1 %v20344_v58  ;;  %v20419_v22 = vld [vmem:[#allocation10 + $0x850] ss:$48 sps:$4 sm:$0xff]   ;;  %v20422_v58 = vld [vmem:[#allocation10 + $0x258] ss:$48 sps:$4 sm:$0xff]  }
 0x89d   :  { %12749 = vmatprep.subr.bf16.mxu0 %v20349_v10  ;;  %12790 = vmatprep.subr.bf16.mxu1 %v20352_v42  ;;  %v20427_v10 = vld [vmem:[#allocation10 + $0x8b4] ss:$48 sps:$4 sm:$0xff]   ;;  %v20430_v42 = vld [vmem:[#allocation10 + $0x2bc] ss:$48 sps:$4 sm:$0xff]  }
 0x8a0   :  { %12750 = vmatpush1.bf16.msra.mxu0 %v20347_v9  ;;  %12791 = vmatpush1.bf16.msra.mxu1 %v20350_v11  ;;  %v20425_v9 = vld [vmem:[#allocation10 + $0x8b0] ss:$48 sps:$4 sm:$0xff]   ;;  %v20428_v11 = vld [vmem:[#allocation10 + $0x2b8] ss:$48 sps:$4 sm:$0xff]  }
 0x8a1   :  { %12751 = vmatprep.subr.bf16.mxu0 %v20355_v18  ;;  %12792 = vmatprep.subr.bf16.mxu1 %v20358_v47  ;;  %v20433_v18 = vld [vmem:[#allocation10 + $0x914] ss:$48 sps:$4 sm:$0xff]   ;;  %v20436_v47 = vld [vmem:[#allocation10 + $0x31c] ss:$48 sps:$4 sm:$0xff]  }
 0x8a4   :  { %12752 = vmatpush1.bf16.msra.mxu0 %v20353_v16  ;;  %12793 = vmatpush1.bf16.msra.mxu1 %v20356_v62  ;;  %v20431_v16 = vld [vmem:[#allocation10 + $0x910] ss:$48 sps:$4 sm:$0xff]   ;;  %v20434_v62 = vld [vmem:[#allocation10 + $0x318] ss:$48 sps:$4 sm:$0xff]  }
 0x8a5   :  { %12753 = vmatprep.subr.bf16.mxu0 %v20361_v36  ;;  %12794 = vmatprep.subr.bf16.mxu1 %v20364_v29  ;;  %v20439_v36 = vld [vmem:[#allocation10 + $0x974] ss:$48 sps:$4 sm:$0xff]   ;;  %v20442_v29 = vld [vmem:[#allocation10 + $0x37c] ss:$48 sps:$4 sm:$0xff]  }
 0x8a8   :  { %12754 = vmatpush1.bf16.msra.mxu0 %v20359_v60  ;;  %12795 = vmatpush1.bf16.msra.mxu1 %v20362_v20  ;;  %v20437_v60 = vld [vmem:[#allocation10 + $0x970] ss:$48 sps:$4 sm:$0xff]   ;;  %v20440_v20 = vld [vmem:[#allocation10 + $0x378] ss:$48 sps:$4 sm:$0xff]  }
 0x8a9   :  { %12755 = vmatprep.subr.bf16.mxu0 %v20367_v15  ;;  %12796 = vmatprep.subr.bf16.mxu1 %v20370_v1  ;;  %v20445_v15 = vld [vmem:[#allocation10 + $0x9d4] ss:$48 sps:$4 sm:$0xff]   ;;  %v20448_v1 = vld [vmem:[#allocation10 + $0x3dc] ss:$48 sps:$4 sm:$0xff]  }
 0x8ac   :  { %12756 = vmatpush1.bf16.msra.mxu0 %v20365_v2  ;;  %12797 = vmatpush1.bf16.msra.mxu1 %v20368_v17  ;;  %v20443_v2 = vld [vmem:[#allocation10 + $0x9d0] ss:$48 sps:$4 sm:$0xff]   ;;  %v20446_v17 = vld [vmem:[#allocation10 + $0x3d8] ss:$48 sps:$4 sm:$0xff]  }
 0x8ad   :  { %12757 = vmatprep.subr.bf16.mxu0 %v20373_v30  ;;  %12798 = vmatprep.subr.bf16.mxu1 %v20376_v56  ;;  %v20451_v30 = vld [vmem:[#allocation10 + $0xa34] ss:$48 sps:$4 sm:$0xff]   ;;  %v20454_v56 = vld [vmem:[#allocation10 + $0x43c] ss:$48 sps:$4 sm:$0xff]  }
 0x8b0   :  { %12758 = vmatpush1.bf16.msra.mxu0 %v20371_v32  ;;  %12799 = vmatpush1.bf16.msra.mxu1 %v20374_v4  ;;  %v20449_v32 = vld [vmem:[#allocation10 + $0xa30] ss:$48 sps:$4 sm:$0xff]   ;;  %v20452_v4 = vld [vmem:[#allocation10 + $0x438] ss:$48 sps:$4 sm:$0xff]  }
 0x8b1   :  { %12759 = vmatprep.subr.bf16.mxu0 %v20379_v13  ;;  %12800 = vmatprep.subr.bf16.mxu1 %v20382_v52  ;;  %v20457_v13 = vld [vmem:[#allocation10 + $0xa94] ss:$48 sps:$4 sm:$0xff]   ;;  %v20460_v52 = vld [vmem:[#allocation10 + $0x49c] ss:$48 sps:$4 sm:$0xff]  }
 0x8b4   :  { %12760 = vmatpush1.bf16.msra.mxu0 %v20377_v40  ;;  %12801 = vmatpush1.bf16.msra.mxu1 %v20380_v31  ;;  %v20455_v40 = vld [vmem:[#allocation10 + $0xa90] ss:$48 sps:$4 sm:$0xff]   ;;  %v20458_v31 = vld [vmem:[#allocation10 + $0x498] ss:$48 sps:$4 sm:$0xff]  }
 0x8b5   :  { %12811 = vmatprep.subr.bf16.mxu0 %v20385_v39  ;;  %12852 = vmatprep.subr.bf16.mxu1 %v20388_v0  ;;  %v20463_v39 = vld [vmem:[#allocation10 + $0xaf4] ss:$48 sps:$4 sm:$0xff]   ;;  %v20466_v0 = vld [vmem:[#allocation10 + $0x4fc] ss:$48 sps:$4 sm:$0xff]  }
 0x8b7   :  { %12762 = vmatmul.mubr.bf16.vlgmr.msra.gmra.mrb[92].mxu0 %v22427_v24  ;;  %12803 = vmatmul.mubr.bf16.vlgmr.msra.gmra.mrb[92].mxu1 %v22384_v48 }
 0x8b8   :  { %12812 = vmatpush1.bf16.msra.mxu0 %v20383_v55  ;;  %12843 = vmatprep.mubr.bf16.mxu0 %v22422_v27  ;;  %v20461_v55 = vld [vmem:[#allocation10 + $0xaf0] ss:$48 sps:$4 sm:$0xff]  }
 0x8b9   :  { %12853 = vmatpush1.bf16.msra.mxu1 %v20386_v41  ;;  %12884 = vmatprep.mubr.bf16.mxu1 %v22379_v45  ;;  %v20464_v41 = vld [vmem:[#allocation10 + $0x4f8] ss:$48 sps:$4 sm:$0xff]  }
 0x8ba   :  { %12813 = vmatprep.subr.bf16.mxu0 %v20391_v38  ;;  %12854 = vmatprep.subr.bf16.mxu1 %v20394_v59  ;;  %v20469_v38 = vld [vmem:[#allocation10 + $0xb54] ss:$48 sps:$4 sm:$0xff]   ;;  %v20472_v59 = vld [vmem:[#allocation10 + $0x55c] ss:$48 sps:$4 sm:$0xff]  }
 0x8bc   :  { %12814 = vmatpush1.bf16.msra.mxu0 %v20389_v23  ;;  %v20467_v23 = vld [vmem:[#allocation10 + $0xb50] ss:$48 sps:$4 sm:$0xff]  }
 0x8bd   :  { %12855 = vmatpush1.bf16.msra.mxu1 %v20392_v44  ;;  %12815 = vmatprep.subr.bf16.mxu0 %v20397_v34  ;;  %v20470_v44 = vld [vmem:[#allocation10 + $0x558] ss:$48 sps:$4 sm:$0xff]   ;;  %v20475_v34 = vld [vmem:[#allocation10 + $0xbb4] ss:$48 sps:$4 sm:$0xff]  }
 0x8be   :  { %12856 = vmatprep.subr.bf16.mxu1 %v20400_v33  ;;  %v20478_v33 = vld [vmem:[#allocation10 + $0x5bc] ss:$48 sps:$4 sm:$0xff]  }
 0x8c0   :  { %12816 = vmatpush1.bf16.msra.mxu0 %v20395_v37  ;;  %v20473_v37 = vld [vmem:[#allocation10 + $0xbb0] ss:$48 sps:$4 sm:$0xff]  }
 0x8c1   :  { %12857 = vmatpush1.bf16.msra.mxu1 %v20398_v49  ;;  %12817 = vmatprep.subr.bf16.mxu0 %v20403_v50  ;;  %v20476_v49 = vld [vmem:[#allocation10 + $0x5b8] ss:$48 sps:$4 sm:$0xff]   ;;  %v20481_v50 = vld [vmem:[#allocation10 + $0x61c] ss:$48 sps:$4 sm:$0xff]  }
 0x8c2   :  { %12858 = vmatprep.subr.bf16.mxu1 %v20406_v61  ;;  %v20484_v61 = vld [vmem:[#allocation10 + $0x24] ss:$48 sps:$4 sm:$0xff]  }
 0x8c4   :  { %12818 = vmatpush1.bf16.msra.mxu0 %v20401_v28  ;;  %v20479_v28 = vld [vmem:[#allocation10 + $0x618] ss:$48 sps:$4 sm:$0xff]  }
 0x8c5   :  { %12859 = vmatpush1.bf16.msra.mxu1 %v20404_v8  ;;  %12819 = vmatprep.subr.bf16.mxu0 %v20409_v21  ;;  %v20482_v8 = vld [vmem:[#allocation10 + $0x20] ss:$48 sps:$4 sm:$0xff]   ;;  %v20487_v21 = vld [vmem:[#allocation10 + $0x67c] ss:$48 sps:$4 sm:$0xff]  }
 0x8c6   :  { %12860 = vmatprep.subr.bf16.mxu1 %v20412_v3  ;;  %v20490_v3 = vld [vmem:[#allocation10 + $0x84] ss:$48 sps:$4 sm:$0xff]  }
 0x8c8   :  { %12820 = vmatpush1.bf16.msra.mxu0 %v20407_v25  ;;  %v20485_v25 = vld [vmem:[#allocation10 + $0x678] ss:$48 sps:$4 sm:$0xff]  }
 0x8c9   :  { %12861 = vmatpush1.bf16.msra.mxu1 %v20410_v54  ;;  %12821 = vmatprep.subr.bf16.mxu0 %v20415_v14  ;;  %v20488_v54 = vld [vmem:[#allocation10 + $0x80] ss:$48 sps:$4 sm:$0xff]   ;;  %v20493_v14 = vld [vmem:[#allocation10 + $0x6dc] ss:$48 sps:$4 sm:$0xff]  }
 0x8ca   :  { %12862 = vmatprep.subr.bf16.mxu1 %v20418_v46  ;;  %v20496_v46 = vld [vmem:[#allocation10 + $0xe4] ss:$48 sps:$4 sm:$0xff]  }
 0x8cc   :  { %12822 = vmatpush1.bf16.msra.mxu0 %v20413_v26  ;;  %v20491_v26 = vld [vmem:[#allocation10 + $0x6d8] ss:$48 sps:$4 sm:$0xff]  }
 0x8cd   :  { %12863 = vmatpush1.bf16.msra.mxu1 %v20416_v43  ;;  %12823 = vmatprep.subr.bf16.mxu0 %v20421_v19  ;;  %v20494_v43 = vld [vmem:[#allocation10 + $0xe0] ss:$48 sps:$4 sm:$0xff]   ;;  %v20499_v19 = vld [vmem:[#allocation10 + $0x73c] ss:$48 sps:$4 sm:$0xff]  }
 0x8ce   :  { %12864 = vmatprep.subr.bf16.mxu1 %v20424_v57  ;;  %v20502_v57 = vld [vmem:[#allocation10 + $0x144] ss:$48 sps:$4 sm:$0xff]  }
 0x8d0   :  { %12824 = vmatpush1.bf16.msra.mxu0 %v20419_v22  ;;  %v20497_v22 = vld [vmem:[#allocation10 + $0x738] ss:$48 sps:$4 sm:$0xff]  }
 0x8d1   :  { %12865 = vmatpush1.bf16.msra.mxu1 %v20422_v58  ;;  %12825 = vmatprep.subr.bf16.mxu0 %v20427_v10  ;;  %v20500_v58 = vld [vmem:[#allocation10 + $0x140] ss:$48 sps:$4 sm:$0xff]   ;;  %v20505_v10 = vld [vmem:[#allocation10 + $0x79c] ss:$48 sps:$4 sm:$0xff]  }
 0x8d2   :  { %12866 = vmatprep.subr.bf16.mxu1 %v20430_v42  ;;  %v20508_v42 = vld [vmem:[#allocation10 + $0x1a4] ss:$48 sps:$4 sm:$0xff]  }
 0x8d4   :  { %12826 = vmatpush1.bf16.msra.mxu0 %v20425_v9  ;;  %v20503_v9 = vld [vmem:[#allocation10 + $0x798] ss:$48 sps:$4 sm:$0xff]  }
 0x8d5   :  { %12867 = vmatpush1.bf16.msra.mxu1 %v20428_v11  ;;  %12827 = vmatprep.subr.bf16.mxu0 %v20433_v18  ;;  %v20506_v11 = vld [vmem:[#allocation10 + $0x1a0] ss:$48 sps:$4 sm:$0xff]   ;;  %v20511_v18 = vld [vmem:[#allocation10 + $0x7fc] ss:$48 sps:$4 sm:$0xff]  }
 0x8d6   :  { %12868 = vmatprep.subr.bf16.mxu1 %v20436_v47  ;;  %v20514_v47 = vld [vmem:[#allocation10 + $0x204] ss:$48 sps:$4 sm:$0xff]  }
 0x8d8   :  { %12828 = vmatpush1.bf16.msra.mxu0 %v20431_v16  ;;  %v20509_v16 = vld [vmem:[#allocation10 + $0x7f8] ss:$48 sps:$4 sm:$0xff]  }
 0x8d9   :  { %12869 = vmatpush1.bf16.msra.mxu1 %v20434_v62  ;;  %12829 = vmatprep.subr.bf16.mxu0 %v20439_v36  ;;  %v20512_v62 = vld [vmem:[#allocation10 + $0x200] ss:$48 sps:$4 sm:$0xff]   ;;  %v20517_v36 = vld [vmem:[#allocation10 + $0x85c] ss:$48 sps:$4 sm:$0xff]  }
 0x8da   :  { %12870 = vmatprep.subr.bf16.mxu1 %v20442_v29 }
 0x8dc   :  { %12830 = vmatpush1.bf16.msra.mxu0 %v20437_v60  ;;  %v20520_v60 = vld [vmem:[#allocation10 + $0x264] ss:$48 sps:$4 sm:$0xff]  }
 0x8dd   :  { %12871 = vmatpush1.bf16.msra.mxu1 %v20440_v20  ;;  %12831 = vmatprep.subr.bf16.mxu0 %v20445_v15 }
 0x8de   :  { %12872 = vmatprep.subr.bf16.mxu1 %v20448_v1  ;;  %v20515_v1 = vld [vmem:[#allocation10 + $0x858] ss:$48 sps:$4 sm:$0xff]  }
 0x8e0   :  { %12832 = vmatpush1.bf16.msra.mxu0 %v20443_v2 }
 0x8e1   :  { %12873 = vmatpush1.bf16.msra.mxu1 %v20446_v17  ;;  %12833 = vmatprep.subr.bf16.mxu0 %v20451_v30  ;;  %v20518_v17 = vld [vmem:[#allocation10 + $0x260] ss:$48 sps:$4 sm:$0xff]   ;;  %v20523_v30 = vld [vmem:[#allocation10 + $0x8bc] ss:$48 sps:$4 sm:$0xff]  }
 0x8e2   :  { %12874 = vmatprep.subr.bf16.mxu1 %v20454_v56  ;;  %v20526_v56 = vld [vmem:[#allocation10 + $0x2c4] ss:$48 sps:$4 sm:$0xff]  }
 0x8e4   :  { %12834 = vmatpush1.bf16.msra.mxu0 %v20449_v32  ;;  %v20521_v32 = vld [vmem:[#allocation10 + $0x8b8] ss:$48 sps:$4 sm:$0xff]  }
 0x8e5   :  { %12875 = vmatpush1.bf16.msra.mxu1 %v20452_v4  ;;  %12835 = vmatprep.subr.bf16.mxu0 %v20457_v13  ;;  %v20524_v4 = vld [vmem:[#allocation10 + $0x2c0] ss:$48 sps:$4 sm:$0xff]   ;;  %v20529_v13 = vld [vmem:[#allocation10 + $0x91c] ss:$48 sps:$4 sm:$0xff]  }
 0x8e6   :  { %12876 = vmatprep.subr.bf16.mxu1 %v20460_v52  ;;  %v20532_v52 = vld [vmem:[#allocation10 + $0x324] ss:$48 sps:$4 sm:$0xff]  }
 0x8e8   :  { %12836 = vmatpush1.bf16.msra.mxu0 %v20455_v40  ;;  %v20527_v40 = vld [vmem:[#allocation10 + $0x918] ss:$48 sps:$4 sm:$0xff]  }
 0x8e9   :  { %12877 = vmatpush1.bf16.msra.mxu1 %v20458_v31  ;;  %12837 = vmatprep.subr.bf16.mxu0 %v20463_v39  ;;  %v20530_v31 = vld [vmem:[#allocation10 + $0x320] ss:$48 sps:$4 sm:$0xff]   ;;  %v20535_v39 = vld [vmem:[#allocation10 + $0x97c] ss:$48 sps:$4 sm:$0xff]  }
 0x8ea   :  { %12878 = vmatprep.subr.bf16.mxu1 %v20466_v0  ;;  %v20538_v0 = vld [vmem:[#allocation10 + $0x384] ss:$48 sps:$4 sm:$0xff]  }
 0x8ec   :  { %12838 = vmatpush1.bf16.msra.mxu0 %v20461_v55  ;;  %v20533_v55 = vld [vmem:[#allocation10 + $0x978] ss:$48 sps:$4 sm:$0xff]  }
 0x8ed   :  { %12879 = vmatpush1.bf16.msra.mxu1 %v20464_v41  ;;  %12839 = vmatprep.subr.bf16.mxu0 %v20469_v38  ;;  %v20536_v41 = vld [vmem:[#allocation10 + $0x380] ss:$48 sps:$4 sm:$0xff]   ;;  %v20541_v38 = vld [vmem:[#allocation10 + $0x9dc] ss:$48 sps:$4 sm:$0xff]  }
 0x8ee   :  { %12880 = vmatprep.subr.bf16.mxu1 %v20472_v59  ;;  %v20544_v59 = vld [vmem:[#allocation10 + $0x3e4] ss:$48 sps:$4 sm:$0xff]  }
 0x8f0   :  { %12840 = vmatpush1.bf16.msra.mxu0 %v20467_v23  ;;  %v20539_v23 = vld [vmem:[#allocation10 + $0x9d8] ss:$48 sps:$4 sm:$0xff]  }
 0x8f1   :  { %12881 = vmatpush1.bf16.msra.mxu1 %v20470_v44  ;;  %12841 = vmatprep.subr.bf16.mxu0 %v20475_v34  ;;  %v20542_v44 = vld [vmem:[#allocation10 + $0x3e0] ss:$48 sps:$4 sm:$0xff]   ;;  %v20547_v34 = vld [vmem:[#allocation10 + $0xa3c] ss:$48 sps:$4 sm:$0xff]  }
 0x8f2   :  { %12882 = vmatprep.subr.bf16.mxu1 %v20478_v33  ;;  %v20550_v33 = vld [vmem:[#allocation10 + $0x444] ss:$48 sps:$4 sm:$0xff]  }
 0x8f4   :  { %12842 = vmatpush1.bf16.msra.mxu0 %v20473_v37  ;;  %v20545_v37 = vld [vmem:[#allocation10 + $0xa38] ss:$48 sps:$4 sm:$0xff]  }
 0x8f5   :  { %12883 = vmatpush1.bf16.msra.mxu1 %v20476_v49  ;;  %12893 = vmatprep.subr.bf16.mxu0 %v20481_v50  ;;  %v20548_v49 = vld [vmem:[#allocation10 + $0x440] ss:$48 sps:$4 sm:$0xff]   ;;  %v20553_v50 = vld [vmem:[#allocation10 + $0xa9c] ss:$48 sps:$4 sm:$0xff]  }
 0x8f6   :  { %12934 = vmatprep.subr.bf16.mxu1 %v20484_v61  ;;  %v20556_v61 = vld [vmem:[#allocation10 + $0x4a4] ss:$48 sps:$4 sm:$0xff]  }
 0x8f7   :  { %12844 = vmatmul.mubr.bf16.vlgmr.msra.gmra.mrb[96].mxu0 %v22427_v24 }
 0x8f8   :  { %12885 = vmatmul.mubr.bf16.vlgmr.msra.gmra.mrb[96].mxu1 %v22384_v48  ;;  %12894 = vmatpush1.bf16.msra.mxu0 %v20479_v28  ;;  %v20551_v28 = vld [vmem:[#allocation10 + $0xa98] ss:$48 sps:$4 sm:$0xff]  }
 0x8f9   :  { %12925 = vmatprep.mubr.bf16.mxu0 %v22422_v27  ;;  %12935 = vmatpush1.bf16.msra.mxu1 %v20482_v8  ;;  %v20554_v8 = vld [vmem:[#allocation10 + $0x4a0] ss:$48 sps:$4 sm:$0xff]  }
 0x8fa   :  { %12966 = vmatprep.mubr.bf16.mxu1 %v22379_v45  ;;  %12895 = vmatprep.subr.bf16.mxu0 %v20487_v21  ;;  %v20559_v21 = vld [vmem:[#allocation10 + $0xafc] ss:$48 sps:$4 sm:$0xff]  }
 0x8fb   :  { %12936 = vmatprep.subr.bf16.mxu1 %v20490_v3  ;;  %v20562_v3 = vld [vmem:[#allocation10 + $0x504] ss:$48 sps:$4 sm:$0xff]  }
 0x8fc   :  { %12896 = vmatpush1.bf16.msra.mxu0 %v20485_v25  ;;  %v20557_v25 = vld [vmem:[#allocation10 + $0xaf8] ss:$48 sps:$4 sm:$0xff]  }
 0x8fd   :  { %12937 = vmatpush1.bf16.msra.mxu1 %v20488_v54  ;;  %12897 = vmatprep.subr.bf16.mxu0 %v20493_v14  ;;  %v20560_v54 = vld [vmem:[#allocation10 + $0x500] ss:$48 sps:$4 sm:$0xff]   ;;  %v20565_v14 = vld [vmem:[#allocation10 + $0xb5c] ss:$48 sps:$4 sm:$0xff]  }
 0x8fe   :  { %12938 = vmatprep.subr.bf16.mxu1 %v20496_v46  ;;  %v20568_v46 = vld [vmem:[#allocation10 + $0x564] ss:$48 sps:$4 sm:$0xff]  }
 0x900   :  { %12898 = vmatpush1.bf16.msra.mxu0 %v20491_v26  ;;  %v20563_v26 = vld [vmem:[#allocation10 + $0xb58] ss:$48 sps:$4 sm:$0xff]  }
 0x901   :  { %12939 = vmatpush1.bf16.msra.mxu1 %v20494_v43  ;;  %12899 = vmatprep.subr.bf16.mxu0 %v20499_v19  ;;  %v20566_v43 = vld [vmem:[#allocation10 + $0x560] ss:$48 sps:$4 sm:$0xff]   ;;  %v20571_v19 = vld [vmem:[#allocation10 + $0xbbc] ss:$48 sps:$4 sm:$0xff]  }
 0x902   :  { %12940 = vmatprep.subr.bf16.mxu1 %v20502_v57  ;;  %v20574_v57 = vld [vmem:[#allocation10 + $0x5c4] ss:$48 sps:$4 sm:$0xff]  }
 0x904   :  { %12900 = vmatpush1.bf16.msra.mxu0 %v20497_v22  ;;  %v20569_v22 = vld [vmem:[#allocation10 + $0xbb8] ss:$48 sps:$4 sm:$0xff]  }
 0x905   :  { %12941 = vmatpush1.bf16.msra.mxu1 %v20500_v58  ;;  %12901 = vmatprep.subr.bf16.mxu0 %v20505_v10  ;;  %v20572_v58 = vld [vmem:[#allocation10 + $0x5c0] ss:$48 sps:$4 sm:$0xff]   ;;  %v20577_v10 = vld [vmem:[#allocation10 + $0x624] ss:$48 sps:$4 sm:$0xff]  }
 0x906   :  { %12942 = vmatprep.subr.bf16.mxu1 %v20508_v42  ;;  %v20580_v42 = vld [vmem:[#allocation10 + $0x2c] ss:$48 sps:$4 sm:$0xff]  }
 0x908   :  { %12902 = vmatpush1.bf16.msra.mxu0 %v20503_v9  ;;  %v20575_v9 = vld [vmem:[#allocation10 + $0x620] ss:$48 sps:$4 sm:$0xff]  }
 0x909   :  { %12943 = vmatpush1.bf16.msra.mxu1 %v20506_v11  ;;  %12903 = vmatprep.subr.bf16.mxu0 %v20511_v18  ;;  %v20578_v11 = vld [vmem:[#allocation10 + $0x28] ss:$48 sps:$4 sm:$0xff]   ;;  %v20583_v18 = vld [vmem:[#allocation10 + $0x684] ss:$48 sps:$4 sm:$0xff]  }
 0x90a   :  { %v22442_v29 = vpop.f32.mrb[84].mxu1  ;;  %12944 = vmatprep.subr.bf16.mxu1 %v20514_v47  ;;  %v20586_v47 = vld [vmem:[#allocation10 + $0x8c] ss:$48 sps:$4 sm:$0xff]  }
 0x90b   :  { %v22444_v20 = vpop.f32.mrb[85].mxu1 }
 0x90c   :  { %12904 = vmatpush1.bf16.msra.mxu0 %v20509_v16  ;;  %v12644_v15 = vpop.f32.mrb[86].mxu1  ;;  %v20581_v16 = vld [vmem:[#allocation10 + $0x680] ss:$48 sps:$4 sm:$0xff]  }
 0x90d   :  { %12945 = vmatpush1.bf16.msra.mxu1 %v20512_v62  ;;  %v12645_v2 = vpop.f32.mrb[87].mxu1  ;;  %12905 = vmatprep.subr.bf16.mxu0 %v20517_v36  ;;  %v20584_v62 = vld [vmem:[#allocation10 + $0x88] ss:$48 sps:$4 sm:$0xff]   ;;  %v20589_v36 = vld [vmem:[#allocation10 + $0x6e4] ss:$48 sps:$4 sm:$0xff]  }
 0x90e   :  { %12946 = vmatprep.subr.bf16.mxu1 %v20520_v60  ;;  %v20592_v60 = vld [vmem:[#allocation10 + $0xec] ss:$48 sps:$4 sm:$0xff]   ;;  %v20587_v15 = vld [vmem:[#allocation10 + $0x6e0] ss:$48 sps:$4 sm:$0xff]   ;;  %v20595_v2 = vld [vmem:[#allocation10 + $0x744] ss:$48 sps:$4 sm:$0xff]  }
 0x910   :  { %12906 = vmatpush1.bf16.msra.mxu0 %v20515_v1  ;;  %v20590_v1 = vld [vmem:[#allocation10 + $0xe8] ss:$48 sps:$4 sm:$0xff]  }
 0x911   :  { %12947 = vmatpush1.bf16.msra.mxu1 %v20518_v17  ;;  %12907 = vmatprep.subr.bf16.mxu0 %v20523_v30  ;;  %v20598_v17 = vld [vmem:[#allocation10 + $0x14c] ss:$48 sps:$4 sm:$0xff]   ;;  %v20593_v30 = vld [vmem:[#allocation10 + $0x740] ss:$48 sps:$4 sm:$0xff]  }
 0x912   :  { %12948 = vmatprep.subr.bf16.mxu1 %v20526_v56  ;;  %v20596_v56 = vld [vmem:[#allocation10 + $0x148] ss:$48 sps:$4 sm:$0xff]  }
 0x914   :  { %12908 = vmatpush1.bf16.msra.mxu0 %v20521_v32  ;;  %v20601_v32 = vld [vmem:[#allocation10 + $0x7a4] ss:$48 sps:$4 sm:$0xff]  }
 0x915   :  { %12949 = vmatpush1.bf16.msra.mxu1 %v20524_v4  ;;  %12909 = vmatprep.subr.bf16.mxu0 %v20529_v13  ;;  %v20604_v4 = vld [vmem:[#allocation10 + $0x1ac] ss:$48 sps:$4 sm:$0xff]   ;;  %v20602_v13 = vld [vmem:[#allocation10 + $0x1a8] ss:$48 sps:$4 sm:$0xff]  }
 0x916   :  { %12950 = vmatprep.subr.bf16.mxu1 %v20532_v52  ;;  %v20607_v52 = vld [vmem:[#allocation10 + $0x804] ss:$48 sps:$4 sm:$0xff]  }
 0x918   :  { %12910 = vmatpush1.bf16.msra.mxu0 %v20527_v40  ;;  %v20610_v40 = vld [vmem:[#allocation10 + $0x20c] ss:$48 sps:$4 sm:$0xff]  }
 0x919   :  { %12951 = vmatpush1.bf16.msra.mxu1 %v20530_v31  ;;  %12911 = vmatprep.subr.bf16.mxu0 %v20535_v39  ;;  %v20605_v31 = vld [vmem:[#allocation10 + $0x800] ss:$48 sps:$4 sm:$0xff]   ;;  %v20608_v39 = vld [vmem:[#allocation10 + $0x208] ss:$48 sps:$4 sm:$0xff]  }
 0x91a   :  { %12952 = vmatprep.subr.bf16.mxu1 %v20538_v0  ;;  %v20613_v0 = vld [vmem:[#allocation10 + $0x864] ss:$48 sps:$4 sm:$0xff]  }
 0x91c   :  { %12912 = vmatpush1.bf16.msra.mxu0 %v20533_v55 }
 0x91d   :  { %12953 = vmatpush1.bf16.msra.mxu1 %v20536_v41  ;;  %12913 = vmatprep.subr.bf16.mxu0 %v20541_v38  ;;  %v20616_v38 = vld [vmem:[#allocation10 + $0x26c] ss:$48 sps:$4 sm:$0xff]  }
 0x91e   :  { %12954 = vmatprep.subr.bf16.mxu1 %v20544_v59 }
 0x920   :  { %12914 = vmatpush1.bf16.msra.mxu0 %v20539_v23 }
 0x921   :  { %12955 = vmatpush1.bf16.msra.mxu1 %v20542_v44  ;;  %12915 = vmatprep.subr.bf16.mxu0 %v20547_v34 }
 0x922   :  { %12956 = vmatprep.subr.bf16.mxu1 %v20550_v33 }
 0x924   :  { %12916 = vmatpush1.bf16.msra.mxu0 %v20545_v37 }
 0x925   :  { %12957 = vmatpush1.bf16.msra.mxu1 %v20548_v49  ;;  %12917 = vmatprep.subr.bf16.mxu0 %v20553_v50  ;;  %v20611_v49 = vld [vmem:[#allocation10 + $0x860] ss:$48 sps:$4 sm:$0xff]  }
 0x926   :  { %12958 = vmatprep.subr.bf16.mxu1 %v20556_v61 }
 0x928   :  { %12918 = vmatpush1.bf16.msra.mxu0 %v20551_v28  ;;  %v20614_v28 = vld [vmem:[#allocation10 + $0x268] ss:$48 sps:$4 sm:$0xff]  }
 0x929   :  { %12959 = vmatpush1.bf16.msra.mxu1 %v20554_v8  ;;  %12919 = vmatprep.subr.bf16.mxu0 %v20559_v21  ;;  %v20619_v8 = vld [vmem:[#allocation10 + $0x8c4] ss:$48 sps:$4 sm:$0xff]   ;;  %v20622_v21 = vld [vmem:[#allocation10 + $0x2cc] ss:$48 sps:$4 sm:$0xff]  }
 0x92a   :  { %12960 = vmatprep.subr.bf16.mxu1 %v20562_v3  ;;  %v20620_v3 = vld [vmem:[#allocation10 + $0x2c8] ss:$48 sps:$4 sm:$0xff]  }
 0x92c   :  { %12920 = vmatpush1.bf16.msra.mxu0 %v20557_v25  ;;  %v20625_v25 = vld [vmem:[#allocation10 + $0x924] ss:$48 sps:$4 sm:$0xff]  }
 0x92d   :  { %12961 = vmatpush1.bf16.msra.mxu1 %v20560_v54  ;;  %12921 = vmatprep.subr.bf16.mxu0 %v20565_v14  ;;  %v20623_v54 = vld [vmem:[#allocation10 + $0x920] ss:$48 sps:$4 sm:$0xff]   ;;  %v20626_v14 = vld [vmem:[#allocation10 + $0x328] ss:$48 sps:$4 sm:$0xff]  }
 0x92e   :  { %12962 = vmatprep.subr.bf16.mxu1 %v20568_v46  ;;  %v20631_v46 = vld [vmem:[#allocation10 + $0x984] ss:$48 sps:$4 sm:$0xff]  }
 0x930   :  { %12922 = vmatpush1.bf16.msra.mxu0 %v20563_v26  ;;  %v20634_v26 = vld [vmem:[#allocation10 + $0x38c] ss:$48 sps:$4 sm:$0xff]  }
 0x931   :  { %12963 = vmatpush1.bf16.msra.mxu1 %v20566_v43  ;;  %12923 = vmatprep.subr.bf16.mxu0 %v20571_v19  ;;  %v20629_v43 = vld [vmem:[#allocation10 + $0x980] ss:$48 sps:$4 sm:$0xff]   ;;  %v20632_v19 = vld [vmem:[#allocation10 + $0x388] ss:$48 sps:$4 sm:$0xff]  }
 0x932   :  { %12964 = vmatprep.subr.bf16.mxu1 %v20574_v57  ;;  %v20637_v57 = vld [vmem:[#allocation10 + $0x9e4] ss:$48 sps:$4 sm:$0xff]  }
 0x934   :  { %12924 = vmatpush1.bf16.msra.mxu0 %v20569_v22  ;;  %v20640_v22 = vld [vmem:[#allocation10 + $0x3ec] ss:$48 sps:$4 sm:$0xff]  }
 0x935   :  { %12965 = vmatpush1.bf16.msra.mxu1 %v20572_v58  ;;  %12975 = vmatprep.subr.bf16.mxu0 %v20577_v10  ;;  %v20635_v58 = vld [vmem:[#allocation10 + $0x9e0] ss:$48 sps:$4 sm:$0xff]   ;;  %v20638_v10 = vld [vmem:[#allocation10 + $0x3e8] ss:$48 sps:$4 sm:$0xff]  }
 0x936   :  { %13016 = vmatprep.subr.bf16.mxu1 %v20580_v42  ;;  %v20643_v42 = vld [vmem:[#allocation10 + $0xa44] ss:$48 sps:$4 sm:$0xff]  }
 0x937   :  { %12926 = vmatmul.mubr.bf16.vlgmr.msra.gmra.mrb[100].mxu0 %v22427_v24 }
 0x938   :  { %12967 = vmatmul.mubr.bf16.vlgmr.msra.gmra.mrb[100].mxu1 %v22384_v48  ;;  %12976 = vmatpush1.bf16.msra.mxu0 %v20575_v9  ;;  %v20646_v9 = vld [vmem:[#allocation10 + $0x44c] ss:$48 sps:$4 sm:$0xff]  }
 0x939   :  { %13007 = vmatprep.mubr.bf16.mxu0 %v22422_v27  ;;  %13017 = vmatpush1.bf16.msra.mxu1 %v20578_v11  ;;  %v20641_v11 = vld [vmem:[#allocation10 + $0xa40] ss:$48 sps:$4 sm:$0xff]  }
 0x93a   :  { %13048 = vmatprep.mubr.bf16.mxu1 %v22379_v45  ;;  %12977 = vmatprep.subr.bf16.mxu0 %v20583_v18  ;;  %v20599_v45 = vld [vmem:[#allocation10 + $0x7a0] ss:$48 sps:$4 sm:$0xff]   ;;  %v20644_v18 = vld [vmem:[#allocation10 + $0x448] ss:$48 sps:$4 sm:$0xff]  }
 0x93b   :  { %13018 = vmatprep.subr.bf16.mxu1 %v20586_v47  ;;  %v20649_v47 = vld [vmem:[#allocation10 + $0xaa4] ss:$48 sps:$4 sm:$0xff]  }
 0x93c   :  { %12978 = vmatpush1.bf16.msra.mxu0 %v20581_v16  ;;  %v20652_v16 = vld [vmem:[#allocation10 + $0x4ac] ss:$48 sps:$4 sm:$0xff]  }
 0x93d   :  { %13019 = vmatpush1.bf16.msra.mxu1 %v20584_v62  ;;  %12979 = vmatprep.subr.bf16.mxu0 %v20589_v36  ;;  %v20647_v62 = vld [vmem:[#allocation10 + $0xaa0] ss:$48 sps:$4 sm:$0xff]   ;;  %v20650_v36 = vld [vmem:[#allocation10 + $0x4a8] ss:$48 sps:$4 sm:$0xff]  }
 0x93e   :  { %13020 = vmatprep.subr.bf16.mxu1 %v20592_v60  ;;  %v20655_v60 = vld [vmem:[#allocation10 + $0xb04] ss:$48 sps:$4 sm:$0xff]  }
 0x940   :  { %12980 = vmatpush1.bf16.msra.mxu0 %v20587_v15  ;;  %v20658_v15 = vld [vmem:[#allocation10 + $0x50c] ss:$48 sps:$4 sm:$0xff]  }
 0x941   :  { %13021 = vmatpush1.bf16.msra.mxu1 %v20590_v1  ;;  %12981 = vmatprep.subr.bf16.mxu0 %v20595_v2  ;;  %v20653_v1 = vld [vmem:[#allocation10 + $0xb00] ss:$48 sps:$4 sm:$0xff]   ;;  %v20656_v2 = vld [vmem:[#allocation10 + $0x508] ss:$48 sps:$4 sm:$0xff]  }
 0x942   :  { %13022 = vmatprep.subr.bf16.mxu1 %v20598_v17  ;;  %v20661_v17 = vld [vmem:[#allocation10 + $0xb64] ss:$48 sps:$4 sm:$0xff]  }
 0x944   :  { %12982 = vmatpush1.bf16.msra.mxu0 %v20593_v30  ;;  %v20664_v30 = vld [vmem:[#allocation10 + $0x56c] ss:$48 sps:$4 sm:$0xff]  }
 0x945   :  { %13023 = vmatpush1.bf16.msra.mxu1 %v20596_v56  ;;  %12983 = vmatprep.subr.bf16.mxu0 %v20601_v32  ;;  %v20659_v56 = vld [vmem:[#allocation10 + $0xb60] ss:$48 sps:$4 sm:$0xff]   ;;  %v20662_v32 = vld [vmem:[#allocation10 + $0x568] ss:$48 sps:$4 sm:$0xff]  }
 0x946   :  { %13024 = vmatprep.subr.bf16.mxu1 %v20604_v4  ;;  %v20667_v4 = vld [vmem:[#allocation10 + $0xbc4] ss:$48 sps:$4 sm:$0xff]  }
 0x948   :  { %12984 = vmatpush1.bf16.msra.mxu0 %v20599_v45  ;;  %v20670_v45 = vld [vmem:[#allocation10 + $0x5cc] ss:$48 sps:$4 sm:$0xff]  }
 0x949   :  { %13025 = vmatpush1.bf16.msra.mxu1 %v20602_v13  ;;  %12985 = vmatprep.subr.bf16.mxu0 %v20607_v52  ;;  %v20665_v13 = vld [vmem:[#allocation10 + $0xbc0] ss:$48 sps:$4 sm:$0xff]   ;;  %v20668_v52 = vld [vmem:[#allocation10 + $0x5c8] ss:$48 sps:$4 sm:$0xff]  }
 0x94a   :  { %v22450_v55 = vpop.f32.mrb[88].mxu1  ;;  %v12681_v41 = vpop.f32.mrb[88].mxu0  ;;  %13026 = vmatprep.subr.bf16.mxu1 %v20610_v40  ;;  %v20673_v40 = vld [vmem:[#allocation10 + $0x62c] ss:$48 sps:$4 sm:$0xff]  }
 0x94b   :  { %v22453_v59 = vadd.f32 %v12681_v41, %v22442_v29  ;;  %v22455_v23 = vpop.f32.mrb[89].mxu1  ;;  %v12683_v44 = vpop.f32.mrb[89].mxu0  ;;  %v20617_v29 = vld [vmem:[#allocation10 + $0x8c0] ss:$48 sps:$4 sm:$0xff]   ;;  %v20676_v41 = vld [vmem:[#allocation10 + $0x68c] ss:$48 sps:$4 sm:$0xff]  }
 0x94c   :  { %v22458_v34 = vadd.f32 %v12683_v44, %v22444_v20  ;;  %v12726_v33 = vpop.f32.mrb[90].mxu1  ;;  %12986 = vmatpush1.bf16.msra.mxu0 %v20605_v31  ;;  %v12685_v37 = vpop.f32.mrb[90].mxu0  ;;  %v20628_v20 = vld [vmem:[#allocation10 + $0x32c] ss:$48 sps:$4 sm:$0xff]   ;;  %v20721_v31 = vld [vmem:[#allocation12 + $0x4] ss:$48 sps:$4 sm:$0xff]  }
 0x94d   :  { %13027 = vmatpush1.bf16.msra.mxu1 %v20608_v39  ;;  %v12727_v50 = vpop.f32.mrb[91].mxu1  ;;  %v12686_v61 = vpop.f32.mrb[91].mxu0  ;;  %12987 = vmatprep.subr.bf16.mxu0 %v20613_v0  ;;  %v17352_v39 = vld [vmem:[%s22726_s25 + $0x48] sm:$0xff]  ;;  %v20727_v33 = vld [vmem:[#allocation12 + $0x64] ss:$48 sps:$4 sm:$0xff]  }
 0x94e   :  { %13028 = vmatprep.subr.bf16.mxu1 %v20616_v38  ;;  %v20671_v0 = vld [vmem:[#allocation10 + $0x628] ss:$48 sps:$4 sm:$0xff]   ;;  %v20719_v38 = vld [vmem:[#allocation12] ss:$48 sps:$4 sm:$0xff]   ;;  %v22463_v44 = vpack.c.bf16 %v17352_v39, %v17352_v39  ;;  %v20733_v61 = vld [vmem:[#allocation12 + $0xc4] ss:$48 sps:$4 sm:$0xff]  }
 0x94f   :  { %v20674_v37 = vld [vmem:[#allocation10 + $0x688] ss:$48 sps:$4 sm:$0xff]   ;;  %v20725_v50 = vld [vmem:[#allocation12 + $0x60] ss:$48 sps:$4 sm:$0xff]   ;;  %v20706_v39 = vld [vmem:[#allocation10 + $0xa4c] ss:$48 sps:$4 sm:$0xff]  }
 0x950   :  { %12988 = vmatpush1.bf16.msra.mxu0 %v20611_v49  ;;  %v20679_v49 = vld [vmem:[#allocation10 + $0x6ec] ss:$48 sps:$4 sm:$0xff]  }
 0x951   :  { %13029 = vmatpush1.bf16.msra.mxu1 %v20614_v28  ;;  %12989 = vmatprep.subr.bf16.mxu0 %v20619_v8  ;;  %v20677_v28 = vld [vmem:[#allocation10 + $0x6e8] ss:$48 sps:$4 sm:$0xff]   ;;  %v20682_v8 = vld [vmem:[#allocation10 + $0x74c] ss:$48 sps:$4 sm:$0xff]  }
 0x952   :  { %13030 = vmatprep.subr.bf16.mxu1 %v20622_v21  ;;  %v20731_v21 = vld [vmem:[#allocation12 + $0xc0] ss:$48 sps:$4 sm:$0xff]  }
 0x954   :  { %12990 = vmatpush1.bf16.msra.mxu0 %v20617_v29  ;;  %v20680_v29 = vld [vmem:[#allocation10 + $0x748] ss:$48 sps:$4 sm:$0xff]  }
 0x955   :  { %13031 = vmatpush1.bf16.msra.mxu1 %v20620_v3  ;;  %12991 = vmatprep.subr.bf16.mxu0 %v20625_v25  ;;  %v20737_v3 = vld [vmem:[#allocation12 + $0x120] ss:$48 sps:$4 sm:$0xff]   ;;  %v20745_v25 = vld [vmem:[#allocation12 + $0x184] ss:$48 sps:$4 sm:$0xff]  }
 0x956   :  { %13032 = vmatprep.subr.bf16.mxu1 %v20628_v20  ;;  %v20683_v20 = vld [vmem:[#allocation10 + $0x7a8] ss:$48 sps:$4 sm:$0xff]  }
 0x958   :  { %12992 = vmatpush1.bf16.msra.mxu0 %v20623_v54  ;;  %v20688_v54 = vld [vmem:[#allocation10 + $0x80c] ss:$48 sps:$4 sm:$0xff]  }
 0x959   :  { %13033 = vmatpush1.bf16.msra.mxu1 %v20626_v14  ;;  %12993 = vmatprep.subr.bf16.mxu0 %v20631_v46  ;;  %v20743_v14 = vld [vmem:[#allocation12 + $0x180] ss:$48 sps:$4 sm:$0xff]   ;;  %v20751_v46 = vld [vmem:[#allocation12 + $0x1e4] ss:$48 sps:$4 sm:$0xff]  }
 0x95a   :  { %13034 = vmatprep.subr.bf16.mxu1 %v20634_v26  ;;  %v20686_v26 = vld [vmem:[#allocation10 + $0x808] ss:$48 sps:$4 sm:$0xff]  }
 0x95c   :  { %12994 = vmatpush1.bf16.msra.mxu0 %v20629_v43  ;;  %v20691_v43 = vld [vmem:[#allocation10 + $0x86c] ss:$48 sps:$4 sm:$0xff]  }
 0x95d   :  { %13035 = vmatpush1.bf16.msra.mxu1 %v20632_v19  ;;  %12995 = vmatprep.subr.bf16.mxu0 %v20637_v57 }
 0x95e   :  { %13036 = vmatprep.subr.bf16.mxu1 %v20640_v22  ;;  %v20749_v22 = vld [vmem:[#allocation12 + $0x1e0] ss:$48 sps:$4 sm:$0xff]  }
 0x960   :  { %12996 = vmatpush1.bf16.msra.mxu0 %v20635_v58 }
 0x961   :  { %13037 = vmatpush1.bf16.msra.mxu1 %v20638_v10  ;;  %12997 = vmatprep.subr.bf16.mxu0 %v20643_v42 }
 0x962   :  { %13038 = vmatprep.subr.bf16.mxu1 %v20646_v9  ;;  %v20757_v9 = vld [vmem:[#allocation12 + $0x244] ss:$48 sps:$4 sm:$0xff]  }
 0x964   :  { %12998 = vmatpush1.bf16.msra.mxu0 %v20641_v11 }
 0x965   :  { %13039 = vmatpush1.bf16.msra.mxu1 %v20644_v18  ;;  %12999 = vmatprep.subr.bf16.mxu0 %v20649_v47 }
 0x966   :  { %13040 = vmatprep.subr.bf16.mxu1 %v20652_v16  ;;  %v20689_v16 = vld [vmem:[#allocation10 + $0x868] ss:$48 sps:$4 sm:$0xff]  }
 0x968   :  { %13000 = vmatpush1.bf16.msra.mxu0 %v20647_v62 }
 0x969   :  { %13041 = vmatpush1.bf16.msra.mxu1 %v20650_v36  ;;  %13001 = vmatprep.subr.bf16.mxu0 %v20655_v60  ;;  %v20694_v60 = vld [vmem:[#allocation10 + $0x8cc] ss:$48 sps:$4 sm:$0xff]  }
 0x96a   :  { %13042 = vmatprep.subr.bf16.mxu1 %v20658_v15  ;;  %v20755_v15 = vld [vmem:[#allocation12 + $0x240] ss:$48 sps:$4 sm:$0xff]  }
 0x96c   :  { %13002 = vmatpush1.bf16.msra.mxu0 %v20653_v1  ;;  %v20692_v1 = vld [vmem:[#allocation10 + $0x8c8] ss:$48 sps:$4 sm:$0xff]  }
 0x96d   :  { %13043 = vmatpush1.bf16.msra.mxu1 %v20656_v2  ;;  %13003 = vmatprep.subr.bf16.mxu0 %v20661_v17  ;;  %v20697_v2 = vld [vmem:[#allocation10 + $0x92c] ss:$48 sps:$4 sm:$0xff]   ;;  %v20761_v17 = vld [vmem:[#allocation12 + $0x2a0] ss:$48 sps:$4 sm:$0xff]  }
 0x96e   :  { %13044 = vmatprep.subr.bf16.mxu1 %v20664_v30  ;;  %v20695_v30 = vld [vmem:[#allocation10 + $0x928] ss:$48 sps:$4 sm:$0xff]  }
 0x970   :  { %13004 = vmatpush1.bf16.msra.mxu0 %v20659_v56  ;;  %v20700_v56 = vld [vmem:[#allocation10 + $0x98c] ss:$48 sps:$4 sm:$0xff]  }
 0x971   :  { %13045 = vmatpush1.bf16.msra.mxu1 %v20662_v32  ;;  %13005 = vmatprep.subr.bf16.mxu0 %v20667_v4  ;;  %v20767_v32 = vld [vmem:[#allocation12 + $0x300] ss:$48 sps:$4 sm:$0xff]   ;;  %v20775_v4 = vld [vmem:[#allocation12 + $0x364] ss:$48 sps:$4 sm:$0xff]  }
 0x972   :  { %13046 = vmatprep.subr.bf16.mxu1 %v20670_v45  ;;  %v20698_v45 = vld [vmem:[#allocation10 + $0x988] ss:$48 sps:$4 sm:$0xff]  }
 0x974   :  { %13006 = vmatpush1.bf16.msra.mxu0 %v20665_v13  ;;  %v20703_v13 = vld [vmem:[#allocation10 + $0x9ec] ss:$48 sps:$4 sm:$0xff]  }
 0x975   :  { %13047 = vmatpush1.bf16.msra.mxu1 %v20668_v52  ;;  %13057 = vmatprep.subr.bf16.mxu0 %v20673_v40  ;;  %v20773_v52 = vld [vmem:[#allocation12 + $0x360] ss:$48 sps:$4 sm:$0xff]   ;;  %v20781_v40 = vld [vmem:[#allocation12 + $0x3c4] ss:$48 sps:$4 sm:$0xff]  }
 0x976   :  { %15022 = vmatprep.subr.bf16.mxu1 %v20721_v31  ;;  %v20701_v31 = vld [vmem:[#allocation10 + $0x9e8] ss:$48 sps:$4 sm:$0xff]  }
 0x977   :  { %13008 = vmatmul.mubr.bf16.vlgmr.msra.gmra.mrb[104].mxu0 %v22427_v24 }
 0x978   :  { %13049 = vmatmul.mubr.bf16.vlgmr.msra.gmra.mrb[104].mxu1 %v22384_v48  ;;  %13058 = vmatpush1.bf16.msra.mxu0 %v20671_v0  ;;  %v20739_v48 = vld [vmem:[#allocation12 + $0x124] ss:$48 sps:$4 sm:$0xff]   ;;  %v20779_v0 = vld [vmem:[#allocation12 + $0x3c0] ss:$48 sps:$4 sm:$0xff]  }
 0x979   :  { %13089 = vmatprep.mubr.bf16.mxu0 %v22422_v27  ;;  %13059 = vmatprep.subr.bf16.mxu0 %v20676_v41  ;;  %v20685_v27 = vld [vmem:[#allocation10 + $0x7ac] ss:$48 sps:$4 sm:$0xff]   ;;  %v20787_v41 = vld [vmem:[#allocation12 + $0x424] ss:$48 sps:$4 sm:$0xff]  }
 0x97a   :  { %15023 = vmatpush1.bf16.msra.mxu1 %v20719_v38  ;;  %15054 = vmatprep.mubr.bf16.mxu1 %v22463_v44  ;;  %v20704_v38 = vld [vmem:[#allocation10 + $0xa48] ss:$48 sps:$4 sm:$0xff]  }
 0x97b   :  { %15024 = vmatprep.subr.bf16.mxu1 %v20727_v33  ;;  %v20709_v33 = vld [vmem:[#allocation10 + $0xaac] ss:$48 sps:$4 sm:$0xff]  }
 0x97c   :  { %13060 = vmatpush1.bf16.msra.mxu0 %v20674_v37  ;;  %v20785_v37 = vld [vmem:[#allocation12 + $0x420] ss:$48 sps:$4 sm:$0xff]  }
 0x97d   :  { %13061 = vmatprep.subr.bf16.mxu0 %v20679_v49  ;;  %v20793_v49 = vld [vmem:[#allocation12 + $0x484] ss:$48 sps:$4 sm:$0xff]  }
 0x97e   :  { %15025 = vmatpush1.bf16.msra.mxu1 %v20725_v50  ;;  %v20707_v50 = vld [vmem:[#allocation10 + $0xaa8] ss:$48 sps:$4 sm:$0xff]  }
 0x97f   :  { %15026 = vmatprep.subr.bf16.mxu1 %v20733_v61  ;;  %v20712_v61 = vld [vmem:[#allocation10 + $0xb0c] ss:$48 sps:$4 sm:$0xff]  }
 0x980   :  { %13062 = vmatpush1.bf16.msra.mxu0 %v20677_v28  ;;  %v20791_v28 = vld [vmem:[#allocation12 + $0x480] ss:$48 sps:$4 sm:$0xff]  }
 0x981   :  { %13063 = vmatprep.subr.bf16.mxu0 %v20682_v8  ;;  %v20799_v8 = vld [vmem:[#allocation12 + $0x4e4] ss:$48 sps:$4 sm:$0xff]  }
 0x982   :  { %15027 = vmatpush1.bf16.msra.mxu1 %v20731_v21  ;;  %v20710_v21 = vld [vmem:[#allocation10 + $0xb08] ss:$48 sps:$4 sm:$0xff]  }
 0x983   :  { %15028 = vmatprep.subr.bf16.mxu1 %v20739_v48  ;;  %v20715_v48 = vld [vmem:[#allocation10 + $0xb6c] ss:$48 sps:$4 sm:$0xff]  }
 0x984   :  { %13064 = vmatpush1.bf16.msra.mxu0 %v20680_v29  ;;  %v20797_v29 = vld [vmem:[#allocation12 + $0x4e0] ss:$48 sps:$4 sm:$0xff]  }
 0x985   :  { %13065 = vmatprep.subr.bf16.mxu0 %v20685_v27  ;;  %v20805_v27 = vld [vmem:[#allocation12 + $0x544] ss:$48 sps:$4 sm:$0xff]  }
 0x986   :  { %15029 = vmatpush1.bf16.msra.mxu1 %v20737_v3  ;;  %v20713_v3 = vld [vmem:[#allocation10 + $0xb68] ss:$48 sps:$4 sm:$0xff]  }
 0x987   :  { %15030 = vmatprep.subr.bf16.mxu1 %v20745_v25  ;;  %v20718_v25 = vld [vmem:[#allocation10 + $0xbcc] ss:$48 sps:$4 sm:$0xff]  }
 0x988   :  { %13066 = vmatpush1.bf16.msra.mxu0 %v20683_v20  ;;  %v20803_v20 = vld [vmem:[#allocation12 + $0x540] ss:$48 sps:$4 sm:$0xff]  }
 0x989   :  { %13067 = vmatprep.subr.bf16.mxu0 %v20688_v54  ;;  %v20811_v54 = vld [vmem:[#allocation12 + $0x5a4] ss:$48 sps:$4 sm:$0xff]  }
 0x98a   :  { %v12763_v19 = vpop.f32.mrb[92].mxu0  ;;  %v22469_v57 = vpop.f32.mrb[92].mxu1  ;;  %15031 = vmatpush1.bf16.msra.mxu1 %v20743_v14  ;;  %v20716_v14 = vld [vmem:[#allocation10 + $0xbc8] ss:$48 sps:$4 sm:$0xff]  }
 0x98b   :  { %v22472_v58 = vadd.f32 %v12763_v19, %v22450_v55  ;;  %v12765_v10 = vpop.f32.mrb[93].mxu0  ;;  %v22474_v42 = vpop.f32.mrb[93].mxu1  ;;  %15032 = vmatprep.subr.bf16.mxu1 %v20751_v46  ;;  %v20763_v55 = vld [vmem:[#allocation12 + $0x2a4] ss:$48 sps:$4 sm:$0xff]  }
 0x98c   :  { %v22477_v11 = vadd.f32 %v12765_v10, %v22455_v23  ;;  %v12767_v18 = vpop.f32.mrb[94].mxu0  ;;  %v12808_v47 = vpop.f32.mrb[94].mxu1  ;;  %13068 = vmatpush1.bf16.msra.mxu0 %v20686_v26  ;;  %v20769_v23 = vld [vmem:[#allocation12 + $0x304] ss:$48 sps:$4 sm:$0xff]   ;;  %v17354_v26 = vld [vmem:[%s22726_s25 + $0x58] sm:$0xff] }
 0x98d   :  { %v12768_v62 = vpop.f32.mrb[95].mxu0  ;;  %v12809_v36 = vpop.f32.mrb[95].mxu1  ;;  %13069 = vmatprep.subr.bf16.mxu0 %v20691_v43  ;;  %v20724_v46 = vld [vmem:[#allocation12 + $0x604] ss:$48 sps:$4 sm:$0xff]   ;;  %v20809_v43 = vld [vmem:[#allocation12 + $0x5a0] ss:$48 sps:$4 sm:$0xff]  }
 0x98e   :  { %15033 = vmatpush1.bf16.msra.mxu1 %v20749_v22  ;;  %v17351_v19 = vld [vmem:[%s22726_s25 + $0x40] sm:$0xff]  ;;  %v20817_v22 = vld [vmem:[#allocation12 + $0xc] ss:$48 sps:$4 sm:$0xff]  }
 0x98f   :  { %15034 = vmatprep.subr.bf16.mxu1 %v20757_v9  ;;  %v20722_v10 = vld [vmem:[#allocation12 + $0x600] ss:$48 sps:$4 sm:$0xff]   ;;  %v22485_v9 = vpack.c.bf16 %v17354_v26, %v17354_v26  ;;  %v20730_v18 = vld [vmem:[#allocation12 + $0x664] ss:$48 sps:$4 sm:$0xff]   ;;  %v22487_v47 = vpack.c.bf16 %v17351_v19, %v17351_v19  ;;  %v20823_v62 = vld [vmem:[#allocation12 + $0x6c] ss:$48 sps:$4 sm:$0xff]  }
 0x990   :  { %13070 = vmatpush1.bf16.msra.mxu0 %v20689_v16  ;;  %v20815_v16 = vld [vmem:[#allocation12 + $0x8] ss:$48 sps:$4 sm:$0xff]   ;;  %v20728_v36 = vld [vmem:[#allocation12 + $0x660] ss:$48 sps:$4 sm:$0xff]   ;;  %v20871_v26 = vld [vmem:[#allocation12 + $0x36c] ss:$48 sps:$4 sm:$0xff]  }
 0x991   :  { %13071 = vmatprep.subr.bf16.mxu0 %v20694_v60  ;;  %v20736_v60 = vld [vmem:[#allocation12 + $0x6c4] ss:$48 sps:$4 sm:$0xff]  }
 0x992   :  { %15035 = vmatpush1.bf16.msra.mxu1 %v20755_v15  ;;  %v20821_v15 = vld [vmem:[#allocation12 + $0x68] ss:$48 sps:$4 sm:$0xff]   ;;  %v20784_v19 = vld [vmem:[#allocation12 + $0x9c4] ss:$48 sps:$4 sm:$0xff]  }
 0x993   :  { %15036 = vmatprep.subr.bf16.mxu1 %v20763_v55  ;;  %v20829_v55 = vld [vmem:[#allocation12 + $0xcc] ss:$48 sps:$4 sm:$0xff]  }
 0x994   :  { %13072 = vmatpush1.bf16.msra.mxu0 %v20692_v1  ;;  %v20734_v1 = vld [vmem:[#allocation12 + $0x6c0] ss:$48 sps:$4 sm:$0xff]  }
 0x995   :  { %13073 = vmatprep.subr.bf16.mxu0 %v20697_v2  ;;  %v20827_v2 = vld [vmem:[#allocation12 + $0xc8] ss:$48 sps:$4 sm:$0xff]  }
 0x996   :  { %15037 = vmatpush1.bf16.msra.mxu1 %v20761_v17  ;;  %v20835_v17 = vld [vmem:[#allocation12 + $0x12c] ss:$48 sps:$4 sm:$0xff]  }
 0x997   :  { %15038 = vmatprep.subr.bf16.mxu1 %v20769_v23  ;;  %v20740_v23 = vld [vmem:[#allocation12 + $0x720] ss:$48 sps:$4 sm:$0xff]  }
 0x998   :  { %13074 = vmatpush1.bf16.msra.mxu0 %v20695_v30  ;;  %v20748_v30 = vld [vmem:[#allocation12 + $0x784] ss:$48 sps:$4 sm:$0xff]  }
 0x999   :  { %13075 = vmatprep.subr.bf16.mxu0 %v20700_v56  ;;  %v20833_v56 = vld [vmem:[#allocation12 + $0x128] ss:$48 sps:$4 sm:$0xff]  }
 0x99a   :  { %15039 = vmatpush1.bf16.msra.mxu1 %v20767_v32  ;;  %v20841_v32 = vld [vmem:[#allocation12 + $0x18c] ss:$48 sps:$4 sm:$0xff]  }
 0x99b   :  { %15040 = vmatprep.subr.bf16.mxu1 %v20775_v4  ;;  %v20746_v4 = vld [vmem:[#allocation12 + $0x780] ss:$48 sps:$4 sm:$0xff]  }
 0x99c   :  { %13076 = vmatpush1.bf16.msra.mxu0 %v20698_v45  ;;  %v20754_v45 = vld [vmem:[#allocation12 + $0x7e4] ss:$48 sps:$4 sm:$0xff]  }
 0x99d   :  { %13077 = vmatprep.subr.bf16.mxu0 %v20703_v13  ;;  %v20839_v13 = vld [vmem:[#allocation12 + $0x188] ss:$48 sps:$4 sm:$0xff]  }
 0x99e   :  { %15041 = vmatpush1.bf16.msra.mxu1 %v20773_v52  ;;  %v20847_v52 = vld [vmem:[#allocation12 + $0x1ec] ss:$48 sps:$4 sm:$0xff]  }
 0x99f   :  { %15042 = vmatprep.subr.bf16.mxu1 %v20781_v40  ;;  %v20752_v40 = vld [vmem:[#allocation12 + $0x7e0] ss:$48 sps:$4 sm:$0xff]  }
 0x9a0   :  { %13078 = vmatpush1.bf16.msra.mxu0 %v20701_v31  ;;  %v20760_v31 = vld [vmem:[#allocation12 + $0x844] ss:$48 sps:$4 sm:$0xff]  }
 0x9a1   :  { %13079 = vmatprep.subr.bf16.mxu0 %v20706_v39 }
 0x9a2   :  { %15043 = vmatpush1.bf16.msra.mxu1 %v20779_v0  ;;  %v20845_v0 = vld [vmem:[#allocation12 + $0x1e8] ss:$48 sps:$4 sm:$0xff]  }
 0x9a3   :  { %15044 = vmatprep.subr.bf16.mxu1 %v20787_v41 }
 0x9a4   :  { %13080 = vmatpush1.bf16.msra.mxu0 %v20704_v38 }
 0x9a5   :  { %13081 = vmatprep.subr.bf16.mxu0 %v20709_v33 }
 0x9a6   :  { %15045 = vmatpush1.bf16.msra.mxu1 %v20785_v37  ;;  %v20853_v37 = vld [vmem:[#allocation12 + $0x24c] ss:$48 sps:$4 sm:$0xff]  }
 0x9a7   :  { %15046 = vmatprep.subr.bf16.mxu1 %v20793_v49 }
 0x9a8   :  { %13082 = vmatpush1.bf16.msra.mxu0 %v20707_v50 }
 0x9a9   :  { %13083 = vmatprep.subr.bf16.mxu0 %v20712_v61 }
 0x9aa   :  { %15047 = vmatpush1.bf16.msra.mxu1 %v20791_v28  ;;  %v20758_v28 = vld [vmem:[#allocation12 + $0x840] ss:$48 sps:$4 sm:$0xff]  }
 0x9ab   :  { %15048 = vmatprep.subr.bf16.mxu1 %v20799_v8 }
 0x9ac   :  { %13084 = vmatpush1.bf16.msra.mxu0 %v20710_v21 }
 0x9ad   :  { %13085 = vmatprep.subr.bf16.mxu0 %v20715_v48  ;;  %v20766_v48 = vld [vmem:[#allocation12 + $0x8a4] ss:$48 sps:$4 sm:$0xff]  }
 0x9ae   :  { %15049 = vmatpush1.bf16.msra.mxu1 %v20797_v29 }
 0x9af   :  { %15050 = vmatprep.subr.bf16.mxu1 %v20805_v27  ;;  %v20859_v27 = vld [vmem:[#allocation12 + $0x2ac] ss:$48 sps:$4 sm:$0xff]  }
 0x9b0   :  { %13086 = vmatpush1.bf16.msra.mxu0 %v20713_v3  ;;  %v20764_v3 = vld [vmem:[#allocation12 + $0x8a0] ss:$48 sps:$4 sm:$0xff]  }
 0x9b1   :  { %13087 = vmatprep.subr.bf16.mxu0 %v20718_v25  ;;  %v20772_v25 = vld [vmem:[#allocation12 + $0x904] ss:$48 sps:$4 sm:$0xff]  }
 0x9b2   :  { %15051 = vmatpush1.bf16.msra.mxu1 %v20803_v20  ;;  %v20865_v20 = vld [vmem:[#allocation12 + $0x30c] ss:$48 sps:$4 sm:$0xff]  }
 0x9b3   :  { %15052 = vmatprep.subr.bf16.mxu1 %v20811_v54  ;;  %v20770_v54 = vld [vmem:[#allocation12 + $0x900] ss:$48 sps:$4 sm:$0xff]  }
 0x9b4   :  { %13088 = vmatpush1.bf16.msra.mxu0 %v20716_v14  ;;  %v20778_v14 = vld [vmem:[#allocation12 + $0x964] ss:$48 sps:$4 sm:$0xff]  }
 0x9b5   :  { %15063 = vmatprep.subr.bf16.mxu0 %v20724_v46  ;;  %v20863_v46 = vld [vmem:[#allocation12 + $0x308] ss:$48 sps:$4 sm:$0xff]  }
 0x9b6   :  { %15053 = vmatpush1.bf16.msra.mxu1 %v20809_v43  ;;  %v20776_v43 = vld [vmem:[#allocation12 + $0x960] ss:$48 sps:$4 sm:$0xff]  }
 0x9b7   :  { %13090 = vmatmul.mubr.bf16.vlgmr.msra.gmra.mrb[108].mxu0 %v22427_v24  ;;  %15104 = vmatprep.subr.bf16.mxu1 %v20817_v22  ;;  %v20742_v24 = vld [vmem:[#allocation12 + $0x724] ss:$48 sps:$4 sm:$0xff]   ;;  %v20869_v22 = vld [vmem:[#allocation12 + $0x368] ss:$48 sps:$4 sm:$0xff]  }
 0x9b8   :  { %15064 = vmatpush1.bf16.msra.mxu0 %v20722_v10  ;;  %15095 = vmatprep.mubr.bf16.mxu0 %v22485_v9  ;;  %v20877_v10 = vld [vmem:[#allocation12 + $0x3cc] ss:$48 sps:$4 sm:$0xff]  }
 0x9b9   :  { %15065 = vmatprep.subr.bf16.mxu0 %v20730_v18  ;;  %15055 = vmatmul.mubr.bf16.vlgmr.msra.gmra.mrb[108].mxu1 %v22487_v47  ;;  %v20782_v18 = vld [vmem:[#allocation12 + $0x9c0] ss:$48 sps:$4 sm:$0xff]  }
 0x9ba   :  { %15105 = vmatpush1.bf16.msra.mxu1 %v20815_v16  ;;  %15136 = vmatprep.mubr.bf16.mxu1 %v22463_v44  ;;  %v20790_v16 = vld [vmem:[#allocation12 + $0xa24] ss:$48 sps:$4 sm:$0xff]  }
 0x9bb   :  { %15106 = vmatprep.subr.bf16.mxu1 %v20823_v62  ;;  %v20875_v62 = vld [vmem:[#allocation12 + $0x3c8] ss:$48 sps:$4 sm:$0xff]  }
 0x9bc   :  { %15066 = vmatpush1.bf16.msra.mxu0 %v20728_v36  ;;  %v20883_v36 = vld [vmem:[#allocation12 + $0x42c] ss:$48 sps:$4 sm:$0xff]  }
 0x9bd   :  { %15067 = vmatprep.subr.bf16.mxu0 %v20736_v60  ;;  %v20788_v60 = vld [vmem:[#allocation12 + $0xa20] ss:$48 sps:$4 sm:$0xff]  }
 0x9be   :  { %15107 = vmatpush1.bf16.msra.mxu1 %v20821_v15  ;;  %v20796_v15 = vld [vmem:[#allocation12 + $0xa84] ss:$48 sps:$4 sm:$0xff]  }
 0x9bf   :  { %15108 = vmatprep.subr.bf16.mxu1 %v20829_v55  ;;  %v20881_v55 = vld [vmem:[#allocation12 + $0x428] ss:$48 sps:$4 sm:$0xff]  }
 0x9c0   :  { %15068 = vmatpush1.bf16.msra.mxu0 %v20734_v1  ;;  %v20889_v1 = vld [vmem:[#allocation12 + $0x48c] ss:$48 sps:$4 sm:$0xff]  }
 0x9c1   :  { %15069 = vmatprep.subr.bf16.mxu0 %v20742_v24  ;;  %v20794_v24 = vld [vmem:[#allocation12 + $0xa80] ss:$48 sps:$4 sm:$0xff]  }
 0x9c2   :  { %15109 = vmatpush1.bf16.msra.mxu1 %v20827_v2  ;;  %v20802_v2 = vld [vmem:[#allocation12 + $0xae4] ss:$48 sps:$4 sm:$0xff]  }
 0x9c3   :  { %15110 = vmatprep.subr.bf16.mxu1 %v20835_v17  ;;  %v20887_v17 = vld [vmem:[#allocation12 + $0x488] ss:$48 sps:$4 sm:$0xff]  }
 0x9c4   :  { %15070 = vmatpush1.bf16.msra.mxu0 %v20740_v23  ;;  %v20895_v23 = vld [vmem:[#allocation12 + $0x4ec] ss:$48 sps:$4 sm:$0xff]  }
 0x9c5   :  { %15071 = vmatprep.subr.bf16.mxu0 %v20748_v30  ;;  %v20800_v30 = vld [vmem:[#allocation12 + $0xae0] ss:$48 sps:$4 sm:$0xff]  }
 0x9c6   :  { %15111 = vmatpush1.bf16.msra.mxu1 %v20833_v56  ;;  %v20808_v56 = vld [vmem:[#allocation12 + $0xb44] ss:$48 sps:$4 sm:$0xff]  }
 0x9c7   :  { %15112 = vmatprep.subr.bf16.mxu1 %v20841_v32  ;;  %v20893_v32 = vld [vmem:[#allocation12 + $0x4e8] ss:$48 sps:$4 sm:$0xff]  }
 0x9c8   :  { %15072 = vmatpush1.bf16.msra.mxu0 %v20746_v4  ;;  %v20901_v4 = vld [vmem:[#allocation12 + $0x54c] ss:$48 sps:$4 sm:$0xff]  }
 0x9c9   :  { %15073 = vmatprep.subr.bf16.mxu0 %v20754_v45  ;;  %v20806_v45 = vld [vmem:[#allocation12 + $0xb40] ss:$48 sps:$4 sm:$0xff]  }
 0x9ca   :  { %v12845_v39 = vpop.f32.mrb[96].mxu0  ;;  %15113 = vmatpush1.bf16.msra.mxu1 %v20839_v13  ;;  %v20814_v13 = vld [vmem:[#allocation12 + $0xba4] ss:$48 sps:$4 sm:$0xff]  }
 0x9cb   :  { %v22494_v41 = vadd.f32 %v12845_v39, %v22469_v57  ;;  %v22496_v38 = vpop.f32.mrb[96].mxu1  ;;  %v12847_v33 = vpop.f32.mrb[97].mxu0  ;;  %15114 = vmatprep.subr.bf16.mxu1 %v20847_v52  ;;  %v20851_v57 = vld [vmem:[#allocation12 + $0x248] ss:$48 sps:$4 sm:$0xff]   ;;  %v17353_v39 = vld [vmem:[%s22726_s25 + $0x50] sm:$0xff] }
 0x9cc   :  { %v22499_v49 = vadd.f32 %v12847_v33, %v22474_v42  ;;  %v22501_v50 = vpop.f32.mrb[97].mxu1  ;;  %v12849_v61 = vpop.f32.mrb[98].mxu0  ;;  %15074 = vmatpush1.bf16.msra.mxu0 %v20752_v40  ;;  %v20857_v42 = vld [vmem:[#allocation12 + $0x2a8] ss:$48 sps:$4 sm:$0xff]   ;;  %v20907_v40 = vld [vmem:[#allocation12 + $0x5ac] ss:$48 sps:$4 sm:$0xff]  }
 0x9cd   :  { %v12890_v8 = vpop.f32.mrb[98].mxu1  ;;  %v12850_v21 = vpop.f32.mrb[99].mxu0  ;;  %15075 = vmatprep.subr.bf16.mxu0 %v20760_v31  ;;  %v20899_v52 = vld [vmem:[#allocation12 + $0x548] ss:$48 sps:$4 sm:$0xff]   ;;  %v20812_v31 = vld [vmem:[#allocation12 + $0xba0] ss:$48 sps:$4 sm:$0xff]  }
 0x9ce   :  { %v12891_v29 = vpop.f32.mrb[99].mxu1  ;;  %15115 = vmatpush1.bf16.msra.mxu1 %v20845_v0  ;;  %v20820_v0 = vld [vmem:[#allocation12 + $0x60c] ss:$48 sps:$4 sm:$0xff]   ;;  %v20905_v33 = vld [vmem:[#allocation12 + $0x5a8] ss:$48 sps:$4 sm:$0xff]  }
 0x9cf   :  { %15116 = vmatprep.subr.bf16.mxu1 %v20853_v37  ;;  %v22506_v37 = vpack.c.bf16 %v17353_v39, %v17353_v39  ;;  %v20913_v61 = vld [vmem:[#allocation12 + $0x14] ss:$48 sps:$4 sm:$0xff]   ;;  %v20826_v8 = vld [vmem:[#allocation12 + $0x66c] ss:$48 sps:$4 sm:$0xff]   ;;  %v20911_v21 = vld [vmem:[#allocation12 + $0x10] ss:$48 sps:$4 sm:$0xff]  }
 0x9d0   :  { %15076 = vmatpush1.bf16.msra.mxu0 %v20758_v28  ;;  %v20818_v28 = vld [vmem:[#allocation12 + $0x608] ss:$48 sps:$4 sm:$0xff]  }
 0x9d1   :  { %15077 = vmatprep.subr.bf16.mxu0 %v20766_v48  ;;  %v20919_v48 = vld [vmem:[#allocation12 + $0x74] ss:$48 sps:$4 sm:$0xff]   ;;  %v20824_v29 = vld [vmem:[#allocation12 + $0x668] ss:$48 sps:$4 sm:$0xff]  }
 0x9d2   :  { %15117 = vmatpush1.bf16.msra.mxu1 %v20851_v57  ;;  %v20832_v57 = vld [vmem:[#allocation12 + $0x6cc] ss:$48 sps:$4 sm:$0xff]   ;;  %v20866_v39 = vld [vmem:[#allocation12 + $0x908] ss:$48 sps:$4 sm:$0xff]  }
 0x9d3   :  { %15118 = vmatprep.subr.bf16.mxu1 %v20859_v27  ;;  %v20917_v27 = vld [vmem:[#allocation12 + $0x70] ss:$48 sps:$4 sm:$0xff]  }
 0x9d4   :  { %15078 = vmatpush1.bf16.msra.mxu0 %v20764_v3  ;;  %v20925_v3 = vld [vmem:[#allocation12 + $0xd4] ss:$48 sps:$4 sm:$0xff]  }
 0x9d5   :  { %15079 = vmatprep.subr.bf16.mxu0 %v20772_v25  ;;  %v20830_v25 = vld [vmem:[#allocation12 + $0x6c8] ss:$48 sps:$4 sm:$0xff]  }
 0x9d6   :  { %15119 = vmatpush1.bf16.msra.mxu1 %v20857_v42  ;;  %v20838_v42 = vld [vmem:[#allocation12 + $0x72c] ss:$48 sps:$4 sm:$0xff]  }
 0x9d7   :  { %15120 = vmatprep.subr.bf16.mxu1 %v20865_v20  ;;  %v20923_v20 = vld [vmem:[#allocation12 + $0xd0] ss:$48 sps:$4 sm:$0xff]  }
 0x9d8   :  { %15080 = vmatpush1.bf16.msra.mxu0 %v20770_v54  ;;  %v20931_v54 = vld [vmem:[#allocation12 + $0x134] ss:$48 sps:$4 sm:$0xff]  }
 0x9d9   :  { %15081 = vmatprep.subr.bf16.mxu0 %v20778_v14  ;;  %v20836_v14 = vld [vmem:[#allocation12 + $0x728] ss:$48 sps:$4 sm:$0xff]  }
 0x9da   :  { %15121 = vmatpush1.bf16.msra.mxu1 %v20863_v46  ;;  %v20844_v46 = vld [vmem:[#allocation12 + $0x78c] ss:$48 sps:$4 sm:$0xff]  }
 0x9db   :  { %15122 = vmatprep.subr.bf16.mxu1 %v20871_v26  ;;  %v20929_v26 = vld [vmem:[#allocation12 + $0x130] ss:$48 sps:$4 sm:$0xff]  }
 0x9dc   :  { %15082 = vmatpush1.bf16.msra.mxu0 %v20776_v43  ;;  %v20937_v43 = vld [vmem:[#allocation12 + $0x194] ss:$48 sps:$4 sm:$0xff]  }
 0x9dd   :  { %15083 = vmatprep.subr.bf16.mxu0 %v20784_v19  ;;  %v20842_v19 = vld [vmem:[#allocation12 + $0x788] ss:$48 sps:$4 sm:$0xff]  }
 0x9de   :  { %15123 = vmatpush1.bf16.msra.mxu1 %v20869_v22  ;;  %v20850_v22 = vld [vmem:[#allocation12 + $0x7ec] ss:$48 sps:$4 sm:$0xff]  }
 0x9df   :  { %15124 = vmatprep.subr.bf16.mxu1 %v20877_v10  ;;  %v20935_v10 = vld [vmem:[#allocation12 + $0x190] ss:$48 sps:$4 sm:$0xff]  }
 0x9e0   :  { %15084 = vmatpush1.bf16.msra.mxu0 %v20782_v18  ;;  %v20943_v18 = vld [vmem:[#allocation12 + $0x1f4] ss:$48 sps:$4 sm:$0xff]  }
 0x9e1   :  { %15085 = vmatprep.subr.bf16.mxu0 %v20790_v16  ;;  %v20848_v16 = vld [vmem:[#allocation12 + $0x7e8] ss:$48 sps:$4 sm:$0xff]  }
 0x9e2   :  { %15125 = vmatpush1.bf16.msra.mxu1 %v20875_v62  ;;  %v20856_v62 = vld [vmem:[#allocation12 + $0x84c] ss:$48 sps:$4 sm:$0xff]  }
 0x9e3   :  { %15126 = vmatprep.subr.bf16.mxu1 %v20883_v36 }
 0x9e4   :  { %15086 = vmatpush1.bf16.msra.mxu0 %v20788_v60  ;;  %v20941_v60 = vld [vmem:[#allocation12 + $0x1f0] ss:$48 sps:$4 sm:$0xff]  }
 0x9e5   :  { %15087 = vmatprep.subr.bf16.mxu0 %v20796_v15 }
 0x9e6   :  { %15127 = vmatpush1.bf16.msra.mxu1 %v20881_v55 }
 0x9e7   :  { %15128 = vmatprep.subr.bf16.mxu1 %v20889_v1 }
 0x9e8   :  { %15088 = vmatpush1.bf16.msra.mxu0 %v20794_v24  ;;  %v20949_v24 = vld [vmem:[#allocation12 + $0x254] ss:$48 sps:$4 sm:$0xff]  }
 0x9e9   :  { %15089 = vmatprep.subr.bf16.mxu0 %v20802_v2 }
 0x9ea   :  { %15129 = vmatpush1.bf16.msra.mxu1 %v20887_v17 }
 0x9eb   :  { %15130 = vmatprep.subr.bf16.mxu1 %v20895_v23 }
 0x9ec   :  { %15090 = vmatpush1.bf16.msra.mxu0 %v20800_v30  ;;  %v20854_v30 = vld [vmem:[#allocation12 + $0x848] ss:$48 sps:$4 sm:$0xff]  }
 0x9ed   :  { %15091 = vmatprep.subr.bf16.mxu0 %v20808_v56 }
 0x9ee   :  { %15131 = vmatpush1.bf16.msra.mxu1 %v20893_v32 }
 0x9ef   :  { %15132 = vmatprep.subr.bf16.mxu1 %v20901_v4  ;;  %v20862_v4 = vld [vmem:[#allocation12 + $0x8ac] ss:$48 sps:$4 sm:$0xff]  }
 0x9f0   :  { %15092 = vmatpush1.bf16.msra.mxu0 %v20806_v45 }
 0x9f1   :  { %15093 = vmatprep.subr.bf16.mxu0 %v20814_v13  ;;  %v20955_v13 = vld [vmem:[#allocation12 + $0x2b4] ss:$48 sps:$4 sm:$0xff]  }
 0x9f2   :  { %15133 = vmatpush1.bf16.msra.mxu1 %v20899_v52  ;;  %v20860_v52 = vld [vmem:[#allocation12 + $0x8a8] ss:$48 sps:$4 sm:$0xff]  }
 0x9f3   :  { %15134 = vmatprep.subr.bf16.mxu1 %v20907_v40  ;;  %v20868_v40 = vld [vmem:[#allocation12 + $0x90c] ss:$48 sps:$4 sm:$0xff]  }
 0x9f4   :  { %15094 = vmatpush1.bf16.msra.mxu0 %v20812_v31  ;;  %v20961_v31 = vld [vmem:[#allocation12 + $0x314] ss:$48 sps:$4 sm:$0xff]  }
 0x9f5   :  { %15145 = vmatprep.subr.bf16.mxu0 %v20820_v0  ;;  %v20874_v0 = vld [vmem:[#allocation12 + $0x96c] ss:$48 sps:$4 sm:$0xff]  }
 0x9f6   :  { %15135 = vmatpush1.bf16.msra.mxu1 %v20905_v33  ;;  %v20959_v33 = vld [vmem:[#allocation12 + $0x310] ss:$48 sps:$4 sm:$0xff]  }
 0x9f7   :  { %15096 = vmatmul.mubr.bf16.vlgmr.msra.gmra.mrb[112].mxu0 %v22506_v37  ;;  %15186 = vmatprep.subr.bf16.mxu1 %v20913_v61  ;;  %v20967_v61 = vld [vmem:[#allocation12 + $0x374] ss:$48 sps:$4 sm:$0xff]  }
 0x9f8   :  { %15146 = vmatpush1.bf16.msra.mxu0 %v20818_v28  ;;  %15177 = vmatprep.mubr.bf16.mxu0 %v22485_v9  ;;  %v20872_v28 = vld [vmem:[#allocation12 + $0x968] ss:$48 sps:$4 sm:$0xff]  }
 0x9f9   :  { %15147 = vmatprep.subr.bf16.mxu0 %v20826_v8  ;;  %15137 = vmatmul.mubr.bf16.vlgmr.msra.gmra.mrb[112].mxu1 %v22487_v47  ;;  %v20880_v8 = vld [vmem:[#allocation12 + $0x9cc] ss:$48 sps:$4 sm:$0xff]  }
 0x9fa   :  { %15187 = vmatpush1.bf16.msra.mxu1 %v20911_v21  ;;  %15218 = vmatprep.mubr.bf16.mxu1 %v22463_v44  ;;  %v20965_v21 = vld [vmem:[#allocation12 + $0x370] ss:$48 sps:$4 sm:$0xff]  }
 0x9fb   :  { %15188 = vmatprep.subr.bf16.mxu1 %v20919_v48  ;;  %v20973_v48 = vld [vmem:[#allocation12 + $0x3d4] ss:$48 sps:$4 sm:$0xff]  }
 0x9fc   :  { %15148 = vmatpush1.bf16.msra.mxu0 %v20824_v29  ;;  %v20878_v29 = vld [vmem:[#allocation12 + $0x9c8] ss:$48 sps:$4 sm:$0xff]  }
 0x9fd   :  { %15149 = vmatprep.subr.bf16.mxu0 %v20832_v57  ;;  %v20886_v57 = vld [vmem:[#allocation12 + $0xa2c] ss:$48 sps:$4 sm:$0xff]  }
 0x9fe   :  { %15189 = vmatpush1.bf16.msra.mxu1 %v20917_v27  ;;  %v20971_v27 = vld [vmem:[#allocation12 + $0x3d0] ss:$48 sps:$4 sm:$0xff]  }
 0x9ff   :  { %15190 = vmatprep.subr.bf16.mxu1 %v20925_v3  ;;  %v20979_v3 = vld [vmem:[#allocation12 + $0x434] ss:$48 sps:$4 sm:$0xff]  }
 0xa00   :  { %15150 = vmatpush1.bf16.msra.mxu0 %v20830_v25  ;;  %v20884_v25 = vld [vmem:[#allocation12 + $0xa28] ss:$48 sps:$4 sm:$0xff]  }
 0xa01   :  { %15151 = vmatprep.subr.bf16.mxu0 %v20838_v42  ;;  %v20892_v42 = vld [vmem:[#allocation12 + $0xa8c] ss:$48 sps:$4 sm:$0xff]  }
 0xa02   :  { %15191 = vmatpush1.bf16.msra.mxu1 %v20923_v20  ;;  %v20977_v20 = vld [vmem:[#allocation12 + $0x430] ss:$48 sps:$4 sm:$0xff]  }
 0xa03   :  { %15192 = vmatprep.subr.bf16.mxu1 %v20931_v54  ;;  %v20985_v54 = vld [vmem:[#allocation12 + $0x494] ss:$48 sps:$4 sm:$0xff]  }
 0xa04   :  { %15152 = vmatpush1.bf16.msra.mxu0 %v20836_v14  ;;  %v20890_v14 = vld [vmem:[#allocation12 + $0xa88] ss:$48 sps:$4 sm:$0xff]  }
 0xa05   :  { %15153 = vmatprep.subr.bf16.mxu0 %v20844_v46  ;;  %v20898_v46 = vld [vmem:[#allocation12 + $0xaec] ss:$48 sps:$4 sm:$0xff]  }
 0xa06   :  { %15193 = vmatpush1.bf16.msra.mxu1 %v20929_v26  ;;  %v20983_v26 = vld [vmem:[#allocation12 + $0x490] ss:$48 sps:$4 sm:$0xff]  }
 0xa07   :  { %15194 = vmatprep.subr.bf16.mxu1 %v20937_v43  ;;  %v20991_v43 = vld [vmem:[#allocation12 + $0x4f4] ss:$48 sps:$4 sm:$0xff]  }
 0xa08   :  { %15154 = vmatpush1.bf16.msra.mxu0 %v20842_v19  ;;  %v20896_v19 = vld [vmem:[#allocation12 + $0xae8] ss:$48 sps:$4 sm:$0xff]  }
 0xa09   :  { %15155 = vmatprep.subr.bf16.mxu0 %v20850_v22  ;;  %v20904_v22 = vld [vmem:[#allocation12 + $0xb4c] ss:$48 sps:$4 sm:$0xff]  }
 0xa0a   :  { %v12927_v36 = vpop.f32.mrb[100].mxu0  ;;  %15195 = vmatpush1.bf16.msra.mxu1 %v20935_v10  ;;  %v20989_v10 = vld [vmem:[#allocation12 + $0x4f0] ss:$48 sps:$4 sm:$0xff]  }
 0xa0b   :  { %v22513_v15 = vadd.f32 %v12927_v36, %v22496_v38  ;;  %v22515_v55 = vpop.f32.mrb[100].mxu1  ;;  %v12929_v1 = vpop.f32.mrb[101].mxu0  ;;  %15196 = vmatprep.subr.bf16.mxu1 %v20943_v18  ;;  %v20947_v38 = vld [vmem:[#allocation12 + $0x250] ss:$48 sps:$4 sm:$0xff]   ;;  %v20997_v18 = vld [vmem:[#allocation12 + $0x554] ss:$48 sps:$4 sm:$0xff]  }
 0xa0c   :  { %v22518_v2 = vadd.f32 %v12929_v1, %v22501_v50  ;;  %v22520_v17 = vpop.f32.mrb[101].mxu1  ;;  %v12931_v23 = vpop.f32.mrb[102].mxu0  ;;  %15156 = vmatpush1.bf16.msra.mxu0 %v20848_v16  ;;  %v20953_v50 = vld [vmem:[#allocation12 + $0x2b0] ss:$48 sps:$4 sm:$0xff]   ;;  %v20902_v16 = vld [vmem:[#allocation12 + $0xb48] ss:$48 sps:$4 sm:$0xff]  }
 0xa0d   :  { %v12972_v56 = vpop.f32.mrb[102].mxu1  ;;  %v12932_v32 = vpop.f32.mrb[103].mxu0  ;;  %15157 = vmatprep.subr.bf16.mxu0 %v20856_v62  ;;  %v20910_v62 = vld [vmem:[#allocation12 + $0xbac] ss:$48 sps:$4 sm:$0xff]   ;;  %v20995_v36 = vld [vmem:[#allocation12 + $0x550] ss:$48 sps:$4 sm:$0xff]  }
 0xa0e   :  { %v12973_v45 = vpop.f32.mrb[103].mxu1  ;;  %15197 = vmatpush1.bf16.msra.mxu1 %v20941_v60  ;;  %v21003_v60 = vld [vmem:[#allocation12 + $0x5b4] ss:$48 sps:$4 sm:$0xff]   ;;  %v20908_v1 = vld [vmem:[#allocation12 + $0xba8] ss:$48 sps:$4 sm:$0xff]  }
 0xa0f   :  { %15198 = vmatprep.subr.bf16.mxu1 %v20949_v24  ;;  %v20916_v24 = vld [vmem:[#allocation12 + $0x614] ss:$48 sps:$4 sm:$0xff]   ;;  %v21001_v23 = vld [vmem:[#allocation12 + $0x5b0] ss:$48 sps:$4 sm:$0xff]   ;;  %v21015_v45 = vld [vmem:[#allocation12 + $0x7c] ss:$48 sps:$4 sm:$0xff]  }
 0xa10   :  { %15158 = vmatpush1.bf16.msra.mxu0 %v20854_v30  ;;  %v21009_v30 = vld [vmem:[#allocation12 + $0x1c] ss:$48 sps:$4 sm:$0xff]   ;;  %v20914_v56 = vld [vmem:[#allocation12 + $0x610] ss:$48 sps:$4 sm:$0xff]   ;;  %v20922_v32 = vld [vmem:[#allocation12 + $0x674] ss:$48 sps:$4 sm:$0xff]  }
 0xa11   :  { %15159 = vmatprep.subr.bf16.mxu0 %v20862_v4  ;;  %v21007_v4 = vld [vmem:[#allocation12 + $0x18] ss:$48 sps:$4 sm:$0xff]  }
 0xa12   :  { %15199 = vmatpush1.bf16.msra.mxu1 %v20947_v38  ;;  %v20920_v38 = vld [vmem:[#allocation12 + $0x670] ss:$48 sps:$4 sm:$0xff]  }
 0xa13   :  { %15200 = vmatprep.subr.bf16.mxu1 %v20955_v13  ;;  %v20928_v13 = vld [vmem:[#allocation12 + $0x6d4] ss:$48 sps:$4 sm:$0xff]  }
 0xa14   :  { %15160 = vmatpush1.bf16.msra.mxu0 %v20860_v52  ;;  %v21013_v52 = vld [vmem:[#allocation12 + $0x78] ss:$48 sps:$4 sm:$0xff]  }
 0xa15   :  { %15161 = vmatprep.subr.bf16.mxu0 %v20868_v40  ;;  %v21021_v40 = vld [vmem:[#allocation12 + $0xdc] ss:$48 sps:$4 sm:$0xff]  }
 0xa16   :  { %15201 = vmatpush1.bf16.msra.mxu1 %v20953_v50  ;;  %v20926_v50 = vld [vmem:[#allocation12 + $0x6d0] ss:$48 sps:$4 sm:$0xff]  }
 0xa17   :  { %15202 = vmatprep.subr.bf16.mxu1 %v20961_v31  ;;  %v20934_v31 = vld [vmem:[#allocation12 + $0x734] ss:$48 sps:$4 sm:$0xff]  }
 0xa18   :  { %15162 = vmatpush1.bf16.msra.mxu0 %v20866_v39  ;;  %v21019_v39 = vld [vmem:[#allocation12 + $0xd8] ss:$48 sps:$4 sm:$0xff]  }
 0xa19   :  { %15163 = vmatprep.subr.bf16.mxu0 %v20874_v0  ;;  %v21027_v0 = vld [vmem:[#allocation12 + $0x13c] ss:$48 sps:$4 sm:$0xff]  }
 0xa1a   :  { %15203 = vmatpush1.bf16.msra.mxu1 %v20959_v33  ;;  %v20932_v33 = vld [vmem:[#allocation12 + $0x730] ss:$48 sps:$4 sm:$0xff]  }
 0xa1b   :  { %15204 = vmatprep.subr.bf16.mxu1 %v20967_v61  ;;  %v20940_v61 = vld [vmem:[#allocation12 + $0x794] ss:$48 sps:$4 sm:$0xff]  }
 0xa1c   :  { %15164 = vmatpush1.bf16.msra.mxu0 %v20872_v28  ;;  %v21025_v28 = vld [vmem:[#allocation12 + $0x138] ss:$48 sps:$4 sm:$0xff]  }
 0xa1d   :  { %15165 = vmatprep.subr.bf16.mxu0 %v20880_v8  ;;  %v21033_v8 = vld [vmem:[#allocation12 + $0x19c] ss:$48 sps:$4 sm:$0xff]  }
 0xa1e   :  { %15205 = vmatpush1.bf16.msra.mxu1 %v20965_v21  ;;  %v20938_v21 = vld [vmem:[#allocation12 + $0x790] ss:$48 sps:$4 sm:$0xff]  }
 0xa1f   :  { %15206 = vmatprep.subr.bf16.mxu1 %v20973_v48  ;;  %v20946_v48 = vld [vmem:[#allocation12 + $0x7f4] ss:$48 sps:$4 sm:$0xff]  }
 0xa20   :  { %15166 = vmatpush1.bf16.msra.mxu0 %v20878_v29  ;;  %v21031_v29 = vld [vmem:[#allocation12 + $0x198] ss:$48 sps:$4 sm:$0xff]  }
 0xa21   :  { %15167 = vmatprep.subr.bf16.mxu0 %v20886_v57  ;;  %v21039_v57 = vld [vmem:[#allocation12 + $0x1fc] ss:$48 sps:$4 sm:$0xff]  }
 0xa22   :  { %15207 = vmatpush1.bf16.msra.mxu1 %v20971_v27  ;;  %v20944_v27 = vld [vmem:[#allocation12 + $0x7f0] ss:$48 sps:$4 sm:$0xff]  }
 0xa23   :  { %15208 = vmatprep.subr.bf16.mxu1 %v20979_v3  ;;  %v20952_v3 = vld [vmem:[#allocation12 + $0x854] ss:$48 sps:$4 sm:$0xff]  }
 0xa24   :  { %15168 = vmatpush1.bf16.msra.mxu0 %v20884_v25 }
 0xa25   :  { %15169 = vmatprep.subr.bf16.mxu0 %v20892_v42  ;;  %v21037_v42 = vld [vmem:[#allocation12 + $0x1f8] ss:$48 sps:$4 sm:$0xff]  }
 0xa26   :  { %15209 = vmatpush1.bf16.msra.mxu1 %v20977_v20 }
 0xa27   :  { %15210 = vmatprep.subr.bf16.mxu1 %v20985_v54 }
 0xa28   :  { %15170 = vmatpush1.bf16.msra.mxu0 %v20890_v14 }
 0xa29   :  { %15171 = vmatprep.subr.bf16.mxu0 %v20898_v46  ;;  %v21045_v46 = vld [vmem:[#allocation12 + $0x25c] ss:$48 sps:$4 sm:$0xff]  }
 0xa2a   :  { %15211 = vmatpush1.bf16.msra.mxu1 %v20983_v26 }
 0xa2b   :  { %15212 = vmatprep.subr.bf16.mxu1 %v20991_v43 }
 0xa2c   :  { %15172 = vmatpush1.bf16.msra.mxu0 %v20896_v19 }
 0xa2d   :  { %15173 = vmatprep.subr.bf16.mxu0 %v20904_v22  ;;  %v20950_v22 = vld [vmem:[#allocation12 + $0x850] ss:$48 sps:$4 sm:$0xff]  }
 0xa2e   :  { %15213 = vmatpush1.bf16.msra.mxu1 %v20989_v10 }
 0xa2f   :  { %15214 = vmatprep.subr.bf16.mxu1 %v20997_v18 }
 0xa30   :  { %15174 = vmatpush1.bf16.msra.mxu0 %v20902_v16  ;;  %v20958_v16 = vld [vmem:[#allocation12 + $0x8b4] ss:$48 sps:$4 sm:$0xff]  }
 0xa31   :  { %15175 = vmatprep.subr.bf16.mxu0 %v20910_v62 }
 0xa32   :  { %15215 = vmatpush1.bf16.msra.mxu1 %v20995_v36  ;;  %v21051_v36 = vld [vmem:[#allocation12 + $0x2bc] ss:$48 sps:$4 sm:$0xff]  }
 0xa33   :  { %15216 = vmatprep.subr.bf16.mxu1 %v21003_v60  ;;  %v20956_v60 = vld [vmem:[#allocation12 + $0x8b0] ss:$48 sps:$4 sm:$0xff]  }
 0xa34   :  { %15176 = vmatpush1.bf16.msra.mxu0 %v20908_v1  ;;  %v20964_v1 = vld [vmem:[#allocation12 + $0x914] ss:$48 sps:$4 sm:$0xff]  }
 0xa35   :  { %15227 = vmatprep.subr.bf16.mxu0 %v20916_v24  ;;  %v21057_v24 = vld [vmem:[#allocation12 + $0x31c] ss:$48 sps:$4 sm:$0xff]  }
 0xa36   :  { %15217 = vmatpush1.bf16.msra.mxu1 %v21001_v23  ;;  %v20962_v23 = vld [vmem:[#allocation12 + $0x910] ss:$48 sps:$4 sm:$0xff]  }
 0xa37   :  { %15178 = vmatmul.mubr.bf16.vlgmr.msra.gmra.mrb[116].mxu0 %v22506_v37  ;;  %15268 = vmatprep.subr.bf16.mxu1 %v21009_v30  ;;  %v20970_v30 = vld [vmem:[#allocation12 + $0x974] ss:$48 sps:$4 sm:$0xff]  }
 0xa38   :  { %15228 = vmatpush1.bf16.msra.mxu0 %v20914_v56  ;;  %15259 = vmatprep.mubr.bf16.mxu0 %v22485_v9  ;;  %v21055_v56 = vld [vmem:[#allocation12 + $0x318] ss:$48 sps:$4 sm:$0xff]  }
 0xa39   :  { %15229 = vmatprep.subr.bf16.mxu0 %v20922_v32  ;;  %15219 = vmatmul.mubr.bf16.vlgmr.msra.gmra.mrb[116].mxu1 %v22487_v47  ;;  %v21063_v32 = vld [vmem:[#allocation12 + $0x37c] ss:$48 sps:$4 sm:$0xff]  }
 0xa3a   :  { %15269 = vmatpush1.bf16.msra.mxu1 %v21007_v4  ;;  %15300 = vmatprep.mubr.bf16.mxu1 %v22463_v44  ;;  %v20968_v4 = vld [vmem:[#allocation12 + $0x970] ss:$48 sps:$4 sm:$0xff]  }
 0xa3b   :  { %15270 = vmatprep.subr.bf16.mxu1 %v21015_v45  ;;  %v20976_v45 = vld [vmem:[#allocation12 + $0x9d4] ss:$48 sps:$4 sm:$0xff]  }
 0xa3c   :  { %15230 = vmatpush1.bf16.msra.mxu0 %v20920_v38  ;;  %v21061_v38 = vld [vmem:[#allocation12 + $0x378] ss:$48 sps:$4 sm:$0xff]  }
 0xa3d   :  { %15231 = vmatprep.subr.bf16.mxu0 %v20928_v13  ;;  %v21069_v13 = vld [vmem:[#allocation12 + $0x3dc] ss:$48 sps:$4 sm:$0xff]  }
 0xa3e   :  { %15271 = vmatpush1.bf16.msra.mxu1 %v21013_v52  ;;  %v20974_v52 = vld [vmem:[#allocation12 + $0x9d0] ss:$48 sps:$4 sm:$0xff]  }
 0xa3f   :  { %15272 = vmatprep.subr.bf16.mxu1 %v21021_v40  ;;  %v20982_v40 = vld [vmem:[#allocation12 + $0xa34] ss:$48 sps:$4 sm:$0xff]  }
 0xa40   :  { %15232 = vmatpush1.bf16.msra.mxu0 %v20926_v50  ;;  %v21067_v50 = vld [vmem:[#allocation12 + $0x3d8] ss:$48 sps:$4 sm:$0xff]  }
 0xa41   :  { %15233 = vmatprep.subr.bf16.mxu0 %v20934_v31  ;;  %v21075_v31 = vld [vmem:[#allocation12 + $0x43c] ss:$48 sps:$4 sm:$0xff]  }
 0xa42   :  { %15273 = vmatpush1.bf16.msra.mxu1 %v21019_v39  ;;  %v20980_v39 = vld [vmem:[#allocation12 + $0xa30] ss:$48 sps:$4 sm:$0xff]  }
 0xa43   :  { %15274 = vmatprep.subr.bf16.mxu1 %v21027_v0  ;;  %v20988_v0 = vld [vmem:[#allocation12 + $0xa94] ss:$48 sps:$4 sm:$0xff]  }
 0xa44   :  { %15234 = vmatpush1.bf16.msra.mxu0 %v20932_v33  ;;  %v21073_v33 = vld [vmem:[#allocation12 + $0x438] ss:$48 sps:$4 sm:$0xff]  }
 0xa45   :  { %15235 = vmatprep.subr.bf16.mxu0 %v20940_v61  ;;  %v21081_v61 = vld [vmem:[#allocation12 + $0x49c] ss:$48 sps:$4 sm:$0xff]  }
 0xa46   :  { %15275 = vmatpush1.bf16.msra.mxu1 %v21025_v28  ;;  %v20986_v28 = vld [vmem:[#allocation12 + $0xa90] ss:$48 sps:$4 sm:$0xff]  }
 0xa47   :  { %15276 = vmatprep.subr.bf16.mxu1 %v21033_v8  ;;  %v20994_v8 = vld [vmem:[#allocation12 + $0xaf4] ss:$48 sps:$4 sm:$0xff]  }
 0xa48   :  { %15236 = vmatpush1.bf16.msra.mxu0 %v20938_v21  ;;  %v21079_v21 = vld [vmem:[#allocation12 + $0x498] ss:$48 sps:$4 sm:$0xff]  }
 0xa49   :  { %15237 = vmatprep.subr.bf16.mxu0 %v20946_v48  ;;  %v21087_v48 = vld [vmem:[#allocation12 + $0x4fc] ss:$48 sps:$4 sm:$0xff]  }
 0xa4a   :  { %v13009_v25 = vpop.f32.mrb[104].mxu0  ;;  %15277 = vmatpush1.bf16.msra.mxu1 %v21031_v29  ;;  %v20992_v29 = vld [vmem:[#allocation12 + $0xaf0] ss:$48 sps:$4 sm:$0xff]  }
 0xa4b   :  { %v22527_v20 = vadd.f32 %v13009_v25, %v22515_v55  ;;  %v22529_v54 = vpop.f32.mrb[104].mxu1  ;;  %v13011_v14 = vpop.f32.mrb[105].mxu0  ;;  %15278 = vmatprep.subr.bf16.mxu1 %v21039_v57  ;;  %v21043_v55 = vld [vmem:[#allocation12 + $0x258] ss:$48 sps:$4 sm:$0xff]   ;;  %v21000_v57 = vld [vmem:[#allocation12 + $0xb54] ss:$48 sps:$4 sm:$0xff]  }
 0xa4c   :  { %v22532_v26 = vadd.f32 %v13011_v14, %v22520_v17  ;;  %v22534_v43 = vpop.f32.mrb[105].mxu1  ;;  %v13013_v19 = vpop.f32.mrb[106].mxu0  ;;  %15238 = vmatpush1.bf16.msra.mxu0 %v20944_v27  ;;  %v21049_v17 = vld [vmem:[#allocation12 + $0x2b8] ss:$48 sps:$4 sm:$0xff]   ;;  %v20998_v25 = vld [vmem:[#allocation12 + $0xb50] ss:$48 sps:$4 sm:$0xff]  }
 0xa4d   :  { %v13054_v10 = vpop.f32.mrb[106].mxu1  ;;  %v13014_v18 = vpop.f32.mrb[107].mxu0  ;;  %15239 = vmatprep.subr.bf16.mxu0 %v20952_v3  ;;  %v21085_v27 = vld [vmem:[#allocation12 + $0x4f8] ss:$48 sps:$4 sm:$0xff]   ;;  %v21093_v3 = vld [vmem:[#allocation12 + $0x55c] ss:$48 sps:$4 sm:$0xff]  }
 0xa4e   :  { %v13055_v62 = vpop.f32.mrb[107].mxu1  ;;  %15279 = vmatpush1.bf16.msra.mxu1 %v21037_v42  ;;  %v21006_v42 = vld [vmem:[#allocation12 + $0xbb4] ss:$48 sps:$4 sm:$0xff]   ;;  %v21091_v14 = vld [vmem:[#allocation12 + $0x558] ss:$48 sps:$4 sm:$0xff]  }
 0xa4f   :  { %15280 = vmatprep.subr.bf16.mxu1 %v21045_v46  ;;  %v21099_v46 = vld [vmem:[#allocation12 + $0x5bc] ss:$48 sps:$4 sm:$0xff]   ;;  %v21004_v19 = vld [vmem:[#allocation12 + $0xbb0] ss:$48 sps:$4 sm:$0xff]   ;;  %v21097_v10 = vld [vmem:[#allocation12 + $0x5b8] ss:$48 sps:$4 sm:$0xff]  }
 0xa50   :  { %15240 = vmatpush1.bf16.msra.mxu0 %v20950_v22  ;;  %v21012_v22 = vld [vmem:[#allocation12 + $0x61c] ss:$48 sps:$4 sm:$0xff]   ;;  %v21105_v18 = vld [vmem:[#allocation12 + $0x24] ss:$48 sps:$4 sm:$0xff]  }
 0xa51   :  { %15241 = vmatprep.subr.bf16.mxu0 %v20958_v16  ;;  %v21010_v16 = vld [vmem:[#allocation12 + $0x618] ss:$48 sps:$4 sm:$0xff]   ;;  %v21018_v62 = vld [vmem:[#allocation12 + $0x67c] ss:$48 sps:$4 sm:$0xff]  }
 0xa52   :  { %15281 = vmatpush1.bf16.msra.mxu1 %v21043_v55  ;;  %v21103_v55 = vld [vmem:[#allocation12 + $0x20] ss:$48 sps:$4 sm:$0xff]  }
 0xa53   :  { %15282 = vmatprep.subr.bf16.mxu1 %v21051_v36  ;;  %v21111_v36 = vld [vmem:[#allocation12 + $0x84] ss:$48 sps:$4 sm:$0xff]  }
 0xa54   :  { %15242 = vmatpush1.bf16.msra.mxu0 %v20956_v60  ;;  %v21016_v60 = vld [vmem:[#allocation12 + $0x678] ss:$48 sps:$4 sm:$0xff]  }
 0xa55   :  { %15243 = vmatprep.subr.bf16.mxu0 %v20964_v1  ;;  %v21024_v1 = vld [vmem:[#allocation12 + $0x6dc] ss:$48 sps:$4 sm:$0xff]  }
 0xa56   :  { %15283 = vmatpush1.bf16.msra.mxu1 %v21049_v17  ;;  %v21109_v17 = vld [vmem:[#allocation12 + $0x80] ss:$48 sps:$4 sm:$0xff]  }
 0xa57   :  { %15284 = vmatprep.subr.bf16.mxu1 %v21057_v24  ;;  %v21117_v24 = vld [vmem:[#allocation12 + $0xe4] ss:$48 sps:$4 sm:$0xff]  }
 0xa58   :  { %15244 = vmatpush1.bf16.msra.mxu0 %v20962_v23  ;;  %v21022_v23 = vld [vmem:[#allocation12 + $0x6d8] ss:$48 sps:$4 sm:$0xff]  }
 0xa59   :  { %15245 = vmatprep.subr.bf16.mxu0 %v20970_v30  ;;  %v21030_v30 = vld [vmem:[#allocation12 + $0x73c] ss:$48 sps:$4 sm:$0xff]  }
 0xa5a   :  { %15285 = vmatpush1.bf16.msra.mxu1 %v21055_v56  ;;  %v21115_v56 = vld [vmem:[#allocation12 + $0xe0] ss:$48 sps:$4 sm:$0xff]  }
 0xa5b   :  { %15286 = vmatprep.subr.bf16.mxu1 %v21063_v32  ;;  %v21123_v32 = vld [vmem:[#allocation12 + $0x144] ss:$48 sps:$4 sm:$0xff]  }
 0xa5c   :  { %15246 = vmatpush1.bf16.msra.mxu0 %v20968_v4  ;;  %v21028_v4 = vld [vmem:[#allocation12 + $0x738] ss:$48 sps:$4 sm:$0xff]  }
 0xa5d   :  { %15247 = vmatprep.subr.bf16.mxu0 %v20976_v45  ;;  %v21036_v45 = vld [vmem:[#allocation12 + $0x79c] ss:$48 sps:$4 sm:$0xff]  }
 0xa5e   :  { %15287 = vmatpush1.bf16.msra.mxu1 %v21061_v38  ;;  %v21121_v38 = vld [vmem:[#allocation12 + $0x140] ss:$48 sps:$4 sm:$0xff]  }
 0xa5f   :  { %15288 = vmatprep.subr.bf16.mxu1 %v21069_v13  ;;  %v21129_v13 = vld [vmem:[#allocation12 + $0x1a4] ss:$48 sps:$4 sm:$0xff]  }
 0xa60   :  { %15248 = vmatpush1.bf16.msra.mxu0 %v20974_v52  ;;  %v21034_v52 = vld [vmem:[#allocation12 + $0x798] ss:$48 sps:$4 sm:$0xff]  }
 0xa61   :  { %15249 = vmatprep.subr.bf16.mxu0 %v20982_v40  ;;  %v21042_v40 = vld [vmem:[#allocation12 + $0x7fc] ss:$48 sps:$4 sm:$0xff]  }
 0xa62   :  { %15289 = vmatpush1.bf16.msra.mxu1 %v21067_v50  ;;  %v21127_v50 = vld [vmem:[#allocation12 + $0x1a0] ss:$48 sps:$4 sm:$0xff]  }
 0xa63   :  { %15290 = vmatprep.subr.bf16.mxu1 %v21075_v31  ;;  %v21135_v31 = vld [vmem:[#allocation12 + $0x204] ss:$48 sps:$4 sm:$0xff]  }
 0xa64   :  { %15250 = vmatpush1.bf16.msra.mxu0 %v20980_v39  ;;  %v21040_v39 = vld [vmem:[#allocation12 + $0x7f8] ss:$48 sps:$4 sm:$0xff]  }
 0xa65   :  { %15251 = vmatprep.subr.bf16.mxu0 %v20988_v0  ;;  %v21048_v0 = vld [vmem:[#allocation12 + $0x85c] ss:$48 sps:$4 sm:$0xff]  }
 0xa66   :  { %15291 = vmatpush1.bf16.msra.mxu1 %v21073_v33 }
 0xa67   :  { %15292 = vmatprep.subr.bf16.mxu1 %v21081_v61  ;;  %v21133_v61 = vld [vmem:[#allocation12 + $0x200] ss:$48 sps:$4 sm:$0xff]  }
 0xa68   :  { %15252 = vmatpush1.bf16.msra.mxu0 %v20986_v28 }
 0xa69   :  { %15253 = vmatprep.subr.bf16.mxu0 %v20994_v8 }
 0xa6a   :  { %15293 = vmatpush1.bf16.msra.mxu1 %v21079_v21  ;;  %v21141_v21 = vld [vmem:[#allocation12 + $0x264] ss:$48 sps:$4 sm:$0xff]  }
 0xa6b   :  { %15294 = vmatprep.subr.bf16.mxu1 %v21087_v48 }
 0xa6c   :  { %15254 = vmatpush1.bf16.msra.mxu0 %v20992_v29 }
 0xa6d   :  { %15255 = vmatprep.subr.bf16.mxu0 %v21000_v57  ;;  %v21046_v57 = vld [vmem:[#allocation12 + $0x858] ss:$48 sps:$4 sm:$0xff]  }
 0xa6e   :  { %15295 = vmatpush1.bf16.msra.mxu1 %v21085_v27 }
 0xa6f   :  { %15296 = vmatprep.subr.bf16.mxu1 %v21093_v3 }
 0xa70   :  { %15256 = vmatpush1.bf16.msra.mxu0 %v20998_v25  ;;  %v21054_v25 = vld [vmem:[#allocation12 + $0x8bc] ss:$48 sps:$4 sm:$0xff]  }
 0xa71   :  { %15257 = vmatprep.subr.bf16.mxu0 %v21006_v42 }
 0xa72   :  { %15297 = vmatpush1.bf16.msra.mxu1 %v21091_v14 }
 0xa73   :  { %15298 = vmatprep.subr.bf16.mxu1 %v21099_v46 }
 0xa74   :  { %15258 = vmatpush1.bf16.msra.mxu0 %v21004_v19  ;;  %v21147_v19 = vld [vmem:[#allocation12 + $0x2c4] ss:$48 sps:$4 sm:$0xff]  }
 0xa75   :  { %15309 = vmatprep.subr.bf16.mxu0 %v21012_v22  ;;  %v21052_v22 = vld [vmem:[#allocation12 + $0x8b8] ss:$48 sps:$4 sm:$0xff]  }
 0xa76   :  { %15299 = vmatpush1.bf16.msra.mxu1 %v21097_v10  ;;  %v21145_v10 = vld [vmem:[#allocation12 + $0x2c0] ss:$48 sps:$4 sm:$0xff]  }
 0xa77   :  { %15260 = vmatmul.mubr.bf16.vlgmr.msra.gmra.mrb[120].mxu0 %v22506_v37  ;;  %15350 = vmatprep.subr.bf16.mxu1 %v21105_v18  ;;  %v21153_v18 = vld [vmem:[#allocation12 + $0x324] ss:$48 sps:$4 sm:$0xff]  }
 0xa78   :  { %15310 = vmatpush1.bf16.msra.mxu0 %v21010_v16  ;;  %15341 = vmatprep.mubr.bf16.mxu0 %v22485_v9  ;;  %v21058_v16 = vld [vmem:[#allocation12 + $0x918] ss:$48 sps:$4 sm:$0xff]  }
 0xa79   :  { %15311 = vmatprep.subr.bf16.mxu0 %v21018_v62  ;;  %15301 = vmatmul.mubr.bf16.vlgmr.msra.gmra.mrb[120].mxu1 %v22487_v47  ;;  %v21066_v62 = vld [vmem:[#allocation12 + $0x97c] ss:$48 sps:$4 sm:$0xff]  }
 0xa7a   :  { %15351 = vmatpush1.bf16.msra.mxu1 %v21103_v55  ;;  %15382 = vmatprep.mubr.bf16.mxu1 %v22463_v44  ;;  %v21151_v55 = vld [vmem:[#allocation12 + $0x320] ss:$48 sps:$4 sm:$0xff]  }
 0xa7b   :  { %15352 = vmatprep.subr.bf16.mxu1 %v21111_v36  ;;  %v21159_v36 = vld [vmem:[#allocation12 + $0x384] ss:$48 sps:$4 sm:$0xff]  }
 0xa7c   :  { %15312 = vmatpush1.bf16.msra.mxu0 %v21016_v60  ;;  %v21064_v60 = vld [vmem:[#allocation12 + $0x978] ss:$48 sps:$4 sm:$0xff]  }
 0xa7d   :  { %15313 = vmatprep.subr.bf16.mxu0 %v21024_v1  ;;  %v21072_v1 = vld [vmem:[#allocation12 + $0x9dc] ss:$48 sps:$4 sm:$0xff]  }
 0xa7e   :  { %15353 = vmatpush1.bf16.msra.mxu1 %v21109_v17  ;;  %v21157_v17 = vld [vmem:[#allocation12 + $0x380] ss:$48 sps:$4 sm:$0xff]  }
 0xa7f   :  { %15354 = vmatprep.subr.bf16.mxu1 %v21117_v24  ;;  %v21165_v24 = vld [vmem:[#allocation12 + $0x3e4] ss:$48 sps:$4 sm:$0xff]  }
 0xa80   :  { %15314 = vmatpush1.bf16.msra.mxu0 %v21022_v23  ;;  %v21070_v23 = vld [vmem:[#allocation12 + $0x9d8] ss:$48 sps:$4 sm:$0xff]  }
 0xa81   :  { %15315 = vmatprep.subr.bf16.mxu0 %v21030_v30  ;;  %v21078_v30 = vld [vmem:[#allocation12 + $0xa3c] ss:$48 sps:$4 sm:$0xff]  }
 0xa82   :  { %15355 = vmatpush1.bf16.msra.mxu1 %v21115_v56  ;;  %v21163_v56 = vld [vmem:[#allocation12 + $0x3e0] ss:$48 sps:$4 sm:$0xff]  }
 0xa83   :  { %15356 = vmatprep.subr.bf16.mxu1 %v21123_v32  ;;  %v21171_v32 = vld [vmem:[#allocation12 + $0x444] ss:$48 sps:$4 sm:$0xff]  }
 0xa84   :  { %15316 = vmatpush1.bf16.msra.mxu0 %v21028_v4  ;;  %v21076_v4 = vld [vmem:[#allocation12 + $0xa38] ss:$48 sps:$4 sm:$0xff]  }
 0xa85   :  { %15317 = vmatprep.subr.bf16.mxu0 %v21036_v45  ;;  %v21084_v45 = vld [vmem:[#allocation12 + $0xa9c] ss:$48 sps:$4 sm:$0xff]  }
 0xa86   :  { %15357 = vmatpush1.bf16.msra.mxu1 %v21121_v38  ;;  %v21169_v38 = vld [vmem:[#allocation12 + $0x440] ss:$48 sps:$4 sm:$0xff]  }
 0xa87   :  { %15358 = vmatprep.subr.bf16.mxu1 %v21129_v13  ;;  %v21177_v13 = vld [vmem:[#allocation12 + $0x4a4] ss:$48 sps:$4 sm:$0xff]  }
 0xa88   :  { %15318 = vmatpush1.bf16.msra.mxu0 %v21034_v52  ;;  %v21082_v52 = vld [vmem:[#allocation12 + $0xa98] ss:$48 sps:$4 sm:$0xff]  }
 0xa89   :  { %15319 = vmatprep.subr.bf16.mxu0 %v21042_v40  ;;  %v21090_v40 = vld [vmem:[#allocation12 + $0xafc] ss:$48 sps:$4 sm:$0xff]  }
 0xa8a   :  { %v13091_v33 = vpop.f32.mrb[108].mxu0  ;;  %15359 = vmatpush1.bf16.msra.mxu1 %v21127_v50  ;;  %v21175_v50 = vld [vmem:[#allocation12 + $0x4a0] ss:$48 sps:$4 sm:$0xff]  }
 0xa8b   :  { %v22541_v28 = vadd.f32 %v13091_v33, %v22529_v54  ;;  %v13093_v8 = vpop.f32.mrb[109].mxu0  ;;  %15360 = vmatprep.subr.bf16.mxu1 %v21135_v31  ;;  %v21139_v54 = vld [vmem:[#allocation12 + $0x260] ss:$48 sps:$4 sm:$0xff]   ;;  %v21183_v31 = vld [vmem:[#allocation12 + $0x504] ss:$48 sps:$4 sm:$0xff]  }
 0xa8c   :  { %v22544_v48 = vadd.f32 %v13093_v8, %v22534_v43  ;;  %v13095_v29 = vpop.f32.mrb[110].mxu0  ;;  %15320 = vmatpush1.bf16.msra.mxu0 %v21040_v39  ;;  %v22546_v27 = vpop.f32.mrb[108].mxu1  ;;  %v21060_v43 = vld [vmem:[#allocation12 + $0x91c] ss:$48 sps:$4 sm:$0xff]   ;;  %v21088_v39 = vld [vmem:[#allocation12 + $0xaf8] ss:$48 sps:$4 sm:$0xff]  }
 0xa8d   :  { %v13096_v3 = vpop.f32.mrb[111].mxu0  ;;  %15321 = vmatprep.subr.bf16.mxu0 %v21048_v0  ;;  %v22548_v42 = vpop.f32.mrb[109].mxu1  ;;  %v21096_v0 = vld [vmem:[#allocation12 + $0xb5c] ss:$48 sps:$4 sm:$0xff]   ;;  %v21181_v33 = vld [vmem:[#allocation12 + $0x500] ss:$48 sps:$4 sm:$0xff]  }
 0xa8e   :  { %15361 = vmatpush1.bf16.msra.mxu1 %v21133_v61  ;;  %v15060_v14 = vpop.f32.mrb[110].mxu1  ;;  %v21189_v61 = vld [vmem:[#allocation12 + $0x564] ss:$48 sps:$4 sm:$0xff]   ;;  %v21094_v8 = vld [vmem:[#allocation12 + $0xb58] ss:$48 sps:$4 sm:$0xff]  }
 0xa8f   :  { %v15061_v46 = vpop.f32.mrb[111].mxu1  ;;  %15362 = vmatprep.subr.bf16.mxu1 %v21141_v21  ;;  %v21102_v21 = vld [vmem:[#allocation12 + $0xbbc] ss:$48 sps:$4 sm:$0xff]   ;;  %v21187_v29 = vld [vmem:[#allocation12 + $0x560] ss:$48 sps:$4 sm:$0xff]  }
 0xa90   :  { %15322 = vmatpush1.bf16.msra.mxu0 %v21046_v57  ;;  %v21195_v57 = vld [vmem:[#allocation12 + $0x5c4] ss:$48 sps:$4 sm:$0xff]   ;;  %v21100_v3 = vld [vmem:[#allocation12 + $0xbb8] ss:$48 sps:$4 sm:$0xff]   ;;  %v21193_v14 = vld [vmem:[#allocation12 + $0x5c0] ss:$48 sps:$4 sm:$0xff]  }
 0xa91   :  { %15323 = vmatprep.subr.bf16.mxu0 %v21054_v25  ;;  %v21108_v25 = vld [vmem:[#allocation12 + $0x624] ss:$48 sps:$4 sm:$0xff]   ;;  %v21106_v46 = vld [vmem:[#allocation12 + $0x620] ss:$48 sps:$4 sm:$0xff]  }
 0xa92   :  { %15363 = vmatpush1.bf16.msra.mxu1 %v21139_v54  ;;  %v21201_v54 = vld [vmem:[#allocation12 + $0x2c] ss:$48 sps:$4 sm:$0xff]  }
 0xa93   :  { %15364 = vmatprep.subr.bf16.mxu1 %v21147_v19  ;;  %v21114_v19 = vld [vmem:[#allocation12 + $0x684] ss:$48 sps:$4 sm:$0xff]  }
 0xa94   :  { %15324 = vmatpush1.bf16.msra.mxu0 %v21052_v22  ;;  %v21199_v22 = vld [vmem:[#allocation12 + $0x28] ss:$48 sps:$4 sm:$0xff]  }
 0xa95   :  { %15325 = vmatprep.subr.bf16.mxu0 %v21060_v43  ;;  %v21207_v43 = vld [vmem:[#allocation12 + $0x8c] ss:$48 sps:$4 sm:$0xff]  }
 0xa96   :  { %15365 = vmatpush1.bf16.msra.mxu1 %v21145_v10  ;;  %v21112_v10 = vld [vmem:[#allocation12 + $0x680] ss:$48 sps:$4 sm:$0xff]  }
 0xa97   :  { %15366 = vmatprep.subr.bf16.mxu1 %v21153_v18  ;;  %v21120_v18 = vld [vmem:[#allocation12 + $0x6e4] ss:$48 sps:$4 sm:$0xff]  }
 0xa98   :  { %15326 = vmatpush1.bf16.msra.mxu0 %v21058_v16  ;;  %v21205_v16 = vld [vmem:[#allocation12 + $0x88] ss:$48 sps:$4 sm:$0xff]  }
 0xa99   :  { %15327 = vmatprep.subr.bf16.mxu0 %v21066_v62  ;;  %v21213_v62 = vld [vmem:[#allocation12 + $0xec] ss:$48 sps:$4 sm:$0xff]  }
 0xa9a   :  { %15367 = vmatpush1.bf16.msra.mxu1 %v21151_v55  ;;  %v21118_v55 = vld [vmem:[#allocation12 + $0x6e0] ss:$48 sps:$4 sm:$0xff]  }
 0xa9b   :  { %15368 = vmatprep.subr.bf16.mxu1 %v21159_v36  ;;  %v21126_v36 = vld [vmem:[#allocation12 + $0x744] ss:$48 sps:$4 sm:$0xff]  }
 0xa9c   :  { %15328 = vmatpush1.bf16.msra.mxu0 %v21064_v60  ;;  %v21211_v60 = vld [vmem:[#allocation12 + $0xe8] ss:$48 sps:$4 sm:$0xff]  }
 0xa9d   :  { %15329 = vmatprep.subr.bf16.mxu0 %v21072_v1  ;;  %v21219_v1 = vld [vmem:[#allocation12 + $0x14c] ss:$48 sps:$4 sm:$0xff]  }
 0xa9e   :  { %15369 = vmatpush1.bf16.msra.mxu1 %v21157_v17  ;;  %v21124_v17 = vld [vmem:[#allocation12 + $0x740] ss:$48 sps:$4 sm:$0xff]  }
 0xa9f   :  { %15370 = vmatprep.subr.bf16.mxu1 %v21165_v24  ;;  %v21132_v24 = vld [vmem:[#allocation12 + $0x7a4] ss:$48 sps:$4 sm:$0xff]  }
 0xaa0   :  { %15330 = vmatpush1.bf16.msra.mxu0 %v21070_v23  ;;  %v21217_v23 = vld [vmem:[#allocation12 + $0x148] ss:$48 sps:$4 sm:$0xff]  }
 0xaa1   :  { %15331 = vmatprep.subr.bf16.mxu0 %v21078_v30  ;;  %v21225_v30 = vld [vmem:[#allocation12 + $0x1ac] ss:$48 sps:$4 sm:$0xff]  }
 0xaa2   :  { %15371 = vmatpush1.bf16.msra.mxu1 %v21163_v56  ;;  %v21138_v56 = vld [vmem:[#allocation12 + $0x804] ss:$48 sps:$4 sm:$0xff]  }
 0xaa3   :  { %15372 = vmatprep.subr.bf16.mxu1 %v21171_v32  ;;  %v21223_v32 = vld [vmem:[#allocation12 + $0x1a8] ss:$48 sps:$4 sm:$0xff]  }
 0xaa4   :  { %15332 = vmatpush1.bf16.msra.mxu0 %v21076_v4  ;;  %v21231_v4 = vld [vmem:[#allocation12 + $0x20c] ss:$48 sps:$4 sm:$0xff]  }
 0xaa5   :  { %15333 = vmatprep.subr.bf16.mxu0 %v21084_v45  ;;  %v21136_v45 = vld [vmem:[#allocation12 + $0x800] ss:$48 sps:$4 sm:$0xff]  }
 0xaa6   :  { %15373 = vmatpush1.bf16.msra.mxu1 %v21169_v38  ;;  %v21144_v38 = vld [vmem:[#allocation12 + $0x864] ss:$48 sps:$4 sm:$0xff]  }
 0xaa7   :  { %15374 = vmatprep.subr.bf16.mxu1 %v21177_v13 }
 0xaa8   :  { %15334 = vmatpush1.bf16.msra.mxu0 %v21082_v52  ;;  %v21229_v52 = vld [vmem:[#allocation12 + $0x208] ss:$48 sps:$4 sm:$0xff]  }
 0xaa9   :  { %15335 = vmatprep.subr.bf16.mxu0 %v21090_v40 }
 0xaaa   :  { %15375 = vmatpush1.bf16.msra.mxu1 %v21175_v50 }
 0xaab   :  { %15376 = vmatprep.subr.bf16.mxu1 %v21183_v31  ;;  %v21237_v31 = vld [vmem:[#allocation12 + $0x26c] ss:$48 sps:$4 sm:$0xff]  }
 0xaac   :  { %15336 = vmatpush1.bf16.msra.mxu0 %v21088_v39 }
 0xaad   :  { %15337 = vmatprep.subr.bf16.mxu0 %v21096_v0 }
 0xaae   :  { %15377 = vmatpush1.bf16.msra.mxu1 %v21181_v33  ;;  %v21142_v33 = vld [vmem:[#allocation12 + $0x860] ss:$48 sps:$4 sm:$0xff]  }
 0xaaf   :  { %15378 = vmatprep.subr.bf16.mxu1 %v21189_v61 }
 0xab0   :  { %15338 = vmatpush1.bf16.msra.mxu0 %v21094_v8 }
 0xab1   :  { %15339 = vmatprep.subr.bf16.mxu0 %v21102_v21 }
 0xab2   :  { %15379 = vmatpush1.bf16.msra.mxu1 %v21187_v29  ;;  %v21150_v29 = vld [vmem:[#allocation12 + $0x8c4] ss:$48 sps:$4 sm:$0xff]  }
 0xab3   :  { %15380 = vmatprep.subr.bf16.mxu1 %v21195_v57 }
 0xab4   :  { %15340 = vmatpush1.bf16.msra.mxu0 %v21100_v3 }
 0xab5   :  { %15391 = vmatprep.subr.bf16.mxu0 %v21108_v25  ;;  %v21235_v25 = vld [vmem:[#allocation12 + $0x268] ss:$48 sps:$4 sm:$0xff]  }
 0xab6   :  { %15381 = vmatpush1.bf16.msra.mxu1 %v21193_v14  ;;  %v21243_v14 = vld [vmem:[#allocation12 + $0x2cc] ss:$48 sps:$4 sm:$0xff]  }
 0xab7   :  { %15342 = vmatmul.mubr.bf16.vlgmr.msra.gmra.mrb[124].mxu0 %v22506_v37  ;;  %15432 = vmatprep.subr.bf16.mxu1 %v21201_v54  ;;  %v21148_v54 = vld [vmem:[#allocation12 + $0x8c0] ss:$48 sps:$4 sm:$0xff]  }
 0xab8   :  { %15392 = vmatpush1.bf16.msra.mxu0 %v21106_v46  ;;  %15423 = vmatprep.mubr.bf16.mxu0 %v22485_v9  ;;  %v21156_v46 = vld [vmem:[#allocation12 + $0x924] ss:$48 sps:$4 sm:$0xff]  }
 0xab9   :  { %15393 = vmatprep.subr.bf16.mxu0 %v21114_v19  ;;  %15383 = vmatmul.mubr.bf16.vlgmr.msra.gmra.mrb[124].mxu1 %v22487_v47  ;;  %v21249_v19 = vld [vmem:[#allocation12 + $0x32c] ss:$48 sps:$4 sm:$0xff]  }
 0xaba   :  { %15433 = vmatpush1.bf16.msra.mxu1 %v21199_v22  ;;  %15464 = vmatprep.mubr.bf16.mxu1 %v22463_v44  ;;  %v21130_v44 = vld [vmem:[#allocation12 + $0x7a0] ss:$48 sps:$4 sm:$0xff]  }
 0xabb   :  { %15434 = vmatprep.subr.bf16.mxu1 %v21207_v43  ;;  %v21154_v22 = vld [vmem:[#allocation12 + $0x920] ss:$48 sps:$4 sm:$0xff]   ;;  %v21162_v43 = vld [vmem:[#allocation12 + $0x984] ss:$48 sps:$4 sm:$0xff]  }
 0xabc   :  { %15394 = vmatpush1.bf16.msra.mxu0 %v21112_v10  ;;  %v21255_v10 = vld [vmem:[#allocation12 + $0x38c] ss:$48 sps:$4 sm:$0xff]  }
 0xabd   :  { %15395 = vmatprep.subr.bf16.mxu0 %v21120_v18  ;;  %v21160_v18 = vld [vmem:[#allocation12 + $0x980] ss:$48 sps:$4 sm:$0xff]  }
 0xabe   :  { %15435 = vmatpush1.bf16.msra.mxu1 %v21205_v16  ;;  %v21168_v16 = vld [vmem:[#allocation12 + $0x9e4] ss:$48 sps:$4 sm:$0xff]  }
 0xabf   :  { %15436 = vmatprep.subr.bf16.mxu1 %v21213_v62  ;;  %v21253_v62 = vld [vmem:[#allocation12 + $0x388] ss:$48 sps:$4 sm:$0xff]  }
 0xac0   :  { %15396 = vmatpush1.bf16.msra.mxu0 %v21118_v55  ;;  %v21261_v55 = vld [vmem:[#allocation12 + $0x3ec] ss:$48 sps:$4 sm:$0xff]  }
 0xac1   :  { %15397 = vmatprep.subr.bf16.mxu0 %v21126_v36  ;;  %v21166_v36 = vld [vmem:[#allocation12 + $0x9e0] ss:$48 sps:$4 sm:$0xff]  }
 0xac2   :  { %15437 = vmatpush1.bf16.msra.mxu1 %v21211_v60  ;;  %v21174_v60 = vld [vmem:[#allocation12 + $0xa44] ss:$48 sps:$4 sm:$0xff]  }
 0xac3   :  { %15438 = vmatprep.subr.bf16.mxu1 %v21219_v1  ;;  %v21259_v1 = vld [vmem:[#allocation12 + $0x3e8] ss:$48 sps:$4 sm:$0xff]  }
 0xac4   :  { %15398 = vmatpush1.bf16.msra.mxu0 %v21124_v17  ;;  %v21267_v17 = vld [vmem:[#allocation12 + $0x44c] ss:$48 sps:$4 sm:$0xff]  }
 0xac5   :  { %15399 = vmatprep.subr.bf16.mxu0 %v21132_v24  ;;  %v21172_v24 = vld [vmem:[#allocation12 + $0xa40] ss:$48 sps:$4 sm:$0xff]  }
 0xac6   :  { %15439 = vmatpush1.bf16.msra.mxu1 %v21217_v23  ;;  %v21180_v23 = vld [vmem:[#allocation12 + $0xaa4] ss:$48 sps:$4 sm:$0xff]  }
 0xac7   :  { %15440 = vmatprep.subr.bf16.mxu1 %v21225_v30  ;;  %v21265_v30 = vld [vmem:[#allocation12 + $0x448] ss:$48 sps:$4 sm:$0xff]  }
 0xac8   :  { %15400 = vmatpush1.bf16.msra.mxu0 %v21130_v44  ;;  %v21273_v44 = vld [vmem:[#allocation12 + $0x4ac] ss:$48 sps:$4 sm:$0xff]  }
 0xac9   :  { %15401 = vmatprep.subr.bf16.mxu0 %v21138_v56  ;;  %v21178_v56 = vld [vmem:[#allocation12 + $0xaa0] ss:$48 sps:$4 sm:$0xff]  }
 0xaca   :  { %v15097_v13 = vpop.f32.mrb[112].mxu0  ;;  %15441 = vmatpush1.bf16.msra.mxu1 %v21223_v32  ;;  %v21186_v32 = vld [vmem:[#allocation12 + $0xb04] ss:$48 sps:$4 sm:$0xff]  }
 0xacb   :  { %v15098_v40 = vadd.f32 %v15097_v13, %v22546_v27  ;;  %v15099_v50 = vpop.f32.mrb[113].mxu0  ;;  %15442 = vmatprep.subr.bf16.mxu1 %v21231_v4  ;;  %v21271_v4 = vld [vmem:[#allocation12 + $0x4a8] ss:$48 sps:$4 sm:$0xff]   ;;  %v21192_v13 = vld [vmem:[#allocation12 + $0xb64] ss:$48 sps:$4 sm:$0xff]  }
 0xacc   :  { %v15100_v39 = vadd.f32 %v15099_v50, %v22548_v42  ;;  %v15101_v0 = vpop.f32.mrb[114].mxu0  ;;  %15402 = vmatpush1.bf16.msra.mxu0 %v21136_v45  ;;  %v22556_v61 = vpop.f32.mrb[112].mxu1  ;;  %v21279_v45 = vld [vmem:[#allocation12 + $0x50c] ss:$48 sps:$4 sm:$0xff]   ;;  %v21190_v50 = vld [vmem:[#allocation12 + $0xb60] ss:$48 sps:$4 sm:$0xff]  }
 0xacd   :  { %v22559_v8 = vadd.f32 %v15098_v40, %v22453_v59  ;;  %v15102_v21 = vpop.f32.mrb[115].mxu0  ;;  %15403 = vmatprep.subr.bf16.mxu0 %v21144_v38  ;;  %v22561_v57 = vpop.f32.mrb[113].mxu1  ;;  %v21241_v59 = vld [vmem:[#allocation12 + $0x2c8] ss:$48 sps:$4 sm:$0xff]   ;;  %v21184_v38 = vld [vmem:[#allocation12 + $0xb00] ss:$48 sps:$4 sm:$0xff]  }
 0xace   :  { %v22564_v27 = vadd.f32 %v15100_v39, %v22458_v34  ;;  %15443 = vmatpush1.bf16.msra.mxu1 %v21229_v52  ;;  %v15142_v3 = vpop.f32.mrb[114].mxu1  ;;  %v21247_v34 = vld [vmem:[#allocation12 + $0x328] ss:$48 sps:$4 sm:$0xff]   ;;  %v21285_v40 = vld [vmem:[#allocation12 + $0x56c] ss:$48 sps:$4 sm:$0xff]  }
 0xacf   :  { %v15143_v42 = vpop.f32.mrb[115].mxu1  ;;  %15444 = vmatprep.subr.bf16.mxu1 %v21237_v31  ;;  %v21277_v52 = vld [vmem:[#allocation12 + $0x508] ss:$48 sps:$4 sm:$0xff]   ;;  %v21198_v31 = vld [vmem:[#allocation12 + $0xbc4] ss:$48 sps:$4 sm:$0xff]  }
 0xad0   :  { %15404 = vmatpush1.bf16.msra.mxu0 %v21142_v33  ;;  %v21283_v39 = vld [vmem:[#allocation12 + $0x568] ss:$48 sps:$4 sm:$0xff]   ;;  %v21291_v0 = vld [vmem:[#allocation12 + $0x5cc] ss:$48 sps:$4 sm:$0xff]   ;;  %v21196_v33 = vld [vmem:[#allocation12 + $0xbc0] ss:$48 sps:$4 sm:$0xff]  }
 0xad1   :  { %15405 = vmatprep.subr.bf16.mxu0 %v21150_v29  ;;  %v21204_v21 = vld [vmem:[#allocation12 + $0x62c] ss:$48 sps:$4 sm:$0xff]   ;;  %v21289_v29 = vld [vmem:[#allocation12 + $0x5c8] ss:$48 sps:$4 sm:$0xff]  }
 0xad2   :  { %15445 = vmatpush1.bf16.msra.mxu1 %v21235_v25  ;;  %v21202_v3 = vld [vmem:[#allocation12 + $0x628] ss:$48 sps:$4 sm:$0xff]   ;;  %v21210_v25 = vld [vmem:[#allocation12 + $0x68c] ss:$48 sps:$4 sm:$0xff]  }
 0xad3   :  { %15446 = vmatprep.subr.bf16.mxu1 %v21243_v14  ;;  %v21208_v42 = vld [vmem:[#allocation12 + $0x688] ss:$48 sps:$4 sm:$0xff]   ;;  %v21216_v14 = vld [vmem:[#allocation12 + $0x6ec] ss:$48 sps:$4 sm:$0xff]  }
 0xad4   :  { %15406 = vmatpush1.bf16.msra.mxu0 %v21148_v54  ;;  %v21214_v54 = vld [vmem:[#allocation12 + $0x6e8] ss:$48 sps:$4 sm:$0xff]  }
 0xad5   :  { %15407 = vmatprep.subr.bf16.mxu0 %v21156_v46  ;;  %v21222_v46 = vld [vmem:[#allocation12 + $0x74c] ss:$48 sps:$4 sm:$0xff]  }
 0xad6   :  { %15447 = vmatpush1.bf16.msra.mxu1 %v21241_v59  ;;  %v21220_v59 = vld [vmem:[#allocation12 + $0x748] ss:$48 sps:$4 sm:$0xff]  }
 0xad7   :  { %15448 = vmatprep.subr.bf16.mxu1 %v21249_v19  ;;  %v21228_v19 = vld [vmem:[#allocation12 + $0x7ac] ss:$48 sps:$4 sm:$0xff]  }
 0xad8   :  { %15408 = vmatpush1.bf16.msra.mxu0 %v21154_v22  ;;  %v21226_v22 = vld [vmem:[#allocation12 + $0x7a8] ss:$48 sps:$4 sm:$0xff]  }
 0xad9   :  { %15409 = vmatprep.subr.bf16.mxu0 %v21162_v43  ;;  %v21234_v43 = vld [vmem:[#allocation12 + $0x80c] ss:$48 sps:$4 sm:$0xff]  }
 0xada   :  { %15449 = vmatpush1.bf16.msra.mxu1 %v21247_v34  ;;  %v21232_v34 = vld [vmem:[#allocation12 + $0x808] ss:$48 sps:$4 sm:$0xff]  }
 0xadb   :  { %15450 = vmatprep.subr.bf16.mxu1 %v21255_v10 }
 0xadc   :  { %15410 = vmatpush1.bf16.msra.mxu0 %v21160_v18 }
 0xadd   :  { %15411 = vmatprep.subr.bf16.mxu0 %v21168_v16 }
 0xade   :  { %15451 = vmatpush1.bf16.msra.mxu1 %v21253_v62 }
 0xadf   :  { %15452 = vmatprep.subr.bf16.mxu1 %v21261_v55  ;;  %v21238_v55 = vld [vmem:[#allocation12 + $0x868] ss:$48 sps:$4 sm:$0xff]  }
 0xae0   :  { %15412 = vmatpush1.bf16.msra.mxu0 %v21166_v36 }
 0xae1   :  { %15413 = vmatprep.subr.bf16.mxu0 %v21174_v60 }
 0xae2   :  { %15453 = vmatpush1.bf16.msra.mxu1 %v21259_v1 }
 0xae3   :  { %15454 = vmatprep.subr.bf16.mxu1 %v21267_v17  ;;  %v21246_v17 = vld [vmem:[#allocation12 + $0x8cc] ss:$48 sps:$4 sm:$0xff]  }
 0xae4   :  { %15414 = vmatpush1.bf16.msra.mxu0 %v21172_v24 }
 0xae5   :  { %15415 = vmatprep.subr.bf16.mxu0 %v21180_v23 }
 0xae6   :  { %15455 = vmatpush1.bf16.msra.mxu1 %v21265_v30 }
 0xae7   :  { %15456 = vmatprep.subr.bf16.mxu1 %v21273_v44 }
 0xae8   :  { %15416 = vmatpush1.bf16.msra.mxu0 %v21178_v56  ;;  %v21250_v56 = vld [vmem:[#allocation12 + $0x928] ss:$48 sps:$4 sm:$0xff]  }
 0xae9   :  { %15417 = vmatprep.subr.bf16.mxu0 %v21186_v32  ;;  %v21258_v32 = vld [vmem:[#allocation12 + $0x98c] ss:$48 sps:$4 sm:$0xff]  }
 0xaea   :  { %15457 = vmatpush1.bf16.msra.mxu1 %v21271_v4  ;;  %v21264_v4 = vld [vmem:[#allocation12 + $0x9ec] ss:$48 sps:$4 sm:$0xff]  }
 0xaeb   :  { %15458 = vmatprep.subr.bf16.mxu1 %v21279_v45  ;;  %v21262_v45 = vld [vmem:[#allocation12 + $0x9e8] ss:$48 sps:$4 sm:$0xff]  }
 0xaec   :  { %15418 = vmatpush1.bf16.msra.mxu0 %v21184_v38  ;;  %v21270_v38 = vld [vmem:[#allocation12 + $0xa4c] ss:$48 sps:$4 sm:$0xff]  }
 0xaed   :  { %15419 = vmatprep.subr.bf16.mxu0 %v21192_v13  ;;  %v21276_v13 = vld [vmem:[#allocation12 + $0xaac] ss:$48 sps:$4 sm:$0xff]  }
 0xaee   :  { %15459 = vmatpush1.bf16.msra.mxu1 %v21277_v52  ;;  %v21295_v52 = vld [vmem:[#allocation13 + $0x40] sm:$0xff]  }
 0xaef   :  { %15460 = vmatprep.subr.bf16.mxu1 %v21285_v40  ;;  %v21296_v40 = vld [vmem:[#allocation13] sm:$0xff]  }
 0xaf0   :  { %15420 = vmatpush1.bf16.msra.mxu0 %v21190_v50  ;;  %v21274_v50 = vld [vmem:[#allocation12 + $0xaa8] ss:$48 sps:$4 sm:$0xff]  }
 0xaf1   :  { %15421 = vmatprep.subr.bf16.mxu0 %v21198_v31  ;;  %v21282_v31 = vld [vmem:[#allocation12 + $0xb0c] ss:$48 sps:$4 sm:$0xff]  }
 0xaf2   :  { %15461 = vmatpush1.bf16.msra.mxu1 %v21283_v39  ;;  %v21280_v39 = vld [vmem:[#allocation12 + $0xb08] ss:$48 sps:$4 sm:$0xff]  }
 0xaf3   :  { %15462 = vmatprep.subr.bf16.mxu1 %v21291_v0  ;;  %v21288_v0 = vld [vmem:[#allocation12 + $0xb6c] ss:$48 sps:$4 sm:$0xff]  }
 0xaf4   :  { %15422 = vmatpush1.bf16.msra.mxu0 %v21196_v33  ;;  %v21286_v33 = vld [vmem:[#allocation12 + $0xb68] ss:$48 sps:$4 sm:$0xff]  }
 0xaf5   :  { %15473 = vmatprep.subr.bf16.mxu0 %v21204_v21  ;;  %v21294_v21 = vld [vmem:[#allocation12 + $0xbcc] ss:$48 sps:$4 sm:$0xff]  }
 0xaf6   :  { %15463 = vmatpush1.bf16.msra.mxu1 %v21289_v29  ;;  %v21292_v29 = vld [vmem:[#allocation12 + $0xbc8] ss:$48 sps:$4 sm:$0xff]  }
 0xaf7   :  { %15424 = vmatmul.mubr.bf16.vlgmr.msra.gmra.mrb[128].mxu0 %v22506_v37  ;;  %18181 = vmatprep.subr.bf16.mxu1 %v21295_v52 }
 0xaf8   :  { %15474 = vmatpush1.bf16.msra.mxu0 %v21202_v3  ;;  %15505 = vmatprep.mubr.bf16.mxu0 %v22485_v9  ;;  %v21240_v9 = vld [vmem:[#allocation12 + $0x86c] ss:$48 sps:$4 sm:$0xff]  }
 0xaf9   :  { %15475 = vmatprep.subr.bf16.mxu0 %v21210_v25  ;;  %15465 = vmatmul.mubr.bf16.vlgmr.msra.gmra.mrb[128].mxu1 %v22487_v47  ;;  %v21297_v25 = vld [vmem:[#allocation13 + $0x48] sm:$0xff]  }
 0xafa   :  { %18182 = vmatpush3.bf16.msra.mxu1 %v21296_v40 }
 0xafb   :  { %18183 = vmatprep.subr.bf16.mxu1 %v21297_v25  ;;  %v21321_v25 = vld [vmem:[#allocation13 + $0xe8] sm:$0xff]  }
 0xafc   :  { %15476 = vmatpush1.bf16.msra.mxu0 %v21208_v42 }
 0xafd   :  { %15477 = vmatprep.subr.bf16.mxu0 %v21216_v14 }
 0xb00   :  { %15478 = vmatpush1.bf16.msra.mxu0 %v21214_v54  ;;  %v21298_v54 = vld [vmem:[#allocation13 + $0x8] sm:$0xff]  }
 0xb01   :  { %15479 = vmatprep.subr.bf16.mxu0 %v21222_v46  ;;  %18184 = vmatpush3.bf16.msra.mxu1 %v21298_v54  ;;  %v21325_v54 = vld [vmem:[#allocation13 + $0xf8] sm:$0xff]  }
 0xb04   :  { %15480 = vmatpush1.bf16.msra.mxu0 %v21220_v59 }
 0xb05   :  { %15481 = vmatprep.subr.bf16.mxu0 %v21228_v19 }
 0xb08   :  { %15482 = vmatpush1.bf16.msra.mxu0 %v21226_v22 }
 0xb09   :  { %15483 = vmatprep.subr.bf16.mxu0 %v21234_v43 }
 0xb0a   :  { %v15179_v10 = vpop.f32.mrb[116].mxu0 }
 0xb0b   :  { %v15180_v18 = vadd.f32 %v15179_v10, %v22556_v61  ;;  %v15181_v47 = vpop.f32.mrb[117].mxu0  ;;  %v21244_v61 = vld [vmem:[#allocation12 + $0x8c8] ss:$48 sps:$4 sm:$0xff]  }
 0xb0c   :  { %v15182_v16 = vadd.f32 %v15181_v47, %v22561_v57  ;;  %v15183_v62 = vpop.f32.mrb[118].mxu0  ;;  %15484 = vmatpush1.bf16.msra.mxu0 %v21232_v34  ;;  %v15220_v36 = vpop.f32.mrb[116].mxu1  ;;  %v21252_v57 = vld [vmem:[#allocation12 + $0x92c] ss:$48 sps:$4 sm:$0xff]   ;;  %v21300_v47 = vld [vmem:[#allocation13 + $0x10] sm:$0xff]  }
 0xb0d   :  { %v22572_v60 = vadd.f32 %v15180_v18, %v22472_v58  ;;  %v15184_v1 = vpop.f32.mrb[119].mxu0  ;;  %15485 = vmatprep.subr.bf16.mxu0 %v21240_v9  ;;  %v15222_v24 = vpop.f32.mrb[117].mxu1  ;;  %v21256_v58 = vld [vmem:[#allocation12 + $0x988] ss:$48 sps:$4 sm:$0xff]  }
 0xb0e   :  { %v22575_v23 = vadd.f32 %v15182_v16, %v22477_v11  ;;  %v15224_v30 = vpop.f32.mrb[118].mxu1  ;;  %v21268_v11 = vld [vmem:[#allocation12 + $0xa48] ss:$48 sps:$4 sm:$0xff]  }
 0xb0f   :  { %v15225_v44 = vpop.f32.mrb[119].mxu1  ;;  %v21301_v16 = vld [vmem:[#allocation13 + $0x58] sm:$0xff]   ;;  %v21306_v1 = vld [vmem:[#allocation13 + $0x28] sm:$0xff]  }
 0xb10   :  { %15486 = vmatpush1.bf16.msra.mxu0 %v21238_v55  ;;  %v21302_v62 = vld [vmem:[#allocation13 + $0x18] sm:$0xff]   ;;  %v21303_v55 = vld [vmem:[#allocation13 + $0x60] sm:$0xff]  }
 0xb11   :  { %15487 = vmatprep.subr.bf16.mxu0 %v21246_v17  ;;  %v21307_v17 = vld [vmem:[#allocation13 + $0x70] sm:$0xff]   ;;  %v21310_v30 = vld [vmem:[#allocation13 + $0x38] sm:$0xff]   ;;  %v21311_v44 = vld [vmem:[#allocation13 + $0xc0] sm:$0xff]  }
 0xb14   :  { %15488 = vmatpush1.bf16.msra.mxu0 %v21244_v61  ;;  %v21312_v61 = vld [vmem:[#allocation13 + $0x80] sm:$0xff]  }
 0xb15   :  { %15489 = vmatprep.subr.bf16.mxu0 %v21252_v57 }
 0xb18   :  { %15490 = vmatpush1.bf16.msra.mxu0 %v21250_v56  ;;  %v21313_v56 = vld [vmem:[#allocation13 + $0xc8] sm:$0xff]  }
 0xb19   :  { %15491 = vmatprep.subr.bf16.mxu0 %v21258_v32 }
 0xb1c   :  { %15492 = vmatpush1.bf16.msra.mxu0 %v21256_v58 }
 0xb1d   :  { %15493 = vmatprep.subr.bf16.mxu0 %v21264_v4  ;;  %v21314_v4 = vld [vmem:[#allocation13 + $0x88] sm:$0xff]  }
 0xb20   :  { %15494 = vmatpush1.bf16.msra.mxu0 %v21262_v45 }
 0xb21   :  { %15495 = vmatprep.subr.bf16.mxu0 %v21270_v38 }
 0xb24   :  { %15496 = vmatpush1.bf16.msra.mxu0 %v21268_v11 }
 0xb25   :  { %15497 = vmatprep.subr.bf16.mxu0 %v21276_v13 }
 0xb28   :  { %15498 = vmatpush1.bf16.msra.mxu0 %v21274_v50 }
 0xb29   :  { %15499 = vmatprep.subr.bf16.mxu0 %v21282_v31 }
 0xb2c   :  { %15500 = vmatpush1.bf16.msra.mxu0 %v21280_v39  ;;  %v21315_v39 = vld [vmem:[#allocation13 + $0xd0] sm:$0xff]  }
 0xb2d   :  { %15501 = vmatprep.subr.bf16.mxu0 %v21288_v0 }
 0xb30   :  { %15502 = vmatpush1.bf16.msra.mxu0 %v21286_v33  ;;  %v21316_v33 = vld [vmem:[#allocation13 + $0x90] sm:$0xff]  }
 0xb31   :  { %15503 = vmatprep.subr.bf16.mxu0 %v21294_v21  ;;  %v21317_v21 = vld [vmem:[#allocation13 + $0xd8] sm:$0xff]  }
 0xb34   :  { %15504 = vmatpush1.bf16.msra.mxu0 %v21292_v29  ;;  %v21318_v29 = vld [vmem:[#allocation13 + $0x98] sm:$0xff]  }
 0xb35   :  { %18203 = vmatprep.subr.bf16.mxu0 %v21311_v44 }
 0xb37   :  { %15506 = vmatmul.mubr.bf16.vlgmr.msra.gmra.mrb[132].mxu0 %v22506_v37  ;;  %v21299_v37 = vld [vmem:[#allocation13 + $0x50] sm:$0xff]  }
 0xb38   :  { %18185 = vmatprep.subr.bf16.mxu1 %v21299_v37  ;;  %18204 = vmatpush3.bf16.msra.mxu0 %v21312_v61 }
 0xb39   :  { %18186 = vmatpush3.bf16.msra.mxu1 %v21300_v47  ;;  %18205 = vmatprep.subr.bf16.mxu0 %v21313_v56 }
 0xb3a   :  { %18187 = vmatprep.subr.bf16.mxu1 %v21301_v16 }
 0xb3c   :  { %18206 = vmatpush3.bf16.msra.mxu0 %v21314_v4 }
 0xb3d   :  { %18188 = vmatpush3.bf16.msra.mxu1 %v21302_v62  ;;  %18207 = vmatprep.subr.bf16.mxu0 %v21315_v39 }
 0xb3e   :  { %18189 = vmatprep.subr.bf16.mxu1 %v21303_v55 }
 0xb40   :  { %18208 = vmatpush3.bf16.msra.mxu0 %v21316_v33 }
 0xb41   :  { %18209 = vmatprep.subr.bf16.mxu0 %v21317_v21 }
 0xb44   :  { %18210 = vmatpush3.bf16.msra.mxu0 %v21318_v29 }
 0xb4a   :  { %v15261_v3 = vpop.f32.mrb[120].mxu0 }
 0xb4b   :  { %v15262_v42 = vadd.f32 %v15261_v3, %v15220_v36  ;;  %v15263_v14 = vpop.f32.mrb[121].mxu0  ;;  %v21304_v36 = vld [vmem:[#allocation13 + $0x20] sm:$0xff]  }
 0xb4c   :  { %v15264_v46 = vadd.f32 %v15263_v14, %v15222_v24  ;;  %v15265_v59 = vpop.f32.mrb[122].mxu0  ;;  %v15302_v19 = vpop.f32.mrb[120].mxu1  ;;  %18190 = vmatpush3.bf16.msra.mxu1 %v21304_v36  ;;  %v21309_v24 = vld [vmem:[#allocation13 + $0x78] sm:$0xff]   ;;  %v21319_v3 = vld [vmem:[#allocation13 + $0xe0] sm:$0xff]   ;;  %v21323_v14 = vld [vmem:[#allocation13 + $0xf0] sm:$0xff]  }
 0xb4d   :  { %v22579_v22 = vadd.f32 %v15262_v42, %v22494_v41  ;;  %v15266_v43 = vpop.f32.mrb[123].mxu0  ;;  %v15304_v34 = vpop.f32.mrb[121].mxu1  ;;  %v21305_v41 = vld [vmem:[#allocation13 + $0x68] sm:$0xff]   ;;  %18211 = vmatprep.subr.bf16.mxu0 %v21319_v3  ;;  %v22597_v59 = vld [vmem:[%s22703_s15] sm:$0xff] }
 0xb4e   :  { %v22582_v9 = vadd.f32 %v15264_v46, %v22499_v49  ;;  %v15306_v10 = vpop.f32.mrb[122].mxu1  ;;  %18191 = vmatprep.subr.bf16.mxu1 %v21305_v41  ;;  %v21308_v49 = vld [vmem:[#allocation13 + $0x30] sm:$0xff]   ;;  %v21322_v42 = vld [vmem:[#allocation13 + $0xa8] sm:$0xff]   ;;  %v21326_v46 = vld [vmem:[#allocation13 + $0xb8] sm:$0xff]   ;;  %v15530_v43 = vrot.slane %v22597_v59, %v22055_v7  ;;  %v15542_v47 = vrot.slane %v22597_v59, %v22064_v63  ;;  %v15546_v16 = vrot.slane %v22597_v59, %v22067_v12 }
 0xb4f   :  { %v15307_v18 = vpop.f32.mrb[123].mxu1  ;;  %v22614_v63 = vld [vmem:[%s22705_s17] sm:$0xf] }
 0xb50   :  { %18192 = vmatpush3.bf16.msra.mxu1 %v21306_v1  ;;  %v15564_v10 = vadd.f32 %v15530_v43, %v22564_v27  ;;  %v15567_v62 = vadd.f32 %v15542_v47, %v22579_v22  ;;  %v15568_v55 = vadd.f32 %v15546_v16, %v22582_v9  ;;  %v22619_v22 = vld [vmem:[%s22728_s20] sm:$0xf] }
 0xb51   :  { %18193 = vmatprep.subr.bf16.mxu1 %v21307_v17  ;;  %v15623_v44 = vrot.slane %v22619_v22, %v22052_v6 }
 0xb52   :  { %v18124_v18 = vmul.f32 -1.442695, %v15564_v10  ;;  %v18127_v36 = vmul.f32 -1.442695, %v15567_v62  ;;  %v18128_v41 = vmul.f32 -1.442695, %v15568_v55  ;;  %v15534_v55 = vrot.slane %v22597_v59, %v21994_v51 }
 0xb54   :  { %18194 = vmatpush3.bf16.msra.mxu1 %v21308_v49  ;;  %v15648_v49 = vrot.slane %v22614_v63, %v22052_v6 }
 0xb55   :  { %18195 = vmatprep.subr.bf16.mxu1 %v21309_v24 }
 0xb58   :  { %18196 = vmatpush3.bf16.msra.mxu1 %v21310_v30  ;;  %v15652_v30 = vrot.slane %v22614_v63, %v22055_v7 }
 0xb8a   :  { %v15343_v57 = vpop.f32.mrb[124].mxu0 }
 0xb8b   :  { %v15344_v32 = vadd.f32 %v15343_v57, %v15302_v19  ;;  %v15345_v58 = vpop.f32.mrb[125].mxu0  ;;  %v15526_v19 = vrot.slane %v22597_v59, %v22052_v6 }
 0xb8c   :  { %v15346_v45 = vadd.f32 %v15345_v58, %v15304_v34  ;;  %v15347_v38 = vpop.f32.mrb[126].mxu0  ;;  %v22584_v11 = vpop.f32.mrb[124].mxu1 }
 0xb8d   :  { %v22587_v13 = vadd.f32 %v15344_v32, %v22513_v15  ;;  %v15348_v52 = vpop.f32.mrb[127].mxu0  ;;  %v22589_v40 = vpop.f32.mrb[125].mxu1  ;;  %v21320_v15 = vld [vmem:[#allocation13 + $0xa0] sm:$0xff]   ;;  %v15563_v34 = vadd.f32 %v15526_v19, %v22559_v8  ;;  %v15627_v32 = vrot.slane %v22619_v22, %v22055_v7 }
 0xb8e   :  { %v22592_v50 = vadd.f32 %v15346_v45, %v22518_v2  ;;  %v15388_v31 = vpop.f32.mrb[126].mxu1  ;;  %18212 = vmatpush3.bf16.msra.mxu0 %v21320_v15  ;;  %v21324_v2 = vld [vmem:[#allocation13 + $0xb0] sm:$0xff]  }
 0xb8f   :  { %v15389_v0 = vpop.f32.mrb[127].mxu1  ;;  %18213 = vmatprep.subr.bf16.mxu0 %v21321_v25  ;;  %v18123_v37 = vmul.f32 -1.442695, %v15563_v34  ;;  %v15641_v7 = vadd.f32 %v15627_v32, %v22532_v26  ;;  %v21457_v26 = vld [vmem:[%s22726_s25 + $0x48] sm:$0xff] }
 0xb91   :  { %21407 = vpow2.f32 %v18123_v37 }
 0xb92   :  { %18214 = vmatpush3.bf16.msra.mxu0 %v21322_v42  ;;  %21409 = vpow2.f32 %v18124_v18 }
 0xb93   :  { %18215 = vmatprep.subr.bf16.mxu0 %v21323_v14  ;;  %21411 = vpow2.f32 %v18127_v36  ;;  %v15538_v36 = vrot.slane %v22597_v59, %v21997_v53 }
 0xb94   :  { %21413 = vpow2.f32 %v18128_v41  ;;  %v15565_v41 = vadd.f32 %v15534_v55, %v22572_v60 }
 0xb96   :  { %18216 = vmatpush3.bf16.msra.mxu0 %v21324_v2 }
 0xb97   :  { %18217 = vmatprep.subr.bf16.mxu0 %v21325_v54 }
 0xb9a   :  { %18218 = vmatpush3.bf16.msra.mxu0 %v21326_v46 }
 0xb9b   :  { %v21408_v1 = vpop.eup %21407 }
 0xb9c   :  { %v21410_v8 = vpop.eup %21409  ;;  %v15595_v27 = vadd.f32 1.0, %v21408_v1  ;;  %v15566_v1 = vadd.f32 %v15538_v36, %v22575_v23 }
 0xb9d   :  { %v15596_v17 = vadd.f32 1.0, %v21410_v8  ;;  %v21412_v12 = vpop.eup %21411  ;;  %v18125_v8 = vmul.f32 -1.442695, %v15565_v41 }
 0xb9e   :  { %21415 = vrcp.f32 %v15595_v27  ;;  %v21414_v9 = vpop.eup %21413  ;;  %v15599_v61 = vadd.f32 1.0, %v21412_v12  ;;  %v18126_v27 = vmul.f32 -1.442695, %v15566_v1  ;;  %v15554_v12 = vrot.slane %v22597_v59, %v22120_v5 }
 0xb9f   :  { %21417 = vrcp.f32 %v15596_v17  ;;  %v15600_v58 = vadd.f32 1.0, %v21414_v9  ;;  %v15550_v17 = vrot.slane %v22597_v59, %v22117_v35  ;;  %v15656_v5 = vrot.slane %v22614_v63, %v21994_v51 }
 0xba0   :  { %21419 = vrcp.f32 %v15599_v61 }
 0xba1   :  { %21421 = vrcp.f32 %v15600_v58  ;;  %v15569_v9 = vadd.f32 %v15550_v17, %v22587_v13  ;;  %v15660_v13 = vrot.slane %v22614_v63, %v21997_v53 }
 0xba8   :  { %v21416_v0 = vpop.eup %21415 }
 0xba9   :  { %v21418_v21 = vpop.eup %21417 }
 0xbaa   :  { %v21420_v42 = vpop.eup %21419 }
 0xbab   :  { %v21422_v14 = vpop.eup %21421  ;;  %v15681_v2 = vsub.f32 1.0, %v21420_v42 }
 0xbac   :  { %v15682_v46 = vsub.f32 1.0, %v21422_v14  ;;  %v15690_v37 = vmul.f32 %v21457_v26, %v21422_v14 }
 0xbca   :  { %v15425_v24 = vpop.f32.mrb[128].mxu0 }
 0xbcb   :  { %v15426_v57 = vadd.f32 %v15425_v24, %v22584_v11  ;;  %v15427_v56 = vpop.f32.mrb[129].mxu0  ;;  %v15640_v11 = vadd.f32 %v15623_v44, %v22527_v20  ;;  %v21456_v20 = vld [vmem:[%s22726_s25 + $0x40] sm:$0xff]  ;;  %v18129_v24 = vmul.f32 -1.442695, %v15569_v9 }
 0xbcc   :  { %v15428_v4 = vadd.f32 %v15427_v56, %v22589_v40  ;;  %v15429_v45 = vpop.f32.mrb[130].mxu0  ;;  %v22631_v38 = vpop.f32.mrb[128].mxu1  ;;  %v15689_v34 = vmul.f32 %v21456_v20, %v21420_v42 }
 0xbcd   :  { %v15665_v52 = vadd.f32 %v15648_v49, %v15426_v57  ;;  %v15430_v31 = vpop.f32.mrb[131].mxu0  ;;  %v22633_v39 = vpop.f32.mrb[129].mxu1  ;;  %v15570_v49 = vadd.f32 %v15554_v12, %v22592_v50  ;;  %v15631_v50 = vrot.slane %v22619_v22, %v21994_v51 }
 0xbce   :  { %v15666_v33 = vadd.f32 %v15652_v30, %v15428_v4  ;;  %v15470_v6 = vpop.f32.mrb[130].mxu1  ;;  %v15635_v4 = vrot.slane %v22619_v22, %v21997_v53 }
 0xbcf   :  { %v15669_v29 = vmul.f32 %v21416_v0, %v15665_v52  ;;  %v15471_v3 = vpop.f32.mrb[131].mxu1  ;;  %v18130_v30 = vmul.f32 -1.442695, %v15570_v49  ;;  %v15642_v63 = vadd.f32 %v15631_v50, %v22541_v28 }
 0xbd0   :  { %v15670_v40 = vmul.f32 %v21418_v21, %v15666_v33 }
 0xbd1   :  { %v15673_v15 = vadd.f32 %v15669_v29, %v15640_v11  ;;  %v15643_v29 = vadd.f32 %v15635_v4, %v22544_v48 }
 0xbd2   :  { %v15674_v25 = vadd.f32 %v15670_v40, %v15641_v7 }
 0xbd3   :  { %21423 = vtanh.f32 %v15673_v15 }
 0xbd4   :  { %21425 = vtanh.f32 %v15674_v25 }
 0xbd5   :  { %21427 = vpow2.f32 %v18125_v8 }
 0xbd6   :  { %21429 = vpow2.f32 %v18126_v27 }
 0xbd7   :  { %21431 = vpow2.f32 %v18129_v24 }
 0xbd8   :  { %21433 = vpow2.f32 %v18130_v30 }
 0xbdd   :  { %v21424_v54 = vpop.eup %21423 }
 0xbde   :  { %v21426_v19 = vpop.eup %21425  ;;  %v15685_v43 = vmul.f32 %v21424_v54, %v15681_v2 }
 0xbdf   :  { %v15686_v10 = vmul.f32 %v21426_v19, %v15682_v46  ;;  %v21428_v44 = vpop.eup %21427 }
 0xbe0   :  { %v15693_v18 = vadd.f32 %v15689_v34, %v15685_v43  ;;  %v21430_v60 = vpop.eup %21429  ;;  %v15597_v23 = vadd.f32 1.0, %v21428_v44 }
 0xbe1   :  { %v15694_v47 = vadd.f32 %v15690_v37, %v15686_v10  ;;  %v15598_v61 = vadd.f32 1.0, %v21430_v60  ;;  %v21432_v35 = vpop.eup %21431 }
 0xbe2   :  { %18135 = vst [vmem:[%s22709_s21 + $0x40] sm:$0xff] %v15693_v18  ;;  %v15711_v62 = vpack.c.bf16 %v15693_v18, %v15693_v18  ;;  %21435 = vrcp.f32 %v15597_v23  ;;  %v21434_v57 = vpop.eup %21433  ;;  %v15601_v56 = vadd.f32 1.0, %v21432_v35 }
 0xbe3   :  { %18136 = vst [vmem:[%s22709_s21 + $0x48] sm:$0xff] %v15694_v47  ;;  %v15712_v16 = vpack.c.bf16 %v15694_v47, %v15694_v47  ;;  %21437 = vrcp.f32 %v15598_v61  ;;  %v15602_v45 = vadd.f32 1.0, %v21434_v57  ;;  %v18139_v47 = vld [vmem:[#allocation15] ss:$0 sm:$0xff] }
 0xbe4   :  { %21439 = vrcp.f32 %v15601_v56 }
 0xbe5   :  { %16010 = vmatprep.mubr.bf16.mxu1 %v15712_v16  ;;  %21441 = vrcp.f32 %v15602_v45 }
 0xbe6   :  { %16011 = vmatmul.mubr.bf16.vlgmr.msra.gmra.mrb[132].mxu1 %v15711_v62 }
 0xbea   :  { %v21458_v28 = vld [vmem:[%s22726_s25 + $0x50] sm:$0xff]  ;;  %v21459_v48 = vld [vmem:[%s22726_s25 + $0x58] sm:$0xff] }
 0xbec   :  { %v21436_v6 = vpop.eup %21435 }
 0xbed   :  { %v21438_v11 = vpop.eup %21437 }
 0xbee   :  { %v21440_v53 = vpop.eup %21439 }
 0xbef   :  { %v21442_v22 = vpop.eup %21441  ;;  %v15691_v14 = vmul.f32 %v21458_v28, %v21440_v53 }
 0xbf0   :  { %v15684_v15 = vsub.f32 1.0, %v21442_v22  ;;  %v15692_v54 = vmul.f32 %v21459_v48, %v21442_v22 }
 0xc0a   :  { %v15507_v59 = vpop.f32.mrb[132].mxu0 }
 0xc0b   :  { %v15508_v32 = vadd.f32 %v15507_v59, %v22631_v38  ;;  %v15509_v58 = vpop.f32.mrb[133].mxu0 }
 0xc0c   :  { %v15510_v52 = vadd.f32 %v15509_v58, %v22633_v39  ;;  %v15511_v31 = vpop.f32.mrb[134].mxu0  ;;  %v15683_v39 = vsub.f32 1.0, %v21440_v53 }
 0xc0d   :  { %v15667_v0 = vadd.f32 %v15656_v5, %v15508_v32  ;;  %v15512_v33 = vpop.f32.mrb[135].mxu0 }
 0xc0e   :  { %v15668_v21 = vadd.f32 %v15660_v13, %v15510_v52 }
 0xc0f   :  { %v15671_v51 = vmul.f32 %v21436_v6, %v15667_v0 }
 0xc10   :  { %v15672_v38 = vmul.f32 %v21438_v11, %v15668_v21 }
 0xc11   :  { %v15675_v3 = vadd.f32 %v15671_v51, %v15642_v63 }
 0xc12   :  { %v15676_v7 = vadd.f32 %v15672_v38, %v15643_v29 }
 0xc13   :  { %21443 = vtanh.f32 %v15675_v3 }
 0xc14   :  { %21445 = vtanh.f32 %v15676_v7 }
 0xc1d   :  { %v21444_v40 = vpop.eup %21443 }
 0xc1e   :  { %v21446_v25 = vpop.eup %21445  ;;  %v15687_v42 = vmul.f32 %v21444_v40, %v15683_v39 }
 0xc1f   :  { %v15688_v2 = vmul.f32 %v21446_v25, %v15684_v15 }
 0xc20   :  { %v15695_v46 = vadd.f32 %v15691_v14, %v15687_v42 }
 0xc21   :  { %v15696_v19 = vadd.f32 %v15692_v54, %v15688_v2 }
 0xc22   :  { %18137 = vst [vmem:[%s22709_s21 + $0x50] sm:$0xff] %v15695_v46  ;;  %v15713_v20 = vpack.c.bf16 %v15695_v46, %v15695_v46 }
 0xc23   :  { %18138 = vst [vmem:[%s22709_s21 + $0x58] sm:$0xff] %v15696_v19  ;;  %v15714_v43 = vpack.c.bf16 %v15696_v19, %v15696_v19  ;;  %s22729_s21 = sld [smem:[#allocation28_spill]] }
 0xc25   :  { %16050 = vmatprep.mubr.bf16.mxu0 %v15714_v43 }
 0xc26   :  { %16051 = vmatmul.mubr.bf16.vlgmr.msra.gmra.mrb[136].mxu0 %v15713_v20 }
 0xcb9   :  { %v18197_v34 = vpop.f32.mrb[132].mxu1 }
 0xcba   :  { %v18198_v10 = vpop.f32.mrb[133].mxu1 }
 0xcbb   :  { %v18199_v26 = vadd.f32 %v18198_v10, %v18197_v34  ;;  %v18200_v37 = vpop.f32.mrb[134].mxu1 }
 0xcbc   :  { %v18201_v18 = vpop.f32.mrb[135].mxu1 }
 0xcbd   :  { %v16013_v55 = vadd.f32 %v18199_v26, %v18139_v47 }
 0xcf9   :  { %v18219_v16 = vpop.f32.mrb[136].mxu0 }
 0xcfa   :  { %v18220_v62 = vpop.f32.mrb[137].mxu0 }
 0xcfb   :  { %v18221_v36 = vadd.f32 %v18220_v62, %v18219_v16  ;;  %v18222_v41 = vpop.f32.mrb[138].mxu0 }
 0xcfc   :  { %v18223_v1 = vpop.f32.mrb[139].mxu0 }
 0xcfd   :  { %v16053_v8 = vadd.f32 %v18221_v36, %v16013_v55 }
 0xcff   :  { %16058 = vst [vmem:[%s22729_s21] sm:$0xff] %v16053_v8 }
 0xd00   :  { %16067 = vsyncpa [#allocation3], 1 }
 0xd01   :  { %16068 = vsyncpa [#allocation5], 1 }
 0xd02   :  { %16069 = vsyncpa [#allocation8], 1 }
 0xd03   :  { %16070 = vsyncpa [#allocation11], 1 }
 0xd04   :  { %16071 = vsyncpa [#allocation14], 1 }

</bundles_post_ra>
